<compile_context>
chip_gen: v7x
topology: tpu7x:2x2x1
jax: 0.10.0
libtpu: 0.0.40
codegen_flags: <defaults>
</compile_context>

<pallas_src>
import jax
import jax.numpy as jnp
from jax import lax
from jax.experimental import pallas as pl
from jax.experimental.pallas import tpu as pltpu

DILATIONS = (48, 76, 96, 111, 124, 135, 144, 152)


def _pick_tile(L, max_tile=1536):
    """Largest multiple-of-128 divisor of L that is <= max_tile (fallback: L)."""
    if L % 128 != 0:
        return L  # degenerate shapes: single full-width tile
    best = 128
    t = 128
    while t <= min(L, max_tile):
        if L % t == 0:
            best = t
        t += 128
    return best


def _make_kernel(C_in, C_out, T, num_tiles, pad_rows, tap_shifts):
    """tap_shifts: static flattened-element shifts (= freq_shift * W), one per tap."""

    def kernel(x_ref, w_ref, b_ref, o_ref, xpad_ref):
        # x_ref   : (1, C_in, num_tiles, T)  whole batch element (revisited over j)
        # w_ref   : (C_out, n_taps * C_in)   per-tap weight columns
        # b_ref   : (C_out, 1)               summed bias
        # o_ref   : (1, C_out, T)            one lane-dense output tile
        # xpad_ref: (C_in, n_rows, T)        zero-padded VMEM copy of the input
        j = pl.program_id(1)

        # Fill the padded scratch once per batch element.  The spatial-tile
        # grid axis is "arbitrary" (sequential per n), so j == 0 always runs
        # first for each batch element on each core.
        @pl.when(j == 0)
        def _fill():
            zeros = jnp.zeros((C_in, pad_rows, T), jnp.float32)
            xpad_ref[:, :pad_rows, :] = zeros
            xpad_ref[:, pad_rows + num_tiles:, :] = zeros
            xpad_ref[:, pad_rows:pad_rows + num_tiles, :] = (
                x_ref[0].astype(jnp.float32))

        # Bias folded into the accumulator init (broadcast hoisted out of the
        # tap loop).  acc is (C_out, T): a handful of vregs, stays in registers.
        acc = jnp.broadcast_to(b_ref[...], (C_out, T))

        for t, shift in enumerate(tap_shifts):          # static loop: 17 taps
            # flattened shift = q whole tiles + a static in-tile rotation rloc
            q, rloc = divmod(shift, T)                  # python ints (static)
            row = j + pad_rows + q                      # dynamic sublane index
            row_a = xpad_ref[:, pl.ds(row, 1), :]       # (C_in, 1, T)
            if rloc == 0:
                xt = row_a
            else:
                row_b = xpad_ref[:, pl.ds(row + 1, 1), :]
                # shifted window = tail of row_a followed by head of row_b
                xt = jnp.concatenate(
                    [row_a[:, :, rloc:], row_b[:, :, :rloc]], axis=2)
            for ci in range(C_in):                      # static loop: C_in
                k = t * C_in + ci
                wk = w_ref[:, k:k + 1]                  # (C_out, 1)
                xs = xt[ci]                             # (1, T)
                acc = acc + wk * xs                     # VPU broadcast FMA

        o_ref[0] = jnp.maximum(acc, 0.0).astype(o_ref.dtype)

    return kernel


def harmonic_dilated_conv(x, weights, biases):
    """x: (N, C_in, H, W) NCHW.  weights[i]: (C_out, C_in, 3, 1).  biases[i]: (C_out,)."""
    N, C_in, H, W = x.shape
    C_out = weights[0].shape[0]
    L = H * W
    T = _pick_tile(L)
    num_tiles = L // T
    max_shift = max(DILATIONS) * W                 # largest flattened-element shift
    pad_rows = -(-max_shift // T)                  # ceil(max_shift / T)
    n_rows = num_tiles + 2 * pad_rows

    # ---- glue (all free reshapes / tiny weight prep, no transposes) ----
    x_tiled = x.reshape(N, C_in, num_tiles, T)

    # One (C_out, C_in) weight matrix per distinct frequency shift: 8 negative,
    # one merged centre tap (all 8 centre taps act on the unshifted input),
    # 8 positive.
    shifts = sorted(-d for d in DILATIONS) + [0] + sorted(DILATIONS)   # 17
    taps = []
    for s in shifts:
        if s == 0:
            w = sum(weights[i][:, :, 1, 0] for i in range(len(DILATIONS)))
        else:
            i = DILATIONS.index(abs(s))
            k = 0 if s < 0 else 2
            w = weights[i][:, :, k, 0]
        taps.append(w)                                          # (C_out, C_in)
    w_cat = jnp.concatenate(taps, axis=1).astype(jnp.float32)   # (C_out, 17*C_in)
    b_sum = sum(biases).reshape(C_out, 1).astype(jnp.float32)

    tap_shifts = tuple(s * W for s in shifts)       # static flattened shifts

    kernel = _make_kernel(C_in, C_out, T, num_tiles, pad_rows, tap_shifts)

    out_flat = pl.pallas_call(
        kernel,
        out_shape=jax.ShapeDtypeStruct((N, C_out, L), x.dtype),
        grid_spec=pltpu.PrefetchScalarGridSpec(
            num_scalar_prefetch=0,
            grid=(N, num_tiles),
            in_specs=[
                # Whole (C_in, num_tiles, T) slab per batch element.  Its block
                # index is constant over j, so it is DMA'd from HBM once per n.
                pl.BlockSpec((1, C_in, num_tiles, T), lambda n, j: (n, 0, 0, 0)),
                pl.BlockSpec((C_out, w_cat.shape[1]), lambda n, j: (0, 0)),
                pl.BlockSpec((C_out, 1), lambda n, j: (0, 0)),
            ],
            out_specs=pl.BlockSpec((1, C_out, T), lambda n, j: (n, 0, j)),
            scratch_shapes=[pltpu.VMEM((C_in, n_rows, T), jnp.float32)],
        ),
        compiler_params=pltpu.CompilerParams(
            # Batch axis parallel (megacore).  The spatial-tile axis stays
            # sequential per batch element because the padded VMEM scratch is
            # filled at j == 0 and reused by the following tiles of that n.
            dimension_semantics=("parallel", "arbitrary"),
            # NOTE: no vmem_limit_bytes request — total VMEM use is ~0.5 MiB.
        ),
    )(x_tiled, w_cat, b_sum)

    return out_flat.reshape(N, C_out, H, W)         # free reshape back to NCHW


def reference(x, weights, biases):
    """Pure-JAX reference: 8 dilated convs (NCHW) + bias, summed, ReLU."""
    acc = 0.0
    for w, b, d in zip(weights, biases, DILATIONS):
        y = lax.conv_general_dilated(
            x, w, window_strides=(1, 1), padding="SAME",
            rhs_dilation=(d, 1),
            dimension_numbers=("NCHW", "OIHW", "NCHW"))
        acc = acc + y + b.reshape(1, -1, 1, 1)
    return jnp.maximum(acc, 0.0)


if __name__ == "__main__":
    # H=352 freq bins (88 keys * 4 bins/semitone, as the fixed dilations
    # assume), W=8 time frames, C_in=4, C_out=8, batch 2.
    N, C_in, C_out, H, W = 2, 4, 8, 352, 8

    key = jax.random.PRNGKey(0)
    keys = jax.random.split(key, 1 + 2 * len(DILATIONS))
    x = jax.random.normal(keys[0], (N, C_in, H, W), dtype=jnp.float32)

    bound = 1.0 / jnp.sqrt(jnp.float32(C_in * 3))  # ~= PyTorch conv default init
    weights, biases = [], []
    for i in range(len(DILATIONS)):
        w = jax.random.uniform(keys[1 + 2 * i], (C_out, C_in, 3, 1),
                               minval=-bound, maxval=bound, dtype=jnp.float32)
        b = jax.random.uniform(keys[2 + 2 * i], (C_out,),
                               minval=-bound, maxval=bound, dtype=jnp.float32)
        weights.append(w)
        biases.append(b)

    out = harmonic_dilated_conv(x, weights, biases)
    out = jax.block_until_ready(out)

    ref = jax.block_until_ready(reference(x, weights, biases))
    assert out.shape == (N, C_out, H, W)
    assert jnp.allclose(out, ref, atol=1e-4, rtol=1e-4), (
        "mismatch vs reference, max err %e" % float(jnp.max(jnp.abs(out - ref))))

    print("KERNEL_OK")
</pallas_src>

<mosaic_0001>
module attributes {stable_mosaic.version = 11 : i64} {
  func.func @kernel(%arg0: i32, %arg1: i32, %arg2: memref<1x4x2x1408xf32, #tpu.memory_space<vmem>>, %arg3: memref<8x68xf32, #tpu.memory_space<vmem>>, %arg4: memref<8x1xf32, #tpu.memory_space<vmem>>, %arg5: memref<1x8x1408xf32, #tpu.memory_space<vmem>>, %arg6: memref<4x4x1408xf32, #tpu.memory_space<vmem>>) attributes {dimension_semantics = [#tpu.dimension_semantics<parallel>, #tpu.dimension_semantics<arbitrary>], iteration_bounds = array<i64: 2, 2>, scalar_prefetch = 0 : i64, scratch_operands = 1 : i64, tpu.core_type = #tpu.core_type<tc>, window_params = [{transform_indices = @transform_0, window_bounds = array<i64: 1, 4, 2, 1408>}, {pipeline_mode = #tpu.pipeline_mode<synchronous>, transform_indices = @transform_1, window_bounds = array<i64: 8, 68>}, {pipeline_mode = #tpu.pipeline_mode<synchronous>, transform_indices = @transform_2, window_bounds = array<i64: 8, 1>}, {transform_indices = @transform_3, window_bounds = array<i64: 1, 8, 1408>}]} {
    %c0_i32 = arith.constant 0 : i32
    %0 = arith.cmpi eq, %arg1, %c0_i32 : i32
    %1 = arith.extui %0 : i1 to i32
    %c0_i32_0 = arith.constant 0 : i32
    %2 = arith.cmpi ne, %1, %c0_i32_0 : i32
    scf.if %2 {
      %cst_188 = arith.constant 0.000000e+00 : f32
      %651 = vector.broadcast %cst_188 : f32 to vector<4x1x1408xf32>
      %c0_189 = arith.constant 0 : index
      %c0_190 = arith.constant 0 : index
      %c0_191 = arith.constant 0 : index
      %652 = vector.load %arg6[%c0_189, %c0_190, %c0_191] : memref<4x4x1408xf32, #tpu.memory_space<vmem>>, vector<4x1x1408xf32>
      tpu.vector_store %arg6[%c0_189, %c0_190, %c0_191], %651 {strides = array<i32>} : memref<4x4x1408xf32, #tpu.memory_space<vmem>>, vector<4x1x1408xf32>,
      %c0_192 = arith.constant 0 : index
      %c3_193 = arith.constant 3 : index
      %c0_194 = arith.constant 0 : index
      %653 = vector.load %arg6[%c0_192, %c3_193, %c0_194] : memref<4x4x1408xf32, #tpu.memory_space<vmem>>, vector<4x1x1408xf32>
      tpu.vector_store %arg6[%c0_192, %c3_193, %c0_194], %651 {strides = array<i32>} : memref<4x4x1408xf32, #tpu.memory_space<vmem>>, vector<4x1x1408xf32>,
      %c0_195 = arith.constant 0 : index
      %c0_196 = arith.constant 0 : index
      %c0_197 = arith.constant 0 : index
      %c0_198 = arith.constant 0 : index
      %654 = vector.load %arg2[%c0_195, %c0_196, %c0_197, %c0_198] : memref<1x4x2x1408xf32, #tpu.memory_space<vmem>>, vector<1x4x2x1408xf32>
      %655 = vector.shape_cast %654 : vector<1x4x2x1408xf32> to vector<4x2x1408xf32>
      %c0_199 = arith.constant 0 : index
      %c1_200 = arith.constant 1 : index
      %c0_201 = arith.constant 0 : index
      %656 = vector.load %arg6[%c0_199, %c1_200, %c0_201] : memref<4x4x1408xf32, #tpu.memory_space<vmem>>, vector<4x2x1408xf32>
      tpu.vector_store %arg6[%c0_199, %c1_200, %c0_201], %655 {strides = array<i32>} : memref<4x4x1408xf32, #tpu.memory_space<vmem>>, vector<4x2x1408xf32>,
    } else {
    }
    %c0 = arith.constant 0 : index
    %c0_1 = arith.constant 0 : index
    %3 = vector.load %arg4[%c0, %c0_1] : memref<8x1xf32, #tpu.memory_space<vmem>>, vector<8x1xf32>
    %4 = vector.shape_cast %3 : vector<8x1xf32> to vector<8x1xf32>
    %5 = vector.broadcast %4 : vector<8x1xf32> to vector<8x1408xf32>
    %c1_i32 = arith.constant 1 : i32
    %6 = arith.addi %arg1, %c1_i32 : i32
    %c-1_i32 = arith.constant -1 : i32
    %7 = arith.addi %6, %c-1_i32 : i32
    %c0_2 = arith.constant 0 : index
    %8 = arith.index_cast %7 : i32 to index
    %c0_3 = arith.constant 0 : index
    %9 = vector.load %arg6[%c0_2, %8, %c0_3] : memref<4x4x1408xf32, #tpu.memory_space<vmem>>, vector<4x1x1408xf32>
    %c1_i32_4 = arith.constant 1 : i32
    %10 = arith.addi %7, %c1_i32_4 : i32
    %c0_5 = arith.constant 0 : index
    %11 = arith.index_cast %10 : i32 to index
    %c0_6 = arith.constant 0 : index
    %12 = vector.load %arg6[%c0_5, %11, %c0_6] : memref<4x4x1408xf32, #tpu.memory_space<vmem>>, vector<4x1x1408xf32>
    %13 = vector.extract_strided_slice %9 {offsets = [0, 0, 192], sizes = [4, 1, 1216], strides = [1, 1, 1]} : vector<4x1x1408xf32> to vector<4x1x1216xf32>
    %14 = vector.extract_strided_slice %12 {offsets = [0, 0, 0], sizes = [4, 1, 192], strides = [1, 1, 1]} : vector<4x1x1408xf32> to vector<4x1x192xf32>
    %15 = tpu.concatenate %13, %14 in 2 : vector<4x1x1216xf32>, vector<4x1x192xf32> -> vector<4x1x1408xf32>
    %c0_7 = arith.constant 0 : index
    %c0_8 = arith.constant 0 : index
    %16 = vector.load %arg3[%c0_7, %c0_8] : memref<8x68xf32, #tpu.memory_space<vmem>>, vector<8x1xf32>
    %17 = vector.extract_strided_slice %15 {offsets = [0, 0, 0], sizes = [1, 1, 1408], strides = [1, 1, 1]} : vector<4x1x1408xf32> to vector<1x1x1408xf32>
    %18 = vector.shape_cast %17 : vector<1x1x1408xf32> to vector<1x1408xf32>
    %19 = vector.broadcast %16 : vector<8x1xf32> to vector<8x1408xf32>
    %20 = vector.broadcast %18 : vector<1x1408xf32> to vector<8x1408xf32>
    %21 = arith.mulf %19, %20 : vector<8x1408xf32>
    %22 = arith.addf %5, %21 : vector<8x1408xf32>
    %c0_9 = arith.constant 0 : index
    %c1 = arith.constant 1 : index
    %23 = vector.load %arg3[%c0_9, %c1] : memref<8x68xf32, #tpu.memory_space<vmem>>, vector<8x1xf32>
    %24 = vector.extract_strided_slice %15 {offsets = [1, 0, 0], sizes = [1, 1, 1408], strides = [1, 1, 1]} : vector<4x1x1408xf32> to vector<1x1x1408xf32>
    %25 = vector.shape_cast %24 : vector<1x1x1408xf32> to vector<1x1408xf32>
    %26 = vector.broadcast %23 : vector<8x1xf32> to vector<8x1408xf32>
    %27 = vector.broadcast %25 : vector<1x1408xf32> to vector<8x1408xf32>
    %28 = arith.mulf %26, %27 : vector<8x1408xf32>
    %29 = arith.addf %22, %28 : vector<8x1408xf32>
    %c0_10 = arith.constant 0 : index
    %c2 = arith.constant 2 : index
    %30 = vector.load %arg3[%c0_10, %c2] : memref<8x68xf32, #tpu.memory_space<vmem>>, vector<8x1xf32>
    %31 = vector.extract_strided_slice %15 {offsets = [2, 0, 0], sizes = [1, 1, 1408], strides = [1, 1, 1]} : vector<4x1x1408xf32> to vector<1x1x1408xf32>
    %32 = vector.shape_cast %31 : vector<1x1x1408xf32> to vector<1x1408xf32>
    %33 = vector.broadcast %30 : vector<8x1xf32> to vector<8x1408xf32>
    %34 = vector.broadcast %32 : vector<1x1408xf32> to vector<8x1408xf32>
    %35 = arith.mulf %33, %34 : vector<8x1408xf32>
    %36 = arith.addf %29, %35 : vector<8x1408xf32>
    %c0_11 = arith.constant 0 : index
    %c3 = arith.constant 3 : index
    %37 = vector.load %arg3[%c0_11, %c3] : memref<8x68xf32, #tpu.memory_space<vmem>>, vector<8x1xf32>
    %38 = vector.extract_strided_slice %15 {offsets = [3, 0, 0], sizes = [1, 1, 1408], strides = [1, 1, 1]} : vector<4x1x1408xf32> to vector<1x1x1408xf32>
    %39 = vector.shape_cast %38 : vector<1x1x1408xf32> to vector<1x1408xf32>
    %40 = vector.broadcast %37 : vector<8x1xf32> to vector<8x1408xf32>
    %41 = vector.broadcast %39 : vector<1x1408xf32> to vector<8x1408xf32>
    %42 = arith.mulf %40, %41 : vector<8x1408xf32>
    %43 = arith.addf %36, %42 : vector<8x1408xf32>
    %c1_i32_12 = arith.constant 1 : i32
    %44 = arith.addi %arg1, %c1_i32_12 : i32
    %c-1_i32_13 = arith.constant -1 : i32
    %45 = arith.addi %44, %c-1_i32_13 : i32
    %c0_14 = arith.constant 0 : index
    %46 = arith.index_cast %45 : i32 to index
    %c0_15 = arith.constant 0 : index
    %47 = vector.load %arg6[%c0_14, %46, %c0_15] : memref<4x4x1408xf32, #tpu.memory_space<vmem>>, vector<4x1x1408xf32>
    %c1_i32_16 = arith.constant 1 : i32
    %48 = arith.addi %45, %c1_i32_16 : i32
    %c0_17 = arith.constant 0 : index
    %49 = arith.index_cast %48 : i32 to index
    %c0_18 = arith.constant 0 : index
    %50 = vector.load %arg6[%c0_17, %49, %c0_18] : memref<4x4x1408xf32, #tpu.memory_space<vmem>>, vector<4x1x1408xf32>
    %51 = vector.extract_strided_slice %47 {offsets = [0, 0, 256], sizes = [4, 1, 1152], strides = [1, 1, 1]} : vector<4x1x1408xf32> to vector<4x1x1152xf32>
    %52 = vector.extract_strided_slice %50 {offsets = [0, 0, 0], sizes = [4, 1, 256], strides = [1, 1, 1]} : vector<4x1x1408xf32> to vector<4x1x256xf32>
    %53 = tpu.concatenate %51, %52 in 2 : vector<4x1x1152xf32>, vector<4x1x256xf32> -> vector<4x1x1408xf32>
    %c0_19 = arith.constant 0 : index
    %c4 = arith.constant 4 : index
    %54 = vector.load %arg3[%c0_19, %c4] : memref<8x68xf32, #tpu.memory_space<vmem>>, vector<8x1xf32>
    %55 = vector.extract_strided_slice %53 {offsets = [0, 0, 0], sizes = [1, 1, 1408], strides = [1, 1, 1]} : vector<4x1x1408xf32> to vector<1x1x1408xf32>
    %56 = vector.shape_cast %55 : vector<1x1x1408xf32> to vector<1x1408xf32>
    %57 = vector.broadcast %54 : vector<8x1xf32> to vector<8x1408xf32>
    %58 = vector.broadcast %56 : vector<1x1408xf32> to vector<8x1408xf32>
    %59 = arith.mulf %57, %58 : vector<8x1408xf32>
    %60 = arith.addf %43, %59 : vector<8x1408xf32>
    %c0_20 = arith.constant 0 : index
    %c5 = arith.constant 5 : index
    %61 = vector.load %arg3[%c0_20, %c5] : memref<8x68xf32, #tpu.memory_space<vmem>>, vector<8x1xf32>
    %62 = vector.extract_strided_slice %53 {offsets = [1, 0, 0], sizes = [1, 1, 1408], strides = [1, 1, 1]} : vector<4x1x1408xf32> to vector<1x1x1408xf32>
    %63 = vector.shape_cast %62 : vector<1x1x1408xf32> to vector<1x1408xf32>
    %64 = vector.broadcast %61 : vector<8x1xf32> to vector<8x1408xf32>
    %65 = vector.broadcast %63 : vector<1x1408xf32> to vector<8x1408xf32>
    %66 = arith.mulf %64, %65 : vector<8x1408xf32>
    %67 = arith.addf %60, %66 : vector<8x1408xf32>
    %c0_21 = arith.constant 0 : index
    %c6 = arith.constant 6 : index
    %68 = vector.load %arg3[%c0_21, %c6] : memref<8x68xf32, #tpu.memory_space<vmem>>, vector<8x1xf32>
    %69 = vector.extract_strided_slice %53 {offsets = [2, 0, 0], sizes = [1, 1, 1408], strides = [1, 1, 1]} : vector<4x1x1408xf32> to vector<1x1x1408xf32>
    %70 = vector.shape_cast %69 : vector<1x1x1408xf32> to vector<1x1408xf32>
    %71 = vector.broadcast %68 : vector<8x1xf32> to vector<8x1408xf32>
    %72 = vector.broadcast %70 : vector<1x1408xf32> to vector<8x1408xf32>
    %73 = arith.mulf %71, %72 : vector<8x1408xf32>
    %74 = arith.addf %67, %73 : vector<8x1408xf32>
    %c0_22 = arith.constant 0 : index
    %c7 = arith.constant 7 : index
    %75 = vector.load %arg3[%c0_22, %c7] : memref<8x68xf32, #tpu.memory_space<vmem>>, vector<8x1xf32>
    %76 = vector.extract_strided_slice %53 {offsets = [3, 0, 0], sizes = [1, 1, 1408], strides = [1, 1, 1]} : vector<4x1x1408xf32> to vector<1x1x1408xf32>
    %77 = vector.shape_cast %76 : vector<1x1x1408xf32> to vector<1x1408xf32>
    %78 = vector.broadcast %75 : vector<8x1xf32> to vector<8x1408xf32>
    %79 = vector.broadcast %77 : vector<1x1408xf32> to vector<8x1408xf32>
    %80 = arith.mulf %78, %79 : vector<8x1408xf32>
    %81 = arith.addf %74, %80 : vector<8x1408xf32>
    %c1_i32_23 = arith.constant 1 : i32
    %82 = arith.addi %arg1, %c1_i32_23 : i32
    %c-1_i32_24 = arith.constant -1 : i32
    %83 = arith.addi %82, %c-1_i32_24 : i32
    %c0_25 = arith.constant 0 : index
    %84 = arith.index_cast %83 : i32 to index
    %c0_26 = arith.constant 0 : index
    %85 = vector.load %arg6[%c0_25, %84, %c0_26] : memref<4x4x1408xf32, #tpu.memory_space<vmem>>, vector<4x1x1408xf32>
    %c1_i32_27 = arith.constant 1 : i32
    %86 = arith.addi %83, %c1_i32_27 : i32
    %c0_28 = arith.constant 0 : index
    %87 = arith.index_cast %86 : i32 to index
    %c0_29 = arith.constant 0 : index
    %88 = vector.load %arg6[%c0_28, %87, %c0_29] : memref<4x4x1408xf32, #tpu.memory_space<vmem>>, vector<4x1x1408xf32>
    %89 = vector.extract_strided_slice %85 {offsets = [0, 0, 328], sizes = [4, 1, 1080], strides = [1, 1, 1]} : vector<4x1x1408xf32> to vector<4x1x1080xf32>
    %90 = vector.extract_strided_slice %88 {offsets = [0, 0, 0], sizes = [4, 1, 328], strides = [1, 1, 1]} : vector<4x1x1408xf32> to vector<4x1x328xf32>
    %91 = tpu.concatenate %89, %90 in 2 : vector<4x1x1080xf32>, vector<4x1x328xf32> -> vector<4x1x1408xf32>
    %c0_30 = arith.constant 0 : index
    %c8 = arith.constant 8 : index
    %92 = vector.load %arg3[%c0_30, %c8] : memref<8x68xf32, #tpu.memory_space<vmem>>, vector<8x1xf32>
    %93 = vector.extract_strided_slice %91 {offsets = [0, 0, 0], sizes = [1, 1, 1408], strides = [1, 1, 1]} : vector<4x1x1408xf32> to vector<1x1x1408xf32>
    %94 = vector.shape_cast %93 : vector<1x1x1408xf32> to vector<1x1408xf32>
    %95 = vector.broadcast %92 : vector<8x1xf32> to vector<8x1408xf32>
    %96 = vector.broadcast %94 : vector<1x1408xf32> to vector<8x1408xf32>
    %97 = arith.mulf %95, %96 : vector<8x1408xf32>
    %98 = arith.addf %81, %97 : vector<8x1408xf32>
    %c0_31 = arith.constant 0 : index
    %c9 = arith.constant 9 : index
    %99 = vector.load %arg3[%c0_31, %c9] : memref<8x68xf32, #tpu.memory_space<vmem>>, vector<8x1xf32>
    %100 = vector.extract_strided_slice %91 {offsets = [1, 0, 0], sizes = [1, 1, 1408], strides = [1, 1, 1]} : vector<4x1x1408xf32> to vector<1x1x1408xf32>
    %101 = vector.shape_cast %100 : vector<1x1x1408xf32> to vector<1x1408xf32>
    %102 = vector.broadcast %99 : vector<8x1xf32> to vector<8x1408xf32>
    %103 = vector.broadcast %101 : vector<1x1408xf32> to vector<8x1408xf32>
    %104 = arith.mulf %102, %103 : vector<8x1408xf32>
    %105 = arith.addf %98, %104 : vector<8x1408xf32>
    %c0_32 = arith.constant 0 : index
    %c10 = arith.constant 10 : index
    %106 = vector.load %arg3[%c0_32, %c10] : memref<8x68xf32, #tpu.memory_space<vmem>>, vector<8x1xf32>
    %107 = vector.extract_strided_slice %91 {offsets = [2, 0, 0], sizes = [1, 1, 1408], strides = [1, 1, 1]} : vector<4x1x1408xf32> to vector<1x1x1408xf32>
    %108 = vector.shape_cast %107 : vector<1x1x1408xf32> to vector<1x1408xf32>
    %109 = vector.broadcast %106 : vector<8x1xf32> to vector<8x1408xf32>
    %110 = vector.broadcast %108 : vector<1x1408xf32> to vector<8x1408xf32>
    %111 = arith.mulf %109, %110 : vector<8x1408xf32>
    %112 = arith.addf %105, %111 : vector<8x1408xf32>
    %c0_33 = arith.constant 0 : index
    %c11 = arith.constant 11 : index
    %113 = vector.load %arg3[%c0_33, %c11] : memref<8x68xf32, #tpu.memory_space<vmem>>, vector<8x1xf32>
    %114 = vector.extract_strided_slice %91 {offsets = [3, 0, 0], sizes = [1, 1, 1408], strides = [1, 1, 1]} : vector<4x1x1408xf32> to vector<1x1x1408xf32>
    %115 = vector.shape_cast %114 : vector<1x1x1408xf32> to vector<1x1408xf32>
    %116 = vector.broadcast %113 : vector<8x1xf32> to vector<8x1408xf32>
    %117 = vector.broadcast %115 : vector<1x1408xf32> to vector<8x1408xf32>
    %118 = arith.mulf %116, %117 : vector<8x1408xf32>
    %119 = arith.addf %112, %118 : vector<8x1408xf32>
    %c1_i32_34 = arith.constant 1 : i32
    %120 = arith.addi %arg1, %c1_i32_34 : i32
    %c-1_i32_35 = arith.constant -1 : i32
    %121 = arith.addi %120, %c-1_i32_35 : i32
    %c0_36 = arith.constant 0 : index
    %122 = arith.index_cast %121 : i32 to index
    %c0_37 = arith.constant 0 : index
    %123 = vector.load %arg6[%c0_36, %122, %c0_37] : memref<4x4x1408xf32, #tpu.memory_space<vmem>>, vector<4x1x1408xf32>
    %c1_i32_38 = arith.constant 1 : i32
    %124 = arith.addi %121, %c1_i32_38 : i32
    %c0_39 = arith.constant 0 : index
    %125 = arith.index_cast %124 : i32 to index
    %c0_40 = arith.constant 0 : index
    %126 = vector.load %arg6[%c0_39, %125, %c0_40] : memref<4x4x1408xf32, #tpu.memory_space<vmem>>, vector<4x1x1408xf32>
    %127 = vector.extract_strided_slice %123 {offsets = [0, 0, 416], sizes = [4, 1, 992], strides = [1, 1, 1]} : vector<4x1x1408xf32> to vector<4x1x992xf32>
    %128 = vector.extract_strided_slice %126 {offsets = [0, 0, 0], sizes = [4, 1, 416], strides = [1, 1, 1]} : vector<4x1x1408xf32> to vector<4x1x416xf32>
    %129 = tpu.concatenate %127, %128 in 2 : vector<4x1x992xf32>, vector<4x1x416xf32> -> vector<4x1x1408xf32>
    %c0_41 = arith.constant 0 : index
    %c12 = arith.constant 12 : index
    %130 = vector.load %arg3[%c0_41, %c12] : memref<8x68xf32, #tpu.memory_space<vmem>>, vector<8x1xf32>
    %131 = vector.extract_strided_slice %129 {offsets = [0, 0, 0], sizes = [1, 1, 1408], strides = [1, 1, 1]} : vector<4x1x1408xf32> to vector<1x1x1408xf32>
    %132 = vector.shape_cast %131 : vector<1x1x1408xf32> to vector<1x1408xf32>
    %133 = vector.broadcast %130 : vector<8x1xf32> to vector<8x1408xf32>
    %134 = vector.broadcast %132 : vector<1x1408xf32> to vector<8x1408xf32>
    %135 = arith.mulf %133, %134 : vector<8x1408xf32>
    %136 = arith.addf %119, %135 : vector<8x1408xf32>
    %c0_42 = arith.constant 0 : index
    %c13 = arith.constant 13 : index
    %137 = vector.load %arg3[%c0_42, %c13] : memref<8x68xf32, #tpu.memory_space<vmem>>, vector<8x1xf32>
    %138 = vector.extract_strided_slice %129 {offsets = [1, 0, 0], sizes = [1, 1, 1408], strides = [1, 1, 1]} : vector<4x1x1408xf32> to vector<1x1x1408xf32>
    %139 = vector.shape_cast %138 : vector<1x1x1408xf32> to vector<1x1408xf32>
    %140 = vector.broadcast %137 : vector<8x1xf32> to vector<8x1408xf32>
    %141 = vector.broadcast %139 : vector<1x1408xf32> to vector<8x1408xf32>
    %142 = arith.mulf %140, %141 : vector<8x1408xf32>
    %143 = arith.addf %136, %142 : vector<8x1408xf32>
    %c0_43 = arith.constant 0 : index
    %c14 = arith.constant 14 : index
    %144 = vector.load %arg3[%c0_43, %c14] : memref<8x68xf32, #tpu.memory_space<vmem>>, vector<8x1xf32>
    %145 = vector.extract_strided_slice %129 {offsets = [2, 0, 0], sizes = [1, 1, 1408], strides = [1, 1, 1]} : vector<4x1x1408xf32> to vector<1x1x1408xf32>
    %146 = vector.shape_cast %145 : vector<1x1x1408xf32> to vector<1x1408xf32>
    %147 = vector.broadcast %144 : vector<8x1xf32> to vector<8x1408xf32>
    %148 = vector.broadcast %146 : vector<1x1408xf32> to vector<8x1408xf32>
    %149 = arith.mulf %147, %148 : vector<8x1408xf32>
    %150 = arith.addf %143, %149 : vector<8x1408xf32>
    %c0_44 = arith.constant 0 : index
    %c15 = arith.constant 15 : index
    %151 = vector.load %arg3[%c0_44, %c15] : memref<8x68xf32, #tpu.memory_space<vmem>>, vector<8x1xf32>
    %152 = vector.extract_strided_slice %129 {offsets = [3, 0, 0], sizes = [1, 1, 1408], strides = [1, 1, 1]} : vector<4x1x1408xf32> to vector<1x1x1408xf32>
    %153 = vector.shape_cast %152 : vector<1x1x1408xf32> to vector<1x1408xf32>
    %154 = vector.broadcast %151 : vector<8x1xf32> to vector<8x1408xf32>
    %155 = vector.broadcast %153 : vector<1x1408xf32> to vector<8x1408xf32>
    %156 = arith.mulf %154, %155 : vector<8x1408xf32>
    %157 = arith.addf %150, %156 : vector<8x1408xf32>
    %c1_i32_45 = arith.constant 1 : i32
    %158 = arith.addi %arg1, %c1_i32_45 : i32
    %c-1_i32_46 = arith.constant -1 : i32
    %159 = arith.addi %158, %c-1_i32_46 : i32
    %c0_47 = arith.constant 0 : index
    %160 = arith.index_cast %159 : i32 to index
    %c0_48 = arith.constant 0 : index
    %161 = vector.load %arg6[%c0_47, %160, %c0_48] : memref<4x4x1408xf32, #tpu.memory_space<vmem>>, vector<4x1x1408xf32>
    %c1_i32_49 = arith.constant 1 : i32
    %162 = arith.addi %159, %c1_i32_49 : i32
    %c0_50 = arith.constant 0 : index
    %163 = arith.index_cast %162 : i32 to index
    %c0_51 = arith.constant 0 : index
    %164 = vector.load %arg6[%c0_50, %163, %c0_51] : memref<4x4x1408xf32, #tpu.memory_space<vmem>>, vector<4x1x1408xf32>
    %165 = vector.extract_strided_slice %161 {offsets = [0, 0, 520], sizes = [4, 1, 888], strides = [1, 1, 1]} : vector<4x1x1408xf32> to vector<4x1x888xf32>
    %166 = vector.extract_strided_slice %164 {offsets = [0, 0, 0], sizes = [4, 1, 520], strides = [1, 1, 1]} : vector<4x1x1408xf32> to vector<4x1x520xf32>
    %167 = tpu.concatenate %165, %166 in 2 : vector<4x1x888xf32>, vector<4x1x520xf32> -> vector<4x1x1408xf32>
    %c0_52 = arith.constant 0 : index
    %c16 = arith.constant 16 : index
    %168 = vector.load %arg3[%c0_52, %c16] : memref<8x68xf32, #tpu.memory_space<vmem>>, vector<8x1xf32>
    %169 = vector.extract_strided_slice %167 {offsets = [0, 0, 0], sizes = [1, 1, 1408], strides = [1, 1, 1]} : vector<4x1x1408xf32> to vector<1x1x1408xf32>
    %170 = vector.shape_cast %169 : vector<1x1x1408xf32> to vector<1x1408xf32>
    %171 = vector.broadcast %168 : vector<8x1xf32> to vector<8x1408xf32>
    %172 = vector.broadcast %170 : vector<1x1408xf32> to vector<8x1408xf32>
    %173 = arith.mulf %171, %172 : vector<8x1408xf32>
    %174 = arith.addf %157, %173 : vector<8x1408xf32>
    %c0_53 = arith.constant 0 : index
    %c17 = arith.constant 17 : index
    %175 = vector.load %arg3[%c0_53, %c17] : memref<8x68xf32, #tpu.memory_space<vmem>>, vector<8x1xf32>
    %176 = vector.extract_strided_slice %167 {offsets = [1, 0, 0], sizes = [1, 1, 1408], strides = [1, 1, 1]} : vector<4x1x1408xf32> to vector<1x1x1408xf32>
    %177 = vector.shape_cast %176 : vector<1x1x1408xf32> to vector<1x1408xf32>
    %178 = vector.broadcast %175 : vector<8x1xf32> to vector<8x1408xf32>
    %179 = vector.broadcast %177 : vector<1x1408xf32> to vector<8x1408xf32>
    %180 = arith.mulf %178, %179 : vector<8x1408xf32>
    %181 = arith.addf %174, %180 : vector<8x1408xf32>
    %c0_54 = arith.constant 0 : index
    %c18 = arith.constant 18 : index
    %182 = vector.load %arg3[%c0_54, %c18] : memref<8x68xf32, #tpu.memory_space<vmem>>, vector<8x1xf32>
    %183 = vector.extract_strided_slice %167 {offsets = [2, 0, 0], sizes = [1, 1, 1408], strides = [1, 1, 1]} : vector<4x1x1408xf32> to vector<1x1x1408xf32>
    %184 = vector.shape_cast %183 : vector<1x1x1408xf32> to vector<1x1408xf32>
    %185 = vector.broadcast %182 : vector<8x1xf32> to vector<8x1408xf32>
    %186 = vector.broadcast %184 : vector<1x1408xf32> to vector<8x1408xf32>
    %187 = arith.mulf %185, %186 : vector<8x1408xf32>
    %188 = arith.addf %181, %187 : vector<8x1408xf32>
    %c0_55 = arith.constant 0 : index
    %c19 = arith.constant 19 : index
    %189 = vector.load %arg3[%c0_55, %c19] : memref<8x68xf32, #tpu.memory_space<vmem>>, vector<8x1xf32>
    %190 = vector.extract_strided_slice %167 {offsets = [3, 0, 0], sizes = [1, 1, 1408], strides = [1, 1, 1]} : vector<4x1x1408xf32> to vector<1x1x1408xf32>
    %191 = vector.shape_cast %190 : vector<1x1x1408xf32> to vector<1x1408xf32>
    %192 = vector.broadcast %189 : vector<8x1xf32> to vector<8x1408xf32>
    %193 = vector.broadcast %191 : vector<1x1408xf32> to vector<8x1408xf32>
    %194 = arith.mulf %192, %193 : vector<8x1408xf32>
    %195 = arith.addf %188, %194 : vector<8x1408xf32>
    %c1_i32_56 = arith.constant 1 : i32
    %196 = arith.addi %arg1, %c1_i32_56 : i32
    %c-1_i32_57 = arith.constant -1 : i32
    %197 = arith.addi %196, %c-1_i32_57 : i32
    %c0_58 = arith.constant 0 : index
    %198 = arith.index_cast %197 : i32 to index
    %c0_59 = arith.constant 0 : index
    %199 = vector.load %arg6[%c0_58, %198, %c0_59] : memref<4x4x1408xf32, #tpu.memory_space<vmem>>, vector<4x1x1408xf32>
    %c1_i32_60 = arith.constant 1 : i32
    %200 = arith.addi %197, %c1_i32_60 : i32
    %c0_61 = arith.constant 0 : index
    %201 = arith.index_cast %200 : i32 to index
    %c0_62 = arith.constant 0 : index
    %202 = vector.load %arg6[%c0_61, %201, %c0_62] : memref<4x4x1408xf32, #tpu.memory_space<vmem>>, vector<4x1x1408xf32>
    %203 = vector.extract_strided_slice %199 {offsets = [0, 0, 640], sizes = [4, 1, 768], strides = [1, 1, 1]} : vector<4x1x1408xf32> to vector<4x1x768xf32>
    %204 = vector.extract_strided_slice %202 {offsets = [0, 0, 0], sizes = [4, 1, 640], strides = [1, 1, 1]} : vector<4x1x1408xf32> to vector<4x1x640xf32>
    %205 = tpu.concatenate %203, %204 in 2 : vector<4x1x768xf32>, vector<4x1x640xf32> -> vector<4x1x1408xf32>
    %c0_63 = arith.constant 0 : index
    %c20 = arith.constant 20 : index
    %206 = vector.load %arg3[%c0_63, %c20] : memref<8x68xf32, #tpu.memory_space<vmem>>, vector<8x1xf32>
    %207 = vector.extract_strided_slice %205 {offsets = [0, 0, 0], sizes = [1, 1, 1408], strides = [1, 1, 1]} : vector<4x1x1408xf32> to vector<1x1x1408xf32>
    %208 = vector.shape_cast %207 : vector<1x1x1408xf32> to vector<1x1408xf32>
    %209 = vector.broadcast %206 : vector<8x1xf32> to vector<8x1408xf32>
    %210 = vector.broadcast %208 : vector<1x1408xf32> to vector<8x1408xf32>
    %211 = arith.mulf %209, %210 : vector<8x1408xf32>
    %212 = arith.addf %195, %211 : vector<8x1408xf32>
    %c0_64 = arith.constant 0 : index
    %c21 = arith.constant 21 : index
    %213 = vector.load %arg3[%c0_64, %c21] : memref<8x68xf32, #tpu.memory_space<vmem>>, vector<8x1xf32>
    %214 = vector.extract_strided_slice %205 {offsets = [1, 0, 0], sizes = [1, 1, 1408], strides = [1, 1, 1]} : vector<4x1x1408xf32> to vector<1x1x1408xf32>
    %215 = vector.shape_cast %214 : vector<1x1x1408xf32> to vector<1x1408xf32>
    %216 = vector.broadcast %213 : vector<8x1xf32> to vector<8x1408xf32>
    %217 = vector.broadcast %215 : vector<1x1408xf32> to vector<8x1408xf32>
    %218 = arith.mulf %216, %217 : vector<8x1408xf32>
    %219 = arith.addf %212, %218 : vector<8x1408xf32>
    %c0_65 = arith.constant 0 : index
    %c22 = arith.constant 22 : index
    %220 = vector.load %arg3[%c0_65, %c22] : memref<8x68xf32, #tpu.memory_space<vmem>>, vector<8x1xf32>
    %221 = vector.extract_strided_slice %205 {offsets = [2, 0, 0], sizes = [1, 1, 1408], strides = [1, 1, 1]} : vector<4x1x1408xf32> to vector<1x1x1408xf32>
    %222 = vector.shape_cast %221 : vector<1x1x1408xf32> to vector<1x1408xf32>
    %223 = vector.broadcast %220 : vector<8x1xf32> to vector<8x1408xf32>
    %224 = vector.broadcast %222 : vector<1x1408xf32> to vector<8x1408xf32>
    %225 = arith.mulf %223, %224 : vector<8x1408xf32>
    %226 = arith.addf %219, %225 : vector<8x1408xf32>
    %c0_66 = arith.constant 0 : index
    %c23 = arith.constant 23 : index
    %227 = vector.load %arg3[%c0_66, %c23] : memref<8x68xf32, #tpu.memory_space<vmem>>, vector<8x1xf32>
    %228 = vector.extract_strided_slice %205 {offsets = [3, 0, 0], sizes = [1, 1, 1408], strides = [1, 1, 1]} : vector<4x1x1408xf32> to vector<1x1x1408xf32>
    %229 = vector.shape_cast %228 : vector<1x1x1408xf32> to vector<1x1408xf32>
    %230 = vector.broadcast %227 : vector<8x1xf32> to vector<8x1408xf32>
    %231 = vector.broadcast %229 : vector<1x1408xf32> to vector<8x1408xf32>
    %232 = arith.mulf %230, %231 : vector<8x1408xf32>
    %233 = arith.addf %226, %232 : vector<8x1408xf32>
    %c1_i32_67 = arith.constant 1 : i32
    %234 = arith.addi %arg1, %c1_i32_67 : i32
    %c-1_i32_68 = arith.constant -1 : i32
    %235 = arith.addi %234, %c-1_i32_68 : i32
    %c0_69 = arith.constant 0 : index
    %236 = arith.index_cast %235 : i32 to index
    %c0_70 = arith.constant 0 : index
    %237 = vector.load %arg6[%c0_69, %236, %c0_70] : memref<4x4x1408xf32, #tpu.memory_space<vmem>>, vector<4x1x1408xf32>
    %c1_i32_71 = arith.constant 1 : i32
    %238 = arith.addi %235, %c1_i32_71 : i32
    %c0_72 = arith.constant 0 : index
    %239 = arith.index_cast %238 : i32 to index
    %c0_73 = arith.constant 0 : index
    %240 = vector.load %arg6[%c0_72, %239, %c0_73] : memref<4x4x1408xf32, #tpu.memory_space<vmem>>, vector<4x1x1408xf32>
    %241 = vector.extract_strided_slice %237 {offsets = [0, 0, 800], sizes = [4, 1, 608], strides = [1, 1, 1]} : vector<4x1x1408xf32> to vector<4x1x608xf32>
    %242 = vector.extract_strided_slice %240 {offsets = [0, 0, 0], sizes = [4, 1, 800], strides = [1, 1, 1]} : vector<4x1x1408xf32> to vector<4x1x800xf32>
    %243 = tpu.concatenate %241, %242 in 2 : vector<4x1x608xf32>, vector<4x1x800xf32> -> vector<4x1x1408xf32>
    %c0_74 = arith.constant 0 : index
    %c24 = arith.constant 24 : index
    %244 = vector.load %arg3[%c0_74, %c24] : memref<8x68xf32, #tpu.memory_space<vmem>>, vector<8x1xf32>
    %245 = vector.extract_strided_slice %243 {offsets = [0, 0, 0], sizes = [1, 1, 1408], strides = [1, 1, 1]} : vector<4x1x1408xf32> to vector<1x1x1408xf32>
    %246 = vector.shape_cast %245 : vector<1x1x1408xf32> to vector<1x1408xf32>
    %247 = vector.broadcast %244 : vector<8x1xf32> to vector<8x1408xf32>
    %248 = vector.broadcast %246 : vector<1x1408xf32> to vector<8x1408xf32>
    %249 = arith.mulf %247, %248 : vector<8x1408xf32>
    %250 = arith.addf %233, %249 : vector<8x1408xf32>
    %c0_75 = arith.constant 0 : index
    %c25 = arith.constant 25 : index
    %251 = vector.load %arg3[%c0_75, %c25] : memref<8x68xf32, #tpu.memory_space<vmem>>, vector<8x1xf32>
    %252 = vector.extract_strided_slice %243 {offsets = [1, 0, 0], sizes = [1, 1, 1408], strides = [1, 1, 1]} : vector<4x1x1408xf32> to vector<1x1x1408xf32>
    %253 = vector.shape_cast %252 : vector<1x1x1408xf32> to vector<1x1408xf32>
    %254 = vector.broadcast %251 : vector<8x1xf32> to vector<8x1408xf32>
    %255 = vector.broadcast %253 : vector<1x1408xf32> to vector<8x1408xf32>
    %256 = arith.mulf %254, %255 : vector<8x1408xf32>
    %257 = arith.addf %250, %256 : vector<8x1408xf32>
    %c0_76 = arith.constant 0 : index
    %c26 = arith.constant 26 : index
    %258 = vector.load %arg3[%c0_76, %c26] : memref<8x68xf32, #tpu.memory_space<vmem>>, vector<8x1xf32>
    %259 = vector.extract_strided_slice %243 {offsets = [2, 0, 0], sizes = [1, 1, 1408], strides = [1, 1, 1]} : vector<4x1x1408xf32> to vector<1x1x1408xf32>
    %260 = vector.shape_cast %259 : vector<1x1x1408xf32> to vector<1x1408xf32>
    %261 = vector.broadcast %258 : vector<8x1xf32> to vector<8x1408xf32>
    %262 = vector.broadcast %260 : vector<1x1408xf32> to vector<8x1408xf32>
    %263 = arith.mulf %261, %262 : vector<8x1408xf32>
    %264 = arith.addf %257, %263 : vector<8x1408xf32>
    %c0_77 = arith.constant 0 : index
    %c27 = arith.constant 27 : index
    %265 = vector.load %arg3[%c0_77, %c27] : memref<8x68xf32, #tpu.memory_space<vmem>>, vector<8x1xf32>
    %266 = vector.extract_strided_slice %243 {offsets = [3, 0, 0], sizes = [1, 1, 1408], strides = [1, 1, 1]} : vector<4x1x1408xf32> to vector<1x1x1408xf32>
    %267 = vector.shape_cast %266 : vector<1x1x1408xf32> to vector<1x1408xf32>
    %268 = vector.broadcast %265 : vector<8x1xf32> to vector<8x1408xf32>
    %269 = vector.broadcast %267 : vector<1x1408xf32> to vector<8x1408xf32>
    %270 = arith.mulf %268, %269 : vector<8x1408xf32>
    %271 = arith.addf %264, %270 : vector<8x1408xf32>
    %c1_i32_78 = arith.constant 1 : i32
    %272 = arith.addi %arg1, %c1_i32_78 : i32
    %c-1_i32_79 = arith.constant -1 : i32
    %273 = arith.addi %272, %c-1_i32_79 : i32
    %c0_80 = arith.constant 0 : index
    %274 = arith.index_cast %273 : i32 to index
    %c0_81 = arith.constant 0 : index
    %275 = vector.load %arg6[%c0_80, %274, %c0_81] : memref<4x4x1408xf32, #tpu.memory_space<vmem>>, vector<4x1x1408xf32>
    %c1_i32_82 = arith.constant 1 : i32
    %276 = arith.addi %273, %c1_i32_82 : i32
    %c0_83 = arith.constant 0 : index
    %277 = arith.index_cast %276 : i32 to index
    %c0_84 = arith.constant 0 : index
    %278 = vector.load %arg6[%c0_83, %277, %c0_84] : memref<4x4x1408xf32, #tpu.memory_space<vmem>>, vector<4x1x1408xf32>
    %279 = vector.extract_strided_slice %275 {offsets = [0, 0, 1024], sizes = [4, 1, 384], strides = [1, 1, 1]} : vector<4x1x1408xf32> to vector<4x1x384xf32>
    %280 = vector.extract_strided_slice %278 {offsets = [0, 0, 0], sizes = [4, 1, 1024], strides = [1, 1, 1]} : vector<4x1x1408xf32> to vector<4x1x1024xf32>
    %281 = tpu.concatenate %279, %280 in 2 : vector<4x1x384xf32>, vector<4x1x1024xf32> -> vector<4x1x1408xf32>
    %c0_85 = arith.constant 0 : index
    %c28 = arith.constant 28 : index
    %282 = vector.load %arg3[%c0_85, %c28] : memref<8x68xf32, #tpu.memory_space<vmem>>, vector<8x1xf32>
    %283 = vector.extract_strided_slice %281 {offsets = [0, 0, 0], sizes = [1, 1, 1408], strides = [1, 1, 1]} : vector<4x1x1408xf32> to vector<1x1x1408xf32>
    %284 = vector.shape_cast %283 : vector<1x1x1408xf32> to vector<1x1408xf32>
    %285 = vector.broadcast %282 : vector<8x1xf32> to vector<8x1408xf32>
    %286 = vector.broadcast %284 : vector<1x1408xf32> to vector<8x1408xf32>
    %287 = arith.mulf %285, %286 : vector<8x1408xf32>
    %288 = arith.addf %271, %287 : vector<8x1408xf32>
    %c0_86 = arith.constant 0 : index
    %c29 = arith.constant 29 : index
    %289 = vector.load %arg3[%c0_86, %c29] : memref<8x68xf32, #tpu.memory_space<vmem>>, vector<8x1xf32>
    %290 = vector.extract_strided_slice %281 {offsets = [1, 0, 0], sizes = [1, 1, 1408], strides = [1, 1, 1]} : vector<4x1x1408xf32> to vector<1x1x1408xf32>
    %291 = vector.shape_cast %290 : vector<1x1x1408xf32> to vector<1x1408xf32>
    %292 = vector.broadcast %289 : vector<8x1xf32> to vector<8x1408xf32>
    %293 = vector.broadcast %291 : vector<1x1408xf32> to vector<8x1408xf32>
    %294 = arith.mulf %292, %293 : vector<8x1408xf32>
    %295 = arith.addf %288, %294 : vector<8x1408xf32>
    %c0_87 = arith.constant 0 : index
    %c30 = arith.constant 30 : index
    %296 = vector.load %arg3[%c0_87, %c30] : memref<8x68xf32, #tpu.memory_space<vmem>>, vector<8x1xf32>
    %297 = vector.extract_strided_slice %281 {offsets = [2, 0, 0], sizes = [1, 1, 1408], strides = [1, 1, 1]} : vector<4x1x1408xf32> to vector<1x1x1408xf32>
    %298 = vector.shape_cast %297 : vector<1x1x1408xf32> to vector<1x1408xf32>
    %299 = vector.broadcast %296 : vector<8x1xf32> to vector<8x1408xf32>
    %300 = vector.broadcast %298 : vector<1x1408xf32> to vector<8x1408xf32>
    %301 = arith.mulf %299, %300 : vector<8x1408xf32>
    %302 = arith.addf %295, %301 : vector<8x1408xf32>
    %c0_88 = arith.constant 0 : index
    %c31 = arith.constant 31 : index
    %303 = vector.load %arg3[%c0_88, %c31] : memref<8x68xf32, #tpu.memory_space<vmem>>, vector<8x1xf32>
    %304 = vector.extract_strided_slice %281 {offsets = [3, 0, 0], sizes = [1, 1, 1408], strides = [1, 1, 1]} : vector<4x1x1408xf32> to vector<1x1x1408xf32>
    %305 = vector.shape_cast %304 : vector<1x1x1408xf32> to vector<1x1408xf32>
    %306 = vector.broadcast %303 : vector<8x1xf32> to vector<8x1408xf32>
    %307 = vector.broadcast %305 : vector<1x1408xf32> to vector<8x1408xf32>
    %308 = arith.mulf %306, %307 : vector<8x1408xf32>
    %309 = arith.addf %302, %308 : vector<8x1408xf32>
    %c1_i32_89 = arith.constant 1 : i32
    %310 = arith.addi %arg1, %c1_i32_89 : i32
    %c0_i32_90 = arith.constant 0 : i32
    %311 = arith.addi %310, %c0_i32_90 : i32
    %c0_91 = arith.constant 0 : index
    %312 = arith.index_cast %311 : i32 to index
    %c0_92 = arith.constant 0 : index
    %313 = vector.load %arg6[%c0_91, %312, %c0_92] : memref<4x4x1408xf32, #tpu.memory_space<vmem>>, vector<4x1x1408xf32>
    %c0_93 = arith.constant 0 : index
    %c32 = arith.constant 32 : index
    %314 = vector.load %arg3[%c0_93, %c32] : memref<8x68xf32, #tpu.memory_space<vmem>>, vector<8x1xf32>
    %315 = vector.extract_strided_slice %313 {offsets = [0, 0, 0], sizes = [1, 1, 1408], strides = [1, 1, 1]} : vector<4x1x1408xf32> to vector<1x1x1408xf32>
    %316 = vector.shape_cast %315 : vector<1x1x1408xf32> to vector<1x1408xf32>
    %317 = vector.broadcast %314 : vector<8x1xf32> to vector<8x1408xf32>
    %318 = vector.broadcast %316 : vector<1x1408xf32> to vector<8x1408xf32>
    %319 = arith.mulf %317, %318 : vector<8x1408xf32>
    %320 = arith.addf %309, %319 : vector<8x1408xf32>
    %c0_94 = arith.constant 0 : index
    %c33 = arith.constant 33 : index
    %321 = vector.load %arg3[%c0_94, %c33] : memref<8x68xf32, #tpu.memory_space<vmem>>, vector<8x1xf32>
    %322 = vector.extract_strided_slice %313 {offsets = [1, 0, 0], sizes = [1, 1, 1408], strides = [1, 1, 1]} : vector<4x1x1408xf32> to vector<1x1x1408xf32>
    %323 = vector.shape_cast %322 : vector<1x1x1408xf32> to vector<1x1408xf32>
    %324 = vector.broadcast %321 : vector<8x1xf32> to vector<8x1408xf32>
    %325 = vector.broadcast %323 : vector<1x1408xf32> to vector<8x1408xf32>
    %326 = arith.mulf %324, %325 : vector<8x1408xf32>
    %327 = arith.addf %320, %326 : vector<8x1408xf32>
    %c0_95 = arith.constant 0 : index
    %c34 = arith.constant 34 : index
    %328 = vector.load %arg3[%c0_95, %c34] : memref<8x68xf32, #tpu.memory_space<vmem>>, vector<8x1xf32>
    %329 = vector.extract_strided_slice %313 {offsets = [2, 0, 0], sizes = [1, 1, 1408], strides = [1, 1, 1]} : vector<4x1x1408xf32> to vector<1x1x1408xf32>
    %330 = vector.shape_cast %329 : vector<1x1x1408xf32> to vector<1x1408xf32>
    %331 = vector.broadcast %328 : vector<8x1xf32> to vector<8x1408xf32>
    %332 = vector.broadcast %330 : vector<1x1408xf32> to vector<8x1408xf32>
    %333 = arith.mulf %331, %332 : vector<8x1408xf32>
    %334 = arith.addf %327, %333 : vector<8x1408xf32>
    %c0_96 = arith.constant 0 : index
    %c35 = arith.constant 35 : index
    %335 = vector.load %arg3[%c0_96, %c35] : memref<8x68xf32, #tpu.memory_space<vmem>>, vector<8x1xf32>
    %336 = vector.extract_strided_slice %313 {offsets = [3, 0, 0], sizes = [1, 1, 1408], strides = [1, 1, 1]} : vector<4x1x1408xf32> to vector<1x1x1408xf32>
    %337 = vector.shape_cast %336 : vector<1x1x1408xf32> to vector<1x1408xf32>
    %338 = vector.broadcast %335 : vector<8x1xf32> to vector<8x1408xf32>
    %339 = vector.broadcast %337 : vector<1x1408xf32> to vector<8x1408xf32>
    %340 = arith.mulf %338, %339 : vector<8x1408xf32>
    %341 = arith.addf %334, %340 : vector<8x1408xf32>
    %c1_i32_97 = arith.constant 1 : i32
    %342 = arith.addi %arg1, %c1_i32_97 : i32
    %c0_i32_98 = arith.constant 0 : i32
    %343 = arith.addi %342, %c0_i32_98 : i32
    %c0_99 = arith.constant 0 : index
    %344 = arith.index_cast %343 : i32 to index
    %c0_100 = arith.constant 0 : index
    %345 = vector.load %arg6[%c0_99, %344, %c0_100] : memref<4x4x1408xf32, #tpu.memory_space<vmem>>, vector<4x1x1408xf32>
    %c1_i32_101 = arith.constant 1 : i32
    %346 = arith.addi %343, %c1_i32_101 : i32
    %c0_102 = arith.constant 0 : index
    %347 = arith.index_cast %346 : i32 to index
    %c0_103 = arith.constant 0 : index
    %348 = vector.load %arg6[%c0_102, %347, %c0_103] : memref<4x4x1408xf32, #tpu.memory_space<vmem>>, vector<4x1x1408xf32>
    %349 = vector.extract_strided_slice %345 {offsets = [0, 0, 384], sizes = [4, 1, 1024], strides = [1, 1, 1]} : vector<4x1x1408xf32> to vector<4x1x1024xf32>
    %350 = vector.extract_strided_slice %348 {offsets = [0, 0, 0], sizes = [4, 1, 384], strides = [1, 1, 1]} : vector<4x1x1408xf32> to vector<4x1x384xf32>
    %351 = tpu.concatenate %349, %350 in 2 : vector<4x1x1024xf32>, vector<4x1x384xf32> -> vector<4x1x1408xf32>
    %c0_104 = arith.constant 0 : index
    %c36 = arith.constant 36 : index
    %352 = vector.load %arg3[%c0_104, %c36] : memref<8x68xf32, #tpu.memory_space<vmem>>, vector<8x1xf32>
    %353 = vector.extract_strided_slice %351 {offsets = [0, 0, 0], sizes = [1, 1, 1408], strides = [1, 1, 1]} : vector<4x1x1408xf32> to vector<1x1x1408xf32>
    %354 = vector.shape_cast %353 : vector<1x1x1408xf32> to vector<1x1408xf32>
    %355 = vector.broadcast %352 : vector<8x1xf32> to vector<8x1408xf32>
    %356 = vector.broadcast %354 : vector<1x1408xf32> to vector<8x1408xf32>
    %357 = arith.mulf %355, %356 : vector<8x1408xf32>
    %358 = arith.addf %341, %357 : vector<8x1408xf32>
    %c0_105 = arith.constant 0 : index
    %c37 = arith.constant 37 : index
    %359 = vector.load %arg3[%c0_105, %c37] : memref<8x68xf32, #tpu.memory_space<vmem>>, vector<8x1xf32>
    %360 = vector.extract_strided_slice %351 {offsets = [1, 0, 0], sizes = [1, 1, 1408], strides = [1, 1, 1]} : vector<4x1x1408xf32> to vector<1x1x1408xf32>
    %361 = vector.shape_cast %360 : vector<1x1x1408xf32> to vector<1x1408xf32>
    %362 = vector.broadcast %359 : vector<8x1xf32> to vector<8x1408xf32>
    %363 = vector.broadcast %361 : vector<1x1408xf32> to vector<8x1408xf32>
    %364 = arith.mulf %362, %363 : vector<8x1408xf32>
    %365 = arith.addf %358, %364 : vector<8x1408xf32>
    %c0_106 = arith.constant 0 : index
    %c38 = arith.constant 38 : index
    %366 = vector.load %arg3[%c0_106, %c38] : memref<8x68xf32, #tpu.memory_space<vmem>>, vector<8x1xf32>
    %367 = vector.extract_strided_slice %351 {offsets = [2, 0, 0], sizes = [1, 1, 1408], strides = [1, 1, 1]} : vector<4x1x1408xf32> to vector<1x1x1408xf32>
    %368 = vector.shape_cast %367 : vector<1x1x1408xf32> to vector<1x1408xf32>
    %369 = vector.broadcast %366 : vector<8x1xf32> to vector<8x1408xf32>
    %370 = vector.broadcast %368 : vector<1x1408xf32> to vector<8x1408xf32>
    %371 = arith.mulf %369, %370 : vector<8x1408xf32>
    %372 = arith.addf %365, %371 : vector<8x1408xf32>
    %c0_107 = arith.constant 0 : index
    %c39 = arith.constant 39 : index
    %373 = vector.load %arg3[%c0_107, %c39] : memref<8x68xf32, #tpu.memory_space<vmem>>, vector<8x1xf32>
    %374 = vector.extract_strided_slice %351 {offsets = [3, 0, 0], sizes = [1, 1, 1408], strides = [1, 1, 1]} : vector<4x1x1408xf32> to vector<1x1x1408xf32>
    %375 = vector.shape_cast %374 : vector<1x1x1408xf32> to vector<1x1408xf32>
    %376 = vector.broadcast %373 : vector<8x1xf32> to vector<8x1408xf32>
    %377 = vector.broadcast %375 : vector<1x1408xf32> to vector<8x1408xf32>
    %378 = arith.mulf %376, %377 : vector<8x1408xf32>
    %379 = arith.addf %372, %378 : vector<8x1408xf32>
    %c1_i32_108 = arith.constant 1 : i32
    %380 = arith.addi %arg1, %c1_i32_108 : i32
    %c0_i32_109 = arith.constant 0 : i32
    %381 = arith.addi %380, %c0_i32_109 : i32
    %c0_110 = arith.constant 0 : index
    %382 = arith.index_cast %381 : i32 to index
    %c0_111 = arith.constant 0 : index
    %383 = vector.load %arg6[%c0_110, %382, %c0_111] : memref<4x4x1408xf32, #tpu.memory_space<vmem>>, vector<4x1x1408xf32>
    %c1_i32_112 = arith.constant 1 : i32
    %384 = arith.addi %381, %c1_i32_112 : i32
    %c0_113 = arith.constant 0 : index
    %385 = arith.index_cast %384 : i32 to index
    %c0_114 = arith.constant 0 : index
    %386 = vector.load %arg6[%c0_113, %385, %c0_114] : memref<4x4x1408xf32, #tpu.memory_space<vmem>>, vector<4x1x1408xf32>
    %387 = vector.extract_strided_slice %383 {offsets = [0, 0, 608], sizes = [4, 1, 800], strides = [1, 1, 1]} : vector<4x1x1408xf32> to vector<4x1x800xf32>
    %388 = vector.extract_strided_slice %386 {offsets = [0, 0, 0], sizes = [4, 1, 608], strides = [1, 1, 1]} : vector<4x1x1408xf32> to vector<4x1x608xf32>
    %389 = tpu.concatenate %387, %388 in 2 : vector<4x1x800xf32>, vector<4x1x608xf32> -> vector<4x1x1408xf32>
    %c0_115 = arith.constant 0 : index
    %c40 = arith.constant 40 : index
    %390 = vector.load %arg3[%c0_115, %c40] : memref<8x68xf32, #tpu.memory_space<vmem>>, vector<8x1xf32>
    %391 = vector.extract_strided_slice %389 {offsets = [0, 0, 0], sizes = [1, 1, 1408], strides = [1, 1, 1]} : vector<4x1x1408xf32> to vector<1x1x1408xf32>
    %392 = vector.shape_cast %391 : vector<1x1x1408xf32> to vector<1x1408xf32>
    %393 = vector.broadcast %390 : vector<8x1xf32> to vector<8x1408xf32>
    %394 = vector.broadcast %392 : vector<1x1408xf32> to vector<8x1408xf32>
    %395 = arith.mulf %393, %394 : vector<8x1408xf32>
    %396 = arith.addf %379, %395 : vector<8x1408xf32>
    %c0_116 = arith.constant 0 : index
    %c41 = arith.constant 41 : index
    %397 = vector.load %arg3[%c0_116, %c41] : memref<8x68xf32, #tpu.memory_space<vmem>>, vector<8x1xf32>
    %398 = vector.extract_strided_slice %389 {offsets = [1, 0, 0], sizes = [1, 1, 1408], strides = [1, 1, 1]} : vector<4x1x1408xf32> to vector<1x1x1408xf32>
    %399 = vector.shape_cast %398 : vector<1x1x1408xf32> to vector<1x1408xf32>
    %400 = vector.broadcast %397 : vector<8x1xf32> to vector<8x1408xf32>
    %401 = vector.broadcast %399 : vector<1x1408xf32> to vector<8x1408xf32>
    %402 = arith.mulf %400, %401 : vector<8x1408xf32>
    %403 = arith.addf %396, %402 : vector<8x1408xf32>
    %c0_117 = arith.constant 0 : index
    %c42 = arith.constant 42 : index
    %404 = vector.load %arg3[%c0_117, %c42] : memref<8x68xf32, #tpu.memory_space<vmem>>, vector<8x1xf32>
    %405 = vector.extract_strided_slice %389 {offsets = [2, 0, 0], sizes = [1, 1, 1408], strides = [1, 1, 1]} : vector<4x1x1408xf32> to vector<1x1x1408xf32>
    %406 = vector.shape_cast %405 : vector<1x1x1408xf32> to vector<1x1408xf32>
    %407 = vector.broadcast %404 : vector<8x1xf32> to vector<8x1408xf32>
    %408 = vector.broadcast %406 : vector<1x1408xf32> to vector<8x1408xf32>
    %409 = arith.mulf %407, %408 : vector<8x1408xf32>
    %410 = arith.addf %403, %409 : vector<8x1408xf32>
    %c0_118 = arith.constant 0 : index
    %c43 = arith.constant 43 : index
    %411 = vector.load %arg3[%c0_118, %c43] : memref<8x68xf32, #tpu.memory_space<vmem>>, vector<8x1xf32>
    %412 = vector.extract_strided_slice %389 {offsets = [3, 0, 0], sizes = [1, 1, 1408], strides = [1, 1, 1]} : vector<4x1x1408xf32> to vector<1x1x1408xf32>
    %413 = vector.shape_cast %412 : vector<1x1x1408xf32> to vector<1x1408xf32>
    %414 = vector.broadcast %411 : vector<8x1xf32> to vector<8x1408xf32>
    %415 = vector.broadcast %413 : vector<1x1408xf32> to vector<8x1408xf32>
    %416 = arith.mulf %414, %415 : vector<8x1408xf32>
    %417 = arith.addf %410, %416 : vector<8x1408xf32>
    %c1_i32_119 = arith.constant 1 : i32
    %418 = arith.addi %arg1, %c1_i32_119 : i32
    %c0_i32_120 = arith.constant 0 : i32
    %419 = arith.addi %418, %c0_i32_120 : i32
    %c0_121 = arith.constant 0 : index
    %420 = arith.index_cast %419 : i32 to index
    %c0_122 = arith.constant 0 : index
    %421 = vector.load %arg6[%c0_121, %420, %c0_122] : memref<4x4x1408xf32, #tpu.memory_space<vmem>>, vector<4x1x1408xf32>
    %c1_i32_123 = arith.constant 1 : i32
    %422 = arith.addi %419, %c1_i32_123 : i32
    %c0_124 = arith.constant 0 : index
    %423 = arith.index_cast %422 : i32 to index
    %c0_125 = arith.constant 0 : index
    %424 = vector.load %arg6[%c0_124, %423, %c0_125] : memref<4x4x1408xf32, #tpu.memory_space<vmem>>, vector<4x1x1408xf32>
    %425 = vector.extract_strided_slice %421 {offsets = [0, 0, 768], sizes = [4, 1, 640], strides = [1, 1, 1]} : vector<4x1x1408xf32> to vector<4x1x640xf32>
    %426 = vector.extract_strided_slice %424 {offsets = [0, 0, 0], sizes = [4, 1, 768], strides = [1, 1, 1]} : vector<4x1x1408xf32> to vector<4x1x768xf32>
    %427 = tpu.concatenate %425, %426 in 2 : vector<4x1x640xf32>, vector<4x1x768xf32> -> vector<4x1x1408xf32>
    %c0_126 = arith.constant 0 : index
    %c44 = arith.constant 44 : index
    %428 = vector.load %arg3[%c0_126, %c44] : memref<8x68xf32, #tpu.memory_space<vmem>>, vector<8x1xf32>
    %429 = vector.extract_strided_slice %427 {offsets = [0, 0, 0], sizes = [1, 1, 1408], strides = [1, 1, 1]} : vector<4x1x1408xf32> to vector<1x1x1408xf32>
    %430 = vector.shape_cast %429 : vector<1x1x1408xf32> to vector<1x1408xf32>
    %431 = vector.broadcast %428 : vector<8x1xf32> to vector<8x1408xf32>
    %432 = vector.broadcast %430 : vector<1x1408xf32> to vector<8x1408xf32>
    %433 = arith.mulf %431, %432 : vector<8x1408xf32>
    %434 = arith.addf %417, %433 : vector<8x1408xf32>
    %c0_127 = arith.constant 0 : index
    %c45 = arith.constant 45 : index
    %435 = vector.load %arg3[%c0_127, %c45] : memref<8x68xf32, #tpu.memory_space<vmem>>, vector<8x1xf32>
    %436 = vector.extract_strided_slice %427 {offsets = [1, 0, 0], sizes = [1, 1, 1408], strides = [1, 1, 1]} : vector<4x1x1408xf32> to vector<1x1x1408xf32>
    %437 = vector.shape_cast %436 : vector<1x1x1408xf32> to vector<1x1408xf32>
    %438 = vector.broadcast %435 : vector<8x1xf32> to vector<8x1408xf32>
    %439 = vector.broadcast %437 : vector<1x1408xf32> to vector<8x1408xf32>
    %440 = arith.mulf %438, %439 : vector<8x1408xf32>
    %441 = arith.addf %434, %440 : vector<8x1408xf32>
    %c0_128 = arith.constant 0 : index
    %c46 = arith.constant 46 : index
    %442 = vector.load %arg3[%c0_128, %c46] : memref<8x68xf32, #tpu.memory_space<vmem>>, vector<8x1xf32>
    %443 = vector.extract_strided_slice %427 {offsets = [2, 0, 0], sizes = [1, 1, 1408], strides = [1, 1, 1]} : vector<4x1x1408xf32> to vector<1x1x1408xf32>
    %444 = vector.shape_cast %443 : vector<1x1x1408xf32> to vector<1x1408xf32>
    %445 = vector.broadcast %442 : vector<8x1xf32> to vector<8x1408xf32>
    %446 = vector.broadcast %444 : vector<1x1408xf32> to vector<8x1408xf32>
    %447 = arith.mulf %445, %446 : vector<8x1408xf32>
    %448 = arith.addf %441, %447 : vector<8x1408xf32>
    %c0_129 = arith.constant 0 : index
    %c47 = arith.constant 47 : index
    %449 = vector.load %arg3[%c0_129, %c47] : memref<8x68xf32, #tpu.memory_space<vmem>>, vector<8x1xf32>
    %450 = vector.extract_strided_slice %427 {offsets = [3, 0, 0], sizes = [1, 1, 1408], strides = [1, 1, 1]} : vector<4x1x1408xf32> to vector<1x1x1408xf32>
    %451 = vector.shape_cast %450 : vector<1x1x1408xf32> to vector<1x1408xf32>
    %452 = vector.broadcast %449 : vector<8x1xf32> to vector<8x1408xf32>
    %453 = vector.broadcast %451 : vector<1x1408xf32> to vector<8x1408xf32>
    %454 = arith.mulf %452, %453 : vector<8x1408xf32>
    %455 = arith.addf %448, %454 : vector<8x1408xf32>
    %c1_i32_130 = arith.constant 1 : i32
    %456 = arith.addi %arg1, %c1_i32_130 : i32
    %c0_i32_131 = arith.constant 0 : i32
    %457 = arith.addi %456, %c0_i32_131 : i32
    %c0_132 = arith.constant 0 : index
    %458 = arith.index_cast %457 : i32 to index
    %c0_133 = arith.constant 0 : index
    %459 = vector.load %arg6[%c0_132, %458, %c0_133] : memref<4x4x1408xf32, #tpu.memory_space<vmem>>, vector<4x1x1408xf32>
    %c1_i32_134 = arith.constant 1 : i32
    %460 = arith.addi %457, %c1_i32_134 : i32
    %c0_135 = arith.constant 0 : index
    %461 = arith.index_cast %460 : i32 to index
    %c0_136 = arith.constant 0 : index
    %462 = vector.load %arg6[%c0_135, %461, %c0_136] : memref<4x4x1408xf32, #tpu.memory_space<vmem>>, vector<4x1x1408xf32>
    %463 = vector.extract_strided_slice %459 {offsets = [0, 0, 888], sizes = [4, 1, 520], strides = [1, 1, 1]} : vector<4x1x1408xf32> to vector<4x1x520xf32>
    %464 = vector.extract_strided_slice %462 {offsets = [0, 0, 0], sizes = [4, 1, 888], strides = [1, 1, 1]} : vector<4x1x1408xf32> to vector<4x1x888xf32>
    %465 = tpu.concatenate %463, %464 in 2 : vector<4x1x520xf32>, vector<4x1x888xf32> -> vector<4x1x1408xf32>
    %c0_137 = arith.constant 0 : index
    %c48 = arith.constant 48 : index
    %466 = vector.load %arg3[%c0_137, %c48] : memref<8x68xf32, #tpu.memory_space<vmem>>, vector<8x1xf32>
    %467 = vector.extract_strided_slice %465 {offsets = [0, 0, 0], sizes = [1, 1, 1408], strides = [1, 1, 1]} : vector<4x1x1408xf32> to vector<1x1x1408xf32>
    %468 = vector.shape_cast %467 : vector<1x1x1408xf32> to vector<1x1408xf32>
    %469 = vector.broadcast %466 : vector<8x1xf32> to vector<8x1408xf32>
    %470 = vector.broadcast %468 : vector<1x1408xf32> to vector<8x1408xf32>
    %471 = arith.mulf %469, %470 : vector<8x1408xf32>
    %472 = arith.addf %455, %471 : vector<8x1408xf32>
    %c0_138 = arith.constant 0 : index
    %c49 = arith.constant 49 : index
    %473 = vector.load %arg3[%c0_138, %c49] : memref<8x68xf32, #tpu.memory_space<vmem>>, vector<8x1xf32>
    %474 = vector.extract_strided_slice %465 {offsets = [1, 0, 0], sizes = [1, 1, 1408], strides = [1, 1, 1]} : vector<4x1x1408xf32> to vector<1x1x1408xf32>
    %475 = vector.shape_cast %474 : vector<1x1x1408xf32> to vector<1x1408xf32>
    %476 = vector.broadcast %473 : vector<8x1xf32> to vector<8x1408xf32>
    %477 = vector.broadcast %475 : vector<1x1408xf32> to vector<8x1408xf32>
    %478 = arith.mulf %476, %477 : vector<8x1408xf32>
    %479 = arith.addf %472, %478 : vector<8x1408xf32>
    %c0_139 = arith.constant 0 : index
    %c50 = arith.constant 50 : index
    %480 = vector.load %arg3[%c0_139, %c50] : memref<8x68xf32, #tpu.memory_space<vmem>>, vector<8x1xf32>
    %481 = vector.extract_strided_slice %465 {offsets = [2, 0, 0], sizes = [1, 1, 1408], strides = [1, 1, 1]} : vector<4x1x1408xf32> to vector<1x1x1408xf32>
    %482 = vector.shape_cast %481 : vector<1x1x1408xf32> to vector<1x1408xf32>
    %483 = vector.broadcast %480 : vector<8x1xf32> to vector<8x1408xf32>
    %484 = vector.broadcast %482 : vector<1x1408xf32> to vector<8x1408xf32>
    %485 = arith.mulf %483, %484 : vector<8x1408xf32>
    %486 = arith.addf %479, %485 : vector<8x1408xf32>
    %c0_140 = arith.constant 0 : index
    %c51 = arith.constant 51 : index
    %487 = vector.load %arg3[%c0_140, %c51] : memref<8x68xf32, #tpu.memory_space<vmem>>, vector<8x1xf32>
    %488 = vector.extract_strided_slice %465 {offsets = [3, 0, 0], sizes = [1, 1, 1408], strides = [1, 1, 1]} : vector<4x1x1408xf32> to vector<1x1x1408xf32>
    %489 = vector.shape_cast %488 : vector<1x1x1408xf32> to vector<1x1408xf32>
    %490 = vector.broadcast %487 : vector<8x1xf32> to vector<8x1408xf32>
    %491 = vector.broadcast %489 : vector<1x1408xf32> to vector<8x1408xf32>
    %492 = arith.mulf %490, %491 : vector<8x1408xf32>
    %493 = arith.addf %486, %492 : vector<8x1408xf32>
    %c1_i32_141 = arith.constant 1 : i32
    %494 = arith.addi %arg1, %c1_i32_141 : i32
    %c0_i32_142 = arith.constant 0 : i32
    %495 = arith.addi %494, %c0_i32_142 : i32
    %c0_143 = arith.constant 0 : index
    %496 = arith.index_cast %495 : i32 to index
    %c0_144 = arith.constant 0 : index
    %497 = vector.load %arg6[%c0_143, %496, %c0_144] : memref<4x4x1408xf32, #tpu.memory_space<vmem>>, vector<4x1x1408xf32>
    %c1_i32_145 = arith.constant 1 : i32
    %498 = arith.addi %495, %c1_i32_145 : i32
    %c0_146 = arith.constant 0 : index
    %499 = arith.index_cast %498 : i32 to index
    %c0_147 = arith.constant 0 : index
    %500 = vector.load %arg6[%c0_146, %499, %c0_147] : memref<4x4x1408xf32, #tpu.memory_space<vmem>>, vector<4x1x1408xf32>
    %501 = vector.extract_strided_slice %497 {offsets = [0, 0, 992], sizes = [4, 1, 416], strides = [1, 1, 1]} : vector<4x1x1408xf32> to vector<4x1x416xf32>
    %502 = vector.extract_strided_slice %500 {offsets = [0, 0, 0], sizes = [4, 1, 992], strides = [1, 1, 1]} : vector<4x1x1408xf32> to vector<4x1x992xf32>
    %503 = tpu.concatenate %501, %502 in 2 : vector<4x1x416xf32>, vector<4x1x992xf32> -> vector<4x1x1408xf32>
    %c0_148 = arith.constant 0 : index
    %c52 = arith.constant 52 : index
    %504 = vector.load %arg3[%c0_148, %c52] : memref<8x68xf32, #tpu.memory_space<vmem>>, vector<8x1xf32>
    %505 = vector.extract_strided_slice %503 {offsets = [0, 0, 0], sizes = [1, 1, 1408], strides = [1, 1, 1]} : vector<4x1x1408xf32> to vector<1x1x1408xf32>
    %506 = vector.shape_cast %505 : vector<1x1x1408xf32> to vector<1x1408xf32>
    %507 = vector.broadcast %504 : vector<8x1xf32> to vector<8x1408xf32>
    %508 = vector.broadcast %506 : vector<1x1408xf32> to vector<8x1408xf32>
    %509 = arith.mulf %507, %508 : vector<8x1408xf32>
    %510 = arith.addf %493, %509 : vector<8x1408xf32>
    %c0_149 = arith.constant 0 : index
    %c53 = arith.constant 53 : index
    %511 = vector.load %arg3[%c0_149, %c53] : memref<8x68xf32, #tpu.memory_space<vmem>>, vector<8x1xf32>
    %512 = vector.extract_strided_slice %503 {offsets = [1, 0, 0], sizes = [1, 1, 1408], strides = [1, 1, 1]} : vector<4x1x1408xf32> to vector<1x1x1408xf32>
    %513 = vector.shape_cast %512 : vector<1x1x1408xf32> to vector<1x1408xf32>
    %514 = vector.broadcast %511 : vector<8x1xf32> to vector<8x1408xf32>
    %515 = vector.broadcast %513 : vector<1x1408xf32> to vector<8x1408xf32>
    %516 = arith.mulf %514, %515 : vector<8x1408xf32>
    %517 = arith.addf %510, %516 : vector<8x1408xf32>
    %c0_150 = arith.constant 0 : index
    %c54 = arith.constant 54 : index
    %518 = vector.load %arg3[%c0_150, %c54] : memref<8x68xf32, #tpu.memory_space<vmem>>, vector<8x1xf32>
    %519 = vector.extract_strided_slice %503 {offsets = [2, 0, 0], sizes = [1, 1, 1408], strides = [1, 1, 1]} : vector<4x1x1408xf32> to vector<1x1x1408xf32>
    %520 = vector.shape_cast %519 : vector<1x1x1408xf32> to vector<1x1408xf32>
    %521 = vector.broadcast %518 : vector<8x1xf32> to vector<8x1408xf32>
    %522 = vector.broadcast %520 : vector<1x1408xf32> to vector<8x1408xf32>
    %523 = arith.mulf %521, %522 : vector<8x1408xf32>
    %524 = arith.addf %517, %523 : vector<8x1408xf32>
    %c0_151 = arith.constant 0 : index
    %c55 = arith.constant 55 : index
    %525 = vector.load %arg3[%c0_151, %c55] : memref<8x68xf32, #tpu.memory_space<vmem>>, vector<8x1xf32>
    %526 = vector.extract_strided_slice %503 {offsets = [3, 0, 0], sizes = [1, 1, 1408], strides = [1, 1, 1]} : vector<4x1x1408xf32> to vector<1x1x1408xf32>
    %527 = vector.shape_cast %526 : vector<1x1x1408xf32> to vector<1x1408xf32>
    %528 = vector.broadcast %525 : vector<8x1xf32> to vector<8x1408xf32>
    %529 = vector.broadcast %527 : vector<1x1408xf32> to vector<8x1408xf32>
    %530 = arith.mulf %528, %529 : vector<8x1408xf32>
    %531 = arith.addf %524, %530 : vector<8x1408xf32>
    %c1_i32_152 = arith.constant 1 : i32
    %532 = arith.addi %arg1, %c1_i32_152 : i32
    %c0_i32_153 = arith.constant 0 : i32
    %533 = arith.addi %532, %c0_i32_153 : i32
    %c0_154 = arith.constant 0 : index
    %534 = arith.index_cast %533 : i32 to index
    %c0_155 = arith.constant 0 : index
    %535 = vector.load %arg6[%c0_154, %534, %c0_155] : memref<4x4x1408xf32, #tpu.memory_space<vmem>>, vector<4x1x1408xf32>
    %c1_i32_156 = arith.constant 1 : i32
    %536 = arith.addi %533, %c1_i32_156 : i32
    %c0_157 = arith.constant 0 : index
    %537 = arith.index_cast %536 : i32 to index
    %c0_158 = arith.constant 0 : index
    %538 = vector.load %arg6[%c0_157, %537, %c0_158] : memref<4x4x1408xf32, #tpu.memory_space<vmem>>, vector<4x1x1408xf32>
    %539 = vector.extract_strided_slice %535 {offsets = [0, 0, 1080], sizes = [4, 1, 328], strides = [1, 1, 1]} : vector<4x1x1408xf32> to vector<4x1x328xf32>
    %540 = vector.extract_strided_slice %538 {offsets = [0, 0, 0], sizes = [4, 1, 1080], strides = [1, 1, 1]} : vector<4x1x1408xf32> to vector<4x1x1080xf32>
    %541 = tpu.concatenate %539, %540 in 2 : vector<4x1x328xf32>, vector<4x1x1080xf32> -> vector<4x1x1408xf32>
    %c0_159 = arith.constant 0 : index
    %c56 = arith.constant 56 : index
    %542 = vector.load %arg3[%c0_159, %c56] : memref<8x68xf32, #tpu.memory_space<vmem>>, vector<8x1xf32>
    %543 = vector.extract_strided_slice %541 {offsets = [0, 0, 0], sizes = [1, 1, 1408], strides = [1, 1, 1]} : vector<4x1x1408xf32> to vector<1x1x1408xf32>
    %544 = vector.shape_cast %543 : vector<1x1x1408xf32> to vector<1x1408xf32>
    %545 = vector.broadcast %542 : vector<8x1xf32> to vector<8x1408xf32>
    %546 = vector.broadcast %544 : vector<1x1408xf32> to vector<8x1408xf32>
    %547 = arith.mulf %545, %546 : vector<8x1408xf32>
    %548 = arith.addf %531, %547 : vector<8x1408xf32>
    %c0_160 = arith.constant 0 : index
    %c57 = arith.constant 57 : index
    %549 = vector.load %arg3[%c0_160, %c57] : memref<8x68xf32, #tpu.memory_space<vmem>>, vector<8x1xf32>
    %550 = vector.extract_strided_slice %541 {offsets = [1, 0, 0], sizes = [1, 1, 1408], strides = [1, 1, 1]} : vector<4x1x1408xf32> to vector<1x1x1408xf32>
    %551 = vector.shape_cast %550 : vector<1x1x1408xf32> to vector<1x1408xf32>
    %552 = vector.broadcast %549 : vector<8x1xf32> to vector<8x1408xf32>
    %553 = vector.broadcast %551 : vector<1x1408xf32> to vector<8x1408xf32>
    %554 = arith.mulf %552, %553 : vector<8x1408xf32>
    %555 = arith.addf %548, %554 : vector<8x1408xf32>
    %c0_161 = arith.constant 0 : index
    %c58 = arith.constant 58 : index
    %556 = vector.load %arg3[%c0_161, %c58] : memref<8x68xf32, #tpu.memory_space<vmem>>, vector<8x1xf32>
    %557 = vector.extract_strided_slice %541 {offsets = [2, 0, 0], sizes = [1, 1, 1408], strides = [1, 1, 1]} : vector<4x1x1408xf32> to vector<1x1x1408xf32>
    %558 = vector.shape_cast %557 : vector<1x1x1408xf32> to vector<1x1408xf32>
    %559 = vector.broadcast %556 : vector<8x1xf32> to vector<8x1408xf32>
    %560 = vector.broadcast %558 : vector<1x1408xf32> to vector<8x1408xf32>
    %561 = arith.mulf %559, %560 : vector<8x1408xf32>
    %562 = arith.addf %555, %561 : vector<8x1408xf32>
    %c0_162 = arith.constant 0 : index
    %c59 = arith.constant 59 : index
    %563 = vector.load %arg3[%c0_162, %c59] : memref<8x68xf32, #tpu.memory_space<vmem>>, vector<8x1xf32>
    %564 = vector.extract_strided_slice %541 {offsets = [3, 0, 0], sizes = [1, 1, 1408], strides = [1, 1, 1]} : vector<4x1x1408xf32> to vector<1x1x1408xf32>
    %565 = vector.shape_cast %564 : vector<1x1x1408xf32> to vector<1x1408xf32>
    %566 = vector.broadcast %563 : vector<8x1xf32> to vector<8x1408xf32>
    %567 = vector.broadcast %565 : vector<1x1408xf32> to vector<8x1408xf32>
    %568 = arith.mulf %566, %567 : vector<8x1408xf32>
    %569 = arith.addf %562, %568 : vector<8x1408xf32>
    %c1_i32_163 = arith.constant 1 : i32
    %570 = arith.addi %arg1, %c1_i32_163 : i32
    %c0_i32_164 = arith.constant 0 : i32
    %571 = arith.addi %570, %c0_i32_164 : i32
    %c0_165 = arith.constant 0 : index
    %572 = arith.index_cast %571 : i32 to index
    %c0_166 = arith.constant 0 : index
    %573 = vector.load %arg6[%c0_165, %572, %c0_166] : memref<4x4x1408xf32, #tpu.memory_space<vmem>>, vector<4x1x1408xf32>
    %c1_i32_167 = arith.constant 1 : i32
    %574 = arith.addi %571, %c1_i32_167 : i32
    %c0_168 = arith.constant 0 : index
    %575 = arith.index_cast %574 : i32 to index
    %c0_169 = arith.constant 0 : index
    %576 = vector.load %arg6[%c0_168, %575, %c0_169] : memref<4x4x1408xf32, #tpu.memory_space<vmem>>, vector<4x1x1408xf32>
    %577 = vector.extract_strided_slice %573 {offsets = [0, 0, 1152], sizes = [4, 1, 256], strides = [1, 1, 1]} : vector<4x1x1408xf32> to vector<4x1x256xf32>
    %578 = vector.extract_strided_slice %576 {offsets = [0, 0, 0], sizes = [4, 1, 1152], strides = [1, 1, 1]} : vector<4x1x1408xf32> to vector<4x1x1152xf32>
    %579 = tpu.concatenate %577, %578 in 2 : vector<4x1x256xf32>, vector<4x1x1152xf32> -> vector<4x1x1408xf32>
    %c0_170 = arith.constant 0 : index
    %c60 = arith.constant 60 : index
    %580 = vector.load %arg3[%c0_170, %c60] : memref<8x68xf32, #tpu.memory_space<vmem>>, vector<8x1xf32>
    %581 = vector.extract_strided_slice %579 {offsets = [0, 0, 0], sizes = [1, 1, 1408], strides = [1, 1, 1]} : vector<4x1x1408xf32> to vector<1x1x1408xf32>
    %582 = vector.shape_cast %581 : vector<1x1x1408xf32> to vector<1x1408xf32>
    %583 = vector.broadcast %580 : vector<8x1xf32> to vector<8x1408xf32>
    %584 = vector.broadcast %582 : vector<1x1408xf32> to vector<8x1408xf32>
    %585 = arith.mulf %583, %584 : vector<8x1408xf32>
    %586 = arith.addf %569, %585 : vector<8x1408xf32>
    %c0_171 = arith.constant 0 : index
    %c61 = arith.constant 61 : index
    %587 = vector.load %arg3[%c0_171, %c61] : memref<8x68xf32, #tpu.memory_space<vmem>>, vector<8x1xf32>
    %588 = vector.extract_strided_slice %579 {offsets = [1, 0, 0], sizes = [1, 1, 1408], strides = [1, 1, 1]} : vector<4x1x1408xf32> to vector<1x1x1408xf32>
    %589 = vector.shape_cast %588 : vector<1x1x1408xf32> to vector<1x1408xf32>
    %590 = vector.broadcast %587 : vector<8x1xf32> to vector<8x1408xf32>
    %591 = vector.broadcast %589 : vector<1x1408xf32> to vector<8x1408xf32>
    %592 = arith.mulf %590, %591 : vector<8x1408xf32>
    %593 = arith.addf %586, %592 : vector<8x1408xf32>
    %c0_172 = arith.constant 0 : index
    %c62 = arith.constant 62 : index
    %594 = vector.load %arg3[%c0_172, %c62] : memref<8x68xf32, #tpu.memory_space<vmem>>, vector<8x1xf32>
    %595 = vector.extract_strided_slice %579 {offsets = [2, 0, 0], sizes = [1, 1, 1408], strides = [1, 1, 1]} : vector<4x1x1408xf32> to vector<1x1x1408xf32>
    %596 = vector.shape_cast %595 : vector<1x1x1408xf32> to vector<1x1408xf32>
    %597 = vector.broadcast %594 : vector<8x1xf32> to vector<8x1408xf32>
    %598 = vector.broadcast %596 : vector<1x1408xf32> to vector<8x1408xf32>
    %599 = arith.mulf %597, %598 : vector<8x1408xf32>
    %600 = arith.addf %593, %599 : vector<8x1408xf32>
    %c0_173 = arith.constant 0 : index
    %c63 = arith.constant 63 : index
    %601 = vector.load %arg3[%c0_173, %c63] : memref<8x68xf32, #tpu.memory_space<vmem>>, vector<8x1xf32>
    %602 = vector.extract_strided_slice %579 {offsets = [3, 0, 0], sizes = [1, 1, 1408], strides = [1, 1, 1]} : vector<4x1x1408xf32> to vector<1x1x1408xf32>
    %603 = vector.shape_cast %602 : vector<1x1x1408xf32> to vector<1x1408xf32>
    %604 = vector.broadcast %601 : vector<8x1xf32> to vector<8x1408xf32>
    %605 = vector.broadcast %603 : vector<1x1408xf32> to vector<8x1408xf32>
    %606 = arith.mulf %604, %605 : vector<8x1408xf32>
    %607 = arith.addf %600, %606 : vector<8x1408xf32>
    %c1_i32_174 = arith.constant 1 : i32
    %608 = arith.addi %arg1, %c1_i32_174 : i32
    %c0_i32_175 = arith.constant 0 : i32
    %609 = arith.addi %608, %c0_i32_175 : i32
    %c0_176 = arith.constant 0 : index
    %610 = arith.index_cast %609 : i32 to index
    %c0_177 = arith.constant 0 : index
    %611 = vector.load %arg6[%c0_176, %610, %c0_177] : memref<4x4x1408xf32, #tpu.memory_space<vmem>>, vector<4x1x1408xf32>
    %c1_i32_178 = arith.constant 1 : i32
    %612 = arith.addi %609, %c1_i32_178 : i32
    %c0_179 = arith.constant 0 : index
    %613 = arith.index_cast %612 : i32 to index
    %c0_180 = arith.constant 0 : index
    %614 = vector.load %arg6[%c0_179, %613, %c0_180] : memref<4x4x1408xf32, #tpu.memory_space<vmem>>, vector<4x1x1408xf32>
    %615 = vector.extract_strided_slice %611 {offsets = [0, 0, 1216], sizes = [4, 1, 192], strides = [1, 1, 1]} : vector<4x1x1408xf32> to vector<4x1x192xf32>
    %616 = vector.extract_strided_slice %614 {offsets = [0, 0, 0], sizes = [4, 1, 1216], strides = [1, 1, 1]} : vector<4x1x1408xf32> to vector<4x1x1216xf32>
    %617 = tpu.concatenate %615, %616 in 2 : vector<4x1x192xf32>, vector<4x1x1216xf32> -> vector<4x1x1408xf32>
    %c0_181 = arith.constant 0 : index
    %c64 = arith.constant 64 : index
    %618 = vector.load %arg3[%c0_181, %c64] : memref<8x68xf32, #tpu.memory_space<vmem>>, vector<8x1xf32>
    %619 = vector.extract_strided_slice %617 {offsets = [0, 0, 0], sizes = [1, 1, 1408], strides = [1, 1, 1]} : vector<4x1x1408xf32> to vector<1x1x1408xf32>
    %620 = vector.shape_cast %619 : vector<1x1x1408xf32> to vector<1x1408xf32>
    %621 = vector.broadcast %618 : vector<8x1xf32> to vector<8x1408xf32>
    %622 = vector.broadcast %620 : vector<1x1408xf32> to vector<8x1408xf32>
    %623 = arith.mulf %621, %622 : vector<8x1408xf32>
    %624 = arith.addf %607, %623 : vector<8x1408xf32>
    %c0_182 = arith.constant 0 : index
    %c65 = arith.constant 65 : index
    %625 = vector.load %arg3[%c0_182, %c65] : memref<8x68xf32, #tpu.memory_space<vmem>>, vector<8x1xf32>
    %626 = vector.extract_strided_slice %617 {offsets = [1, 0, 0], sizes = [1, 1, 1408], strides = [1, 1, 1]} : vector<4x1x1408xf32> to vector<1x1x1408xf32>
    %627 = vector.shape_cast %626 : vector<1x1x1408xf32> to vector<1x1408xf32>
    %628 = vector.broadcast %625 : vector<8x1xf32> to vector<8x1408xf32>
    %629 = vector.broadcast %627 : vector<1x1408xf32> to vector<8x1408xf32>
    %630 = arith.mulf %628, %629 : vector<8x1408xf32>
    %631 = arith.addf %624, %630 : vector<8x1408xf32>
    %c0_183 = arith.constant 0 : index
    %c66 = arith.constant 66 : index
    %632 = vector.load %arg3[%c0_183, %c66] : memref<8x68xf32, #tpu.memory_space<vmem>>, vector<8x1xf32>
    %633 = vector.extract_strided_slice %617 {offsets = [2, 0, 0], sizes = [1, 1, 1408], strides = [1, 1, 1]} : vector<4x1x1408xf32> to vector<1x1x1408xf32>
    %634 = vector.shape_cast %633 : vector<1x1x1408xf32> to vector<1x1408xf32>
    %635 = vector.broadcast %632 : vector<8x1xf32> to vector<8x1408xf32>
    %636 = vector.broadcast %634 : vector<1x1408xf32> to vector<8x1408xf32>
    %637 = arith.mulf %635, %636 : vector<8x1408xf32>
    %638 = arith.addf %631, %637 : vector<8x1408xf32>
    %c0_184 = arith.constant 0 : index
    %c67 = arith.constant 67 : index
    %639 = vector.load %arg3[%c0_184, %c67] : memref<8x68xf32, #tpu.memory_space<vmem>>, vector<8x1xf32>
    %640 = vector.extract_strided_slice %617 {offsets = [3, 0, 0], sizes = [1, 1, 1408], strides = [1, 1, 1]} : vector<4x1x1408xf32> to vector<1x1x1408xf32>
    %641 = vector.shape_cast %640 : vector<1x1x1408xf32> to vector<1x1408xf32>
    %642 = vector.broadcast %639 : vector<8x1xf32> to vector<8x1408xf32>
    %643 = vector.broadcast %641 : vector<1x1408xf32> to vector<8x1408xf32>
    %644 = arith.mulf %642, %643 : vector<8x1408xf32>
    %645 = arith.addf %638, %644 : vector<8x1408xf32>
    %cst = arith.constant 0.000000e+00 : f32
    %646 = vector.broadcast %cst : f32 to vector<8x1408xf32>
    %647 = arith.maximumf %645, %646 : vector<8x1408xf32>
    %c0_185 = arith.constant 0 : index
    %c0_186 = arith.constant 0 : index
    %c0_187 = arith.constant 0 : index
    %648 = vector.load %arg5[%c0_185, %c0_186, %c0_187] : memref<1x8x1408xf32, #tpu.memory_space<vmem>>, vector<1x8x1408xf32>
    %649 = vector.shape_cast %648 : vector<1x8x1408xf32> to vector<8x1408xf32>
    %650 = vector.shape_cast %647 : vector<8x1408xf32> to vector<1x8x1408xf32>
    tpu.vector_store %arg5[%c0_185, %c0_186, %c0_187], %650 {strides = array<i32>} : memref<1x8x1408xf32, #tpu.memory_space<vmem>>, vector<1x8x1408xf32>,
    return
  }
  func.func @transform_0(%arg0: i32, %arg1: i32) -> (i32, i32, i32, i32) {
    %c0_i32 = arith.constant 0 : i32
    %c0_i32_0 = arith.constant 0 : i32
    %c0_i32_1 = arith.constant 0 : i32
    %c0_i32_2 = arith.constant 0 : i32
    return %arg0, %c0_i32, %c0_i32_0, %c0_i32_1 : i32, i32, i32, i32
  }
  func.func @transform_1(%arg0: i32, %arg1: i32) -> (i32, i32) {
    %c0_i32 = arith.constant 0 : i32
    %c0_i32_0 = arith.constant 0 : i32
    %c0_i32_1 = arith.constant 0 : i32
    return %c0_i32, %c0_i32_0 : i32, i32
  }
  func.func @transform_2(%arg0: i32, %arg1: i32) -> (i32, i32) {
    %c0_i32 = arith.constant 0 : i32
    %c0_i32_0 = arith.constant 0 : i32
    %c0_i32_1 = arith.constant 0 : i32
    return %c0_i32, %c0_i32_0 : i32, i32
  }
  func.func @transform_3(%arg0: i32, %arg1: i32) -> (i32, i32, i32) {
    %c0_i32 = arith.constant 0 : i32
    %c0_i32_0 = arith.constant 0 : i32
    return %arg0, %c0_i32, %arg1 : i32, i32, i32
  }
}

</mosaic_0001>

<bundles_post_ra>
// kernel: tpu_custom_call.1
= control target key start
LH: loop header
LB: loop body
LE: loop exit
PB: predicated region body
PF: predicated region fallthrough
CT: control target
= control target key end

     0   :  { %8 = vsyncpa [#allocation4], 0  ;;  %s15415_s0 = inlined_call_operand.hbm [shape: f32[2,4,2,1408], index: 0, kind: input, shape index: {}]   ;;  %s15416_s1 = inlined_call_operand.vmem [shape: f32[8,68], index: 1, kind: input, shape index: {}]   ;;  %s15417_s2 = inlined_call_operand.vmem [shape: f32[8,1], index: 2, kind: input, shape index: {}]   ;;  %s15418_s3 = inlined_call_operand.hbm [shape: f32[2,8,2816], index: 3, kind: output, shape index: {}]  }
   0x1   :  { %10 = vsyncpa [#allocation4 + $0x1], 0 }
   0x2   :  { %11 = vsyncpa [#allocation5], 0 }
   0x3   :  { %13 = vsyncpa [#allocation5 + $0x1], 0  ;;  %s7416_s12 = smov 0   ;;  %s7418_s13 = smov 0  }
   0x4   :  { %s7420_s14 = smov 0   ;;  %s7422_s15 = smov 0  }
   0x5   :  { %s7424_s16 = smov 0   ;;  %s7426_s17 = smov 0  }
   0x6   :  { %s7428_s18 = smov 0   ;;  %s7430_s19 = smov 0  }
   0x7   :  { %s7432_s20 = smov 0   ;;  %s7434_s21 = smov 0  }
   0x8   :  { %s7436_s22 = smov 0  }
   0x9 LB: > { %s6832_s23 = sadd.s32 4294967295, %s7313_s22   ;;  %s6833_s24 = sadd.s32 4294967294, %s7313_s22   ;;  %s7313_s22 = sphi %s7436_s22, %s19_s22   ;;  %s7309_s21 = sphi %s7434_s21, %s18227_s21   ;;  %s7305_s20 = sphi %s7432_s20, %s18226_s20   ;;  %s7301_s19 = sphi %s7430_s19, %s18225_s19   ;;  %s7297_s18 = sphi %s7428_s18, %s18224_s18   ;;  %s7293_s17 = sphi %s7426_s17, %s18223_s17   ;;  %s7289_s16 = sphi %s7424_s16, %s18222_s16   ;;  %s7285_s15 = sphi %s7422_s15, %s18221_s15   ;;  %s7281_s14 = sphi %s7420_s14, %s18220_s14   ;;  %s7277_s13 = sphi %s7418_s13, %s18219_s13   ;;  %s7273_s12 = sphi %s7416_s12, %s18218_s12  }
   0xa   : > { %s28_s25 = sadd.s32 1, %s7305_s20  ;;  %s31_s26 = sadd.s32 1, %s7309_s21 }
   0xb   : > { %p29_p0 = scmp.ge.s32.totalorder %s28_s25, 2  ;;  %s38_s27 = sadd.s32 1, %s7293_s17 }
   0xc   : > { %p45_p1 = scmp.ne.s32.totalorder %s7293_s17, %s7289_s16  ;;  %p46_p2 = scmp.eq.s32.totalorder %s7313_s22, 0 }
   0xd   : > { %s18229_s25 = smov (%p29_p0, %s28_s25), 0  ;;  %s18231_s26 = smov (!%p29_p0, %s31_s26), %s7309_s21 }
   0xe   : > { %16210 = sst [smem:[#allocation9_spill]] %s18229_s25  ;;  %p7480_p3 = por %p46_p2, %p45_p1 }
   0xf   : > { %p51_p4 = scmp.ne.s32.totalorder %s7289_s16, %s7285_s15  ;;  %p33_p5 = scmp.ge.s32.totalorder %s18231_s26, 2 }
  0x10   : > { %p52_p6 = scmp.eq.s32.totalorder %s6832_s23, 0  ;;  %s104_s29 = ssub.s32 %s7305_s20, %s18229_s25 }
  0x11   : > { %s108_s30 = sadd.s32 1, %s7281_s14  ;;  %s18233_s26 = smov (%p33_p5, %s18231_s26), 0 }
  0x12   : > { %16212 = sst [smem:[#allocation10_spill]] %s18233_s26  ;;  %p7490_p7 = por %p52_p6, %p51_p4 }
  0x13   : > { %p118_p8 = scmp.ne.s32.totalorder %s7281_s14, %s7277_s13  ;;  %s35_s5 = ssub.s32 %s7309_s21, %s18233_s26 }
  0x14   : > { %p119_p9 = scmp.eq.s32.totalorder %s6832_s23, 3  ;;  %p36_p10 = scmp.eq.s32.totalorder %s35_s5, 0 }
  0x15   : > { %s105_s6 = sor.u32 %s104_s29, %s35_s5  ;;  %p124_p13 = scmp.ne.s32.totalorder %s7277_s13, %s7273_s12 }
  0x16   : > { %p106_p11 = scmp.eq.s32.totalorder %s105_s6, 0  ;;  %p7498_p12 = por %p119_p9, %p118_p8 }
  0x17   : > { %s7503_s8 = scalar_select %p36_p10, %s7293_s17, %s38_s27  }
  0x18   : > { %s16214_s7 = scalar_select %p7498_p12, 1, 0 }
  0x19   : > { %s7506_s9 = scalar_select %p106_p11, %s7281_s14, %s108_s30  }
  0x1a   : > { %p125_p0 = scmp.eq.s32.totalorder %s6833_s24, 3  ;;  %p6895_p1 = scmp.lt.s32.totalorder %s7313_s22, 4 }
  0x1b   : > { %s151_s11 = sand.u32 1, %s7293_s17   ;;  %s6879_s23 = smul.u32 1408, %s7309_s21 }
  0x1c   : > { %p7511_p2 = por %p125_p0, %p124_p13  ;;  %s6878_s15 = smul.u32 88, %s151_s11 }
  0x1d   : > { %p7519_p4 = pnand %p6895_p1, %p7480_p3  ;;  %s7526_s30 = scalar_lea.hbm %s15415_s0, %s6879_s23 }
  0x1e   : > { %s16215_s10 = scalar_select %p7511_p2, 1, 0 }
  0x1f   : > { %s155_s24 = scalar_lea.vmem [#allocation3], %s6878_s15  ;;  %s7531_s28 = scalar_lea.sflag [#allocation4], %s151_s11 }
  0x20   : > { %s162_s6 = sshll.u32 %s155_s24, 4  ;;  %s7161_s26 = scalar_lea.hbm %s7526_s30, 1408  ;;  %s7528_s6 = int_to_ptr.vmem [resolvable:$true] %s162_s6 }
  0x21   : > { %p7162_p3 = scmp.ne.s32.totalorder %s7526_s30, %s7161_s26  ;;  %p7163_p6 = pneg %p7519_p4 }
  0x22   : > { %s7166_s27 = scalar_lea.hbm %s15415_s0, 2816  ;;  %p7167_p10 = scmp.lt.u32.totalorder %s7526_s30, %s15415_s0 }
  0x23   : > { %p7164_p8 = pnand %p7163_p6, %p7162_p3  ;;  %p7168_p11 = scmp.lt.u32.totalorder %s7166_s27, %s7161_s26 }
  0x24   : > { %p7170_p0 = scmp.lt.u32.totalorder %s7161_s26, %s7526_s30 }
  0x25   : > { %p7165_p9 = pneg %p7164_p8  ;;  %p7169_p13 = por %p7168_p11, %p7167_p10 }
  0x27   : > { %p7171_p1 = por %p7170_p0, %p7169_p13 }
  0x29   : > { %p7172_p5 = pnand %p7171_p1, %p7165_p9 }
  0x2b   : > { %7175 = shalt.err (!%p7172_p5)
}
  0x2c   : > { %s7176_s11 = scalar_lea.vmem %s7528_s6, 1408  ;;  %s7315_s24 = smov [#allocation3]  }
  0x2d   : > { %p7177_p3 = scmp.ne.s32.totalorder %s7528_s6, %s7176_s11  ;;  %s7181_s23 = sshll.u32 %s7315_s24, 4  ;;  %s7182_s23 = int_to_ptr.vmem [resolvable:$false] %s7181_s23 }
  0x2e   : > { %s7183_s25 = scalar_lea.vmem %s7182_s23, 2816  ;;  %p7184_p12 = scmp.lt.s32.totalorder %s7528_s6, %s7182_s23 }
  0x2f   : > { %p7179_p8 = pnand %p7177_p3, %p7163_p6  ;;  %p7185_p10 = scmp.lt.s32.totalorder %s7183_s25, %s7176_s11 }
  0x31   : > { %p7180_p2 = pneg %p7179_p8  ;;  %p7186_p11 = por %p7185_p10, %p7184_p12 }
  0x33   : > { %p7187_p13 = pnand %p7186_p11, %p7180_p2 }
  0x35   : > { %7190 = shalt.err (!%p7187_p13)
}
  0x36   : > { %s7316_s26 = smov 352   ;;  %s7317_s5 = smov 22  }
  0x37   : > { %6890 = dma.hbm_to_vmem [thread:$0]  (!%p7519_p4), %s7526_s30, 1408, %s7528_s6, %s7531_s28, %s7316_s26, %s7316_s26, %s7317_s5  }
  0x38   : > { %p170_p5 = scmp.lt.s32.totalorder %s7313_s22, 5  ;;  %p16217_p6 = scmp.ge.s32.totalorder %s7313_s22, 1 }
  0x3a   : > { %p171_p9 = pnand %p16217_p6, %p170_p5 }
  0x3c   : > { %174 = sbr.rel (%p171_p9) target bundleno = 1361 (0x551), region = 32 }
  0x43   : > { %s176_s27 = sand.u32 1, %s7289_s16  }
  0x44   : > { %s6880_s15 = smul.u32 88, %s176_s27  ;;  %s177_s11 = scalar_lea.sflag [#allocation4], %s176_s27 }
  0x46   : > { %s7563_s24 = scalar_lea.vmem [#allocation3], %s6880_s15 }
  0x47   : > { %7264 = dma.done.wait (%p7490_p7), %s177_s11, 1408  }
  0x48   : > { %7266 = vsyncadd (%p7490_p7), %s177_s11, 4294965888  ;;  %s200_s29 = sand.u32 1, %s7277_s13   ;;  %p6838_p12 = scmp.ne.s32.totalorder %s7297_s18, 0 }
  0x49   : > { %s6881_s30 = smul.u32 88, %s200_s29  ;;  %v209_v0 = vlaneseq (!%p6838_p12)  ;;  %v243_v1 = vld [vmem:[%s7563_s24] sm:$0xff] (!%p6838_p12)  ;;  %v244_v2 = vld [vmem:[%s7563_s24 + $0x8] sm:$0xff] (!%p6838_p12)  ;;  %v246_v3 = vld [vmem:[%s7563_s24 + $0x16] sm:$0xff] (!%p6838_p12)  ;;  %v7318_v4 = vmov (!%p6838_p12), 0.0  }
  0x4a   : > { %207 = sbr.rel (%p6838_p12) target bundleno = 100 (0x64), region = 40  ;;  %208 = vst [vmem:[#allocation2] ss:$4 sm:$0xff] (!%p6838_p12), %v7318_v4  ;;  %216 = vst [vmem:[#allocation2 + $0x2c] ss:$4 sm:$0xff] (!%p6838_p12), %v7318_v4  ;;  %v7580_v8 = vld [vmem:[%s7563_s24 + $0x1e] sm:$0xff] (!%p6838_p12)  ;;  %v267_v15 = vcombine.high (!%p6838_p12), %v243_v1, %v243_v1  ;;  %v282_v16 = vcombine.high (!%p6838_p12), %v244_v2, %v244_v2  ;;  %v312_v21 = vcombine.high (!%p6838_p12), %v246_v3, %v246_v3 }
  0x4b   : > { %s7572_s6 = scalar_lea.vmem [#allocation6], %s6881_s30  ;;  %220 = vst [vmem:[#allocation2 + $0x58] ss:$4 sm:$0xff] (!%p6838_p12), %v7318_v4  ;;  %224 = vst [vmem:[#allocation2 + $0x84] ss:$4 sm:$0xff] (!%p6838_p12), %v7318_v4  ;;  %vm211_vm0 = vcmp.lt.s32.totalorder (!%p6838_p12), %v209_v0, 384  ;;  %v327_v22 = vcombine.high (!%p6838_p12), %v7580_v8, %v7580_v8 }
  0x4c   : > { %228 = vst [vmem:[#allocation2 + $0x3] ss:$4 sm:$0xff] (!%p6838_p12), %v7318_v4  ;;  %232 = vst [vmem:[#allocation2 + $0x2f] ss:$4 sm:$0xff] (!%p6838_p12), %v7318_v4  ;;  %v7319_v5 = vmov (!%p6838_p12), 1983009808  }
  0x4d   : > { %236 = vst [vmem:[#allocation2 + $0x5b] ss:$4 sm:$0xff] (!%p6838_p12), %v7318_v4  ;;  %240 = vst [vmem:[#allocation2 + $0x87] ss:$4 sm:$0xff] (!%p6838_p12), %v7318_v4  ;;  %v269_v6 = vunpack.c.l.s4 (!%p6838_p12), %v7319_v5  ;;  %v245_v7 = vld [vmem:[%s7563_s24 + $0x10] sm:$0x3f] (!%p6838_p12) }
  0x4e   : > { %v7583_v9 = vld [vmem:[%s7563_s24 + $0x26] sm:$0x3f] (!%p6838_p12)  ;;  %v272_v10 = vshrl.u32 (!%p6838_p12), %v209_v0, 7  ;;  %v7586_v11 = vld [vmem:[%s7563_s24 + $0x2c] sm:$0xff] (!%p6838_p12)  ;;  %v7589_v12 = vld [vmem:[%s7563_s24 + $0x34] sm:$0xff] (!%p6838_p12)  ;;  %v297_v20 = vcombine.high (!%p6838_p12), %v245_v7, %v245_v7 }
  0x4f   : > { %v7592_v13 = vld [vmem:[%s7563_s24 + $0x3c] sm:$0x3f] (!%p6838_p12)  ;;  %214 = vst.msk [vmem:[#allocation2 + $0x20] ss:$4 sm:$0x7] (!%p6838_p12), %vm211_vm0, %v7318_v4  ;;  %v270_v14 = vunpack.c.0.s8 (!%p6838_p12), %v269_v6  ;;  %v7595_v17 = vld [vmem:[%s7563_s24 + $0x42] sm:$0xff] (!%p6838_p12)  ;;  %v342_v24 = vcombine.high (!%p6838_p12), %v7583_v9, %v7583_v9  ;;  %v357_v25 = vcombine.high (!%p6838_p12), %v7586_v11, %v7586_v11  ;;  %v372_v26 = vcombine.high (!%p6838_p12), %v7589_v12, %v7589_v12 }
  0x50   : > { %218 = vst.msk [vmem:[#allocation2 + $0x4c] ss:$4 sm:$0x7] (!%p6838_p12), %vm211_vm0, %v7318_v4  ;;  %222 = vst.msk [vmem:[#allocation2 + $0x78] ss:$4 sm:$0x7] (!%p6838_p12), %vm211_vm0, %v7318_v4  ;;  %v387_v27 = vcombine.high (!%p6838_p12), %v7592_v13, %v7592_v13  ;;  %v402_v28 = vcombine.high (!%p6838_p12), %v7595_v17, %v7595_v17 }
  0x51   : > { %226 = vst.msk [vmem:[#allocation2 + $0xa4] ss:$4 sm:$0x7] %vm211_vm0, %v7318_v4  ;;  %230 = vst.msk [vmem:[#allocation2 + $0x23] ss:$4 sm:$0x7] %vm211_vm0, %v7318_v4  ;;  %v7605_v23 = vsub.s32 %v270_v14, %v272_v10 }
  0x52   : > { %234 = vst.msk [vmem:[#allocation2 + $0x4f] ss:$4 sm:$0x7] %vm211_vm0, %v7318_v4  ;;  %238 = vst.msk [vmem:[#allocation2 + $0x7b] ss:$4 sm:$0x7] %vm211_vm0, %v7318_v4 }
  0x53   : > { %242 = vst.msk [vmem:[#allocation2 + $0xa7] ss:$4 sm:$0x7] %vm211_vm0, %v7318_v4  ;;  %v7598_v18 = vld [vmem:[%s7563_s24 + $0x4a] sm:$0xff]  ;;  %v7601_v19 = vld [vmem:[%s7563_s24 + $0x52] sm:$0x3f]  ;;  %v274_v31 = vrot.slane %v243_v1, %v7605_v23  ;;  %v281_v32 = vrot.slane %v267_v15, %v7605_v23  ;;  %v289_v33 = vrot.slane %v244_v2, %v7605_v23  ;;  %v296_v34 = vrot.slane %v282_v16, %v7605_v23 }
  0x54   : > { %v417_v29 = vcombine.high %v7598_v18, %v7598_v18  ;;  %v432_v30 = vcombine.high %v7601_v19, %v7601_v19  ;;  %v304_v35 = vrot.slane %v245_v7, %v7605_v23  ;;  %v311_v36 = vrot.slane %v297_v20, %v7605_v23 }
  0x55   : > { %v319_v37 = vrot.slane %v246_v3, %v7605_v23  ;;  %v326_v38 = vrot.slane %v312_v21, %v7605_v23  ;;  %v447_v39 = vrot.slane %v274_v31, 7  ;;  %v448_v40 = vrot.slane %v281_v32, 7 }
  0x56   : > { %v449_v41 = vrot.slane %v289_v33, 7  ;;  %v450_v42 = vrot.slane %v296_v34, 7  ;;  %v451_v43 = vrot.slane %v304_v35, 7  ;;  %v452_v44 = vrot.slane %v311_v36, 7 }
  0x57   : > { %v453_v45 = vrot.slane %v319_v37, 7  ;;  %v454_v46 = vrot.slane %v326_v38, 7  ;;  %495 = vst [vmem:[#allocation2] sm:$0x66] %v447_v39  ;;  %496 = vst [vmem:[#allocation2 + $0x8] sm:$0x66] %v448_v40  ;;  %v334_v47 = vrot.slane %v7580_v8, %v7605_v23  ;;  %v341_v48 = vrot.slane %v327_v22, %v7605_v23 }
  0x58   : > { %497 = vst [vmem:[#allocation2 + $0x10] sm:$0x66] %v449_v41  ;;  %498 = vst [vmem:[#allocation2 + $0x18] sm:$0x66] %v450_v42  ;;  %v349_v49 = vrot.slane %v7583_v9, %v7605_v23  ;;  %v356_v50 = vrot.slane %v342_v24, %v7605_v23  ;;  %v364_v51 = vrot.slane %v7586_v11, %v7605_v23 }
  0x59   : > { %499 = vst [vmem:[#allocation2 + $0x20] sm:$0x66] %v451_v43  ;;  %500 = vst [vmem:[#allocation2 + $0x28] sm:$0x6] %v452_v44  ;;  %v371_v52 = vrot.slane %v357_v25, %v7605_v23  ;;  %v379_v53 = vrot.slane %v7589_v12, %v7605_v23  ;;  %v386_v54 = vrot.slane %v372_v26, %v7605_v23  ;;  %v455_v55 = vrot.slane %v334_v47, 7 }
  0x5a   : > { %501 = vst [vmem:[#allocation2 + $0x2c] sm:$0x66] %v453_v45  ;;  %502 = vst [vmem:[#allocation2 + $0x34] sm:$0x66] %v454_v46  ;;  %v456_v56 = vrot.slane %v341_v48, 7  ;;  %v457_v57 = vrot.slane %v349_v49, 7  ;;  %v394_v63 = vrot.slane %v7592_v13, %v7605_v23  ;;  %v401_v0 = vrot.slane %v387_v27, %v7605_v23 }
  0x5b   : > { %v458_v58 = vrot.slane %v356_v50, 7  ;;  %v459_v59 = vrot.slane %v364_v51, 7  ;;  %v460_v60 = vrot.slane %v371_v52, 7  ;;  %v461_v61 = vrot.slane %v379_v53, 7  ;;  %503 = vst [vmem:[#allocation2 + $0x3c] sm:$0x66] %v455_v55 }
  0x5c   : > { %v462_v62 = vrot.slane %v386_v54, 7  ;;  %504 = vst [vmem:[#allocation2 + $0x44] sm:$0x66] %v456_v56  ;;  %505 = vst [vmem:[#allocation2 + $0x4c] sm:$0x66] %v457_v57  ;;  %v409_v1 = vrot.slane %v7595_v17, %v7605_v23  ;;  %v416_v2 = vrot.slane %v402_v28, %v7605_v23  ;;  %v424_v3 = vrot.slane %v7598_v18, %v7605_v23 }
  0x5d   : > { %506 = vst [vmem:[#allocation2 + $0x54] sm:$0x6] %v458_v58  ;;  %507 = vst [vmem:[#allocation2 + $0x58] sm:$0x66] %v459_v59  ;;  %v431_v4 = vrot.slane %v417_v29, %v7605_v23  ;;  %v439_v5 = vrot.slane %v7601_v19, %v7605_v23  ;;  %v446_v6 = vrot.slane %v432_v30, %v7605_v23  ;;  %v463_v7 = vrot.slane %v394_v63, 7 }
  0x5e   : > { %508 = vst [vmem:[#allocation2 + $0x60] sm:$0x66] %v460_v60  ;;  %509 = vst [vmem:[#allocation2 + $0x68] sm:$0x66] %v461_v61  ;;  %v464_v8 = vrot.slane %v401_v0, 7  ;;  %v465_v9 = vrot.slane %v409_v1, 7 }
  0x5f   : > { %510 = vst [vmem:[#allocation2 + $0x70] sm:$0x66] %v462_v62  ;;  %v466_v10 = vrot.slane %v416_v2, 7  ;;  %v467_v11 = vrot.slane %v424_v3, 7  ;;  %v468_v12 = vrot.slane %v431_v4, 7  ;;  %v469_v13 = vrot.slane %v439_v5, 7 }
  0x60   : > { %v470_v14 = vrot.slane %v446_v6, 7  ;;  %511 = vst [vmem:[#allocation2 + $0x78] sm:$0x66] %v463_v7  ;;  %512 = vst [vmem:[#allocation2 + $0x80] sm:$0x6] %v464_v8 }
  0x61   : > { %513 = vst [vmem:[#allocation2 + $0x84] sm:$0x66] %v465_v9  ;;  %514 = vst [vmem:[#allocation2 + $0x8c] sm:$0x66] %v466_v10 }
  0x62   : > { %515 = vst [vmem:[#allocation2 + $0x94] sm:$0x66] %v467_v11  ;;  %516 = vst [vmem:[#allocation2 + $0x9c] sm:$0x66] %v468_v12 }
  0x63   : > { %517 = vst [vmem:[#allocation2 + $0xa4] sm:$0x66] %v469_v13  ;;  %518 = vst [vmem:[#allocation2 + $0xac] sm:$0x6] %v470_v14 }
  0x64 PF: > { %v519_v15 = vld [vmem:[%s15417_s2] sm:$0xff]  ;;  %s526_s23 = sshra.s32 %s7297_s18, 2  ;;  %s529_s25 = sand.u32 3, %s7297_s18  ;;  %v598_v16 = vlaneseq  ;;  %v7320_v17 = vmov 0   ;;  %v7321_v26 = vmov 1   ;;  %vm838_vm1 = vcmask 523264  }
  0x65   : > { %7076 = vset.pattern.permute.xlu0 %v7320_v17  ;;  %s6839_s26 = smul.u32 44, %s526_s23  ;;  %7077 = vset.pattern.permute.xlu1 %v7320_v17  ;;  %s7322_s15 = smov 64   ;;  %vm1661_vm2 = vcmask 457728   ;;  %vm2138_vm3 = vcmask 785408   ;;  %vm2615_vm4 = vcmask 982016   ;;  %vm4141_vm5 = vcmask 261120  }
  0x66   : > { %522 = vperm.xlu0 %7076, %v519_v15   ;;  %v599_v18 = vshrl.u32 %v598_v16, 7  ;;  %s525_s11 = sadd.s32 1, %s7297_s18  ;;  %vm4806_vm6 = vcmask 64512   ;;  %vm5491_vm7 = vcmask 588800   ;;  %p18214_p2 = scmp.ne.s32.totalorder %s16214_s7, 0 }
  0x67   : > { %s532_s5 = sadd.s32 %s6839_s26, %s529_s25  ;;  %s558_s24 = sshra.s32 %s525_s11, 2 }
  0x68   : > { %v7658_v19 = vsub.s32 1, %v599_v18  ;;  %v7660_v20 = vsub.s32 2, %v599_v18  ;;  %v7662_v21 = vsub.s32 3, %v599_v18  ;;  %s7664_s27 = scalar_lea.vmem [#allocation2], %s532_s5  ;;  %v7667_v23 = vsub.s32 4, %v599_v18  ;;  %s6851_s30 = smul.u32 44, %s558_s24 }
  0x69   : > { %v7682_v29 = vsub.s32 5, %v599_v18  ;;  %v7684_v30 = vsub.s32 6, %v599_v18  ;;  %v7686_v31 = vsub.s32 0, %v599_v18  ;;  %v7698_v34 = vsub.s32 7, %v599_v18  ;;  %s561_s4 = sand.u32 3, %s525_s11  ;;  %s7328_s5 = smov 56  }
  0x6a   : > { %16218 = vst [vmem:[#allocation11_spill] sm:$0xff] %v7658_v19  ;;  %16219 = vst [vmem:[#allocation12_spill] sm:$0xff] %v7662_v21  ;;  %v534_v22 = vld [vmem:[%s7664_s27] ss:$4 sm:$0xff]  ;;  %7078 = vset.pattern.permute.xlu0 %v7321_v26  ;;  %s564_s28 = sadd.s32 %s6851_s30, %s561_s4  ;;  %s7338_s11 = smov 120  }
  0x6b   : > { %16220 = vst [vmem:[#allocation13_spill] sm:$0xff] %v7667_v23  ;;  %v7670_v24 = vrot.slane %v534_v22, %v7660_v20  ;;  %v601_v25 = vrot.slane %v534_v22, %v7658_v19  ;;  %v7677_v27 = vrot.slane %v534_v22, %v7662_v21  ;;  %v7680_v28 = vrot.slane %v534_v22, %v7667_v23  ;;  %v6841_v35 = vld [vmem:[%s7664_s27 + $0x20] ss:$4 sm:$0x7]  ;;  %s7869_s23 = scalar_lea.vmem [#allocation2], %s564_s28  ;;  %s7354_s24 = smov 32  }
  0x6c   : > { %16221 = vst [vmem:[#allocation14_spill] sm:$0xff] %v7682_v29  ;;  %16222 = vst [vmem:[#allocation15_spill] sm:$0xff] %v7684_v30  ;;  %v7693_v32 = vrot.slane %v534_v22, %v7682_v29  ;;  %v7696_v33 = vrot.slane %v534_v22, %v7684_v30  ;;  %v7706_v36 = vrot.slane %v534_v22, %v7698_v34  ;;  %v6842_v40 = vld [vmem:[%s7664_s27 + $0x2c] ss:$4 sm:$0xff]  ;;  %s3788_s30 = sadd.s32 2, %s7297_s18 }
  0x6d   : > { %760 = vrot.lane.b32.xlu1 %v7670_v24, %s7322_s15  ;;  %758 = vrot.lane.b32.xlu0 %v601_v25, %s7322_s15  ;;  %16223 = vst [vmem:[#allocation16_spill] sm:$0xff] %v7698_v34  ;;  %v7709_v37 = vrot.slane %v6841_v35, %v7686_v31  ;;  %v7716_v38 = vrot.slane %v6841_v35, %v7658_v19  ;;  %v6844_v47 = vld [vmem:[%s7664_s27 + $0x4c] ss:$4 sm:$0x7]  ;;  %s8809_s4 = sshra.s32 %s3788_s30, 2  ;;  %s3792_s25 = sand.u32 3, %s3788_s30 }
  0x6e   : > { %v7719_v39 = vrot.slane %v6841_v35, %v7660_v20  ;;  %v641_v41 = vrot.slane %v6842_v40, %v7658_v19  ;;  %v7728_v42 = vrot.slane %v6842_v40, %v7660_v20  ;;  %v7734_v43 = vrot.slane %v6842_v40, %v7662_v21  ;;  %v6845_v52 = vld [vmem:[%s7664_s27 + $0x58] ss:$4 sm:$0xff]  ;;  %s6863_s28 = smul.u32 44, %s8809_s4 }
  0x6f   : > { %v7737_v44 = vrot.slane %v6842_v40, %v7667_v23  ;;  %v7744_v45 = vrot.slane %v6842_v40, %v7682_v29  ;;  %v7747_v46 = vrot.slane %v6842_v40, %v7684_v30  ;;  %v7755_v48 = vrot.slane %v6842_v40, %v7698_v34  ;;  %v6847_v59 = vld [vmem:[%s7664_s27 + $0x78] ss:$4 sm:$0x7]  ;;  %v6850_v7 = vld [vmem:[%s7664_s27 + $0xa4] ss:$4 sm:$0x7] }
  0x70   : > { %16224 = vst [vmem:[#allocation17_spill] sm:$0xff] %v7728_v42  ;;  %16225 = vst [vmem:[#allocation18_spill] sm:$0xff] %v7734_v43  ;;  %v7758_v49 = vrot.slane %v6844_v47, %v7686_v31  ;;  %v7765_v50 = vrot.slane %v6844_v47, %v7658_v19  ;;  %v7768_v51 = vrot.slane %v6844_v47, %v7660_v20  ;;  %v6848_v0 = vld [vmem:[%s7664_s27 + $0x84] ss:$4 sm:$0xff]  ;;  %v7323_v47 = vmov 2   ;;  %s7333_s27 = smov 96   ;;  %s8913_s26 = sadd.s32 %s6863_s28, %s3792_s25 }
  0x71   : > { %762 = vrot.lane.b32.xlu1 %v7677_v27, %s7322_s15  ;;  %764 = vrot.lane.b32.xlu0 %v7680_v28, %s7322_s15  ;;  %16226 = vst [vmem:[#allocation19_spill] sm:$0xff] %v7737_v44  ;;  %16227 = vst [vmem:[#allocation20_spill] sm:$0xff] %v7744_v45  ;;  %v681_v53 = vrot.slane %v6845_v52, %v7658_v19  ;;  %v7777_v54 = vrot.slane %v6845_v52, %v7660_v20  ;;  %v7872_v12 = vld [vmem:[%s7869_s23] ss:$4 sm:$0xff]  ;;  %s7378_s28 = smov 72  }
  0x72   : > { %v7783_v55 = vrot.slane %v6845_v52, %v7662_v21  ;;  %v7786_v56 = vrot.slane %v6845_v52, %v7667_v23  ;;  %v7793_v57 = vrot.slane %v6845_v52, %v7682_v29  ;;  %v7796_v58 = vrot.slane %v6845_v52, %v7684_v30  ;;  %v7887_v15 = vld [vmem:[%s7869_s23 + $0x2c] ss:$4 sm:$0xff] }
  0x73   : > { %16228 = vst [vmem:[#allocation21_spill] sm:$0xff] %v7777_v54  ;;  %v7804_v60 = vrot.slane %v6845_v52, %v7698_v34  ;;  %v7807_v61 = vrot.slane %v6847_v59, %v7686_v31  ;;  %v7814_v62 = vrot.slane %v6847_v59, %v7658_v19  ;;  %v7817_v63 = vrot.slane %v6847_v59, %v7660_v20  ;;  %v7902_v18 = vld [vmem:[%s7869_s23 + $0x58] ss:$4 sm:$0xff] }
  0x74   : > { %16229 = vst [vmem:[#allocation22_spill] sm:$0xff] %v7783_v55  ;;  %16230 = vst [vmem:[#allocation23_spill] sm:$0xff] %v7786_v56  ;;  %v721_v1 = vrot.slane %v6848_v0, %v7658_v19  ;;  %v7826_v2 = vrot.slane %v6848_v0, %v7660_v20  ;;  %v7833_v3 = vrot.slane %v6848_v0, %v7662_v21  ;;  %v7917_v26 = vld [vmem:[%s7869_s23 + $0x84] ss:$4 sm:$0xff]  ;;  %v7324_v52 = vmov 4  }
  0x75   : > { %766 = vrot.lane.b32.xlu1 %v7693_v32, %s7322_s15  ;;  %768 = vrot.lane.b32.xlu0 %v7696_v33, %s7322_s15  ;;  %v7836_v4 = vrot.slane %v6848_v0, %v7667_v23  ;;  %v7843_v5 = vrot.slane %v6848_v0, %v7682_v29  ;;  %v7846_v6 = vrot.slane %v6848_v0, %v7684_v30  ;;  %v7326_v59 = vmov 7  }
  0x76   : > { %16231 = vst [vmem:[#allocation24_spill] sm:$0xff] %v7826_v2  ;;  %16232 = vst [vmem:[#allocation25_spill] sm:$0xff] %v7833_v3  ;;  %v7854_v8 = vrot.slane %v6848_v0, %v7698_v34  ;;  %v7857_v9 = vrot.slane %v6850_v7, %v7686_v31  ;;  %v7864_v10 = vrot.slane %v6850_v7, %v7658_v19  ;;  %v7327_v0 = vmov 5  }
  0x77   : > { %16233 = vst [vmem:[#allocation26_spill] sm:$0xff] %v7836_v4  ;;  %v7867_v11 = vrot.slane %v6850_v7, %v7660_v20  ;;  %v7880_v13 = vrot.slane %v7872_v12, %v7686_v31  ;;  %v7884_v14 = vrot.slane %v7872_v12, %v7658_v19  ;;  %v7895_v16 = vrot.slane %v7887_v15, %v7686_v31 }
  0x78   : > { %v7899_v17 = vrot.slane %v7887_v15, %v7658_v19  ;;  %v7910_v22 = vrot.slane %v7902_v18, %v7686_v31  ;;  %v7914_v25 = vrot.slane %v7902_v18, %v7658_v19  ;;  %v7925_v35 = vrot.slane %v7917_v26, %v7686_v31 }
  0x79   : > { %770 = vrot.lane.b32.xlu1 %v7706_v36, %s7322_s15  ;;  %772 = vrot.lane.b32.xlu0 %v7709_v37, %s7322_s15  ;;  %16234 = vst [vmem:[#allocation27_spill] sm:$0xff] %v7880_v13  ;;  %16235 = vst [vmem:[#allocation28_spill] sm:$0xff] %v7884_v14  ;;  %v7929_v40 = vrot.slane %v7917_v26, %v7658_v19 }
  0x7a   : > { %16236 = vst [vmem:[#allocation29_spill] sm:$0xff] %v7895_v16  ;;  %16237 = vst [vmem:[#allocation30_spill] sm:$0xff] %v7899_v17 }
  0x7b   : > { %16238 = vst [vmem:[#allocation31_spill] sm:$0xff] %v7910_v22  ;;  %16239 = vst [vmem:[#allocation32_spill] sm:$0xff] %v7914_v25 }
  0x7c   : > { %16240 = vst [vmem:[#allocation33_spill] sm:$0xff] %v7925_v35  ;;  %16241 = vst [vmem:[#allocation34_spill] sm:$0xff] %v7929_v40 }
  0x7d   : > { %774 = vrot.lane.b32.xlu1 %v7716_v38, %s7322_s15  ;;  %776 = vrot.lane.b32.xlu0 %v7719_v39, %s7322_s15 }
  0x81   : > { %778 = vrot.lane.b32.xlu1 %v641_v41, %s7322_s15  ;;  %780 = vrot.lane.b32.xlu0 %v7728_v42, %s7322_s15  ;;  %v7938_v41 = vld [vmem:[%s15416_s1] sm:$0xff] }
  0x85   : > { %782 = vrot.lane.b32.xlu1 %v7734_v43, %s7322_s15  ;;  %784 = vrot.lane.b32.xlu0 %v7737_v44, %s7322_s15 }
  0x89   : > { %786 = vrot.lane.b32.xlu1 %v7744_v45, %s7322_s15  ;;  %788 = vrot.lane.b32.xlu0 %v7747_v46, %s7322_s15 }
  0x8d   : > { %790 = vrot.lane.b32.xlu1 %v7755_v48, %s7322_s15  ;;  %792 = vrot.lane.b32.xlu0 %v7758_v49, %s7322_s15 }
  0x91   : > { %794 = vrot.lane.b32.xlu1 %v7765_v50, %s7322_s15  ;;  %796 = vrot.lane.b32.xlu0 %v7768_v51, %s7322_s15 }
  0x95   : > { %798 = vrot.lane.b32.xlu1 %v681_v53, %s7322_s15  ;;  %800 = vrot.lane.b32.xlu0 %v7777_v54, %s7322_s15  ;;  %v7325_v53 = vmov 3  }
  0x99   : > { %802 = vrot.lane.b32.xlu1 %v7783_v55, %s7322_s15  ;;  %804 = vrot.lane.b32.xlu0 %v7786_v56, %s7322_s15 }
  0x9d   : > { %806 = vrot.lane.b32.xlu1 %v7793_v57, %s7322_s15  ;;  %808 = vrot.lane.b32.xlu0 %v7796_v58, %s7322_s15 }
  0xa1   : > { %810 = vrot.lane.b32.xlu1 %v7804_v60, %s7322_s15  ;;  %812 = vrot.lane.b32.xlu0 %v7807_v61, %s7322_s15 }
  0xa5   : > { %814 = vrot.lane.b32.xlu1 %v7814_v62, %s7322_s15  ;;  %816 = vrot.lane.b32.xlu0 %v7817_v63, %s7322_s15 }
  0xa9   : > { %818 = vrot.lane.b32.xlu1 %v721_v1, %s7322_s15  ;;  %820 = vrot.lane.b32.xlu0 %v7826_v2, %s7322_s15  ;;  %v7329_v1 = vmov 8  }
  0xad   : > { %822 = vrot.lane.b32.xlu1 %v7833_v3, %s7322_s15  ;;  %824 = vrot.lane.b32.xlu0 %v7836_v4, %s7322_s15 }
  0xb1   : > { %826 = vrot.lane.b32.xlu1 %v7843_v5, %s7322_s15  ;;  %828 = vrot.lane.b32.xlu0 %v7846_v6, %s7322_s15 }
  0xb5   : > { %830 = vrot.lane.b32.xlu1 %v7854_v8, %s7322_s15  ;;  %832 = vrot.lane.b32.xlu0 %v7857_v9, %s7322_s15 }
  0xb9   : > { %834 = vrot.lane.b32.xlu1 %v7864_v10, %s7322_s15  ;;  %836 = vrot.lane.b32.xlu0 %v7867_v11, %s7322_s15 }
  0xbd   : > { %951 = vrot.lane.b32.xlu1 %v7880_v13, %s7322_s15  ;;  %953 = vrot.lane.b32.xlu0 %v7884_v14, %s7322_s15 }
  0xc1   : > { %955 = vrot.lane.b32.xlu1 %v7895_v16, %s7322_s15  ;;  %957 = vrot.lane.b32.xlu0 %v7899_v17, %s7322_s15 }
  0xc5   : > { %959 = vrot.lane.b32.xlu1 %v7910_v22, %s7322_s15  ;;  %961 = vrot.lane.b32.xlu0 %v7914_v25, %s7322_s15 }
  0xc9   : > { %963 = vrot.lane.b32.xlu1 %v7925_v35, %s7322_s15  ;;  %965 = vrot.lane.b32.xlu0 %v7929_v40, %s7322_s15 }
  0xcd   : > { %986 = vperm.xlu1 %7077, %v7938_v41   ;;  %1056 = vperm.xlu0 %7078, %v7938_v41  }
  0xd1   : > { %7079 = vset.pattern.permute.xlu1 %v7323_v47  ;;  %7081 = vset.pattern.permute.xlu0 %v7324_v52  ;;  %v7330_v47 = vmov 6  }
  0xd2   : > { %1126 = vperm.xlu1 %7079, %v7938_v41   ;;  %1310 = vperm.xlu0 %7081, %v7938_v41  }
  0xd6   : > { %7080 = vset.pattern.permute.xlu1 %v7325_v53  ;;  %7084 = vset.pattern.permute.xlu0 %v7326_v59  ;;  %v7331_v59 = vmov 9  }
  0xd7   : > { %1196 = vperm.xlu1 %7080, %v7938_v41   ;;  %1520 = vperm.xlu0 %7084, %v7938_v41  }
  0xdb   : > { %7082 = vset.pattern.permute.xlu1 %v7327_v0  ;;  %1593 = vrot.lane.b32.xlu0 %v7680_v28, %s7328_s5 }
  0xdc   : > { %1380 = vperm.xlu1 %7082, %v7938_v41   ;;  %7085 = vset.pattern.permute.xlu0 %v7329_v1 }
  0xdf   : > { %v7949_v7 = vpop.permute.xlu1 %760  ;;  %1597 = vrot.lane.b32.xlu0 %v7696_v33, %s7328_s5 }
  0xe0   : > { %16242 = vst [vmem:[#allocation35_spill] sm:$0xff] %v7949_v7  ;;  %7083 = vset.pattern.permute.xlu1 %v7330_v47 }
  0xe1   : > { %1450 = vperm.xlu1 %7083, %v7938_v41  }
  0xe3   : > { %v7954_v52 = vpop.permute.xlu1 %762  ;;  %1601 = vrot.lane.b32.xlu0 %v7709_v37, %s7328_s5 }
  0xe4   : > { %16243 = vst [vmem:[#allocation36_spill] sm:$0xff] %v7954_v52 }
  0xe5   : > { %1589 = vrot.lane.b32.xlu1 %v7670_v24, %s7328_s5  ;;  %v7960_v53 = vpop.permute.xlu0 %522 }
  0xe6   : > { %16244 = vst [vmem:[#allocation37_spill] sm:$0xff] %v7960_v53  ;;  %7086 = vset.pattern.permute.xlu1 %v7331_v59 }
  0xe7   : > { %v7962_v0 = vpop.permute.xlu1 %766  ;;  %1605 = vrot.lane.b32.xlu0 %v7719_v39, %s7328_s5 }
  0xe8   : > { %16245 = vst [vmem:[#allocation38_spill] sm:$0xff] %v7962_v0 }
  0xe9   : > { %1591 = vrot.lane.b32.xlu1 %v7677_v27, %s7328_s5  ;;  %v7968_v1 = vpop.permute.xlu0 %758 }
  0xea   : > { %16246 = vst [vmem:[#allocation39_spill] sm:$0xff] %v7968_v1 }
  0xeb   : > { %v7970_v47 = vpop.permute.xlu1 %770  ;;  %1609 = vrot.lane.b32.xlu0 %v7734_v43, %s7328_s5 }
  0xec   : > { %16247 = vst [vmem:[#allocation40_spill] sm:$0xff] %v7970_v47 }
  0xed   : > { %1595 = vrot.lane.b32.xlu1 %v7693_v32, %s7328_s5  ;;  %v7976_v53 = vpop.permute.xlu0 %764 }
  0xee   : > { %16248 = vst [vmem:[#allocation41_spill] sm:$0xff] %v7976_v53 }
  0xef   : > { %v7978_v59 = vpop.permute.xlu1 %774  ;;  %1613 = vrot.lane.b32.xlu0 %v7744_v45, %s7328_s5 }
  0xf0   : > { %16249 = vst [vmem:[#allocation42_spill] sm:$0xff] %v7978_v59 }
  0xf1   : > { %1599 = vrot.lane.b32.xlu1 %v7706_v36, %s7328_s5  ;;  %v7984_v0 = vpop.permute.xlu0 %768 }
  0xf2   : > { %16250 = vst [vmem:[#allocation43_spill] sm:$0xff] %v7984_v0 }
  0xf3   : > { %v7986_v1 = vpop.permute.xlu1 %778  ;;  %1617 = vrot.lane.b32.xlu0 %v7755_v48, %s7328_s5 }
  0xf4   : > { %16251 = vst [vmem:[#allocation44_spill] sm:$0xff] %v7986_v1 }
  0xf5   : > { %1603 = vrot.lane.b32.xlu1 %v7716_v38, %s7328_s5  ;;  %v7992_v47 = vpop.permute.xlu0 %772 }
  0xf6   : > { %16252 = vst [vmem:[#allocation45_spill] sm:$0xff] %v7992_v47 }
  0xf7   : > { %v7994_v53 = vpop.permute.xlu1 %782  ;;  %1621 = vrot.lane.b32.xlu0 %v7765_v50, %s7328_s5 }
  0xf8   : > { %16253 = vst [vmem:[#allocation46_spill] sm:$0xff] %v7994_v53 }
  0xf9   : > { %1607 = vrot.lane.b32.xlu1 %v7728_v42, %s7328_s5  ;;  %v8000_v59 = vpop.permute.xlu0 %776 }
  0xfa   : > { %16254 = vst [vmem:[#allocation47_spill] sm:$0xff] %v8000_v59 }
  0xfb   : > { %v8002_v0 = vpop.permute.xlu1 %786  ;;  %1625 = vrot.lane.b32.xlu0 %v7777_v54, %s7328_s5 }
  0xfc   : > { %16255 = vst [vmem:[#allocation48_spill] sm:$0xff] %v8002_v0 }
  0xfd   : > { %1611 = vrot.lane.b32.xlu1 %v7737_v44, %s7328_s5  ;;  %v8008_v1 = vpop.permute.xlu0 %780 }
  0xfe   : > { %16256 = vst [vmem:[#allocation49_spill] sm:$0xff] %v8008_v1 }
  0xff   : > { %v8010_v47 = vpop.permute.xlu1 %790  ;;  %1629 = vrot.lane.b32.xlu0 %v7786_v56, %s7328_s5 }
 0x100   : > { %16257 = vst [vmem:[#allocation50_spill] sm:$0xff] %v8010_v47 }
 0x101   : > { %1615 = vrot.lane.b32.xlu1 %v7747_v46, %s7328_s5  ;;  %v8016_v53 = vpop.permute.xlu0 %784 }
 0x102   : > { %16258 = vst [vmem:[#allocation51_spill] sm:$0xff] %v8016_v53 }
 0x103   : > { %v8018_v59 = vpop.permute.xlu1 %794  ;;  %1633 = vrot.lane.b32.xlu0 %v7796_v58, %s7328_s5 }
 0x104   : > { %16259 = vst [vmem:[#allocation52_spill] sm:$0xff] %v8018_v59 }
 0x105   : > { %1619 = vrot.lane.b32.xlu1 %v7758_v49, %s7328_s5  ;;  %v8024_v0 = vpop.permute.xlu0 %788 }
 0x106   : > { %16260 = vst [vmem:[#allocation53_spill] sm:$0xff] %v8024_v0 }
 0x107   : > { %v8026_v1 = vpop.permute.xlu1 %798  ;;  %1637 = vrot.lane.b32.xlu0 %v7807_v61, %s7328_s5 }
 0x108   : > { %16261 = vst [vmem:[#allocation54_spill] sm:$0xff] %v8026_v1 }
 0x109   : > { %1623 = vrot.lane.b32.xlu1 %v7768_v51, %s7328_s5  ;;  %v8032_v47 = vpop.permute.xlu0 %792 }
 0x10a   : > { %16262 = vst [vmem:[#allocation55_spill] sm:$0xff] %v8032_v47 }
 0x10b   : > { %v8034_v53 = vpop.permute.xlu1 %802  ;;  %1641 = vrot.lane.b32.xlu0 %v7817_v63, %s7328_s5 }
 0x10c   : > { %16263 = vst [vmem:[#allocation56_spill] sm:$0xff] %v8034_v53 }
 0x10d   : > { %1627 = vrot.lane.b32.xlu1 %v7783_v55, %s7328_s5  ;;  %v8040_v59 = vpop.permute.xlu0 %796 }
 0x10e   : > { %16264 = vst [vmem:[#allocation57_spill] sm:$0xff] %v8040_v59 }
 0x10f   : > { %v8042_v0 = vpop.permute.xlu1 %806  ;;  %1645 = vrot.lane.b32.xlu0 %v7833_v3, %s7328_s5 }
 0x110   : > { %16265 = vst [vmem:[#allocation58_spill] sm:$0xff] %v8042_v0 }
 0x111   : > { %1631 = vrot.lane.b32.xlu1 %v7793_v57, %s7328_s5  ;;  %v8048_v1 = vpop.permute.xlu0 %800 }
 0x112   : > { %16266 = vst [vmem:[#allocation59_spill] sm:$0xff] %v8048_v1 }
 0x113   : > { %v8050_v47 = vpop.permute.xlu1 %810  ;;  %1649 = vrot.lane.b32.xlu0 %v7843_v5, %s7328_s5 }
 0x114   : > { %16267 = vst [vmem:[#allocation60_spill] sm:$0xff] %v8050_v47 }
 0x115   : > { %1635 = vrot.lane.b32.xlu1 %v7804_v60, %s7328_s5  ;;  %v8056_v53 = vpop.permute.xlu0 %804 }
 0x116   : > { %16268 = vst [vmem:[#allocation61_spill] sm:$0xff] %v8056_v53 }
 0x117   : > { %v8058_v59 = vpop.permute.xlu1 %814  ;;  %1653 = vrot.lane.b32.xlu0 %v7854_v8, %s7328_s5 }
 0x118   : > { %16269 = vst [vmem:[#allocation62_spill] sm:$0xff] %v8058_v59  ;;  %v8080_v59 = vrot.slane %v7872_v12, %v7660_v20 }
 0x119   : > { %1639 = vrot.lane.b32.xlu1 %v7814_v62, %s7328_s5  ;;  %v8064_v0 = vpop.permute.xlu0 %808 }
 0x11a   : > { %16270 = vst [vmem:[#allocation63_spill] sm:$0xff] %v8064_v0  ;;  %16274 = vst [vmem:[#allocation67_spill] sm:$0xff] %v8080_v59 }
 0x11b   : > { %v8066_v1 = vpop.permute.xlu1 %818  ;;  %1657 = vrot.lane.b32.xlu0 %v7864_v10, %s7328_s5 }
 0x11c   : > { %16271 = vst [vmem:[#allocation64_spill] sm:$0xff] %v8066_v1 }
 0x11d   : > { %1643 = vrot.lane.b32.xlu1 %v7826_v2, %s7328_s5  ;;  %v8072_v47 = vpop.permute.xlu0 %812 }
 0x11e   : > { %16272 = vst [vmem:[#allocation65_spill] sm:$0xff] %v8072_v47 }
 0x11f   : > { %v8074_v53 = vpop.permute.xlu1 %822  ;;  %1746 = vrot.lane.b32.xlu0 %v7880_v13, %s7328_s5 }
 0x120   : > { %16273 = vst [vmem:[#allocation66_spill] sm:$0xff] %v8074_v53 }
 0x121   : > { %1647 = vrot.lane.b32.xlu1 %v7836_v4, %s7328_s5  ;;  %v8084_v1 = vpop.permute.xlu0 %816 }
 0x122   : > { %16275 = vst [vmem:[#allocation68_spill] sm:$0xff] %v8084_v1 }
 0x123   : > { %1750 = vrot.lane.b32.xlu0 %v8080_v59, %s7328_s5  ;;  %v8088_v0 = vpop.permute.xlu1 %826 }
 0x124   : > { %16276 = vst [vmem:[#allocation69_spill] sm:$0xff] %v8088_v0  ;;  %v8106_v0 = vrot.slane %v7902_v18, %v7660_v20 }
 0x125   : > { %1651 = vrot.lane.b32.xlu1 %v7846_v6, %s7328_s5  ;;  %v8092_v53 = vpop.permute.xlu0 %820 }
 0x126   : > { %16277 = vst [vmem:[#allocation70_spill] sm:$0xff] %v8092_v53  ;;  %16280 = vst [vmem:[#allocation73_spill] sm:$0xff] %v8106_v0 }
 0x127   : > { %1754 = vrot.lane.b32.xlu0 %v7899_v17, %s7328_s5  ;;  %v8098_v47 = vpop.permute.xlu1 %830 }
 0x128   : > { %16278 = vst [vmem:[#allocation71_spill] sm:$0xff] %v8098_v47 }
 0x129   : > { %1655 = vrot.lane.b32.xlu1 %v7857_v9, %s7328_s5  ;;  %v8100_v7 = vpop.permute.xlu0 %824 }
 0x12a   : > { %16279 = vst [vmem:[#allocation72_spill] sm:$0xff] %v8100_v7  ;;  %v8126_v7 = vrot.slane %v7887_v15, %v7660_v20 }
 0x12b   : > { %1758 = vrot.lane.b32.xlu0 %v7910_v22, %s7328_s5  ;;  %v8114_v1 = vpop.permute.xlu1 %834 }
 0x12c   : > { %16282 = vst [vmem:[#allocation75_spill] sm:$0xff] %v8114_v1  ;;  %16284 = vst [vmem:[#allocation77_spill] sm:$0xff] %v8126_v7 }
 0x12d   : > { %1659 = vrot.lane.b32.xlu1 %v7867_v11, %s7328_s5  ;;  %v8110_v53 = vpop.permute.xlu0 %828 }
 0x12e   : > { %16281 = vst [vmem:[#allocation74_spill] sm:$0xff] %v8110_v53 }
 0x12f   : > { %1762 = vrot.lane.b32.xlu0 %v8106_v0, %s7328_s5  ;;  %v8128_v53 = vpop.permute.xlu1 %951 }
 0x130   : > { %16285 = vst [vmem:[#allocation78_spill] sm:$0xff] %v8128_v53 }
 0x131   : > { %1748 = vrot.lane.b32.xlu1 %v7884_v14, %s7328_s5  ;;  %v8118_v47 = vpop.permute.xlu0 %832 }
 0x132   : > { %16283 = vst [vmem:[#allocation76_spill] sm:$0xff] %v8118_v47  ;;  %v7332_v47 = vmov 11  }
 0x133   : > { %1766 = vrot.lane.b32.xlu0 %v7929_v40, %s7328_s5  ;;  %v8137_v2 = vpop.permute.xlu1 %955 }
 0x134   : > { %16288 = vst [vmem:[#allocation81_spill] sm:$0xff] %v8137_v2 }
 0x135   : > { %1752 = vrot.lane.b32.xlu1 %v7895_v16, %s7328_s5  ;;  %v8130_v52 = vpop.permute.xlu0 %836 }
 0x136   : > { %16286 = vst [vmem:[#allocation79_spill] sm:$0xff] %v8130_v52  ;;  %v8150_v52 = vrot.slane %v7917_v26, %v7660_v20 }
 0x137   : > { %1795 = vperm.xlu0 %7085, %v7938_v41  }
 0x138   : > { %16290 = vst [vmem:[#allocation83_spill] sm:$0xff] %v8150_v52 }
 0x139   : > { %1756 = vrot.lane.b32.xlu1 %v8126_v7, %s7328_s5  ;;  %v8135_v1 = vpop.permute.xlu0 %953 }
 0x13a   : > { %16287 = vst [vmem:[#allocation80_spill] sm:$0xff] %v8135_v1  ;;  %v8152_v1 = vpop.permute.xlu1 %959 }
 0x13b   : > { %7088 = vset.pattern.permute.xlu0 %v7332_v47  ;;  %v7334_v47 = vmov 12   ;;  %16291 = vst [vmem:[#allocation84_spill] sm:$0xff] %v8152_v1  ;;  %v7335_v1 = vmov 10  }
 0x13c   : > { %2005 = vperm.xlu0 %7088, %v7938_v41  }
 0x13d   : > { %1760 = vrot.lane.b32.xlu1 %v7914_v25, %s7328_s5  ;;  %v8142_v54 = vpop.permute.xlu0 %957 }
 0x13e   : > { %16289 = vst [vmem:[#allocation82_spill] sm:$0xff] %v8142_v54  ;;  %v8160_v54 = vpop.permute.xlu1 %963 }
 0x13f   : > { %16293 = vst [vmem:[#allocation86_spill] sm:$0xff] %v8160_v54 }
 0x140   : > { %2078 = vrot.lane.b32.xlu0 %v7693_v32, %s7333_s27 }
 0x141   : > { %1764 = vrot.lane.b32.xlu1 %v7925_v35, %s7328_s5  ;;  %7089 = vset.pattern.permute.xlu0 %v7334_v47  ;;  %v8154_v2 = vpop.permute.xlu0 %961 }
 0x142   : > { %16292 = vst [vmem:[#allocation85_spill] sm:$0xff] %v8154_v2 }
 0x144   : > { %2082 = vrot.lane.b32.xlu0 %v7706_v36, %s7333_s27 }
 0x145   : > { %1768 = vrot.lane.b32.xlu1 %v8150_v52, %s7328_s5  ;;  %v8164_v53 = vpop.permute.xlu0 %965 }
 0x146   : > { %16294 = vst [vmem:[#allocation87_spill] sm:$0xff] %v8164_v53  ;;  %v7336_v53 = vmov 13  }
 0x148   : > { %2086 = vrot.lane.b32.xlu0 %v7716_v38, %s7333_s27 }
 0x149   : > { %1865 = vperm.xlu1 %7086, %v7938_v41  }
 0x14c   : > { %v8167_v47 = vpop.permute.xlu1 %986  ;;  %2090 = vrot.lane.b32.xlu0 %v7734_v43, %s7333_s27  ;;  %v8171_v2 = vpop.permute.xlu0 %1056  ;;  %v16542_v43 = vld [vmem:[#allocation61_spill] sm:$0xff] }
 0x14d   : > { %16295 = vst [vmem:[#allocation88_spill] sm:$0xff] %v8167_v47  ;;  %16296 = vst [vmem:[#allocation89_spill] sm:$0xff] %v8171_v2  ;;  %7087 = vset.pattern.permute.xlu1 %v7335_v1 }
 0x14e   : > { %1935 = vperm.xlu1 %7087, %v7938_v41  }
 0x150   : > { %2094 = vrot.lane.b32.xlu0 %v7744_v45, %s7333_s27 }
 0x151   : > { %v8176_v54 = vpop.permute.xlu1 %1126  ;;  %v8178_v42 = vpop.permute.xlu0 %1310 }
 0x152   : > { %16297 = vst [vmem:[#allocation90_spill] sm:$0xff] %v8176_v54  ;;  %16298 = vst [vmem:[#allocation91_spill] sm:$0xff] %v8178_v42  ;;  %2074 = vrot.lane.b32.xlu1 %v7677_v27, %s7333_s27 }
 0x153   : > { %7090 = vset.pattern.permute.xlu1 %v7336_v53 }
 0x154   : > { %2098 = vrot.lane.b32.xlu0 %v7755_v48, %s7333_s27 }
 0x156   : > { %2076 = vrot.lane.b32.xlu1 %v7680_v28, %s7333_s27  ;;  %v8186_v1 = vpop.permute.xlu1 %1196  ;;  %v8188_v2 = vpop.permute.xlu0 %1520 }
 0x157   : > { %16299 = vst [vmem:[#allocation92_spill] sm:$0xff] %v8186_v1  ;;  %16300 = vst [vmem:[#allocation93_spill] sm:$0xff] %v8188_v2 }
 0x158   : > { %2102 = vrot.lane.b32.xlu0 %v7765_v50, %s7333_s27 }
 0x15a   : > { %2080 = vrot.lane.b32.xlu1 %v7696_v33, %s7333_s27  ;;  %v8194_v42 = vpop.permute.xlu0 %1593 }
 0x15b   : > { %16301 = vst [vmem:[#allocation94_spill] sm:$0xff] %v8194_v42  ;;  %v8196_v54 = vpop.permute.xlu1 %1380 }
 0x15c   : > { %16302 = vst [vmem:[#allocation95_spill] sm:$0xff] %v8196_v54  ;;  %2106 = vrot.lane.b32.xlu0 %v7783_v55, %s7333_s27 }
 0x15e   : > { %2084 = vrot.lane.b32.xlu1 %v7709_v37, %s7333_s27  ;;  %v8202_v53 = vpop.permute.xlu0 %1597 }
 0x15f   : > { %16303 = vst [vmem:[#allocation96_spill] sm:$0xff] %v8202_v53 }
 0x160   : > { %v8204_v1 = vpop.permute.xlu1 %1450  ;;  %2110 = vrot.lane.b32.xlu0 %v7793_v57, %s7333_s27 }
 0x161   : > { %16304 = vst [vmem:[#allocation97_spill] sm:$0xff] %v8204_v1 }
 0x162   : > { %2088 = vrot.lane.b32.xlu1 %v7719_v39, %s7333_s27  ;;  %v8210_v2 = vpop.permute.xlu0 %1601 }
 0x163   : > { %16305 = vst [vmem:[#allocation98_spill] sm:$0xff] %v8210_v2 }
 0x164   : > { %v8212_v42 = vpop.permute.xlu1 %1589  ;;  %2114 = vrot.lane.b32.xlu0 %v7804_v60, %s7333_s27 }
 0x165   : > { %16306 = vst [vmem:[#allocation99_spill] sm:$0xff] %v8212_v42 }
 0x166   : > { %2092 = vrot.lane.b32.xlu1 %v7737_v44, %s7333_s27  ;;  %v8218_v54 = vpop.permute.xlu0 %1605 }
 0x167   : > { %16307 = vst [vmem:[#allocation100_spill] sm:$0xff] %v8218_v54 }
 0x168   : > { %v8220_v53 = vpop.permute.xlu1 %1591  ;;  %2118 = vrot.lane.b32.xlu0 %v7814_v62, %s7333_s27 }
 0x169   : > { %16308 = vst [vmem:[#allocation101_spill] sm:$0xff] %v8220_v53 }
 0x16a   : > { %2096 = vrot.lane.b32.xlu1 %v7747_v46, %s7333_s27  ;;  %v8226_v1 = vpop.permute.xlu0 %1609 }
 0x16b   : > { %16309 = vst [vmem:[#allocation102_spill] sm:$0xff] %v8226_v1 }
 0x16c   : > { %v8228_v2 = vpop.permute.xlu1 %1595  ;;  %2122 = vrot.lane.b32.xlu0 %v7833_v3, %s7333_s27  ;;  %v7337_v3 = vmov 15  }
 0x16d   : > { %16310 = vst [vmem:[#allocation103_spill] sm:$0xff] %v8228_v2 }
 0x16e   : > { %2100 = vrot.lane.b32.xlu1 %v7758_v49, %s7333_s27  ;;  %v8234_v42 = vpop.permute.xlu0 %1613 }
 0x16f   : > { %16311 = vst [vmem:[#allocation104_spill] sm:$0xff] %v8234_v42 }
 0x170   : > { %v8236_v54 = vpop.permute.xlu1 %1599  ;;  %2126 = vrot.lane.b32.xlu0 %v7843_v5, %s7333_s27 }
 0x171   : > { %16312 = vst [vmem:[#allocation105_spill] sm:$0xff] %v8236_v54 }
 0x172   : > { %2104 = vrot.lane.b32.xlu1 %v7768_v51, %s7333_s27  ;;  %v8242_v53 = vpop.permute.xlu0 %1617 }
 0x173   : > { %16313 = vst [vmem:[#allocation106_spill] sm:$0xff] %v8242_v53 }
 0x174   : > { %v8244_v1 = vpop.permute.xlu1 %1603  ;;  %2130 = vrot.lane.b32.xlu0 %v7854_v8, %s7333_s27 }
 0x175   : > { %16314 = vst [vmem:[#allocation107_spill] sm:$0xff] %v8244_v1 }
 0x176   : > { %2108 = vrot.lane.b32.xlu1 %v7786_v56, %s7333_s27  ;;  %v8250_v2 = vpop.permute.xlu0 %1621 }
 0x177   : > { %16315 = vst [vmem:[#allocation108_spill] sm:$0xff] %v8250_v2 }
 0x178   : > { %v8252_v42 = vpop.permute.xlu1 %1607  ;;  %2134 = vrot.lane.b32.xlu0 %v7864_v10, %s7333_s27 }
 0x179   : > { %16316 = vst [vmem:[#allocation109_spill] sm:$0xff] %v8252_v42 }
 0x17a   : > { %2112 = vrot.lane.b32.xlu1 %v7796_v58, %s7333_s27  ;;  %v8258_v54 = vpop.permute.xlu0 %1625 }
 0x17b   : > { %16317 = vst [vmem:[#allocation110_spill] sm:$0xff] %v8258_v54 }
 0x17c   : > { %v8260_v53 = vpop.permute.xlu1 %1611  ;;  %2215 = vrot.lane.b32.xlu0 %v7880_v13, %s7333_s27 }
 0x17d   : > { %16318 = vst [vmem:[#allocation111_spill] sm:$0xff] %v8260_v53 }
 0x17e   : > { %2116 = vrot.lane.b32.xlu1 %v7807_v61, %s7333_s27  ;;  %v8266_v1 = vpop.permute.xlu0 %1629 }
 0x17f   : > { %16319 = vst [vmem:[#allocation112_spill] sm:$0xff] %v8266_v1 }
 0x180   : > { %v8268_v2 = vpop.permute.xlu1 %1615  ;;  %2219 = vrot.lane.b32.xlu0 %v8080_v59, %s7333_s27 }
 0x181   : > { %16320 = vst [vmem:[#allocation113_spill] sm:$0xff] %v8268_v2 }
 0x182   : > { %2120 = vrot.lane.b32.xlu1 %v7817_v63, %s7333_s27  ;;  %v8274_v42 = vpop.permute.xlu0 %1633 }
 0x183   : > { %16321 = vst [vmem:[#allocation114_spill] sm:$0xff] %v8274_v42 }
 0x184   : > { %v8276_v54 = vpop.permute.xlu1 %1619  ;;  %2223 = vrot.lane.b32.xlu0 %v7895_v16, %s7333_s27 }
 0x185   : > { %16322 = vst [vmem:[#allocation115_spill] sm:$0xff] %v8276_v54 }
 0x186   : > { %2124 = vrot.lane.b32.xlu1 %v7836_v4, %s7333_s27  ;;  %v8282_v53 = vpop.permute.xlu0 %1637 }
 0x187   : > { %16323 = vst [vmem:[#allocation116_spill] sm:$0xff] %v8282_v53 }
 0x188   : > { %v8284_v1 = vpop.permute.xlu1 %1623  ;;  %2227 = vrot.lane.b32.xlu0 %v8126_v7, %s7333_s27 }
 0x189   : > { %16324 = vst [vmem:[#allocation117_spill] sm:$0xff] %v8284_v1 }
 0x18a   : > { %2128 = vrot.lane.b32.xlu1 %v7846_v6, %s7333_s27  ;;  %v8290_v2 = vpop.permute.xlu0 %1641 }
 0x18b   : > { %16325 = vst [vmem:[#allocation118_spill] sm:$0xff] %v8290_v2 }
 0x18c   : > { %v8292_v42 = vpop.permute.xlu1 %1627  ;;  %2231 = vrot.lane.b32.xlu0 %v7910_v22, %s7333_s27 }
 0x18d   : > { %16326 = vst [vmem:[#allocation119_spill] sm:$0xff] %v8292_v42 }
 0x18e   : > { %2132 = vrot.lane.b32.xlu1 %v7857_v9, %s7333_s27  ;;  %v8298_v54 = vpop.permute.xlu0 %1645 }
 0x18f   : > { %16327 = vst [vmem:[#allocation120_spill] sm:$0xff] %v8298_v54  ;;  %v8318_v54 = vrot.slane %v7872_v12, %v7662_v21 }
 0x190   : > { %v8300_v53 = vpop.permute.xlu1 %1631  ;;  %2235 = vrot.lane.b32.xlu0 %v8106_v0, %s7333_s27 }
 0x191   : > { %16328 = vst [vmem:[#allocation121_spill] sm:$0xff] %v8300_v53  ;;  %16332 = vst [vmem:[#allocation125_spill] sm:$0xff] %v8318_v54 }
 0x192   : > { %2136 = vrot.lane.b32.xlu1 %v7867_v11, %s7333_s27  ;;  %v8306_v1 = vpop.permute.xlu0 %1649 }
 0x193   : > { %16329 = vst [vmem:[#allocation122_spill] sm:$0xff] %v8306_v1 }
 0x194   : > { %v8308_v2 = vpop.permute.xlu1 %1635  ;;  %2239 = vrot.lane.b32.xlu0 %v7925_v35, %s7333_s27 }
 0x195   : > { %16330 = vst [vmem:[#allocation123_spill] sm:$0xff] %v8308_v2 }
 0x196   : > { %2217 = vrot.lane.b32.xlu1 %v7884_v14, %s7333_s27  ;;  %v8314_v42 = vpop.permute.xlu0 %1653 }
 0x197   : > { %16331 = vst [vmem:[#allocation124_spill] sm:$0xff] %v8314_v42 }
 0x198   : > { %v8320_v53 = vpop.permute.xlu1 %1639  ;;  %2243 = vrot.lane.b32.xlu0 %v8150_v52, %s7333_s27 }
 0x199   : > { %16333 = vst [vmem:[#allocation126_spill] sm:$0xff] %v8320_v53  ;;  %v8337_v53 = vrot.slane %v7887_v15, %v7662_v21 }
 0x19a   : > { %2221 = vrot.lane.b32.xlu1 %v8318_v54, %s7333_s27  ;;  %v8326_v1 = vpop.permute.xlu0 %1657 }
 0x19b   : > { %16334 = vst [vmem:[#allocation127_spill] sm:$0xff] %v8326_v1  ;;  %16337 = vst [vmem:[#allocation130_spill] sm:$0xff] %v8337_v53 }
 0x19c   : > { %v8328_v2 = vpop.permute.xlu1 %1643  ;;  %2280 = vperm.xlu0 %7089, %v7938_v41  }
 0x19d   : > { %16335 = vst [vmem:[#allocation128_spill] sm:$0xff] %v8328_v2 }
 0x19e   : > { %2225 = vrot.lane.b32.xlu1 %v7899_v17, %s7333_s27  ;;  %v8333_v42 = vpop.permute.xlu0 %1746 }
 0x19f   : > { %16336 = vst [vmem:[#allocation129_spill] sm:$0xff] %v8333_v42 }
 0x1a0   : > { %v8339_v47 = vpop.permute.xlu1 %1647  ;;  %7092 = vset.pattern.permute.xlu0 %v7337_v3  ;;  %v8356_v3 = vrot.slane %v7902_v18, %v7662_v21 }
 0x1a1   : > { %16338 = vst [vmem:[#allocation131_spill] sm:$0xff] %v8339_v47  ;;  %2490 = vperm.xlu0 %7092, %v7938_v41   ;;  %v7339_v47 = vmov 16  }
 0x1a2   : > { %2229 = vrot.lane.b32.xlu1 %v8337_v53, %s7333_s27  ;;  %v8344_v1 = vpop.permute.xlu0 %1750  ;;  %16342 = vst [vmem:[#allocation135_spill] sm:$0xff] %v8356_v3 }
 0x1a3   : > { %16339 = vst [vmem:[#allocation132_spill] sm:$0xff] %v8344_v1 }
 0x1a4   : > { %v8346_v2 = vpop.permute.xlu1 %1651 }
 0x1a5   : > { %16340 = vst [vmem:[#allocation133_spill] sm:$0xff] %v8346_v2  ;;  %2563 = vrot.lane.b32.xlu0 %v7696_v33, %s7338_s11 }
 0x1a6   : > { %2233 = vrot.lane.b32.xlu1 %v7914_v25, %s7333_s27  ;;  %v8352_v42 = vpop.permute.xlu0 %1754  ;;  %7093 = vset.pattern.permute.xlu0 %v7339_v47  ;;  %v8376_v47 = vrot.slane %v7917_v26, %v7662_v21 }
 0x1a7   : > { %16341 = vst [vmem:[#allocation134_spill] sm:$0xff] %v8352_v42 }
 0x1a8   : > { %v8358_v55 = vpop.permute.xlu1 %1655  ;;  %16347 = vst [vmem:[#allocation140_spill] sm:$0xff] %v8376_v47 }
 0x1a9   : > { %16343 = vst [vmem:[#allocation136_spill] sm:$0xff] %v8358_v55  ;;  %2567 = vrot.lane.b32.xlu0 %v7709_v37, %s7338_s11 }
 0x1aa   : > { %2237 = vrot.lane.b32.xlu1 %v8356_v3, %s7333_s27  ;;  %v8364_v1 = vpop.permute.xlu0 %1758 }
 0x1ab   : > { %16344 = vst [vmem:[#allocation137_spill] sm:$0xff] %v8364_v1 }
 0x1ac   : > { %v8366_v2 = vpop.permute.xlu1 %1659 }
 0x1ad   : > { %16345 = vst [vmem:[#allocation138_spill] sm:$0xff] %v8366_v2  ;;  %2571 = vrot.lane.b32.xlu0 %v7719_v39, %s7338_s11 }
 0x1ae   : > { %2241 = vrot.lane.b32.xlu1 %v7929_v40, %s7333_s27  ;;  %v8372_v42 = vpop.permute.xlu0 %1762 }
 0x1af   : > { %16346 = vst [vmem:[#allocation139_spill] sm:$0xff] %v8372_v42 }
 0x1b0   : > { %v8378_v55 = vpop.permute.xlu1 %1748 }
 0x1b1   : > { %16348 = vst [vmem:[#allocation141_spill] sm:$0xff] %v8378_v55  ;;  %2575 = vrot.lane.b32.xlu0 %v7744_v45, %s7338_s11  ;;  %v7340_v55 = vmov 14  }
 0x1b2   : > { %2245 = vrot.lane.b32.xlu1 %v8376_v47, %s7333_s27  ;;  %v8384_v2 = vpop.permute.xlu0 %1766 }
 0x1b3   : > { %16349 = vst [vmem:[#allocation142_spill] sm:$0xff] %v8384_v2 }
 0x1b4   : > { %v8386_v1 = vpop.permute.xlu1 %1752 }
 0x1b5   : > { %16350 = vst [vmem:[#allocation143_spill] sm:$0xff] %v8386_v1  ;;  %2579 = vrot.lane.b32.xlu0 %v7755_v48, %s7338_s11  ;;  %v7341_v1 = vmov 17  }
 0x1b6   : > { %2350 = vperm.xlu1 %7090, %v7938_v41   ;;  %v8391_v42 = vpop.permute.xlu0 %1795 }
 0x1b7   : > { %16351 = vst [vmem:[#allocation144_spill] sm:$0xff] %v8391_v42 }
 0x1b8   : > { %v8393_v21 = vpop.permute.xlu1 %1756 }
 0x1b9   : > { %16352 = vst [vmem:[#allocation145_spill] sm:$0xff] %v8393_v21  ;;  %2583 = vrot.lane.b32.xlu0 %v7765_v50, %s7338_s11 }
 0x1ba   : > { %7091 = vset.pattern.permute.xlu1 %v7340_v55 }
 0x1bb   : > { %2420 = vperm.xlu1 %7091, %v7938_v41   ;;  %v8398_v45 = vpop.permute.xlu0 %2005 }
 0x1bc   : > { %16353 = vst [vmem:[#allocation146_spill] sm:$0xff] %v8398_v45  ;;  %v8400_v2 = vpop.permute.xlu1 %1760 }
 0x1bd   : > { %16354 = vst [vmem:[#allocation147_spill] sm:$0xff] %v8400_v2  ;;  %2587 = vrot.lane.b32.xlu0 %v7786_v56, %s7338_s11 }
 0x1bf   : > { %2559 = vrot.lane.b32.xlu1 %v7680_v28, %s7338_s11  ;;  %v8406_v42 = vpop.permute.xlu0 %2078 }
 0x1c0   : > { %16355 = vst [vmem:[#allocation148_spill] sm:$0xff] %v8406_v42  ;;  %v8408_v21 = vpop.permute.xlu1 %1764  ;;  %7094 = vset.pattern.permute.xlu1 %v7341_v1 }
 0x1c1   : > { %16356 = vst [vmem:[#allocation149_spill] sm:$0xff] %v8408_v21  ;;  %2591 = vrot.lane.b32.xlu0 %v7796_v58, %s7338_s11 }
 0x1c3   : > { %2561 = vrot.lane.b32.xlu1 %v7693_v32, %s7338_s11  ;;  %v8414_v55 = vpop.permute.xlu0 %2082 }
 0x1c4   : > { %16357 = vst [vmem:[#allocation150_spill] sm:$0xff] %v8414_v55  ;;  %v8416_v2 = vpop.permute.xlu1 %1768 }
 0x1c5   : > { %16358 = vst [vmem:[#allocation151_spill] sm:$0xff] %v8416_v2  ;;  %2595 = vrot.lane.b32.xlu0 %v7807_v61, %s7338_s11 }
 0x1c7   : > { %2565 = vrot.lane.b32.xlu1 %v7706_v36, %s7338_s11  ;;  %v8422_v42 = vpop.permute.xlu0 %2086 }
 0x1c8   : > { %16359 = vst [vmem:[#allocation152_spill] sm:$0xff] %v8422_v42  ;;  %v8424_v45 = vpop.permute.xlu1 %1865 }
 0x1c9   : > { %16360 = vst [vmem:[#allocation153_spill] sm:$0xff] %v8424_v45  ;;  %2599 = vrot.lane.b32.xlu0 %v7817_v63, %s7338_s11 }
 0x1cb   : > { %2569 = vrot.lane.b32.xlu1 %v7716_v38, %s7338_s11  ;;  %v8430_v1 = vpop.permute.xlu0 %2090 }
 0x1cc   : > { %16361 = vst [vmem:[#allocation154_spill] sm:$0xff] %v8430_v1 }
 0x1cd   : > { %v8432_v55 = vpop.permute.xlu1 %1935  ;;  %2603 = vrot.lane.b32.xlu0 %v7843_v5, %s7338_s11 }
 0x1ce   : > { %16362 = vst [vmem:[#allocation155_spill] sm:$0xff] %v8432_v55 }
 0x1cf   : > { %2573 = vrot.lane.b32.xlu1 %v7737_v44, %s7338_s11  ;;  %v8438_v2 = vpop.permute.xlu0 %2094  ;;  %v16545_v44 = vld [vmem:[#allocation60_spill] sm:$0xff] }
 0x1d0   : > { %16363 = vst [vmem:[#allocation156_spill] sm:$0xff] %v8438_v2 }
 0x1d1   : > { %v8440_v42 = vpop.permute.xlu1 %2074  ;;  %2607 = vrot.lane.b32.xlu0 %v7854_v8, %s7338_s11 }
 0x1d2   : > { %16364 = vst [vmem:[#allocation157_spill] sm:$0xff] %v8440_v42 }
 0x1d3   : > { %2577 = vrot.lane.b32.xlu1 %v7747_v46, %s7338_s11  ;;  %v8446_v45 = vpop.permute.xlu0 %2098 }
 0x1d4   : > { %16365 = vst [vmem:[#allocation158_spill] sm:$0xff] %v8446_v45 }
 0x1d5   : > { %v8448_v1 = vpop.permute.xlu1 %2076  ;;  %2611 = vrot.lane.b32.xlu0 %v7864_v10, %s7338_s11 }
 0x1d6   : > { %16366 = vst [vmem:[#allocation159_spill] sm:$0xff] %v8448_v1  ;;  %v8470_v1 = vrot.slane %v7872_v12, %v7667_v23 }
 0x1d7   : > { %2581 = vrot.lane.b32.xlu1 %v7758_v49, %s7338_s11  ;;  %v8454_v55 = vpop.permute.xlu0 %2102 }
 0x1d8   : > { %16367 = vst [vmem:[#allocation160_spill] sm:$0xff] %v8454_v55  ;;  %16371 = vst [vmem:[#allocation164_spill] sm:$0xff] %v8470_v1 }
 0x1d9   : > { %v8456_v2 = vpop.permute.xlu1 %2080  ;;  %2684 = vrot.lane.b32.xlu0 %v7880_v13, %s7338_s11 }
 0x1da   : > { %16368 = vst [vmem:[#allocation161_spill] sm:$0xff] %v8456_v2 }
 0x1db   : > { %2585 = vrot.lane.b32.xlu1 %v7768_v51, %s7338_s11  ;;  %v8462_v42 = vpop.permute.xlu0 %2106 }
 0x1dc   : > { %16369 = vst [vmem:[#allocation162_spill] sm:$0xff] %v8462_v42 }
 0x1dd   : > { %v8464_v45 = vpop.permute.xlu1 %2084  ;;  %2688 = vrot.lane.b32.xlu0 %v8080_v59, %s7338_s11 }
 0x1de   : > { %16370 = vst [vmem:[#allocation163_spill] sm:$0xff] %v8464_v45 }
 0x1df   : > { %2589 = vrot.lane.b32.xlu1 %v7793_v57, %s7338_s11  ;;  %v8474_v55 = vpop.permute.xlu0 %2110 }
 0x1e0   : > { %16372 = vst [vmem:[#allocation165_spill] sm:$0xff] %v8474_v55 }
 0x1e1   : > { %v8476_v2 = vpop.permute.xlu1 %2088  ;;  %2692 = vrot.lane.b32.xlu0 %v8470_v1, %s7338_s11 }
 0x1e2   : > { %16373 = vst [vmem:[#allocation166_spill] sm:$0xff] %v8476_v2 }
 0x1e3   : > { %2593 = vrot.lane.b32.xlu1 %v7804_v60, %s7338_s11  ;;  %v8482_v42 = vpop.permute.xlu0 %2114 }
 0x1e4   : > { %16374 = vst [vmem:[#allocation167_spill] sm:$0xff] %v8482_v42 }
 0x1e5   : > { %v8484_v45 = vpop.permute.xlu1 %2092  ;;  %2696 = vrot.lane.b32.xlu0 %v7899_v17, %s7338_s11 }
 0x1e6   : > { %16375 = vst [vmem:[#allocation168_spill] sm:$0xff] %v8484_v45 }
 0x1e7   : > { %2597 = vrot.lane.b32.xlu1 %v7814_v62, %s7338_s11  ;;  %v8490_v21 = vpop.permute.xlu0 %2118 }
 0x1e8   : > { %16376 = vst [vmem:[#allocation169_spill] sm:$0xff] %v8490_v21 }
 0x1e9   : > { %v8492_v55 = vpop.permute.xlu1 %2096  ;;  %2700 = vrot.lane.b32.xlu0 %v8337_v53, %s7338_s11 }
 0x1ea   : > { %16377 = vst [vmem:[#allocation170_spill] sm:$0xff] %v8492_v55  ;;  %v8514_v55 = vrot.slane %v7902_v18, %v7667_v23 }
 0x1eb   : > { %2601 = vrot.lane.b32.xlu1 %v7836_v4, %s7338_s11  ;;  %v8498_v2 = vpop.permute.xlu0 %2122 }
 0x1ec   : > { %16378 = vst [vmem:[#allocation171_spill] sm:$0xff] %v8498_v2  ;;  %16382 = vst [vmem:[#allocation175_spill] sm:$0xff] %v8514_v55 }
 0x1ed   : > { %v8500_v42 = vpop.permute.xlu1 %2100  ;;  %2704 = vrot.lane.b32.xlu0 %v7910_v22, %s7338_s11 }
 0x1ee   : > { %16379 = vst [vmem:[#allocation172_spill] sm:$0xff] %v8500_v42 }
 0x1ef   : > { %2605 = vrot.lane.b32.xlu1 %v7846_v6, %s7338_s11  ;;  %v8506_v45 = vpop.permute.xlu0 %2126 }
 0x1f0   : > { %16380 = vst [vmem:[#allocation173_spill] sm:$0xff] %v8506_v45 }
 0x1f1   : > { %v8508_v21 = vpop.permute.xlu1 %2104  ;;  %2708 = vrot.lane.b32.xlu0 %v8106_v0, %s7338_s11 }
 0x1f2   : > { %16381 = vst [vmem:[#allocation174_spill] sm:$0xff] %v8508_v21 }
 0x1f3   : > { %2609 = vrot.lane.b32.xlu1 %v7857_v9, %s7338_s11  ;;  %v8518_v2 = vpop.permute.xlu0 %2130 }
 0x1f4   : > { %16383 = vst [vmem:[#allocation176_spill] sm:$0xff] %v8518_v2 }
 0x1f5   : > { %v8520_v42 = vpop.permute.xlu1 %2108  ;;  %2712 = vrot.lane.b32.xlu0 %v8514_v55, %s7338_s11 }
 0x1f6   : > { %16384 = vst [vmem:[#allocation177_spill] sm:$0xff] %v8520_v42 }
 0x1f7   : > { %2613 = vrot.lane.b32.xlu1 %v7867_v11, %s7338_s11  ;;  %v8526_v45 = vpop.permute.xlu0 %2134 }
 0x1f8   : > { %16385 = vst [vmem:[#allocation178_spill] sm:$0xff] %v8526_v45 }
 0x1f9   : > { %v8528_v21 = vpop.permute.xlu1 %2112  ;;  %2716 = vrot.lane.b32.xlu0 %v7929_v40, %s7338_s11 }
 0x1fa   : > { %16386 = vst [vmem:[#allocation179_spill] sm:$0xff] %v8528_v21 }
 0x1fb   : > { %2686 = vrot.lane.b32.xlu1 %v7884_v14, %s7338_s11  ;;  %v8534_v53 = vpop.permute.xlu0 %2215 }
 0x1fc   : > { %16387 = vst [vmem:[#allocation180_spill] sm:$0xff] %v8534_v53 }
 0x1fd   : > { %v8536_v2 = vpop.permute.xlu1 %2116  ;;  %2720 = vrot.lane.b32.xlu0 %v8376_v47, %s7338_s11 }
 0x1fe   : > { %16388 = vst [vmem:[#allocation181_spill] sm:$0xff] %v8536_v2  ;;  %v7342_v2 = vmov 19  }
 0x1ff   : > { %2690 = vrot.lane.b32.xlu1 %v8318_v54, %s7338_s11  ;;  %v8542_v42 = vpop.permute.xlu0 %2219  ;;  %v7343_v54 = vmov 22  }
 0x200   : > { %16389 = vst [vmem:[#allocation182_spill] sm:$0xff] %v8542_v42  ;;  %v8560_v42 = vrot.slane %v7887_v15, %v7667_v23 }
 0x201   : > { %v8544_v45 = vpop.permute.xlu1 %2120  ;;  %2765 = vperm.xlu0 %7093, %v7938_v41  }
 0x202   : > { %16390 = vst [vmem:[#allocation183_spill] sm:$0xff] %v8544_v45  ;;  %16394 = vst [vmem:[#allocation187_spill] sm:$0xff] %v8560_v42 }
 0x203   : > { %2694 = vrot.lane.b32.xlu1 %v7895_v16, %s7338_s11  ;;  %v8549_v21 = vpop.permute.xlu0 %2223 }
 0x204   : > { %16391 = vst [vmem:[#allocation184_spill] sm:$0xff] %v8549_v21 }
 0x205   : > { %v8551_v53 = vpop.permute.xlu1 %2124  ;;  %7096 = vset.pattern.permute.xlu0 %v7342_v2 }
 0x206   : > { %16392 = vst [vmem:[#allocation185_spill] sm:$0xff] %v8551_v53  ;;  %2975 = vperm.xlu0 %7096, %v7938_v41   ;;  %v8571_v53 = vrot.slane %v7872_v12, %v7682_v29 }
 0x207   : > { %2698 = vrot.lane.b32.xlu1 %v8126_v7, %s7338_s11  ;;  %v8556_v47 = vpop.permute.xlu0 %2227 }
 0x208   : > { %16393 = vst [vmem:[#allocation186_spill] sm:$0xff] %v8556_v47  ;;  %16397 = vst [vmem:[#allocation190_spill] sm:$0xff] %v8571_v53 }
 0x209   : > { %v8562_v45 = vpop.permute.xlu1 %2128 }
 0x20a   : > { %16395 = vst [vmem:[#allocation188_spill] sm:$0xff] %v8562_v45  ;;  %7099 = vset.pattern.permute.xlu0 %v7343_v54  ;;  %v7344_v45 = vmov 25  }
 0x20b   : > { %2702 = vrot.lane.b32.xlu1 %v8560_v42, %s7338_s11  ;;  %3133 = vperm.xlu0 %7099, %v7938_v41   ;;  %v8567_v2 = vpop.permute.xlu0 %2231 }
 0x20c   : > { %16396 = vst [vmem:[#allocation189_spill] sm:$0xff] %v8567_v2 }
 0x20d   : > { %v8573_v47 = vpop.permute.xlu1 %2132 }
 0x20e   : > { %16398 = vst [vmem:[#allocation191_spill] sm:$0xff] %v8573_v47  ;;  %v8591_v47 = vrot.slane %v7887_v15, %v7684_v30 }
 0x20f   : > { %2706 = vrot.lane.b32.xlu1 %v7914_v25, %s7338_s11  ;;  %3242 = vrot.lane.b32.xlu0 %v8571_v53, %s7333_s27  ;;  %v8579_v54 = vpop.permute.xlu0 %2235  ;;  %v7347_v53 = vmov 20  }
 0x210   : > { %16399 = vst [vmem:[#allocation192_spill] sm:$0xff] %v8579_v54  ;;  %7102 = vset.pattern.permute.xlu0 %v7344_v45  ;;  %16402 = vst [vmem:[#allocation195_spill] sm:$0xff] %v8591_v47  ;;  %v8603_v54 = vrot.slane %v7902_v18, %v7682_v29 }
 0x211   : > { %v8581_v21 = vpop.permute.xlu1 %2136 }
 0x212   : > { %16400 = vst [vmem:[#allocation193_spill] sm:$0xff] %v8581_v21  ;;  %16405 = vst [vmem:[#allocation198_spill] sm:$0xff] %v8603_v54 }
 0x213   : > { %2710 = vrot.lane.b32.xlu1 %v8356_v3, %s7338_s11  ;;  %3246 = vrot.lane.b32.xlu0 %v8560_v42, %s7333_s27  ;;  %v8587_v2 = vpop.permute.xlu0 %2239  ;;  %v7345_v42 = vmov 18  }
 0x214   : > { %16401 = vst [vmem:[#allocation194_spill] sm:$0xff] %v8587_v2 }
 0x215   : > { %v8593_v7 = vpop.permute.xlu1 %2217 }
 0x216   : > { %16403 = vst [vmem:[#allocation196_spill] sm:$0xff] %v8593_v7  ;;  %v8615_v7 = vrot.slane %v7917_v26, %v7667_v23 }
 0x217   : > { %2714 = vrot.lane.b32.xlu1 %v7925_v35, %s7338_s11  ;;  %3250 = vrot.lane.b32.xlu0 %v8591_v47, %s7333_s27  ;;  %v8599_v45 = vpop.permute.xlu0 %2243 }
 0x218   : > { %16404 = vst [vmem:[#allocation197_spill] sm:$0xff] %v8599_v45  ;;  %16408 = vst [vmem:[#allocation201_spill] sm:$0xff] %v8615_v7 }
 0x219   : > { %v8605_v21 = vpop.permute.xlu1 %2221 }
 0x21a   : > { %16406 = vst [vmem:[#allocation199_spill] sm:$0xff] %v8605_v21  ;;  %v8627_v21 = vrot.slane %v7917_v26, %v7684_v30 }
 0x21b   : > { %2718 = vrot.lane.b32.xlu1 %v8150_v52, %s7338_s11  ;;  %3254 = vrot.lane.b32.xlu0 %v8603_v54, %s7333_s27  ;;  %v8611_v2 = vpop.permute.xlu0 %2280 }
 0x21c   : > { %16407 = vst [vmem:[#allocation200_spill] sm:$0xff] %v8611_v2  ;;  %16411 = vst [vmem:[#allocation204_spill] sm:$0xff] %v8627_v21 }
 0x21d   : > { %v8617_v47 = vpop.permute.xlu1 %2225 }
 0x21e   : > { %16409 = vst [vmem:[#allocation202_spill] sm:$0xff] %v8617_v47 }
 0x21f   : > { %2722 = vrot.lane.b32.xlu1 %v8615_v7, %s7338_s11  ;;  %3258 = vrot.lane.b32.xlu0 %v8615_v7, %s7333_s27  ;;  %s9023_s11 = scalar_lea.vmem [#allocation2], %s8913_s26  ;;  %s7395_s26 = smov [#allocation6]  }
 0x220   : > { %v8623_v45 = vpop.permute.xlu0 %2490 }
 0x221   : > { %16410 = vst [vmem:[#allocation203_spill] sm:$0xff] %v8623_v45  ;;  %v8629_v54 = vpop.permute.xlu1 %2229 }
 0x222   : > { %16412 = vst [vmem:[#allocation205_spill] sm:$0xff] %v8629_v54  ;;  %v7346_v54 = vmov 28  }
 0x223   : > { %2835 = vperm.xlu1 %7094, %v7938_v41   ;;  %3262 = vrot.lane.b32.xlu0 %v8627_v21, %s7333_s27  ;;  %v7349_v21 = vmov 21  }
 0x224   : > { %v8634_v47 = vpop.permute.xlu0 %2563 }
 0x225   : > { %16413 = vst [vmem:[#allocation206_spill] sm:$0xff] %v8634_v47  ;;  %v8636_v2 = vpop.permute.xlu1 %2233 }
 0x226   : > { %16414 = vst [vmem:[#allocation207_spill] sm:$0xff] %v8636_v2  ;;  %v7348_v2 = vmov 31  }
 0x227   : > { %7095 = vset.pattern.permute.xlu1 %v7345_v42  ;;  %3327 = vperm.xlu0 %7102, %v7938_v41  }
 0x228   : > { %2905 = vperm.xlu1 %7095, %v7938_v41   ;;  %v8640_v45 = vpop.permute.xlu0 %2567 }
 0x229   : > { %16415 = vst [vmem:[#allocation208_spill] sm:$0xff] %v8640_v45  ;;  %v8642_v7 = vpop.permute.xlu1 %2237 }
 0x22a   : > { %16416 = vst [vmem:[#allocation209_spill] sm:$0xff] %v8642_v7  ;;  %v7351_v7 = vmov 23  }
 0x22b   : > { %7105 = vset.pattern.permute.xlu0 %v7346_v54 }
 0x22c   : > { %7097 = vset.pattern.permute.xlu1 %v7347_v53  ;;  %v8644_v3 = vpop.permute.xlu0 %2571  ;;  %3469 = vperm.xlu0 %7105, %v7938_v41  }
 0x22d   : > { %16417 = vst [vmem:[#allocation210_spill] sm:$0xff] %v8644_v3  ;;  %3057 = vperm.xlu1 %7097, %v7938_v41   ;;  %v8648_v47 = vpop.permute.xlu1 %2241  ;;  %v7350_v3 = vmov 34  }
 0x22e   : > { %16418 = vst [vmem:[#allocation211_spill] sm:$0xff] %v8648_v47 }
 0x230   : > { %v8650_v42 = vpop.permute.xlu0 %2575  ;;  %7108 = vset.pattern.permute.xlu0 %v7348_v2  ;;  %v7352_v2 = vmov 37  }
 0x231   : > { %16419 = vst [vmem:[#allocation212_spill] sm:$0xff] %v8650_v42  ;;  %7098 = vset.pattern.permute.xlu1 %v7349_v21  ;;  %v8652_v45 = vpop.permute.xlu1 %2245  ;;  %3583 = vperm.xlu0 %7108, %v7938_v41  }
 0x232   : > { %16420 = vst [vmem:[#allocation213_spill] sm:$0xff] %v8652_v45  ;;  %3095 = vperm.xlu1 %7098, %v7938_v41  }
 0x234   : > { %v8656_v53 = vpop.permute.xlu0 %2579 }
 0x235   : > { %16421 = vst [vmem:[#allocation214_spill] sm:$0xff] %v8656_v53  ;;  %v8658_v54 = vpop.permute.xlu1 %2350  ;;  %7111 = vset.pattern.permute.xlu0 %v7350_v3  ;;  %v8672_v3 = vrot.slane %v7872_v12, %v7684_v30 }
 0x236   : > { %16422 = vst [vmem:[#allocation215_spill] sm:$0xff] %v8658_v54  ;;  %7100 = vset.pattern.permute.xlu1 %v7351_v7  ;;  %3705 = vperm.xlu0 %7111, %v7938_v41  }
 0x237   : > { %3171 = vperm.xlu1 %7100, %v7938_v41   ;;  %16426 = vst [vmem:[#allocation219_spill] sm:$0xff] %v8672_v3 }
 0x238   : > { %v8661_v42 = vpop.permute.xlu0 %2583 }
 0x239   : > { %16423 = vst [vmem:[#allocation216_spill] sm:$0xff] %v8661_v42  ;;  %v7353_v42 = vmov 24  }
 0x23a   : > { %v8664_v21 = vpop.permute.xlu1 %2420  ;;  %7114 = vset.pattern.permute.xlu0 %v7352_v2  ;;  %v8683_v2 = vrot.slane %v7887_v15, %v7682_v29 }
 0x23b   : > { %16424 = vst [vmem:[#allocation217_spill] sm:$0xff] %v8664_v21  ;;  %3240 = vrot.lane.b32.xlu1 %v8470_v1, %s7333_s27  ;;  %3936 = vperm.xlu0 %7114, %v7938_v41  }
 0x23c   : > { %v8666_v45 = vpop.permute.xlu0 %2587  ;;  %7101 = vset.pattern.permute.xlu1 %v7353_v42  ;;  %16429 = vst [vmem:[#allocation222_spill] sm:$0xff] %v8683_v2 }
 0x23d   : > { %16425 = vst [vmem:[#allocation218_spill] sm:$0xff] %v8666_v45  ;;  %v8690_v45 = vld [vmem:[%s7869_s23 + $0x20] ss:$4 sm:$0x7] }
 0x23e   : > { %v8675_v7 = vpop.permute.xlu1 %2559  ;;  %v8702_v21 = vrot.slane %v8690_v45, %v7686_v31 }
 0x23f   : > { %16427 = vst [vmem:[#allocation220_spill] sm:$0xff] %v8675_v7  ;;  %3244 = vrot.lane.b32.xlu1 %v8672_v3, %s7333_s27  ;;  %4085 = vrot.lane.b32.xlu0 %v8470_v1, %s7354_s24  ;;  %v7355_v7 = vmov 40   ;;  %v8972_v1 = vrot.slane %v7910_v22, %v7686_v31  ;;  %v16506_v22 = vld [vmem:[#allocation41_spill] sm:$0xff] }
 0x240   : > { %v8677_v53 = vpop.permute.xlu0 %2591  ;;  %7117 = vset.pattern.permute.xlu0 %v7355_v7  ;;  %16433 = vst [vmem:[#allocation226_spill] sm:$0xff] %v8702_v21  ;;  %v8710_v7 = vrot.slane %v7902_v18, %v7684_v30  ;;  %v8853_v30 = vrot.slane %v7758_v49, %v7686_v31 }
 0x241   : > { %16428 = vst [vmem:[#allocation221_spill] sm:$0xff] %v8677_v53  ;;  %16500 = vst [vmem:[#allocation286_spill] sm:$0xff] %v8972_v1 }
 0x242   : > { %v8687_v12 = vpop.permute.xlu1 %2561  ;;  %16435 = vst [vmem:[#allocation228_spill] sm:$0xff] %v8710_v7  ;;  %16470 = vst [vmem:[#allocation260_spill] sm:$0xff] %v8853_v30  ;;  %v16536_v30 = vld [vmem:[#allocation52_spill] sm:$0xff] }
 0x243   : > { %16430 = vst [vmem:[#allocation223_spill] sm:$0xff] %v8687_v12  ;;  %3248 = vrot.lane.b32.xlu1 %v8683_v2, %s7333_s27  ;;  %4089 = vrot.lane.b32.xlu0 %v8672_v3, %s7354_s24 }
 0x244   : > { %v8692_v42 = vpop.permute.xlu0 %2595 }
 0x245   : > { %16431 = vst [vmem:[#allocation224_spill] sm:$0xff] %v8692_v42  ;;  %v8714_v42 = vrot.slane %v8690_v45, %v7660_v20 }
 0x246   : > { %v8698_v53 = vpop.permute.xlu1 %2565 }
 0x247   : > { %16432 = vst [vmem:[#allocation225_spill] sm:$0xff] %v8698_v53  ;;  %3252 = vrot.lane.b32.xlu1 %v8514_v55, %s7333_s27  ;;  %16436 = vst [vmem:[#allocation229_spill] sm:$0xff] %v8714_v42  ;;  %4093 = vrot.lane.b32.xlu0 %v8702_v21, %s7354_s24 }
 0x248   : > { %v8704_v54 = vpop.permute.xlu0 %2599 }
 0x249   : > { %16434 = vst [vmem:[#allocation227_spill] sm:$0xff] %v8704_v54  ;;  %v8726_v54 = vrot.slane %v7917_v26, %v7682_v29  ;;  %v8745_v26 = vld [vmem:[%s7869_s23 + $0x4c] ss:$4 sm:$0x7]  ;;  %v8943_v29 = vrot.slane %v7864_v10, %v7686_v31  ;;  %v8966_v10 = vrot.slane %v7899_v17, %v7686_v31 }
 0x24a   : > { %v8718_v53 = vpop.permute.xlu1 %2569 }
 0x24b   : > { %16437 = vst [vmem:[#allocation230_spill] sm:$0xff] %v8718_v53  ;;  %3256 = vrot.lane.b32.xlu1 %v8710_v7, %s7333_s27  ;;  %16439 = vst [vmem:[#allocation232_spill] sm:$0xff] %v8726_v54  ;;  %4097 = vrot.lane.b32.xlu0 %v8714_v42, %s7354_s24  ;;  %v8742_v53 = vrot.slane %v7887_v15, %v7698_v34  ;;  %v7356_v15 = vmov 26  }
 0x24c   : > { %v8720_v12 = vpop.permute.xlu0 %2603  ;;  %16492 = vst [vmem:[#allocation278_spill] sm:$0xff] %v8943_v29  ;;  %16498 = vst [vmem:[#allocation284_spill] sm:$0xff] %v8966_v10  ;;  %v16530_v10 = vld [vmem:[#allocation53_spill] sm:$0xff] }
 0x24d   : > { %16438 = vst [vmem:[#allocation231_spill] sm:$0xff] %v8720_v12  ;;  %16443 = vst [vmem:[#allocation236_spill] sm:$0xff] %v8742_v53 }
 0x24e   : > { %v8730_v18 = vpop.permute.xlu1 %2573 }
 0x24f   : > { %16440 = vst [vmem:[#allocation233_spill] sm:$0xff] %v8730_v18  ;;  %3260 = vrot.lane.b32.xlu1 %v8726_v54, %s7333_s27  ;;  %4101 = vrot.lane.b32.xlu0 %v8683_v2, %s7354_s24  ;;  %v8756_v18 = vrot.slane %v8745_v26, %v7658_v19  ;;  %s6882_s27 = smul.u32 22, %s7301_s19 }
 0x250   : > { %v8732_v47 = vpop.permute.xlu0 %2607 }
 0x251   : > { %16441 = vst [vmem:[#allocation234_spill] sm:$0xff] %v8732_v47  ;;  %16446 = vst [vmem:[#allocation239_spill] sm:$0xff] %v8756_v18 }
 0x252   : > { %v8738_v12 = vpop.permute.xlu1 %2577 }
 0x253   : > { %16442 = vst [vmem:[#allocation235_spill] sm:$0xff] %v8738_v12  ;;  %3289 = vperm.xlu1 %7101, %v7938_v41   ;;  %4105 = vrot.lane.b32.xlu0 %v8742_v53, %s7354_s24 }
 0x254   : > { %v8747_v21 = vpop.permute.xlu0 %2611 }
 0x255   : > { %16444 = vst [vmem:[#allocation237_spill] sm:$0xff] %v8747_v21 }
 0x256   : > { %v8752_v47 = vpop.permute.xlu1 %2581 }
 0x257   : > { %16445 = vst [vmem:[#allocation238_spill] sm:$0xff] %v8752_v47  ;;  %7103 = vset.pattern.permute.xlu1 %v7356_v15  ;;  %4109 = vrot.lane.b32.xlu0 %v8756_v18, %s7354_s24  ;;  %v7357_v47 = vmov 27   ;;  %v8773_v15 = vld [vmem:[%s7869_s23 + $0x78] ss:$4 sm:$0x7]  ;;  %v7358_v18 = vmov 29  }
 0x258   : > { %v8758_v12 = vpop.permute.xlu0 %2684  ;;  %3365 = vperm.xlu1 %7103, %v7938_v41   ;;  %16451 = vst [vmem:[#allocation244_spill] sm:$0xff] %v8773_v15 }
 0x259   : > { %16447 = vst [vmem:[#allocation240_spill] sm:$0xff] %v8758_v12 }
 0x25a   : > { %v8763_v21 = vpop.permute.xlu1 %2585 }
 0x25b   : > { %16448 = vst [vmem:[#allocation241_spill] sm:$0xff] %v8763_v21  ;;  %4113 = vrot.lane.b32.xlu0 %v8514_v55, %s7354_s24  ;;  %v7360_v55 = vmov 32  }
 0x25c   : > { %v8765_v42 = vpop.permute.xlu0 %2688  ;;  %7104 = vset.pattern.permute.xlu1 %v7357_v47 }
 0x25d   : > { %16449 = vst [vmem:[#allocation242_spill] sm:$0xff] %v8765_v42  ;;  %3403 = vperm.xlu1 %7104, %v7938_v41   ;;  %v8783_v42 = vrot.slane %v8773_v15, %v7686_v31 }
 0x25e   : > { %v8769_v53 = vpop.permute.xlu1 %2589 }
 0x25f   : > { %16450 = vst [vmem:[#allocation243_spill] sm:$0xff] %v8769_v53  ;;  %4117 = vrot.lane.b32.xlu0 %v8710_v7, %s7354_s24  ;;  %16454 = vst [vmem:[#allocation247_spill] sm:$0xff] %v8783_v42  ;;  %v8797_v7 = vrot.slane %v7693_v32, %v7686_v31  ;;  %v8813_v53 = vrot.slane %v7696_v33, %v7686_v31  ;;  %v8817_v32 = vrot.slane %v7706_v36, %v7686_v31  ;;  %v16543_v33 = vld [vmem:[#allocation58_spill] sm:$0xff] }
 0x260   : > { %v8775_v12 = vpop.permute.xlu0 %2692  ;;  %v8883_v36 = vrot.slane %v7796_v58, %v7686_v31 }
 0x261   : > { %16452 = vst [vmem:[#allocation245_spill] sm:$0xff] %v8775_v12  ;;  %7106 = vset.pattern.permute.xlu1 %v7358_v18  ;;  %16456 = vst [vmem:[#allocation249_spill] sm:$0xff] %v8797_v7  ;;  %v8801_v18 = vrot.slane %v8773_v15, %v7660_v20  ;;  %v8825_v12 = vrot.slane %v7716_v38, %v7686_v31  ;;  %v16466_v38 = vld [vmem:[#allocation20_spill] sm:$0xff]  ;;  %v16550_v15 = vld [vmem:[#allocation62_spill] sm:$0xff] }
 0x262   : > { %v8779_v21 = vpop.permute.xlu1 %2593  ;;  %3507 = vperm.xlu1 %7106, %v7938_v41   ;;  %16459 = vst [vmem:[#allocation252_spill] sm:$0xff] %v8813_v53  ;;  %16460 = vst [vmem:[#allocation253_spill] sm:$0xff] %v8817_v32  ;;  %v8841_v3 = vrot.slane %v16466_v38, %v7686_v31  ;;  %v8863_v38 = vrot.slane %v7768_v51, %v7686_v31  ;;  %v8879_v51 = vrot.slane %v7793_v57, %v7686_v31 }
 0x263   : > { %16453 = vst [vmem:[#allocation246_spill] sm:$0xff] %v8779_v21  ;;  %16457 = vst [vmem:[#allocation250_spill] sm:$0xff] %v8801_v18  ;;  %4121 = vrot.lane.b32.xlu0 %v8783_v42, %s7354_s24  ;;  %v8821_v21 = vrot.slane %v7709_v37, %v7686_v31  ;;  %v7359_v37 = vmov 30   ;;  %v8849_v42 = vrot.slane %v7755_v48, %v7686_v31  ;;  %v8899_v57 = vrot.slane %v7817_v63, %v7686_v31 }
 0x264   : > { %v8787_v47 = vpop.permute.xlu0 %2696  ;;  %16462 = vst [vmem:[#allocation255_spill] sm:$0xff] %v8825_v12  ;;  %16467 = vst [vmem:[#allocation20_spill] sm:$0xff] %v8841_v3  ;;  %v8917_v63 = vrot.slane %v7846_v6, %v7686_v31  ;;  %v16540_v3 = vld [vmem:[#allocation56_spill] sm:$0xff] }
 0x265   : > { %16455 = vst [vmem:[#allocation248_spill] sm:$0xff] %v8787_v47  ;;  %16461 = vst [vmem:[#allocation254_spill] sm:$0xff] %v8821_v21  ;;  %v16581_v21 = vld [vmem:[#allocation84_spill] sm:$0xff] }
 0x266   : > { %v8805_v47 = vpop.permute.xlu1 %2597  ;;  %7107 = vset.pattern.permute.xlu1 %v7359_v37  ;;  %16469 = vst [vmem:[#allocation259_spill] sm:$0xff] %v8849_v42  ;;  %v8859_v37 = vrot.slane %v7765_v50, %v7686_v31  ;;  %16472 = vst [vmem:[#allocation262_spill] sm:$0xff] %v8863_v38  ;;  %v16532_v38 = vld [vmem:[#allocation50_spill] sm:$0xff] }
 0x267   : > { %16458 = vst [vmem:[#allocation251_spill] sm:$0xff] %v8805_v47  ;;  %v8829_v47 = vrot.slane %v7719_v39, %v7686_v31  ;;  %v8845_v39 = vrot.slane %v7747_v46, %v7686_v31  ;;  %3545 = vperm.xlu1 %7107, %v7938_v41   ;;  %4125 = vrot.lane.b32.xlu0 %v8801_v18, %s7354_s24  ;;  %16476 = vst [vmem:[#allocation264_spill] sm:$0xff] %v8879_v51  ;;  %v16526_v51 = vld [vmem:[#allocation44_spill] sm:$0xff]  ;;  %v16528_v46 = vld [vmem:[#allocation51_spill] sm:$0xff] }
 0x268   : > { %v8837_v2 = vpop.permute.xlu0 %2700  ;;  %16471 = vst [vmem:[#allocation261_spill] sm:$0xff] %v8859_v37  ;;  %16477 = vst [vmem:[#allocation265_spill] sm:$0xff] %v8883_v36  ;;  %v8895_v41 = vrot.slane %v7814_v62, %v7686_v31  ;;  %v8911_v62 = vrot.slane %v7843_v5, %v7686_v31  ;;  %v8921_v18 = vrot.slane %v7854_v8, %v7686_v31  ;;  %v8928_v5 = vld [vmem:[%s15416_s1] sm:$0xff]  ;;  %v16521_v36 = vld [vmem:[#allocation42_spill] sm:$0xff] }
 0x269   : > { %16463 = vst [vmem:[#allocation256_spill] sm:$0xff] %v8829_v47  ;;  %16465 = vst [vmem:[#allocation257_spill] sm:$0xff] %v8837_v2  ;;  %v8887_v2 = vrot.slane %v7804_v60, %v7686_v31  ;;  %v8939_v8 = vrot.slane %v7857_v9, %v7686_v31  ;;  %v8962_v9 = vrot.slane %v7895_v16, %v7686_v31  ;;  %v16503_v16 = vld [vmem:[#allocation36_spill] sm:$0xff]  ;;  %v16533_v37 = vld [vmem:[#allocation55_spill] sm:$0xff] }
 0x26a   : > { %16468 = vst [vmem:[#allocation258_spill] sm:$0xff] %v8845_v39  ;;  %v8869_v48 = vpop.permute.xlu1 %2601  ;;  %16480 = vst [vmem:[#allocation268_spill] sm:$0xff] %v8895_v41  ;;  %v8995_v1 = vsel %vm838_vm1, %v16503_v16, %v16506_v22  ;;  %v16539_v39 = vld [vmem:[#allocation54_spill] sm:$0xff]  ;;  %v16565_v60 = vld [vmem:[#allocation69_spill] sm:$0xff] }
 0x26b   : > { %16474 = vst [vmem:[#allocation263_spill] sm:$0xff] %v8869_v48  ;;  %16478 = vst [vmem:[#allocation266_spill] sm:$0xff] %v8887_v2  ;;  %v8891_v48 = vrot.slane %v7807_v61, %v7686_v31  ;;  %7109 = vset.pattern.permute.xlu1 %v7360_v55  ;;  %4129 = vrot.lane.b32.xlu0 %v8726_v54, %s7354_s24  ;;  %v7146_v61 = vld [vmem:[%s7869_s23 + $0x84] ss:$4 sm:$0xff] }
 0x26c   : > { %16481 = vst [vmem:[#allocation269_spill] sm:$0xff] %v8899_v57  ;;  %v8901_v50 = vpop.permute.xlu0 %2704  ;;  %16485 = vst [vmem:[#allocation271_spill] sm:$0xff] %v8911_v62  ;;  %3621 = vperm.xlu1 %7109, %v8928_v5   ;;  %v8935_v6 = vrot.slane %v7146_v61, %v7698_v34  ;;  %v8950_v54 = vld [vmem:[%s7869_s23 + $0xa4] ss:$4 sm:$0x7]  ;;  %v8958_v61 = vrot.slane %v7884_v14, %v7686_v31  ;;  %v8980_v14 = vrot.slane %v7925_v35, %v7686_v31  ;;  %v16504_v57 = vld [vmem:[#allocation35_spill] sm:$0xff] }
 0x26d   : > { %16479 = vst [vmem:[#allocation267_spill] sm:$0xff] %v8891_v48  ;;  %16482 = vst [vmem:[#allocation270_spill] sm:$0xff] %v8901_v50  ;;  %v8947_v50 = vrot.slane %v7867_v11, %v7686_v31  ;;  %v8985_v17 = vsel %vm838_vm1, %v16504_v57, %v16503_v16  ;;  %v7361_v35 = vmov 33   ;;  %v9015_v16 = vrot.slane %v8106_v0, %v7686_v31  ;;  %v16520_v2 = vld [vmem:[#allocation45_spill] sm:$0xff] }
 0x26e   : > { %16486 = vst [vmem:[#allocation272_spill] sm:$0xff] %v8917_v63  ;;  %16487 = vst [vmem:[#allocation273_spill] sm:$0xff] %v8921_v18  ;;  %v8931_v55 = vpop.permute.xlu1 %2605  ;;  %v16554_v18 = vld [vmem:[#allocation64_spill] sm:$0xff]  ;;  %v7364_v63 = vmov 38   ;;  %v16577_v47 = vld [vmem:[#allocation81_spill] sm:$0xff] }
 0x26f   : > { %16488 = vst [vmem:[#allocation274_spill] sm:$0xff] %v8928_v5  ;;  %16489 = vst [vmem:[#allocation275_spill] sm:$0xff] %v8931_v55  ;;  %v8954_v55 = vrot.slane %v7880_v13, %v7686_v31  ;;  %v8976_v13 = vrot.slane %v7914_v25, %v7686_v31  ;;  %4133 = vrot.lane.b32.xlu0 %v8935_v6, %s7354_s24 }
 0x270   : > { %16490 = vst [vmem:[#allocation276_spill] sm:$0xff] %v8935_v6  ;;  %16491 = vst [vmem:[#allocation277_spill] sm:$0xff] %v8939_v8  ;;  %v8968_v11 = vpop.permute.xlu0 %2708  ;;  %7110 = vset.pattern.permute.xlu1 %v7361_v35  ;;  %v16512_v35 = vld [vmem:[#allocation77_spill] sm:$0xff]  ;;  %v16553_v8 = vld [vmem:[#allocation70_spill] sm:$0xff] }
 0x271   : > { %16493 = vst [vmem:[#allocation279_spill] sm:$0xff] %v8947_v50  ;;  %16494 = vst [vmem:[#allocation280_spill] sm:$0xff] %v8950_v54  ;;  %v9019_v6 = vrot.slane %v16512_v35, %v7686_v31  ;;  %3663 = vperm.xlu1 %7110, %v8928_v5   ;;  %v16551_v50 = vld [vmem:[#allocation68_spill] sm:$0xff] }
 0x272   : > { %16495 = vst [vmem:[#allocation281_spill] sm:$0xff] %v8954_v55  ;;  %16496 = vst [vmem:[#allocation282_spill] sm:$0xff] %v8958_v61  ;;  %v8999_v25 = vpop.permute.xlu1 %2609  ;;  %v16573_v61 = vld [vmem:[#allocation76_spill] sm:$0xff]  ;;  %v16575_v55 = vld [vmem:[#allocation75_spill] sm:$0xff] }
 0x273   : > { %16497 = vst [vmem:[#allocation283_spill] sm:$0xff] %v8962_v9  ;;  %16499 = vst [vmem:[#allocation285_spill] sm:$0xff] %v8968_v11  ;;  %v16505_v11 = vld [vmem:[#allocation39_spill] sm:$0xff] }
 0x274   : > { %16501 = vst [vmem:[#allocation287_spill] sm:$0xff] %v8976_v13  ;;  %16502 = vst [vmem:[#allocation288_spill] sm:$0xff] %v8980_v14  ;;  %v8990_v41 = vsel %vm838_vm1, %v16505_v11, %v16504_v57  ;;  %v9003_v13 = vrot.slane %v8950_v54, %v7658_v19  ;;  %v9007_v57 = vrot.slane %v7929_v40, %v7686_v31  ;;  %v16515_v40 = vld [vmem:[#allocation38_spill] sm:$0xff]  ;;  %v16522_v54 = vld [vmem:[#allocation47_spill] sm:$0xff] }
 0x275   : > { %16507 = vst [vmem:[#allocation36_spill] sm:$0xff] %v8999_v25  ;;  %v9011_v11 = vrot.slane %v8080_v59, %v7686_v31  ;;  %16511 = vst [vmem:[#allocation289_spill] sm:$0xff] %v9015_v16  ;;  %v9026_v25 = vld [vmem:[%s9023_s11] ss:$4 sm:$0xff]  ;;  %v9031_v59 = vsel %vm838_vm1, %v16506_v22, %v16515_v40  ;;  %v9068_v48 = vsel %vm838_vm1, %v16521_v36, %v16522_v54 }
 0x276   : > { %16508 = vst [vmem:[#allocation35_spill] sm:$0xff] %v9003_v13  ;;  %16509 = vst [vmem:[#allocation39_spill] sm:$0xff] %v9007_v57  ;;  %v16517_v16 = vld [vmem:[#allocation40_spill] sm:$0xff]  ;;  %4137 = vrot.lane.b32.xlu0 %v9003_v13, %s7354_s24  ;;  %v9072_v22 = vpop.permute.xlu1 %2613  ;;  %v7362_v13 = vmov 35   ;;  %v9136_v9 = vrot.slane %v9026_v25, %v7660_v20  ;;  %v9227_v57 = vsel %vm838_vm1, %v16550_v15, %v16551_v50 }
 0x277   : > { %16510 = vst [vmem:[#allocation41_spill] sm:$0xff] %v9011_v11  ;;  %16513 = vst [vmem:[#allocation290_spill] sm:$0xff] %v9019_v6  ;;  %v16516_v11 = vld [vmem:[#allocation43_spill] sm:$0xff]  ;;  %v9043_v6 = vpop.permute.xlu0 %2712  ;;  %7112 = vset.pattern.permute.xlu1 %v7362_v13 }
 0x278   : > { %16514 = vst [vmem:[#allocation291_spill] sm:$0xff] %v9026_v25  ;;  %v9036_v0 = vsel %vm838_vm1, %v16515_v40, %v16516_v11  ;;  %v9041_v35 = vsel %vm838_vm1, %v16516_v11, %v16517_v16  ;;  %16518 = vst [vmem:[#allocation38_spill] sm:$0xff] %v9043_v6  ;;  %v9053_v40 = vrot.slane %v8150_v52, %v7686_v31  ;;  %3747 = vperm.xlu1 %7112, %v8928_v5   ;;  %v9210_v14 = vld [vmem:[%s9023_s11 + $0x2c] ss:$4 sm:$0xff] }
 0x279   : > { %v9058_v11 = vsel %vm838_vm1, %v16517_v16, %v16520_v2  ;;  %v9063_v6 = vsel %vm838_vm1, %v16520_v2, %v16521_v36  ;;  %16523 = vst [vmem:[#allocation40_spill] sm:$0xff] %v9072_v22  ;;  %v9076_v52 = vrot.slane %v9026_v25, %v7686_v31  ;;  %v16525_v36 = vld [vmem:[#allocation49_spill] sm:$0xff]  ;;  %v16527_v22 = vld [vmem:[#allocation46_spill] sm:$0xff]  ;;  %v16529_v2 = vld [vmem:[#allocation48_spill] sm:$0xff] }
 0x27a   : > { %16519 = vst [vmem:[#allocation43_spill] sm:$0xff] %v9053_v40  ;;  %v9087_v56 = vsel %vm838_vm1, %v16526_v51, %v16525_v36  ;;  %v9092_v49 = vsel %vm838_vm1, %v16525_v36, %v16527_v22  ;;  %v9097_v16 = vsel %vm838_vm1, %v16527_v22, %v16528_v46  ;;  %v9102_v40 = vsel %vm838_vm1, %v16528_v46, %v16529_v2  ;;  %v9132_v22 = vpop.permute.xlu1 %2686  ;;  %v16538_v46 = vld [vmem:[#allocation59_spill] sm:$0xff] }
 0x27b   : > { %16524 = vst [vmem:[#allocation45_spill] sm:$0xff] %v9076_v52  ;;  %v9107_v51 = vsel %vm838_vm1, %v16529_v2, %v16530_v10  ;;  %v9110_v13 = vpop.permute.xlu0 %2716  ;;  %v9123_v2 = vsel %vm838_vm1, %v16530_v10, %v16532_v38  ;;  %4226 = vrot.lane.b32.xlu0 %v9076_v52, %s7354_s24  ;;  %16534 = vst [vmem:[#allocation47_spill] sm:$0xff] %v9132_v22  ;;  %v9149_v22 = vsel %vm838_vm1, %v16533_v37, %v16536_v30  ;;  %v16537_v52 = vld [vmem:[#allocation57_spill] sm:$0xff] }
 0x27c   : > { %16531 = vst [vmem:[#allocation42_spill] sm:$0xff] %v9110_v13  ;;  %v9128_v13 = vsel %vm838_vm1, %v16532_v38, %v16533_v37  ;;  %16535 = vst [vmem:[#allocation49_spill] sm:$0xff] %v9136_v9  ;;  %v9154_v42 = vsel %vm838_vm1, %v16536_v30, %v16537_v52  ;;  %v9159_v10 = vsel %vm838_vm1, %v16539_v39, %v16538_v46  ;;  %v7363_v38 = vmov 36  }
 0x27d   : > { %v9164_v36 = vsel %vm838_vm1, %v16538_v46, %v16540_v3  ;;  %7113 = vset.pattern.permute.xlu1 %v7363_v38  ;;  %v9175_v39 = vsel %vm838_vm1, %v16540_v3, %v16542_v43  ;;  %v9180_v46 = vsel %vm838_vm1, %v16542_v43, %v16543_v33  ;;  %v16544_v38 = vld [vmem:[#allocation63_spill] sm:$0xff]  ;;  %v9199_v43 = vrot.slane %v9026_v25, %v7667_v23 }
 0x27e   : > { %3886 = vperm.xlu1 %7113, %v8928_v5   ;;  %v9191_v30 = vsel %vm838_vm1, %v16544_v38, %v16545_v44  ;;  %v9195_v3 = vpop.permute.xlu1 %2690  ;;  %16548 = vst [vmem:[#allocation48_spill] sm:$0xff] %v9210_v14 }
 0x27f   : > { %v9166_v37 = vpop.permute.xlu0 %2720  ;;  %4230 = vrot.lane.b32.xlu0 %v9136_v9, %s7354_s24  ;;  %16546 = vst [vmem:[#allocation46_spill] sm:$0xff] %v9195_v3  ;;  %16547 = vst [vmem:[#allocation51_spill] sm:$0xff] %v9199_v43  ;;  %v16549_v3 = vld [vmem:[#allocation65_spill] sm:$0xff] }
 0x280   : > { %16541 = vst [vmem:[#allocation44_spill] sm:$0xff] %v9166_v37  ;;  %v9186_v37 = vsel %vm838_vm1, %v16543_v33, %v16544_v38  ;;  %v9217_v25 = vsel %vm838_vm1, %v16545_v44, %v16549_v3  ;;  %v9222_v33 = vsel %vm838_vm1, %v16549_v3, %v16550_v15  ;;  %v9240_v3 = vsel %vm838_vm1, %v16554_v18, %v16553_v8  ;;  %v16556_v15 = vld [vmem:[#allocation66_spill] sm:$0xff]  ;;  %v16558_v9 = vld [vmem:[#allocation125_spill] sm:$0xff] }
 0x281   : > { %16555 = vst [vmem:[#allocation50_spill] sm:$0xff] %v9240_v3  ;;  %v9249_v62 = vrot.slane %v16558_v9, %v7686_v31  ;;  %v9258_v18 = vrot.slane %v9210_v14, %v7658_v19  ;;  %v16562_v9 = vld [vmem:[#allocation130_spill] sm:$0xff] }
 0x282   : > { %7115 = vset.pattern.permute.xlu1 %v7364_v63  ;;  %v9254_v44 = vpop.permute.xlu1 %2694  ;;  %v9336_v3 = vld [vmem:[%s9023_s11 + $0x58] ss:$4 sm:$0xff] }
 0x283   : > { %v9229_v38 = vpop.permute.xlu0 %2765  ;;  %16559 = vst [vmem:[#allocation52_spill] sm:$0xff] %v9249_v62  ;;  %4234 = vrot.lane.b32.xlu0 %v9199_v43, %s7354_s24  ;;  %3986 = vperm.xlu1 %7115, %v8928_v5   ;;  %16560 = vst [vmem:[#allocation57_spill] sm:$0xff] %v9254_v44  ;;  %v9268_v62 = vrot.slane %v16562_v9, %v7686_v31  ;;  %v16564_v43 = vld [vmem:[#allocation72_spill] sm:$0xff] }
 0x284   : > { %16552 = vst [vmem:[#allocation53_spill] sm:$0xff] %v9229_v38  ;;  %v9245_v38 = vsel %vm838_vm1, %v16553_v8, %v16556_v15  ;;  %16561 = vst [vmem:[#allocation59_spill] sm:$0xff] %v9258_v18  ;;  %v9275_v4 = vsel %vm838_vm1, %v16556_v15, %v16564_v43  ;;  %v9280_v63 = vsel %vm838_vm1, %v16564_v43, %v16565_v60  ;;  %v16567_v8 = vld [vmem:[#allocation74_spill] sm:$0xff] }
 0x285   : > { %16557 = vst [vmem:[#allocation55_spill] sm:$0xff] %v9245_v38  ;;  %16563 = vst [vmem:[#allocation54_spill] sm:$0xff] %v9268_v62  ;;  %v9287_v9 = vsel %vm838_vm1, %v16565_v60, %v16567_v8  ;;  %v16569_v62 = vld [vmem:[#allocation71_spill] sm:$0xff]  ;;  %v16571_v15 = vld [vmem:[#allocation78_spill] sm:$0xff]  ;;  %v9307_v60 = vsel %vm838_vm1, %v16573_v61, %v16575_v55 }
 0x286   : > { %16566 = vst [vmem:[#allocation56_spill] sm:$0xff] %v9280_v63  ;;  %16568 = vst [vmem:[#allocation61_spill] sm:$0xff] %v9287_v9  ;;  %v9292_v44 = vsel %vm838_vm1, %v16567_v8, %v16569_v62  ;;  %v979_v58 = vsel %vm838_vm1, %v16522_v54, %v16571_v15  ;;  %v9302_v29 = vsel %vm838_vm1, %v16569_v62, %v16573_v61  ;;  %v9316_v54 = vpop.permute.xlu1 %2698  ;;  %v16582_v38 = vld [vmem:[#allocation135_spill] sm:$0xff]  ;;  %v16585_v63 = vld [vmem:[#allocation80_spill] sm:$0xff] }
 0x287   : > { %16570 = vst [vmem:[#allocation58_spill] sm:$0xff] %v9292_v44  ;;  %v9297_v43 = vpop.permute.xlu0 %2975  ;;  %16574 = vst [vmem:[#allocation60_spill] sm:$0xff] %v9302_v29  ;;  %v9312_v8 = vsel %vm838_vm1, %v16537_v52, %v16577_v47  ;;  %4238 = vrot.lane.b32.xlu0 %v9258_v18, %s7354_s24  ;;  %v9329_v52 = vsel %vm838_vm1, %v16551_v50, %v16581_v21  ;;  %v9333_v18 = vrot.slane %v16582_v38, %v7686_v31 }
 0x288   : > { %16572 = vst [vmem:[#allocation63_spill] sm:$0xff] %v9297_v43  ;;  %16576 = vst [vmem:[#allocation65_spill] sm:$0xff] %v9307_v60  ;;  %v16579_v43 = vld [vmem:[#allocation12_spill] sm:$0xff]  ;;  %v1028_v61 = vrot.slane %v979_v58, %v7686_v31  ;;  %v967_v50 = vsel %vm838_vm1, %v16571_v15, %v16585_v63  ;;  %v16588_v58 = vld [vmem:[#allocation79_spill] sm:$0xff]  ;;  %v16596_v29 = vrot.slane %v8990_v41, %v7686_v31 }
 0x289   : > { %16578 = vst [vmem:[#allocation62_spill] sm:$0xff] %v9316_v54  ;;  %v9320_v12 = vrot.slane %v9210_v14, %v16579_v43  ;;  %16583 = vst [vmem:[#allocation70_spill] sm:$0xff] %v9333_v18  ;;  %v7365_v54 = vmov 39   ;;  %v16586_v18 = vld [vmem:[#allocation140_spill] sm:$0xff]  ;;  %v9360_v63 = vsel %vm838_vm1, %v16575_v55, %v16588_v58  ;;  %v9372_v14 = vrot.slane %v9336_v3, %v7686_v31  ;;  %v16593_v60 = vld [vmem:[#allocation82_spill] sm:$0xff] }
 0x28a   : > { %7116 = vset.pattern.permute.xlu1 %v7365_v54  ;;  %16584 = vst [vmem:[#allocation64_spill] sm:$0xff] %v9336_v3  ;;  %v9355_v62 = vrot.slane %v16586_v18, %v7686_v31  ;;  %v9366_v54 = vpop.permute.xlu1 %2702  ;;  %v1032_v18 = vrot.slane %v967_v50, %v7686_v31  ;;  %v968_v15 = vsel %vm838_vm1, %v16577_v47, %v16593_v60  ;;  %v16599_v60 = vld [vmem:[#allocation190_spill] sm:$0xff] }
 0x28b   : > { %16580 = vst [vmem:[#allocation68_spill] sm:$0xff] %v9320_v12  ;;  %4036 = vperm.xlu1 %7116, %v8928_v5   ;;  %4242 = vrot.lane.b32.xlu0 %v9320_v12, %s7354_s24  ;;  %16589 = vst [vmem:[#allocation72_spill] sm:$0xff] %v9366_v54  ;;  %v9368_v38 = vpop.permute.xlu0 %3133  ;;  %v16594_v12 = vld [vmem:[#allocation85_spill] sm:$0xff]  ;;  %v16597_v50 = vrot.slane %v8985_v17, %v7686_v31  ;;  %v16598_v44 = vrot.slane %v8995_v1, %v7686_v31 }
 0x28c   : > { %16587 = vst [vmem:[#allocation66_spill] sm:$0xff] %v9355_v62  ;;  %16590 = vst [vmem:[#allocation69_spill] sm:$0xff] %v9368_v38  ;;  %v16592_v62 = vld [vmem:[#allocation86_spill] sm:$0xff]  ;;  %v9386_v54 = vsel %vm838_vm1, %v16581_v21, %v16594_v12  ;;  %v16595_v38 = vld [vmem:[#allocation88_spill] sm:$0xff]  ;;  %v16602_v17 = vrot.slane %v9036_v0, %v7686_v31  ;;  %v16603_v1 = vrot.slane %v9041_v35, %v7686_v31 }
 0x28d   : > { %16591 = vst [vmem:[#allocation74_spill] sm:$0xff] %v9372_v14  ;;  %v9378_v55 = vsel %vm838_vm1, %v16588_v58, %v16592_v62  ;;  %v1033_v5 = vmul.f32 %v16596_v29, %v16595_v38  ;;  %v1034_v58 = vmul.f32 %v16597_v50, %v16595_v38  ;;  %v1035_v47 = vmul.f32 %v16598_v44, %v16595_v38  ;;  %v7147_v21 = vld [vmem:[%s7869_s23] ss:$4 sm:$0xff] }
 0x28e   : > { %v9404_v12 = vrot.slane %v7147_v21, %v7698_v34  ;;  %v16601_v29 = vrot.slane %v9031_v59, %v7686_v31  ;;  %v1037_v50 = vmul.f32 %v16602_v17, %v16595_v38  ;;  %v1038_v44 = vmul.f32 %v16603_v1, %v16595_v38  ;;  %v9433_v1 = vpop.permute.xlu1 %2706 }
 0x28f   : > { %4087 = vrot.lane.b32.xlu1 %v16599_v60, %s7354_s24  ;;  %v16604_v21 = vrot.slane %v9058_v11, %v7686_v31  ;;  %v7366_v34 = vmov 41   ;;  %v16605_v59 = vrot.slane %v9063_v6, %v7686_v31  ;;  %v16606_v0 = vrot.slane %v9068_v48, %v7686_v31  ;;  %4246 = vrot.lane.b32.xlu0 %v9372_v14, %s7354_s24  ;;  %v9435_v11 = vpop.permute.xlu0 %3242  ;;  %v16610_v48 = vld [vmem:[#allocation87_spill] sm:$0xff] }
 0x290   : > { %16600 = vst [vmem:[#allocation71_spill] sm:$0xff] %v9404_v12  ;;  %v1036_v41 = vmul.f32 %v16601_v29, %v16595_v38  ;;  %7118 = vset.pattern.permute.xlu1 %v7366_v34  ;;  %v1042_v35 = vmul.f32 %v1028_v61, %v16595_v38  ;;  %16607 = vst [vmem:[#allocation78_spill] sm:$0xff] %v9433_v1  ;;  %v9439_v34 = vrot.slane %v9336_v3, %v7660_v20 }
 0x291   : > { %v1039_v60 = vmul.f32 %v16604_v21, %v16595_v38  ;;  %v1040_v29 = vmul.f32 %v16605_v59, %v16595_v38  ;;  %v1041_v17 = vmul.f32 %v16606_v0, %v16595_v38  ;;  %16608 = vst [vmem:[#allocation76_spill] sm:$0xff] %v9435_v11  ;;  %v1102_v6 = vrot.slane %v968_v15, %v7686_v31  ;;  %v16611_v0 = vld [vmem:[#allocation37_spill] sm:$0xff] }
 0x292   : > { %16609 = vst [vmem:[#allocation75_spill] sm:$0xff] %v9439_v34  ;;  %v9447_v61 = vsel %vm838_vm1, %v16592_v62, %v16610_v48  ;;  %v1043_v59 = vmul.f32 %v1032_v18, %v16595_v38  ;;  %v1044_v14 = vadd.f32 %v1033_v5, %v16611_v0  ;;  %v1045_v11 = vadd.f32 %v1034_v58, %v16611_v0 }
 0x293   : > { %v1046_v1 = vadd.f32 %v1035_v47, %v16611_v0  ;;  %v9455_v9 = vrot.slane %v8690_v45, %v7658_v19  ;;  %4091 = vrot.lane.b32.xlu1 %v9404_v12, %s7354_s24  ;;  %v1047_v15 = vadd.f32 %v1036_v41, %v16611_v0  ;;  %v1048_v62 = vadd.f32 %v1037_v50, %v16611_v0  ;;  %v9468_v45 = vpop.permute.xlu1 %2710  ;;  %v9470_v48 = vpop.permute.xlu0 %3246 }
 0x294   : > { %v1049_v38 = vadd.f32 %v1038_v44, %v16611_v0  ;;  %v1050_v5 = vadd.f32 %v1039_v60, %v16611_v0  ;;  %v1051_v18 = vadd.f32 %v1040_v29, %v16611_v0  ;;  %v1052_v58 = vadd.f32 %v1041_v17, %v16611_v0  ;;  %4250 = vrot.lane.b32.xlu0 %v9439_v34, %s7354_s24  ;;  %v16616_v60 = vld [vmem:[#allocation89_spill] sm:$0xff] }
 0x295   : > { %16612 = vst [vmem:[#allocation81_spill] sm:$0xff] %v9455_v9  ;;  %v1053_v47 = vadd.f32 %v1042_v35, %v16611_v0  ;;  %16613 = vst [vmem:[#allocation12_spill] sm:$0xff] %v9468_v45  ;;  %v9474_v41 = vrot.slane %v9336_v3, %v7667_v23  ;;  %v1054_v50 = vadd.f32 %v1043_v59, %v16611_v0 }
 0x296   : > { %16614 = vst [vmem:[#allocation84_spill] sm:$0xff] %v9470_v48  ;;  %v16617_v44 = vrot.slane %v9087_v56, %v7686_v31  ;;  %v16618_v17 = vrot.slane %v9092_v49, %v7686_v31  ;;  %v16619_v21 = vrot.slane %v9097_v16, %v7686_v31  ;;  %v9490_v48 = vld [vmem:[%s9023_s11 + $0x84] ss:$4 sm:$0xff]  ;;  %v16621_v59 = vrot.slane %v9102_v40, %v7686_v31 }
 0x297   : > { %16615 = vst [vmem:[#allocation80_spill] sm:$0xff] %v9474_v41  ;;  %16620 = vst [vmem:[#allocation79_spill] sm:$0xff] %v9490_v48  ;;  %v16622_v56 = vrot.slane %v9107_v51, %v7686_v31  ;;  %v16623_v49 = vrot.slane %v9123_v2, %v7686_v31  ;;  %v16624_v16 = vrot.slane %v9128_v13, %v7686_v31  ;;  %4095 = vrot.lane.b32.xlu1 %v9455_v9, %s7354_s24 }
 0x298   : > { %v1103_v29 = vmul.f32 %v16617_v44, %v16616_v60  ;;  %v1104_v35 = vmul.f32 %v16618_v17, %v16616_v60  ;;  %v1105_v34 = vmul.f32 %v16619_v21, %v16616_v60  ;;  %v1106_v0 = vmul.f32 %v16621_v59, %v16616_v60  ;;  %4254 = vrot.lane.b32.xlu0 %v9474_v41, %s7354_s24 }
 0x299   : > { %v1107_v44 = vmul.f32 %v16622_v56, %v16616_v60  ;;  %v1108_v17 = vmul.f32 %v16623_v49, %v16616_v60  ;;  %v1109_v21 = vmul.f32 %v16624_v16, %v16616_v60  ;;  %v16625_v40 = vrot.slane %v9149_v22, %v7686_v31  ;;  %v9525_v22 = vpop.permute.xlu1 %2714 }
 0x29a   : > { %v16626_v51 = vrot.slane %v9154_v42, %v7686_v31  ;;  %v16627_v2 = vrot.slane %v9312_v8, %v7686_v31  ;;  %v1113_v13 = vmul.f32 %v1102_v6, %v16616_v60  ;;  %v1114_v16 = vadd.f32 %v1103_v29, %v1044_v14  ;;  %16628 = vst [vmem:[#allocation86_spill] sm:$0xff] %v9525_v22 }
 0x29b   : > { %v1110_v59 = vmul.f32 %v16625_v40, %v16616_v60  ;;  %v1115_v45 = vadd.f32 %v1104_v35, %v1045_v11  ;;  %v1116_v3 = vadd.f32 %v1105_v34, %v1046_v1  ;;  %v9527_v40 = vpop.permute.xlu0 %3250  ;;  %v9531_v42 = vrot.slane %v9490_v48, %v7658_v19  ;;  %v16631_v11 = vld [vmem:[#allocation90_spill] sm:$0xff] }
 0x29c   : > { %v1111_v56 = vmul.f32 %v16626_v51, %v16616_v60  ;;  %v1112_v49 = vmul.f32 %v16627_v2, %v16616_v60  ;;  %16629 = vst [vmem:[#allocation82_spill] sm:$0xff] %v9527_v40  ;;  %v1117_v51 = vadd.f32 %v1106_v0, %v1047_v15  ;;  %v1118_v23 = vadd.f32 %v1107_v44, %v1048_v62  ;;  %v16633_v60 = vld [vmem:[#allocation187_spill] sm:$0xff] }
 0x29d   : > { %16630 = vst [vmem:[#allocation85_spill] sm:$0xff] %v9531_v42  ;;  %v1119_v8 = vadd.f32 %v1108_v17, %v1049_v38  ;;  %v1120_v2 = vadd.f32 %v1109_v21, %v1050_v5  ;;  %v1121_v9 = vadd.f32 %v1110_v59, %v1051_v18  ;;  %v16632_v1 = vrot.slane %v9159_v10, %v7686_v31 }
 0x29e   : > { %v1122_v6 = vadd.f32 %v1111_v56, %v1052_v58  ;;  %v1123_v14 = vadd.f32 %v1112_v49, %v1053_v47  ;;  %4099 = vrot.lane.b32.xlu1 %v16633_v60, %s7354_s24  ;;  %v16634_v29 = vrot.slane %v9164_v36, %v7686_v31  ;;  %v16635_v15 = vrot.slane %v9175_v39, %v7686_v31 }
 0x29f   : > { %v1173_v34 = vmul.f32 %v16632_v1, %v16631_v11  ;;  %v16636_v38 = vrot.slane %v9180_v46, %v7686_v31  ;;  %v16637_v10 = vrot.slane %v9186_v37, %v7686_v31  ;;  %v16638_v36 = vrot.slane %v9191_v30, %v7686_v31  ;;  %4258 = vrot.lane.b32.xlu0 %v9531_v42, %s7354_s24  ;;  %v9569_v37 = vpop.permute.xlu1 %2718  ;;  %v9571_v44 = vpop.permute.xlu0 %3254 }
 0x2a0   : > { %v1174_v35 = vmul.f32 %v16634_v29, %v16631_v11  ;;  %v1175_v62 = vmul.f32 %v16635_v15, %v16631_v11  ;;  %v16639_v39 = vrot.slane %v9217_v25, %v7686_v31  ;;  %v16640_v46 = vrot.slane %v9222_v33, %v7686_v31  ;;  %16641 = vst [vmem:[#allocation88_spill] sm:$0xff] %v9569_v37 }
 0x2a1   : > { %v1176_v5 = vmul.f32 %v16636_v38, %v16631_v11  ;;  %v1177_v18 = vmul.f32 %v16637_v10, %v16631_v11  ;;  %v1178_v58 = vmul.f32 %v16638_v36, %v16631_v11  ;;  %16642 = vst [vmem:[#allocation87_spill] sm:$0xff] %v9571_v44  ;;  %v9575_v30 = vrot.slane %v9490_v48, %v16579_v43 }
 0x2a2   : > { %v1179_v47 = vmul.f32 %v16639_v39, %v16631_v11  ;;  %v1180_v0 = vmul.f32 %v16640_v46, %v16631_v11  ;;  %v1124_v17 = vadd.f32 %v1113_v13, %v1054_v50  ;;  %v16644_v25 = vrot.slane %v9227_v57, %v7686_v31  ;;  %v16647_v13 = vld [vmem:[#allocation195_spill] sm:$0xff] }
 0x2a3   : > { %16643 = vst [vmem:[#allocation37_spill] sm:$0xff] %v9575_v30  ;;  %v16645_v33 = vrot.slane %v9329_v52, %v7686_v31  ;;  %v16646_v56 = vrot.slane %v9386_v54, %v7686_v31  ;;  %v1234_v1 = vrot.slane %v9360_v63, %v7686_v31  ;;  %v1238_v50 = vrot.slane %v9378_v55, %v7686_v31  ;;  %v9603_v55 = vpop.permute.xlu1 %2722 }
 0x2a4   : > { %v1181_v21 = vmul.f32 %v16644_v25, %v16631_v11  ;;  %v1242_v57 = vrot.slane %v9447_v61, %v7686_v31  ;;  %4103 = vrot.lane.b32.xlu1 %v16647_v13, %s7354_s24  ;;  %v9599_v52 = vrot.slane %v8745_v26, %v7686_v31  ;;  %v1184_v29 = vadd.f32 %v1173_v34, %v1114_v16  ;;  %v9605_v61 = vpop.permute.xlu0 %3258 }
 0x2a5   : > { %v1182_v59 = vmul.f32 %v16645_v33, %v16631_v11  ;;  %v1183_v49 = vmul.f32 %v16646_v56, %v16631_v11  ;;  %v1185_v15 = vadd.f32 %v1174_v35, %v1115_v45  ;;  %v1186_v54 = vadd.f32 %v1175_v62, %v1116_v3  ;;  %4262 = vrot.lane.b32.xlu0 %v9575_v30, %s7354_s24  ;;  %v16651_v33 = vld [vmem:[#allocation91_spill] sm:$0xff]  ;;  %v16666_v56 = vld [vmem:[#allocation58_spill] sm:$0xff] }
 0x2a6   : > { %16648 = vst [vmem:[#allocation89_spill] sm:$0xff] %v9599_v52  ;;  %v1187_v11 = vadd.f32 %v1176_v5, %v1117_v51  ;;  %v1188_v38 = vadd.f32 %v1177_v18, %v1118_v23  ;;  %v1189_v10 = vadd.f32 %v1178_v58, %v1119_v8  ;;  %v1190_v63 = vadd.f32 %v1179_v47, %v1120_v2  ;;  %v16660_v5 = vld [vmem:[#allocation55_spill] sm:$0xff]  ;;  %v16662_v58 = vld [vmem:[#allocation56_spill] sm:$0xff] }
 0x2a7   : > { %v1191_v36 = vadd.f32 %v1180_v0, %v1121_v9  ;;  %16649 = vst [vmem:[#allocation90_spill] sm:$0xff] %v9603_v55  ;;  %16650 = vst [vmem:[#allocation292_spill] sm:$0xff] %v9605_v61  ;;  %v1192_v39 = vadd.f32 %v1181_v21, %v1122_v6  ;;  %v1193_v46 = vadd.f32 %v1182_v59, %v1123_v14  ;;  %v16656_v6 = vld [vmem:[#allocation92_spill] sm:$0xff]  ;;  %v16657_v14 = vld [vmem:[#allocation50_spill] sm:$0xff] }
 0x2a8   : > { %v1194_v25 = vadd.f32 %v1183_v49, %v1124_v17  ;;  %v16652_v45 = vrot.slane %v7670_v24, %v7686_v31  ;;  %v16653_v23 = vrot.slane %v7677_v27, %v7686_v31  ;;  %v16654_v16 = vrot.slane %v7680_v28, %v7686_v31  ;;  %4107 = vrot.lane.b32.xlu1 %v9599_v52, %s7354_s24  ;;  %v16664_v17 = vld [vmem:[#allocation61_spill] sm:$0xff] }
 0x2a9   : > { %v1360_v8 = vmul.f32 %v8797_v7, %v16651_v33  ;;  %v9625_v24 = vrot.slane %v8745_v26, %v7660_v20  ;;  %v1361_v2 = vmul.f32 %v8813_v53, %v16651_v33  ;;  %v1362_v27 = vmul.f32 %v8817_v32, %v16651_v33 }
 0x2aa   : > { %v1357_v3 = vmul.f32 %v16652_v45, %v16651_v33  ;;  %v1358_v9 = vmul.f32 %v16653_v23, %v16651_v33  ;;  %v1359_v51 = vmul.f32 %v16654_v16, %v16651_v33  ;;  %v16658_v28 = vrot.slane %v16657_v14, %v7686_v31  ;;  %v16668_v45 = vld [vmem:[#allocation274_spill] sm:$0xff]  ;;  %v9656_v23 = vpop.permute.xlu1 %2835  ;;  %v9658_v16 = vpop.permute.xlu0 %3262  ;;  %v16671_v14 = vld [vmem:[#allocation60_spill] sm:$0xff] }
 0x2ab   : > { %16655 = vst [vmem:[#allocation91_spill] sm:$0xff] %v9625_v24  ;;  %v16659_v35 = vrot.slane %v9275_v4, %v7686_v31  ;;  %v16661_v26 = vrot.slane %v16660_v5, %v7686_v31  ;;  %v16663_v47 = vrot.slane %v16662_v58, %v7686_v31  ;;  %v16665_v21 = vrot.slane %v16664_v17, %v7686_v31  ;;  %v16673_v5 = vld [vmem:[#allocation65_spill] sm:$0xff]  ;;  %v16675_v17 = vld [vmem:[#allocation254_spill] sm:$0xff] }
 0x2ac   : > { %v1243_v34 = vmul.f32 %v16658_v28, %v16656_v6  ;;  %v16667_v4 = vrot.slane %v16666_v56, %v7686_v31  ;;  %4307 = vperm.xlu0 %7117, %v16668_v45   ;;  %16669 = vst [vmem:[#allocation92_spill] sm:$0xff] %v9656_v23  ;;  %16670 = vst [vmem:[#allocation50_spill] sm:$0xff] %v9658_v16  ;;  %v16672_v28 = vrot.slane %v16671_v14, %v7686_v31  ;;  %v16676_v56 = vld [vmem:[#allocation255_spill] sm:$0xff]  ;;  %v16677_v14 = vld [vmem:[#allocation256_spill] sm:$0xff]  ;;  %v7367_v53 = vmov 43  }
 0x2ad   : > { %v1245_v62 = vmul.f32 %v16659_v35, %v16656_v6  ;;  %v1244_v18 = vmul.f32 %v16661_v26, %v16656_v6  ;;  %v1246_v0 = vmul.f32 %v16663_v47, %v16656_v6  ;;  %v1247_v59 = vmul.f32 %v16665_v21, %v16656_v6  ;;  %4111 = vrot.lane.b32.xlu1 %v9625_v24, %s7354_s24  ;;  %v16722_v23 = vld [vmem:[#allocation21_spill] sm:$0xff] }
 0x2ae   : > { %v1248_v49 = vmul.f32 %v16667_v4, %v16656_v6  ;;  %v1249_v35 = vmul.f32 %v16672_v28, %v16656_v6  ;;  %v16674_v26 = vrot.slane %v16673_v5, %v7686_v31  ;;  %v1251_v47 = vmul.f32 %v1234_v1, %v16656_v6  ;;  %v16678_v5 = vld [vmem:[#allocation281_spill] sm:$0xff]  ;;  %v16679_v1 = vld [vmem:[#allocation282_spill] sm:$0xff] }
 0x2af   : > { %v1363_v21 = vmul.f32 %v16675_v17, %v16651_v33  ;;  %v1364_v4 = vmul.f32 %v16676_v56, %v16651_v33  ;;  %v1252_v16 = vmul.f32 %v1238_v50, %v16656_v6  ;;  %v1253_v44 = vmul.f32 %v1242_v57, %v16656_v6 }
 0x2b0   : > { %v1250_v58 = vmul.f32 %v16674_v26, %v16656_v6  ;;  %v1365_v28 = vmul.f32 %v16677_v14, %v16651_v33  ;;  %v1366_v26 = vmul.f32 %v16678_v5, %v16651_v33  ;;  %v1367_v40 = vmul.f32 %v16679_v1, %v16651_v33  ;;  %7120 = vset.pattern.permute.xlu0 %v7367_v53  ;;  %v9684_v14 = vpop.permute.xlu1 %2905  ;;  %v16681_v33 = vld [vmem:[#allocation198_spill] sm:$0xff] }
 0x2b1   : > { %v1256_v42 = vadd.f32 %v1245_v62, %v1186_v54  ;;  %v1254_v17 = vadd.f32 %v1243_v34, %v1184_v29  ;;  %v1255_v56 = vadd.f32 %v1244_v18, %v1185_v15  ;;  %v1257_v32 = vadd.f32 %v1246_v0, %v1187_v11  ;;  %4517 = vperm.xlu0 %7120, %v16668_v45   ;;  %v9688_v29 = vpop.permute.xlu0 %3327  ;;  %v7148_v15 = vld [vmem:[%s7869_s23 + $0x58] ss:$4 sm:$0xff]  ;;  %s7369_s23 = smov 8  }
 0x2b2   : > { %v1258_v50 = vadd.f32 %v1247_v59, %v1188_v38  ;;  %v1259_v57 = vadd.f32 %v1248_v49, %v1189_v10  ;;  %v1260_v6 = vadd.f32 %v1249_v35, %v1190_v63  ;;  %v1261_v7 = vadd.f32 %v1250_v58, %v1191_v36  ;;  %16680 = vst [vmem:[#allocation55_spill] sm:$0xff] %v9684_v14  ;;  %v16683_v54 = vld [vmem:[#allocation16_spill] sm:$0xff]  ;;  %v16685_v38 = vld [vmem:[#allocation93_spill] sm:$0xff]  ;;  %v16696_v58 = vld [vmem:[#allocation278_spill] sm:$0xff] }
 0x2b3   : > { %v1262_v41 = vadd.f32 %v1251_v47, %v1192_v39  ;;  %v1263_v5 = vadd.f32 %v1252_v16, %v1193_v46  ;;  %v1264_v61 = vadd.f32 %v1253_v44, %v1194_v25  ;;  %4115 = vrot.lane.b32.xlu1 %v16681_v33, %s7354_s24  ;;  %16682 = vst [vmem:[#allocation56_spill] sm:$0xff] %v9688_v29  ;;  %v16686_v10 = vld [vmem:[#allocation24_spill] sm:$0xff]  ;;  %v16688_v39 = vld [vmem:[#allocation25_spill] sm:$0xff]  ;;  %v16690_v25 = vld [vmem:[#allocation26_spill] sm:$0xff] }
 0x2b4   : > { %v9692_v11 = vrot.slane %v7148_v15, %v16683_v54  ;;  %v1370_v53 = vadd.f32 %v1359_v51, %v1256_v42  ;;  %v16687_v63 = vrot.slane %v16686_v10, %v7686_v31  ;;  %v16689_v44 = vrot.slane %v16688_v39, %v7686_v31  ;;  %v16692_v42 = vld [vmem:[#allocation271_spill] sm:$0xff]  ;;  %v16693_v18 = vld [vmem:[#allocation272_spill] sm:$0xff]  ;;  %v16694_v59 = vld [vmem:[#allocation273_spill] sm:$0xff] }
 0x2b5   : > { %v16691_v34 = vrot.slane %v16690_v25, %v7686_v31  ;;  %v9714_v51 = vmul.f32 %v16692_v42, %v16685_v38  ;;  %v9718_v0 = vmul.f32 %v16693_v18, %v16685_v38  ;;  %v9722_v49 = vmul.f32 %v16694_v59, %v16685_v38  ;;  %v16695_v16 = vld [vmem:[#allocation277_spill] sm:$0xff]  ;;  %v16697_v15 = vld [vmem:[#allocation279_spill] sm:$0xff] }
 0x2b6   : > { %16684 = vst [vmem:[#allocation61_spill] sm:$0xff] %v9692_v11  ;;  %v9698_v36 = vmul.f32 %v16687_v63, %v16685_v38  ;;  %v9704_v46 = vmul.f32 %v16689_v44, %v16685_v38  ;;  %v9726_v35 = vmul.f32 %v16695_v16, %v16685_v38  ;;  %v9730_v47 = vmul.f32 %v16696_v58, %v16685_v38  ;;  %v16698_v63 = vld [vmem:[#allocation288_spill] sm:$0xff]  ;;  %v16699_v44 = vld [vmem:[#allocation39_spill] sm:$0xff]  ;;  %v16705_v14 = vld [vmem:[#allocation17_spill] sm:$0xff] }
 0x2b7   : > { %v9710_v62 = vmul.f32 %v16691_v34, %v16685_v38  ;;  %v9734_v10 = vmul.f32 %v16697_v15, %v16685_v38  ;;  %v9738_v39 = vmul.f32 %v16698_v63, %v16685_v38  ;;  %v9742_v25 = vmul.f32 %v16699_v44, %v16685_v38  ;;  %v16700_v58 = vld [vmem:[#allocation244_spill] sm:$0xff]  ;;  %4119 = vrot.lane.b32.xlu1 %v9692_v11, %s7354_s24  ;;  %v9750_v15 = vpop.permute.xlu1 %3057  ;;  %v9752_v63 = vpop.permute.xlu0 %3469  ;;  %v16704_v44 = vld [vmem:[#allocation95_spill] sm:$0xff] }
 0x2b8   : > { %v7368_v34 = vmov 46   ;;  %v1368_v59 = vadd.f32 %v1357_v3, %v1254_v17  ;;  %v1369_v18 = vadd.f32 %v1358_v9, %v1255_v56  ;;  %v1371_v42 = vadd.f32 %v1360_v8, %v1257_v32  ;;  %16702 = vst [vmem:[#allocation274_spill] sm:$0xff] %v9750_v15  ;;  %16703 = vst [vmem:[#allocation60_spill] sm:$0xff] %v9752_v63  ;;  %v16707_v32 = vld [vmem:[#allocation18_spill] sm:$0xff]  ;;  %v16709_v56 = vld [vmem:[#allocation19_spill] sm:$0xff] }
 0x2b9   : > { %7123 = vset.pattern.permute.xlu0 %v7368_v34  ;;  %v9746_v16 = vrot.slane %v16700_v58, %v7658_v19  ;;  %v1372_v1 = vadd.f32 %v1361_v2, %v1258_v50  ;;  %v1373_v29 = vadd.f32 %v1362_v27, %v1259_v57  ;;  %v1374_v38 = vadd.f32 %v1363_v21, %v1260_v6  ;;  %v16711_v2 = vld [vmem:[#allocation20_spill] sm:$0xff]  ;;  %v16712_v21 = vld [vmem:[#allocation258_spill] sm:$0xff] }
 0x2ba   : > { %v16706_v3 = vrot.slane %v16705_v14, %v7686_v31  ;;  %4691 = vperm.xlu0 %7123, %v16668_v45   ;;  %v16708_v8 = vrot.slane %v16707_v32, %v7686_v31  ;;  %v16710_v58 = vrot.slane %v16709_v56, %v7686_v31  ;;  %v1430_v27 = vmul.f32 %v16711_v2, %v16704_v44  ;;  %v16713_v45 = vld [vmem:[#allocation259_spill] sm:$0xff]  ;;  %v16715_v56 = vld [vmem:[#allocation261_spill] sm:$0xff]  ;;  %v16716_v2 = vld [vmem:[#allocation262_spill] sm:$0xff] }
 0x2bb   : > { %16701 = vst [vmem:[#allocation58_spill] sm:$0xff] %v9746_v16  ;;  %v1431_v50 = vmul.f32 %v16712_v21, %v16704_v44  ;;  %v1375_v14 = vadd.f32 %v1364_v4, %v1261_v7  ;;  %v1376_v57 = vadd.f32 %v1365_v28, %v1262_v41  ;;  %v1432_v6 = vmul.f32 %v16713_v45, %v16704_v44  ;;  %v16717_v7 = vld [vmem:[#allocation283_spill] sm:$0xff]  ;;  %v16718_v4 = vld [vmem:[#allocation284_spill] sm:$0xff]  ;;  %v9789_v45 = vpop.permute.xlu1 %3095 }
 0x2bc   : > { %v1427_v9 = vmul.f32 %v16706_v3, %v16704_v44  ;;  %v1428_v17 = vmul.f32 %v16708_v8, %v16704_v44  ;;  %v1429_v34 = vmul.f32 %v16710_v58, %v16704_v44  ;;  %v1377_v3 = vadd.f32 %v1366_v26, %v1263_v5  ;;  %v16714_v8 = vld [vmem:[#allocation260_spill] sm:$0xff]  ;;  %4123 = vrot.lane.b32.xlu1 %v9746_v16, %s7354_s24 }
 0x2bd   : > { %v1378_v32 = vadd.f32 %v1367_v40, %v1264_v61  ;;  %v1433_v63 = vmul.f32 %v16714_v8, %v16704_v44  ;;  %v1434_v58 = vmul.f32 %v16715_v56, %v16704_v44  ;;  %v1435_v21 = vmul.f32 %v16716_v2, %v16704_v44  ;;  %v9787_v40 = vpop.permute.xlu0 %3583  ;;  %16720 = vst [vmem:[#allocation93_spill] sm:$0xff] %v9789_v45 }
 0x2be   : > { %v1436_v41 = vmul.f32 %v16717_v7, %v16704_v44  ;;  %v1437_v28 = vmul.f32 %v16718_v4, %v16704_v44  ;;  %v1438_v5 = vadd.f32 %v1427_v9, %v1368_v59  ;;  %4768 = vrot.lane.b32.xlu0 %v9404_v12, %s7369_s23  ;;  %16719 = vst [vmem:[#allocation65_spill] sm:$0xff] %v9787_v40  ;;  %v7370_v2 = vmov 49   ;;  %v16721_v7 = vld [vmem:[#allocation97_spill] sm:$0xff]  ;;  %v16724_v9 = vld [vmem:[#allocation22_spill] sm:$0xff] }
 0x2bf   : > { %v1439_v61 = vadd.f32 %v1428_v17, %v1369_v18  ;;  %v1440_v26 = vadd.f32 %v1429_v34, %v1370_v53  ;;  %v1441_v56 = vadd.f32 %v1430_v27, %v1371_v42  ;;  %v1442_v8 = vadd.f32 %v1431_v50, %v1372_v1  ;;  %7126 = vset.pattern.permute.xlu0 %v7370_v2  ;;  %v16726_v18 = vld [vmem:[#allocation23_spill] sm:$0xff]  ;;  %v16728_v17 = vld [vmem:[#allocation264_spill] sm:$0xff]  ;;  %v16731_v50 = vld [vmem:[#allocation201_spill] sm:$0xff] }
 0x2c0   : > { %v1443_v15 = vadd.f32 %v1432_v6, %v1373_v29  ;;  %v16723_v44 = vrot.slane %v16722_v23, %v7686_v31  ;;  %v16725_v4 = vrot.slane %v16724_v9, %v7686_v31  ;;  %v16727_v53 = vrot.slane %v16726_v18, %v7686_v31  ;;  %v16729_v29 = vld [vmem:[#allocation265_spill] sm:$0xff]  ;;  %v16730_v23 = vld [vmem:[#allocation266_spill] sm:$0xff]  ;;  %4127 = vrot.lane.b32.xlu1 %v16731_v50, %s7354_s24  ;;  %v16732_v6 = vld [vmem:[#allocation267_spill] sm:$0xff]  ;;  %v9827_v50 = vpop.permute.xlu1 %3171 }
 0x2c1   : > { %v1444_v42 = vadd.f32 %v1433_v63, %v1374_v38  ;;  %v1500_v34 = vmul.f32 %v16728_v17, %v16721_v7  ;;  %v1501_v2 = vmul.f32 %v16729_v29, %v16721_v7  ;;  %v1502_v27 = vmul.f32 %v16730_v23, %v16721_v7  ;;  %v16734_v63 = vld [vmem:[#allocation269_spill] sm:$0xff]  ;;  %v16735_v18 = vld [vmem:[#allocation286_spill] sm:$0xff]  ;;  %v16737_v29 = vld [vmem:[#allocation287_spill] sm:$0xff]  ;;  %16740 = vst [vmem:[#allocation25_spill] sm:$0xff] %v9827_v50 }
 0x2c2   : > { %v1497_v59 = vmul.f32 %v16723_v44, %v16721_v7  ;;  %v1498_v55 = vmul.f32 %v16725_v4, %v16721_v7  ;;  %v1499_v1 = vmul.f32 %v16727_v53, %v16721_v7  ;;  %v1503_v4 = vmul.f32 %v16732_v6, %v16721_v7  ;;  %v16733_v44 = vld [vmem:[#allocation268_spill] sm:$0xff]  ;;  %v16736_v40 = vld [vmem:[#allocation81_spill] sm:$0xff] }
 0x2c3   : > { %v1504_v9 = vmul.f32 %v16733_v44, %v16721_v7  ;;  %v1505_v38 = vmul.f32 %v16734_v63, %v16721_v7  ;;  %v1506_v53 = vmul.f32 %v16735_v18, %v16721_v7  ;;  %4772 = vrot.lane.b32.xlu0 %v16736_v40, %s7369_s23  ;;  %v1445_v45 = vadd.f32 %v1434_v58, %v1375_v14  ;;  %v9823_v44 = vpop.permute.xlu0 %3705  ;;  %v16739_v18 = vld [vmem:[#allocation204_spill] sm:$0xff]  ;;  %v16809_v40 = vld [vmem:[#allocation127_spill] sm:$0xff] }
 0x2c4   : > { %v1446_v37 = vadd.f32 %v1435_v21, %v1376_v57  ;;  %v1447_v22 = vadd.f32 %v1436_v41, %v1377_v3  ;;  %v1448_v23 = vadd.f32 %v1437_v28, %v1378_v32  ;;  %v1507_v17 = vmul.f32 %v16737_v29, %v16721_v7  ;;  %16738 = vst [vmem:[#allocation24_spill] sm:$0xff] %v9823_v44  ;;  %v16741_v21 = vld [vmem:[#allocation280_spill] sm:$0xff]  ;;  %v16746_v41 = vld [vmem:[#allocation103_spill] sm:$0xff]  ;;  %v16788_v44 = vld [vmem:[#allocation118_spill] sm:$0xff] }
 0x2c5   : > { %v1508_v6 = vadd.f32 %v1497_v59, %v1438_v5  ;;  %v1509_v54 = vadd.f32 %v1498_v55, %v1439_v61  ;;  %v1510_v30 = vadd.f32 %v1499_v1, %v1440_v26  ;;  %v1511_v12 = vadd.f32 %v1500_v34, %v1441_v56  ;;  %4131 = vrot.lane.b32.xlu1 %v16739_v18, %s7354_s24  ;;  %v16743_v55 = vld [vmem:[#allocation101_spill] sm:$0xff]  ;;  %v16744_v56 = vld [vmem:[#allocation99_spill] sm:$0xff]  ;;  %v16749_v61 = vld [vmem:[#allocation98_spill] sm:$0xff] }
 0x2c6   : > { %v1512_v63 = vadd.f32 %v1501_v2, %v1442_v8  ;;  %v1513_v48 = vadd.f32 %v1502_v27, %v1443_v15  ;;  %v9831_v14 = vrot.slane %v16741_v21, %v7686_v31  ;;  %v1514_v57 = vadd.f32 %v1503_v4, %v1444_v42  ;;  %v16745_v8 = vld [vmem:[#allocation94_spill] sm:$0xff]  ;;  %v16750_v59 = vld [vmem:[#allocation107_spill] sm:$0xff]  ;;  %v16751_v42 = vld [vmem:[#allocation100_spill] sm:$0xff] }
 0x2c7   : > { %v1515_v3 = vadd.f32 %v1504_v9, %v1445_v45  ;;  %v1516_v32 = vadd.f32 %v1505_v38, %v1446_v37  ;;  %v1517_v58 = vadd.f32 %v1506_v53, %v1447_v22  ;;  %4776 = vrot.lane.b32.xlu0 %v16647_v13, %s7369_s23  ;;  %v9838_v15 = vsel %vm1661_vm2, %v16744_v56, %v16743_v55  ;;  %v16747_v37 = vld [vmem:[#allocation96_spill] sm:$0xff]  ;;  %v16748_v45 = vld [vmem:[#allocation105_spill] sm:$0xff]  ;;  %v16752_v4 = vld [vmem:[#allocation102_spill] sm:$0xff]  ;;  %v9885_v53 = vpop.permute.xlu1 %3240  ;;  %v9901_v56 = vpop.permute.xlu0 %3936 }
 0x2c8   : > { %16742 = vst [vmem:[#allocation26_spill] sm:$0xff] %v9831_v14  ;;  %v9843_v7 = vsel %vm1661_vm2, %v16743_v55, %v16745_v8  ;;  %v9848_v28 = vsel %vm1661_vm2, %v16745_v8, %v16746_v41  ;;  %v9853_v22 = vsel %vm1661_vm2, %v16746_v41, %v16747_v37  ;;  %v9858_v5 = vsel %vm1661_vm2, %v16747_v37, %v16748_v45  ;;  %v16753_v9 = vld [vmem:[#allocation109_spill] sm:$0xff]  ;;  %v16758_v41 = vld [vmem:[#allocation104_spill] sm:$0xff] }
 0x2c9   : > { %v9863_v26 = vsel %vm1661_vm2, %v16748_v45, %v16749_v61  ;;  %v9868_v1 = vsel %vm1661_vm2, %v16749_v61, %v16750_v59  ;;  %v9873_v34 = vsel %vm1661_vm2, %v16750_v59, %v16751_v42  ;;  %v1518_v2 = vadd.f32 %v1507_v17, %v1448_v23  ;;  %4135 = vrot.lane.b32.xlu1 %v9831_v14, %s7354_s24  ;;  %v16767_v23 = vld [vmem:[#allocation117_spill] sm:$0xff]  ;;  %v16775_v17 = vld [vmem:[#allocation110_spill] sm:$0xff] }
 0x2ca   : > { %v9876_v27 = vadd.f32 %v9710_v62, %v1510_v30  ;;  %v9881_v38 = vsel %vm1661_vm2, %v16753_v9, %v16752_v4  ;;  %16754 = vst [vmem:[#allocation244_spill] sm:$0xff] %v9885_v53  ;;  %v9889_v55 = vrot.slane %v16741_v21, %v7660_v20  ;;  %16756 = vst [vmem:[#allocation17_spill] sm:$0xff] %v9901_v56  ;;  %v16757_v21 = vld [vmem:[#allocation111_spill] sm:$0xff]  ;;  %v16786_v53 = vld [vmem:[#allocation126_spill] sm:$0xff] }
 0x2cb   : > { %4780 = vrot.lane.b32.xlu0 %v9599_v52, %s7369_s23  ;;  %v9914_v61 = vadd.f32 %v9698_v36, %v1508_v6  ;;  %v9917_v59 = vadd.f32 %v9704_v46, %v1509_v54  ;;  %v9920_v9 = vadd.f32 %v9714_v51, %v1511_v12  ;;  %v9925_v8 = vsel %vm1661_vm2, %v16752_v4, %v16757_v21  ;;  %v9937_v54 = vpop.permute.xlu1 %3244  ;;  %v16760_v12 = vld [vmem:[#allocation291_spill] sm:$0xff]  ;;  %v16763_v4 = vld [vmem:[#allocation113_spill] sm:$0xff] }
 0x2cc   : > { %16755 = vst [vmem:[#allocation95_spill] sm:$0xff] %v9889_v55  ;;  %v9930_v37 = vsel %vm1661_vm2, %v16757_v21, %v16758_v41  ;;  %v9933_v45 = vadd.f32 %v9718_v0, %v1512_v63  ;;  %16759 = vst [vmem:[#allocation18_spill] sm:$0xff] %v9937_v54  ;;  %v9941_v36 = vrot.slane %v16760_v12, %v7658_v19  ;;  %v9957_v63 = vpop.permute.xlu0 %4085  ;;  %v16774_v30 = vld [vmem:[#allocation119_spill] sm:$0xff]  ;;  %v16778_v54 = vld [vmem:[#allocation121_spill] sm:$0xff] }
 0x2cd   : > { %4139 = vrot.lane.b32.xlu1 %v9889_v55, %s7354_s24  ;;  %v9944_v46 = vadd.f32 %v9722_v49, %v1513_v48  ;;  %v9947_v51 = vadd.f32 %v9726_v35, %v1514_v57  ;;  %v9950_v6 = vadd.f32 %v9730_v47, %v1515_v3  ;;  %v9953_v0 = vadd.f32 %v9734_v10, %v1516_v32  ;;  %v16764_v48 = vld [vmem:[#allocation106_spill] sm:$0xff]  ;;  %v16765_v35 = vld [vmem:[#allocation115_spill] sm:$0xff]  ;;  %v16766_v32 = vld [vmem:[#allocation108_spill] sm:$0xff] }
 0x2ce   : > { %16761 = vst [vmem:[#allocation19_spill] sm:$0xff] %v9941_v36  ;;  %16762 = vst [vmem:[#allocation97_spill] sm:$0xff] %v9957_v63  ;;  %v9962_v21 = vsel %vm1661_vm2, %v16758_v41, %v16763_v4  ;;  %v9967_v49 = vsel %vm1661_vm2, %v16763_v4, %v16764_v48  ;;  %v9972_v47 = vsel %vm1661_vm2, %v16764_v48, %v16765_v35  ;;  %v16770_v57 = vld [vmem:[#allocation175_spill] sm:$0xff] }
 0x2cf   : > { %4784 = vrot.lane.b32.xlu0 %v9625_v24, %s7369_s23  ;;  %v9975_v10 = vadd.f32 %v9738_v39, %v1517_v58  ;;  %v9984_v41 = vsel %vm1661_vm2, %v16765_v35, %v16766_v32  ;;  %v9987_v4 = vadd.f32 %v9742_v25, %v1518_v2  ;;  %v9992_v48 = vsel %vm1661_vm2, %v16766_v32, %v16767_v23  ;;  %v16768_v39 = vld [vmem:[#allocation164_spill] sm:$0xff]  ;;  %v10004_v35 = vpop.permute.xlu1 %3248  ;;  %v16781_v56 = vld [vmem:[#allocation123_spill] sm:$0xff] }
 0x2d0   : > { %v9996_v58 = vrot.slane %v16768_v39, %v7686_v31  ;;  %v10000_v3 = vrot.slane %v16770_v57, %v7686_v31  ;;  %16772 = vst [vmem:[#allocation23_spill] sm:$0xff] %v10004_v35  ;;  %v10008_v25 = vrot.slane %v16760_v12, %v16579_v43  ;;  %v10019_v63 = vsel %vm1661_vm2, %v16775_v17, %v16774_v30  ;;  %v10023_v39 = vpop.permute.xlu0 %4089  ;;  %v16777_v2 = vld [vmem:[#allocation112_spill] sm:$0xff]  ;;  %v16779_v17 = vld [vmem:[#allocation114_spill] sm:$0xff] }
 0x2d1   : > { %4228 = vrot.lane.b32.xlu1 %v9941_v36, %s7354_s24  ;;  %16776 = vst [vmem:[#allocation101_spill] sm:$0xff] %v10023_v39  ;;  %v10030_v32 = vsel %vm1661_vm2, %v16774_v30, %v16777_v2  ;;  %v10035_v62 = vsel %vm1661_vm2, %v16777_v2, %v16778_v54  ;;  %v10040_v35 = vsel %vm1661_vm2, %v16778_v54, %v16779_v17  ;;  %v16783_v30 = vld [vmem:[#allocation116_spill] sm:$0xff] }
 0x2d2   : > { %16769 = vst [vmem:[#allocation21_spill] sm:$0xff] %v9996_v58  ;;  %16771 = vst [vmem:[#allocation22_spill] sm:$0xff] %v10000_v3  ;;  %v10047_v12 = vsel %vm1661_vm2, %v16779_v17, %v16781_v56  ;;  %v10052_v57 = vsel %vm1661_vm2, %v16781_v56, %v16783_v30  ;;  %v10056_v2 = vrot.slane %v16633_v60, %v7686_v31  ;;  %v16791_v60 = vld [vmem:[#allocation48_spill] sm:$0xff] }
 0x2d3   : > { %16773 = vst [vmem:[#allocation280_spill] sm:$0xff] %v10008_v25  ;;  %4788 = vrot.lane.b32.xlu0 %v9692_v11, %s7369_s23  ;;  %16780 = vst [vmem:[#allocation99_spill] sm:$0xff] %v10040_v35  ;;  %v10063_v39 = vsel %vm1661_vm2, %v16783_v30, %v16786_v53  ;;  %v10068_v17 = vsel %vm1661_vm2, %v16786_v53, %v16788_v44  ;;  %v10072_v56 = vpop.permute.xlu1 %3252  ;;  %v10076_v50 = vrot.slane %v16791_v60, %v7686_v31  ;;  %v16793_v53 = vld [vmem:[#allocation190_spill] sm:$0xff]  ;;  %v16796_v3 = vld [vmem:[#allocation120_spill] sm:$0xff] }
 0x2d4   : > { %16782 = vst [vmem:[#allocation94_spill] sm:$0xff] %v10047_v12  ;;  %16784 = vst [vmem:[#allocation103_spill] sm:$0xff] %v10052_v57  ;;  %v10086_v58 = vrot.slane %v16793_v53, %v7686_v31  ;;  %v16797_v30 = vld [vmem:[#allocation128_spill] sm:$0xff]  ;;  %v16799_v11 = vld [vmem:[#allocation131_spill] sm:$0xff]  ;;  %v10115_v54 = vrot.slane %v16647_v13, %v7686_v31  ;;  %v10137_v13 = vrot.slane %v16791_v60, %v7660_v20 }
 0x2d5   : > { %16785 = vst [vmem:[#allocation96_spill] sm:$0xff] %v10056_v2  ;;  %16787 = vst [vmem:[#allocation105_spill] sm:$0xff] %v10063_v39  ;;  %4232 = vrot.lane.b32.xlu1 %v10008_v25, %s7354_s24  ;;  %v10099_v29 = vsel %vm1661_vm2, %v16797_v30, %v16796_v3  ;;  %v16798_v2 = vld [vmem:[#allocation129_spill] sm:$0xff]  ;;  %v10111_v24 = vsel %vm1661_vm2, %v16796_v3, %v16799_v11  ;;  %v16801_v30 = vld [vmem:[#allocation122_spill] sm:$0xff] }
 0x2d6   : > { %16789 = vst [vmem:[#allocation98_spill] sm:$0xff] %v10068_v17  ;;  %16790 = vst [vmem:[#allocation107_spill] sm:$0xff] %v10072_v56  ;;  %v10090_v56 = vpop.permute.xlu0 %4093  ;;  %v1790_v53 = vsel %vm1661_vm2, %v16751_v42, %v16798_v2  ;;  %v10120_v52 = vsel %vm1661_vm2, %v16799_v11, %v16801_v30  ;;  %v16802_v42 = vld [vmem:[#allocation133_spill] sm:$0xff] }
 0x2d7   : > { %16792 = vst [vmem:[#allocation100_spill] sm:$0xff] %v10076_v50  ;;  %16794 = vst [vmem:[#allocation102_spill] sm:$0xff] %v10086_v58  ;;  %4792 = vrot.lane.b32.xlu0 %v9746_v16, %s7369_s23  ;;  %v10125_v58 = vsel %vm1661_vm2, %v16801_v30, %v16802_v42  ;;  %v10133_v3 = vpop.permute.xlu1 %3256  ;;  %v16806_v30 = vld [vmem:[#allocation124_spill] sm:$0xff]  ;;  %v16813_v57 = vld [vmem:[#allocation141_spill] sm:$0xff] }
 0x2d8   : > { %16795 = vst [vmem:[#allocation109_spill] sm:$0xff] %v10090_v56  ;;  %16800 = vst [vmem:[#allocation111_spill] sm:$0xff] %v10115_v54  ;;  %v10129_v56 = vrot.slane %v16681_v33, %v7686_v31  ;;  %v1833_v54 = vrot.slane %v1790_v53, %v7686_v31  ;;  %v10145_v16 = vsel %vm1661_vm2, %v16802_v42, %v16806_v30  ;;  %v16810_v42 = vld [vmem:[#allocation137_spill] sm:$0xff] }
 0x2d9   : > { %4236 = vrot.lane.b32.xlu1 %v10076_v50, %s7354_s24  ;;  %16804 = vst [vmem:[#allocation291_spill] sm:$0xff] %v10133_v3  ;;  %16805 = vst [vmem:[#allocation113_spill] sm:$0xff] %v10137_v13  ;;  %v10166_v17 = vsel %vm1661_vm2, %v16788_v44, %v16810_v42  ;;  %v16814_v50 = vld [vmem:[#allocation201_spill] sm:$0xff]  ;;  %v2027_v44 = vrot.slane %v10145_v16, %v7686_v31  ;;  %v16823_v16 = vld [vmem:[#allocation144_spill] sm:$0xff] }
 0x2da   : > { %16803 = vst [vmem:[#allocation104_spill] sm:$0xff] %v10129_v56  ;;  %v16807_v56 = vld [vmem:[#allocation136_spill] sm:$0xff]  ;;  %v10154_v3 = vpop.permute.xlu0 %4097  ;;  %16811 = vst [vmem:[#allocation115_spill] sm:$0xff] %v10166_v17  ;;  %v10182_v12 = vrot.slane %v16814_v50, %v7686_v31 }
 0x2db   : > { %v10150_v33 = vsel %vm1661_vm2, %v16806_v30, %v16807_v56  ;;  %4796 = vrot.lane.b32.xlu0 %v16739_v18, %s7369_s23  ;;  %16808 = vst [vmem:[#allocation106_spill] sm:$0xff] %v10154_v3  ;;  %v10161_v53 = vsel %vm1661_vm2, %v16807_v56, %v16809_v40  ;;  %v16812_v30 = vld [vmem:[#allocation138_spill] sm:$0xff]  ;;  %v2019_v3 = vrot.slane %v10120_v52, %v7686_v31  ;;  %v10194_v11 = vpop.permute.xlu1 %3260 }
 0x2dc   : > { %v10171_v39 = vsel %vm1661_vm2, %v16809_v40, %v16812_v30  ;;  %v1770_v56 = vsel %vm1661_vm2, %v16798_v2, %v16813_v57  ;;  %16815 = vst [vmem:[#allocation108_spill] sm:$0xff] %v10182_v12  ;;  %v10190_v52 = vrot.slane %v16739_v18, %v7686_v31  ;;  %16817 = vst [vmem:[#allocation119_spill] sm:$0xff] %v10194_v11  ;;  %v16818_v2 = vld [vmem:[#allocation13_spill] sm:$0xff]  ;;  %v16820_v18 = vld [vmem:[#allocation132_spill] sm:$0xff] }
 0x2dd   : > { %4240 = vrot.lane.b32.xlu1 %v10137_v13, %s7354_s24  ;;  %v10198_v35 = vrot.slane %v16791_v60, %v16818_v2  ;;  %v2035_v50 = vrot.slane %v10161_v53, %v7686_v31  ;;  %v1837_v60 = vrot.slane %v1770_v56, %v7686_v31  ;;  %v16822_v12 = vld [vmem:[#allocation143_spill] sm:$0xff]  ;;  %v16824_v40 = vrot.slane %v9838_v15, %v7686_v31 }
 0x2de   : > { %16816 = vst [vmem:[#allocation117_spill] sm:$0xff] %v10190_v52  ;;  %v1771_v52 = vsel %vm1661_vm2, %v16813_v57, %v16820_v18  ;;  %v10211_v11 = vpop.permute.xlu0 %4101  ;;  %v10217_v53 = vsel %vm1661_vm2, %v16767_v23, %v16822_v12  ;;  %v16825_v18 = vrot.slane %v9843_v7, %v7686_v31  ;;  %v16827_v23 = vrot.slane %v9848_v28, %v7686_v31 }
 0x2df   : > { %16819 = vst [vmem:[#allocation110_spill] sm:$0xff] %v10198_v35  ;;  %4800 = vrot.lane.b32.xlu0 %v9831_v14, %s7369_s23  ;;  %16821 = vst [vmem:[#allocation112_spill] sm:$0xff] %v10211_v11  ;;  %v1842_v13 = vmul.f32 %v16824_v40, %v16823_v16  ;;  %v16826_v14 = vld [vmem:[#allocation134_spill] sm:$0xff]  ;;  %v16828_v15 = vrot.slane %v9853_v22, %v7686_v31  ;;  %v16829_v7 = vrot.slane %v9858_v5, %v7686_v31  ;;  %v10255_v22 = vpop.permute.xlu1 %3289  ;;  %v16833_v5 = vld [vmem:[#allocation64_spill] sm:$0xff] }
 0x2e0   : > { %v1843_v57 = vmul.f32 %v16825_v18, %v16823_v16  ;;  %v10230_v11 = vsel %vm1661_vm2, %v16822_v12, %v16826_v14  ;;  %v1844_v56 = vmul.f32 %v16827_v23, %v16823_v16  ;;  %v1841_v17 = vrot.slane %v1771_v52, %v7686_v31  ;;  %16832 = vst [vmem:[#allocation121_spill] sm:$0xff] %v10255_v22 }
 0x2e1   : > { %v1845_v40 = vmul.f32 %v16828_v15, %v16823_v16  ;;  %v1846_v18 = vmul.f32 %v16829_v7, %v16823_v16  ;;  %v16830_v12 = vrot.slane %v9863_v26, %v7686_v31  ;;  %v16831_v28 = vrot.slane %v9868_v1, %v7686_v31  ;;  %4244 = vrot.lane.b32.xlu1 %v10198_v35, %s7354_s24 }
 0x2e2   : > { %v10259_v15 = vrot.slane %v16833_v5, %v7658_v19  ;;  %v16835_v26 = vrot.slane %v9873_v34, %v7686_v31  ;;  %v1850_v1 = vmul.f32 %v1833_v54, %v16823_v16  ;;  %v1852_v22 = vmul.f32 %v1841_v17, %v16823_v16 }
 0x2e3   : > { %v1847_v2 = vmul.f32 %v16830_v12, %v16823_v16  ;;  %v1848_v23 = vmul.f32 %v16831_v28, %v16823_v16  ;;  %v1851_v12 = vmul.f32 %v1837_v60, %v16823_v16  ;;  %4804 = vrot.lane.b32.xlu0 %v9889_v55, %s7369_s23  ;;  %v10271_v28 = vpop.permute.xlu0 %4105  ;;  %v10277_v52 = vadd.f32 %v1842_v13, %v9914_v61  ;;  %v16838_v61 = vld [vmem:[#allocation149_spill] sm:$0xff] }
 0x2e4   : > { %16834 = vst [vmem:[#allocation114_spill] sm:$0xff] %v10259_v15  ;;  %v1849_v7 = vmul.f32 %v16835_v26, %v16823_v16  ;;  %16836 = vst [vmem:[#allocation123_spill] sm:$0xff] %v10271_v28  ;;  %v10280_v34 = vadd.f32 %v1843_v57, %v9917_v59  ;;  %v10283_v54 = vadd.f32 %v1844_v56, %v9876_v27  ;;  %v16837_v28 = vld [vmem:[#allocation145_spill] sm:$0xff] }
 0x2e5   : > { %v10286_v60 = vadd.f32 %v1845_v40, %v9920_v9  ;;  %v10289_v26 = vadd.f32 %v1846_v18, %v9933_v45  ;;  %v1773_v19 = vsel %vm1661_vm2, %v16826_v14, %v16837_v28  ;;  %v10295_v17 = vadd.f32 %v1847_v2, %v9944_v46  ;;  %4248 = vrot.lane.b32.xlu1 %v10259_v15, %s7354_s24  ;;  %v16840_v46 = vld [vmem:[#allocation142_spill] sm:$0xff]  ;;  %v16847_v18 = vld [vmem:[#allocation139_spill] sm:$0xff] }
 0x2e6   : > { %v10298_v13 = vadd.f32 %v1848_v23, %v9947_v51  ;;  %v1793_v27 = vsel %vm1661_vm2, %v16812_v30, %v16838_v61  ;;  %v10307_v45 = vrot.slane %v16833_v5, %v16579_v43  ;;  %v10310_v59 = vadd.f32 %v1849_v7, %v9950_v6  ;;  %v10325_v43 = vpop.permute.xlu1 %3365  ;;  %v16843_v2 = vld [vmem:[#allocation146_spill] sm:$0xff] }
 0x2e7   : > { %v10313_v14 = vadd.f32 %v1850_v1, %v9953_v0  ;;  %v10316_v9 = vadd.f32 %v1851_v12, %v9975_v10  ;;  %v1776_v51 = vsel %vm1661_vm2, %v16838_v61, %v16840_v46  ;;  %4861 = vrot.lane.b32.xlu0 %v9941_v36, %s7369_s23  ;;  %v10323_v30 = vpop.permute.xlu0 %4109  ;;  %16842 = vst [vmem:[#allocation118_spill] sm:$0xff] %v10325_v43 }
 0x2e8   : > { %16839 = vst [vmem:[#allocation116_spill] sm:$0xff] %v10307_v45  ;;  %16841 = vst [vmem:[#allocation126_spill] sm:$0xff] %v10323_v30  ;;  %v10328_v6 = vadd.f32 %v1852_v22, %v9987_v4  ;;  %v1911_v0 = vrot.slane %v1773_v19, %v7686_v31  ;;  %v16844_v10 = vrot.slane %v10099_v29, %v7686_v31  ;;  %v16846_v4 = vld [vmem:[#allocation147_spill] sm:$0xff] }
 0x2e9   : > { %v16845_v57 = vrot.slane %v10111_v24, %v7686_v31  ;;  %v10344_v40 = vmul.f32 %v2019_v3, %v16843_v2  ;;  %v1774_v19 = vsel %vm1661_vm2, %v16810_v42, %v16846_v4  ;;  %v1775_v29 = vsel %vm1661_vm2, %v16846_v4, %v16847_v18  ;;  %4252 = vrot.lane.b32.xlu1 %v10307_v45, %s7354_s24  ;;  %v16849_v42 = vld [vmem:[#allocation79_spill] sm:$0xff] }
 0x2ea   : > { %v10335_v16 = vmul.f32 %v16844_v10, %v16843_v2  ;;  %v2043_v23 = vrot.slane %v1793_v27, %v7686_v31  ;;  %v16848_v24 = vrot.slane %v10125_v58, %v7686_v31  ;;  %v10360_v5 = vmul.f32 %v2027_v44, %v16843_v2  ;;  %v16852_v44 = vld [vmem:[#allocation151_spill] sm:$0xff] }
 0x2eb   : > { %v10341_v56 = vmul.f32 %v16845_v57, %v16843_v2  ;;  %v2047_v3 = vrot.slane %v1776_v51, %v7686_v31  ;;  %v10367_v7 = vrot.slane %v16849_v42, %v7686_v31  ;;  %v16851_v1 = vrot.slane %v10150_v33, %v7686_v31  ;;  %4865 = vrot.lane.b32.xlu0 %v10008_v25, %s7369_s23  ;;  %v10385_v61 = vpop.permute.xlu0 %4113  ;;  %v10388_v27 = vld [vmem:[%s9023_s11] ss:$4 sm:$0xff] }
 0x2ec   : > { %v10357_v22 = vmul.f32 %v16848_v24, %v16843_v2  ;;  %v10376_v58 = vmul.f32 %v2035_v50, %v16843_v2  ;;  %v10381_v28 = vsel %vm1661_vm2, %v16840_v46, %v16852_v44  ;;  %16853 = vst [vmem:[#allocation120_spill] sm:$0xff] %v10385_v61  ;;  %v16854_v51 = vld [vmem:[#allocation14_spill] sm:$0xff]  ;;  %v16856_v50 = vrot.slane %v10171_v39, %v7686_v31  ;;  %v16857_v4 = vld [vmem:[#allocation219_spill] sm:$0xff]  ;;  %v10406_v24 = vpop.permute.xlu1 %3403  ;;  %v16860_v44 = vld [vmem:[#allocation153_spill] sm:$0xff] }
 0x2ed   : > { %16850 = vst [vmem:[#allocation48_spill] sm:$0xff] %v10367_v7  ;;  %v10373_v12 = vmul.f32 %v16851_v1, %v16843_v2  ;;  %v10392_v33 = vrot.slane %v10388_v27, %v16854_v51  ;;  %v1977_v46 = vrot.slane %v1774_v19, %v7686_v31  ;;  %v1981_v57 = vrot.slane %v1775_v29, %v7686_v31 }
 0x2ee   : > { %v10398_v10 = vmul.f32 %v16856_v50, %v16843_v2  ;;  %v10404_v18 = vrot.slane %v16857_v4, %v7686_v31  ;;  %16859 = vst [vmem:[#allocation131_spill] sm:$0xff] %v10406_v24  ;;  %v10409_v1 = vmul.f32 %v2043_v23, %v16843_v2  ;;  %v16861_v61 = vrot.slane %v9881_v38, %v7686_v31 }
 0x2ef   : > { %16855 = vst [vmem:[#allocation128_spill] sm:$0xff] %v10392_v33  ;;  %v16862_v19 = vrot.slane %v9925_v8, %v7686_v31  ;;  %v16863_v29 = vrot.slane %v9930_v37, %v7686_v31  ;;  %v10424_v36 = vmul.f32 %v2047_v3, %v16843_v2  ;;  %v2051_v23 = vrot.slane %v10381_v28, %v7686_v31 }
 0x2f0   : > { %16858 = vst [vmem:[#allocation129_spill] sm:$0xff] %v10404_v18  ;;  %v1912_v39 = vmul.f32 %v16861_v61, %v16860_v44  ;;  %v16864_v18 = vld [vmem:[#allocation222_spill] sm:$0xff]  ;;  %4256 = vrot.lane.b32.xlu1 %v10367_v7, %s7354_s24  ;;  %v10436_v8 = vrot.slane %v16849_v42, %v7660_v20  ;;  %v16867_v37 = vrot.slane %v9962_v21, %v7686_v31  ;;  %v10456_v21 = vpop.permute.xlu0 %4117 }
 0x2f1   : > { %v1913_v50 = vmul.f32 %v16862_v19, %v16860_v44  ;;  %v1914_v30 = vmul.f32 %v16863_v29, %v16860_v44  ;;  %v10430_v38 = vrot.slane %v16864_v18, %v7686_v31  ;;  %v16868_v28 = vrot.slane %v9967_v49, %v7686_v31  ;;  %4869 = vrot.lane.b32.xlu0 %v10392_v33, %s7369_s23 }
 0x2f2   : > { %16866 = vst [vmem:[#allocation133_spill] sm:$0xff] %v10436_v8  ;;  %v1915_v3 = vmul.f32 %v16867_v37, %v16860_v44  ;;  %v16869_v19 = vrot.slane %v9972_v47, %v7686_v31  ;;  %v16870_v20 = vrot.slane %v9984_v41, %v7686_v31  ;;  %16871 = vst [vmem:[#allocation124_spill] sm:$0xff] %v10456_v21 }
 0x2f3   : > { %16865 = vst [vmem:[#allocation122_spill] sm:$0xff] %v10430_v38  ;;  %v1916_v61 = vmul.f32 %v16868_v28, %v16860_v44  ;;  %v16872_v49 = vrot.slane %v9992_v48, %v7686_v31  ;;  %v16873_v47 = vrot.slane %v10217_v53, %v7686_v31  ;;  %v16874_v41 = vrot.slane %v10230_v11, %v7686_v31  ;;  %v16875_v48 = vld [vmem:[#allocation155_spill] sm:$0xff]  ;;  %v10478_v53 = vpop.permute.xlu1 %3507 }
 0x2f4   : > { %v1917_v29 = vmul.f32 %v16869_v19, %v16860_v44  ;;  %v1918_v18 = vmul.f32 %v16870_v20, %v16860_v44  ;;  %v1922_v20 = vmul.f32 %v1911_v0, %v16860_v44  ;;  %v1923_v24 = vadd.f32 %v1912_v39, %v10277_v52  ;;  %16877 = vst [vmem:[#allocation136_spill] sm:$0xff] %v10478_v53 }
 0x2f5   : > { %v1919_v37 = vmul.f32 %v16872_v49, %v16860_v44  ;;  %v1920_v28 = vmul.f32 %v16873_v47, %v16860_v44  ;;  %v1921_v19 = vmul.f32 %v16874_v41, %v16860_v44  ;;  %v1924_v21 = vadd.f32 %v1913_v50, %v10280_v34  ;;  %v16880_v34 = vld [vmem:[#allocation99_spill] sm:$0xff]  ;;  %4260 = vrot.lane.b32.xlu1 %v10436_v8, %s7354_s24 }
 0x2f6   : > { %v1925_v43 = vadd.f32 %v1914_v30, %v10283_v54  ;;  %v16876_v49 = vrot.slane %v10019_v63, %v7686_v31  ;;  %v16878_v11 = vrot.slane %v10030_v32, %v7686_v31  ;;  %v16879_v52 = vrot.slane %v10035_v62, %v7686_v31  ;;  %v16882_v63 = vld [vmem:[#allocation13_spill] sm:$0xff]  ;;  %v16884_v62 = vld [vmem:[#allocation94_spill] sm:$0xff] }
 0x2f7   : > { %v16881_v54 = vrot.slane %v16880_v34, %v7686_v31  ;;  %v10496_v44 = vrot.slane %v16849_v42, %v16882_v63  ;;  %v1926_v32 = vadd.f32 %v1915_v3, %v10286_v60  ;;  %v1927_v39 = vadd.f32 %v1916_v61, %v10289_v26  ;;  %v16888_v42 = vld [vmem:[#allocation103_spill] sm:$0xff]  ;;  %v16890_v26 = vld [vmem:[#allocation105_spill] sm:$0xff] }
 0x2f8   : > { %v1982_v38 = vmul.f32 %v16876_v49, %v16875_v48  ;;  %v1983_v47 = vmul.f32 %v16878_v11, %v16875_v48  ;;  %v1984_v0 = vmul.f32 %v16879_v52, %v16875_v48  ;;  %v1928_v50 = vadd.f32 %v1917_v29, %v10295_v17  ;;  %v16886_v11 = vld [vmem:[#allocation100_spill] sm:$0xff]  ;;  %v10507_v52 = vpop.permute.xlu0 %4121  ;;  %v16892_v29 = vld [vmem:[#allocation98_spill] sm:$0xff] }
 0x2f9   : > { %v1985_v30 = vmul.f32 %v16881_v54, %v16875_v48  ;;  %16883 = vst [vmem:[#allocation127_spill] sm:$0xff] %v10496_v44  ;;  %v16885_v41 = vrot.slane %v16884_v62, %v7686_v31  ;;  %4873 = vrot.lane.b32.xlu0 %v16886_v11, %s7369_s23  ;;  %16887 = vst [vmem:[#allocation137_spill] sm:$0xff] %v10507_v52  ;;  %v1929_v34 = vadd.f32 %v1918_v18, %v10298_v13  ;;  %v16894_v62 = vld [vmem:[#allocation115_spill] sm:$0xff]  ;;  %v16966_v11 = vld [vmem:[#allocation185_spill] sm:$0xff] }
 0x2fa   : > { %v16889_v60 = vrot.slane %v16888_v42, %v7686_v31  ;;  %v16891_v17 = vrot.slane %v16890_v26, %v7686_v31  ;;  %v16893_v54 = vrot.slane %v16892_v29, %v7686_v31  ;;  %v1991_v18 = vmul.f32 %v1977_v46, %v16875_v48  ;;  %4264 = vrot.lane.b32.xlu1 %v10496_v44, %s7354_s24  ;;  %v10531_v29 = vpop.permute.xlu1 %3545 }
 0x2fb   : > { %v1986_v49 = vmul.f32 %v16885_v41, %v16875_v48  ;;  %v16895_v41 = vrot.slane %v16894_v62, %v7686_v31  ;;  %v1992_v42 = vmul.f32 %v1981_v57, %v16875_v48  ;;  %v1930_v52 = vadd.f32 %v1919_v37, %v10310_v59  ;;  %16896 = vst [vmem:[#allocation138_spill] sm:$0xff] %v10531_v29  ;;  %v16897_v57 = vld [vmem:[#allocation113_spill] sm:$0xff] }
 0x2fc   : > { %v1987_v3 = vmul.f32 %v16889_v60, %v16875_v48  ;;  %v1988_v61 = vmul.f32 %v16891_v17, %v16875_v48  ;;  %v1989_v63 = vmul.f32 %v16893_v54, %v16875_v48  ;;  %v1993_v60 = vadd.f32 %v1982_v38, %v1923_v24  ;;  %v10538_v24 = vpop.permute.xlu0 %4125 }
 0x2fd   : > { %v1990_v13 = vmul.f32 %v16895_v41, %v16875_v48  ;;  %v1994_v53 = vadd.f32 %v1983_v47, %v1924_v21  ;;  %v1995_v26 = vadd.f32 %v1984_v0, %v1925_v43  ;;  %v1996_v17 = vadd.f32 %v1985_v30, %v1926_v32  ;;  %4877 = vrot.lane.b32.xlu0 %v16897_v57, %s7369_s23  ;;  %v16905_v30 = vld [vmem:[#allocation15_spill] sm:$0xff] }
 0x2fe   : > { %v1931_v54 = vadd.f32 %v1920_v28, %v10313_v14  ;;  %v1932_v62 = vadd.f32 %v1921_v19, %v10316_v9  ;;  %v1933_v41 = vadd.f32 %v1922_v20, %v10328_v6  ;;  %v1997_v46 = vadd.f32 %v1986_v49, %v1927_v39  ;;  %16898 = vst [vmem:[#allocation141_spill] sm:$0xff] %v10538_v24  ;;  %v16899_v9 = vld [vmem:[#allocation159_spill] sm:$0xff]  ;;  %v16900_v6 = vld [vmem:[#allocation157_spill] sm:$0xff]  ;;  %v16936_v24 = vld [vmem:[#allocation160_spill] sm:$0xff] }
 0x2ff   : > { %v2062_v59 = vmul.f32 %v2051_v23, %v16843_v2  ;;  %v1998_v43 = vadd.f32 %v1987_v3, %v1928_v50  ;;  %v1999_v38 = vadd.f32 %v1988_v61, %v1929_v34  ;;  %v2000_v21 = vadd.f32 %v1989_v63, %v1930_v52  ;;  %v10561_v20 = vld [vmem:[%s15416_s1] sm:$0xff]  ;;  %v16931_v3 = vld [vmem:[#allocation172_spill] sm:$0xff] }
 0x300   : > { %v2001_v37 = vadd.f32 %v1990_v13, %v1931_v54  ;;  %v2002_v48 = vadd.f32 %v1991_v18, %v1932_v62  ;;  %v2003_v47 = vadd.f32 %v1992_v42, %v1933_v41  ;;  %v10542_v14 = vadd.f32 %v10335_v16, %v1993_v60  ;;  %4377 = vperm.xlu1 %7118, %v10561_v20   ;;  %v16901_v16 = vld [vmem:[#allocation148_spill] sm:$0xff]  ;;  %v16907_v39 = vld [vmem:[#allocation161_spill] sm:$0xff] }
 0x301   : > { %v10547_v28 = vsel %vm2138_vm3, %v16900_v6, %v16899_v9  ;;  %v10550_v19 = vadd.f32 %v10341_v56, %v1994_v53  ;;  %v10553_v2 = vadd.f32 %v10344_v40, %v1995_v26  ;;  %v10556_v23 = vadd.f32 %v10357_v22, %v1996_v17  ;;  %4881 = vrot.lane.b32.xlu0 %v10198_v35, %s7369_s23  ;;  %v10574_v40 = vpop.permute.xlu0 %4129  ;;  %v10576_v22 = vpop.permute.xlu1 %3621  ;;  %v10579_v53 = vld [vmem:[%s9023_s11 + $0x2c] ss:$4 sm:$0xff] }
 0x302   : > { %v10567_v0 = vsel %vm2138_vm3, %v16899_v9, %v16901_v16  ;;  %v10570_v56 = vadd.f32 %v10360_v5, %v1997_v46  ;;  %16902 = vst [vmem:[#allocation132_spill] sm:$0xff] %v10574_v40  ;;  %16903 = vst [vmem:[#allocation143_spill] sm:$0xff] %v10576_v22  ;;  %v10583_v32 = vrot.slane %v10579_v53, %v16905_v30  ;;  %v16908_v5 = vld [vmem:[#allocation150_spill] sm:$0xff]  ;;  %v16911_v60 = vld [vmem:[#allocation81_spill] sm:$0xff] }
 0x303   : > { %16904 = vst [vmem:[#allocation144_spill] sm:$0xff] %v10579_v53  ;;  %v10588_v50 = vsel %vm2138_vm3, %v16901_v16, %v16907_v39  ;;  %v2142_v49 = vsel %vm2138_vm3, %v16907_v39, %v16908_v5  ;;  %v10594_v52 = vadd.f32 %v10373_v12, %v1998_v43  ;;  %v10597_v34 = vadd.f32 %v10376_v58, %v1999_v38  ;;  %v16909_v58 = vld [vmem:[#allocation226_spill] sm:$0xff]  ;;  %v16914_v17 = vld [vmem:[#allocation163_spill] sm:$0xff]  ;;  %v16915_v62 = vld [vmem:[#allocation228_spill] sm:$0xff] }
 0x304   : > { %16906 = vst [vmem:[#allocation134_spill] sm:$0xff] %v10583_v32  ;;  %v10602_v61 = vadd.f32 %v10398_v10, %v2000_v21  ;;  %v10605_v63 = vadd.f32 %v10409_v1, %v2001_v37  ;;  %v10608_v13 = vadd.f32 %v10424_v36, %v2002_v48  ;;  %v10612_v12 = vadd.f32 %v2062_v59, %v2003_v47  ;;  %v16918_v59 = vld [vmem:[#allocation152_spill] sm:$0xff]  ;;  %v16919_v38 = vld [vmem:[#allocation166_spill] sm:$0xff]  ;;  %v16961_v53 = vld [vmem:[#allocation183_spill] sm:$0xff] }
 0x305   : > { %v10616_v42 = vrot.slane %v16909_v58, %v7686_v31  ;;  %v10620_v26 = vrot.slane %v16911_v60, %v7686_v31  ;;  %v7371_v10 = vmov 42   ;;  %v10625_v36 = vrot.slane %v2142_v49, %v7686_v31  ;;  %4885 = vrot.lane.b32.xlu0 %v10583_v32, %s7369_s23  ;;  %v10636_v46 = vpop.permute.xlu0 %4133  ;;  %v16920_v37 = vld [vmem:[#allocation168_spill] sm:$0xff]  ;;  %v16921_v48 = vld [vmem:[#allocation154_spill] sm:$0xff]  ;;  %v10654_v16 = vpop.permute.xlu1 %3663  ;;  %v16967_v35 = vld [vmem:[#allocation171_spill] sm:$0xff] }
 0x306   : > { %7119 = vset.pattern.permute.xlu1 %v7371_v10  ;;  %v2143_v54 = vsel %vm2138_vm3, %v16908_v5, %v16914_v17  ;;  %v10632_v41 = vrot.slane %v16915_v62, %v7686_v31  ;;  %16917 = vst [vmem:[#allocation146_spill] sm:$0xff] %v10636_v46  ;;  %v2144_v43 = vsel %vm2138_vm3, %v16914_v17, %v16918_v59  ;;  %v16922_v9 = vld [vmem:[#allocation232_spill] sm:$0xff]  ;;  %16924 = vst [vmem:[#allocation139_spill] sm:$0xff] %v10654_v16  ;;  %v16926_v49 = vld [vmem:[#allocation170_spill] sm:$0xff] }
 0x307   : > { %16910 = vst [vmem:[#allocation64_spill] sm:$0xff] %v10616_v42  ;;  %16912 = vst [vmem:[#allocation145_spill] sm:$0xff] %v10620_v26  ;;  %v2145_v21 = vsel %vm2138_vm3, %v16918_v59, %v16919_v38  ;;  %v10647_v47 = vsel %vm2138_vm3, %v16921_v48, %v16920_v37  ;;  %v10651_v6 = vrot.slane %v16922_v9, %v7686_v31  ;;  %4447 = vperm.xlu1 %7119, %v10561_v20   ;;  %v16925_v39 = vld [vmem:[#allocation156_spill] sm:$0xff]  ;;  %v16930_v1 = vld [vmem:[#allocation158_spill] sm:$0xff] }
 0x308   : > { %16913 = vst [vmem:[#allocation149_spill] sm:$0xff] %v10625_v36  ;;  %16916 = vst [vmem:[#allocation142_spill] sm:$0xff] %v10632_v41  ;;  %v10659_v5 = vsel %vm2138_vm3, %v16920_v37, %v16925_v39  ;;  %v10664_v10 = vsel %vm2138_vm3, %v16925_v39, %v16926_v49  ;;  %v16927_v17 = vld [vmem:[#allocation236_spill] sm:$0xff]  ;;  %v10671_v48 = vrot.slane %v2143_v54, %v7686_v31  ;;  %v16932_v46 = vld [vmem:[#allocation239_spill] sm:$0xff] }
 0x309   : > { %16923 = vst [vmem:[#allocation147_spill] sm:$0xff] %v10651_v6  ;;  %v10668_v59 = vrot.slane %v16927_v17, %v7686_v31  ;;  %v2149_v18 = vsel %vm2138_vm3, %v16926_v49, %v16930_v1  ;;  %v2150_v37 = vsel %vm2138_vm3, %v16930_v1, %v16931_v3  ;;  %v10681_v40 = vrot.slane %v16932_v46, %v7686_v31  ;;  %v10696_v1 = vpop.permute.xlu0 %4137  ;;  %v16940_v54 = vld [vmem:[#allocation58_spill] sm:$0xff]  ;;  %v16945_v9 = vld [vmem:[#allocation177_spill] sm:$0xff]  ;;  %v16951_v16 = vld [vmem:[#allocation167_spill] sm:$0xff] }
 0x30a   : > { %16929 = vst [vmem:[#allocation151_spill] sm:$0xff] %v10671_v48  ;;  %v10684_v39 = vrot.slane %v2144_v43, %v7686_v31  ;;  %v10687_v57 = vrot.slane %v2145_v21, %v7686_v31  ;;  %v2151_v49 = vsel %vm2138_vm3, %v16931_v3, %v16936_v24  ;;  %4889 = vrot.lane.b32.xlu0 %v10259_v15, %s7369_s23  ;;  %16937 = vst [vmem:[#allocation13_spill] sm:$0xff] %v10696_v1  ;;  %v16938_v21 = vld [vmem:[#allocation247_spill] sm:$0xff]  ;;  %v7372_v3 = vmov 44   ;;  %v16944_v41 = vld [vmem:[#allocation174_spill] sm:$0xff] }
 0x30b   : > { %16928 = vst [vmem:[#allocation79_spill] sm:$0xff] %v10668_v59  ;;  %16933 = vst [vmem:[#allocation153_spill] sm:$0xff] %v10681_v40  ;;  %v10704_v26 = vrot.slane %v16938_v21, %v7686_v31  ;;  %v10708_v42 = vrot.slane %v16940_v54, %v7686_v31  ;;  %7121 = vset.pattern.permute.xlu1 %v7372_v3  ;;  %v10711_v15 = vrot.slane %v2149_v18, %v7686_v31  ;;  %v16946_v60 = vld [vmem:[#allocation162_spill] sm:$0xff]  ;;  %v16949_v18 = vld [vmem:[#allocation165_spill] sm:$0xff] }
 0x30c   : > { %16934 = vst [vmem:[#allocation155_spill] sm:$0xff] %v10684_v39  ;;  %16935 = vst [vmem:[#allocation99_spill] sm:$0xff] %v10687_v57  ;;  %v10714_v1 = vrot.slane %v2150_v37, %v7686_v31  ;;  %v2152_v43 = vsel %vm2138_vm3, %v16936_v24, %v16944_v41  ;;  %4615 = vperm.xlu1 %7121, %v10561_v20   ;;  %v10728_v3 = vrot.slane %v2151_v49, %v7686_v31  ;;  %v16950_v54 = vld [vmem:[#allocation179_spill] sm:$0xff]  ;;  %v16952_v22 = vld [vmem:[#allocation180_spill] sm:$0xff] }
 0x30d   : > { %16939 = vst [vmem:[#allocation94_spill] sm:$0xff] %v10704_v26  ;;  %16941 = vst [vmem:[#allocation103_spill] sm:$0xff] %v10708_v42  ;;  %v10722_v26 = vsel %vm2138_vm3, %v16946_v60, %v16945_v9  ;;  %v10725_v42 = vpop.permute.xlu1 %3747  ;;  %v10733_v37 = vsel %vm2138_vm3, %v16945_v9, %v16949_v18  ;;  %v10738_v24 = vsel %vm2138_vm3, %v16949_v18, %v16950_v54  ;;  %v16953_v49 = vld [vmem:[#allocation181_spill] sm:$0xff]  ;;  %v10751_v9 = vpop.permute.xlu0 %4226  ;;  %v16959_v59 = vld [vmem:[#allocation276_spill] sm:$0xff] }
 0x30e   : > { %16942 = vst [vmem:[#allocation105_spill] sm:$0xff] %v10711_v15  ;;  %16943 = vst [vmem:[#allocation98_spill] sm:$0xff] %v10714_v1  ;;  %v2156_v60 = vsel %vm2138_vm3, %v16950_v54, %v16951_v16  ;;  %v2157_v29 = vsel %vm2138_vm3, %v16951_v16, %v16953_v49  ;;  %4893 = vrot.lane.b32.xlu0 %v10307_v45, %s7369_s23  ;;  %v10754_v6 = vld [vmem:[%s9023_s11 + $0x58] ss:$4 sm:$0xff]  ;;  %v10761_v54 = vrot.slane %v2152_v43, %v7686_v31  ;;  %v7373_v45 = vmov 45  }
 0x30f   : > { %16947 = vst [vmem:[#allocation115_spill] sm:$0xff] %v10725_v42  ;;  %16948 = vst [vmem:[#allocation159_spill] sm:$0xff] %v10728_v3  ;;  %v2275_v42 = vsel %vm2138_vm3, %v16919_v38, %v16952_v22  ;;  %v10758_v18 = vrot.slane %v10754_v6, %v16854_v51  ;;  %v16958_v40 = vld [vmem:[#allocation169_spill] sm:$0xff]  ;;  %v10770_v55 = vrot.slane %v16959_v59, %v7686_v31  ;;  %v16962_v51 = vld [vmem:[#allocation184_spill] sm:$0xff] }
 0x310   : > { %16954 = vst [vmem:[#allocation157_spill] sm:$0xff] %v10751_v9  ;;  %16955 = vst [vmem:[#allocation148_spill] sm:$0xff] %v10754_v6  ;;  %v2158_v16 = vsel %vm2138_vm3, %v16953_v49, %v16958_v40  ;;  %v2159_v43 = vsel %vm2138_vm3, %v16958_v40, %v16961_v53  ;;  %v2276_v38 = vsel %vm2138_vm3, %v16944_v41, %v16962_v51  ;;  %7122 = vset.pattern.permute.xlu1 %v7373_v45  ;;  %v16970_v41 = vld [vmem:[#allocation173_spill] sm:$0xff]  ;;  %v16975_v59 = vld [vmem:[#allocation176_spill] sm:$0xff] }
 0x311   : > { %16956 = vst [vmem:[#allocation15_spill] sm:$0xff] %v10758_v18  ;;  %16957 = vst [vmem:[#allocation161_spill] sm:$0xff] %v10761_v54  ;;  %v10783_v49 = vrot.slane %v2156_v60, %v7686_v31  ;;  %v10789_v9 = vrot.slane %v2157_v29, %v7686_v31  ;;  %v10794_v25 = vsel %vm2138_vm3, %v16967_v35, %v16966_v11  ;;  %4653 = vperm.xlu1 %7122, %v10561_v20   ;;  %v10797_v40 = vpop.permute.xlu1 %3886  ;;  %v16971_v60 = vld [vmem:[#allocation188_spill] sm:$0xff]  ;;  %v10814_v35 = vpop.permute.xlu0 %4230  ;;  %v16976_v6 = vld [vmem:[#allocation51_spill] sm:$0xff] }
 0x312   : > { %16960 = vst [vmem:[#allocation150_spill] sm:$0xff] %v10770_v55  ;;  %v10786_v55 = vrot.slane %v2275_v42, %v7686_v31  ;;  %16968 = vst [vmem:[#allocation168_spill] sm:$0xff] %v10797_v40  ;;  %v10800_v45 = vrot.slane %v2158_v16, %v7686_v31  ;;  %v10805_v42 = vsel %vm2138_vm3, %v16966_v11, %v16970_v41  ;;  %4897 = vrot.lane.b32.xlu0 %v10758_v18, %s7369_s23  ;;  %v16978_v18 = vld [vmem:[#allocation189_spill] sm:$0xff]  ;;  %v16980_v21 = vld [vmem:[#allocation178_spill] sm:$0xff] }
 0x313   : > { %16963 = vst [vmem:[#allocation163_spill] sm:$0xff] %v10783_v49  ;;  %16965 = vst [vmem:[#allocation166_spill] sm:$0xff] %v10789_v9  ;;  %v10810_v29 = vsel %vm2138_vm3, %v16970_v41, %v16971_v60  ;;  %v10817_v40 = vrot.slane %v2159_v43, %v7686_v31  ;;  %v10820_v16 = vrot.slane %v2276_v38, %v7686_v31  ;;  %v16979_v43 = vld [vmem:[#allocation191_spill] sm:$0xff]  ;;  %v7374_v9 = vmov 47  }
 0x314   : > { %16964 = vst [vmem:[#allocation152_spill] sm:$0xff] %v10786_v55  ;;  %16969 = vst [vmem:[#allocation154_spill] sm:$0xff] %v10800_v45  ;;  %v2163_v11 = vsel %vm2138_vm3, %v16971_v60, %v16975_v59  ;;  %v10827_v32 = vrot.slane %v16976_v6, %v7686_v31  ;;  %v2164_v38 = vsel %vm2138_vm3, %v16975_v59, %v16979_v43  ;;  %v16981_v6 = vld [vmem:[#allocation196_spill] sm:$0xff] }
 0x315   : > { %16972 = vst [vmem:[#allocation156_spill] sm:$0xff] %v10814_v35  ;;  %16973 = vst [vmem:[#allocation170_spill] sm:$0xff] %v10817_v40  ;;  %v2277_v35 = vsel %vm2138_vm3, %v16961_v53, %v16978_v18  ;;  %v2165_v62 = vsel %vm2138_vm3, %v16979_v43, %v16980_v21  ;;  %v2247_v41 = vsel %vm2138_vm3, %v16952_v22, %v16981_v6  ;;  %v16982_v40 = vld [vmem:[#allocation199_spill] sm:$0xff]  ;;  %v16983_v53 = vld [vmem:[#allocation182_spill] sm:$0xff]  ;;  %7124 = vset.pattern.permute.xlu1 %v7374_v9  ;;  %v10863_v22 = vpop.permute.xlu0 %4234 }
 0x316   : > { %16974 = vst [vmem:[#allocation158_spill] sm:$0xff] %v10820_v16  ;;  %16977 = vst [vmem:[#allocation172_spill] sm:$0xff] %v10827_v32  ;;  %v2249_v45 = vsel %vm2138_vm3, %v16983_v53, %v16982_v40  ;;  %v10851_v59 = vrot.slane %v2163_v11, %v7686_v31  ;;  %v2248_v43 = vsel %vm2138_vm3, %v16981_v6, %v16983_v53  ;;  %v16985_v60 = vld [vmem:[#allocation68_spill] sm:$0xff]  ;;  %4729 = vperm.xlu1 %7124, %v10561_v20   ;;  %v10865_v40 = vpop.permute.xlu1 %3986  ;;  %v16992_v53 = vld [vmem:[#allocation193_spill] sm:$0xff] }
 0x317   : > { %v10858_v32 = vrot.slane %v16985_v60, %v7686_v31  ;;  %4901 = vrot.lane.b32.xlu0 %v10367_v7, %s7369_s23  ;;  %16987 = vst [vmem:[#allocation177_spill] sm:$0xff] %v10863_v22  ;;  %16988 = vst [vmem:[#allocation162_spill] sm:$0xff] %v10865_v40  ;;  %v10868_v9 = vrot.slane %v2277_v35, %v7686_v31  ;;  %v10871_v11 = vrot.slane %v2164_v38, %v7686_v31  ;;  %v16993_v60 = vld [vmem:[#allocation194_spill] sm:$0xff]  ;;  %v16996_v40 = vld [vmem:[#allocation200_spill] sm:$0xff] }
 0x318   : > { %16984 = vst [vmem:[#allocation160_spill] sm:$0xff] %v10851_v59  ;;  %v10874_v6 = vrot.slane %v2165_v62, %v7686_v31  ;;  %v2278_v7 = vsel %vm2138_vm3, %v16992_v53, %v16993_v60  ;;  %v10883_v22 = vrot.slane %v2247_v41, %v7686_v31  ;;  %v10886_v35 = vrot.slane %v2249_v45, %v7686_v31 }
 0x319   : > { %16986 = vst [vmem:[#allocation174_spill] sm:$0xff] %v10858_v32  ;;  %16989 = vst [vmem:[#allocation165_spill] sm:$0xff] %v10868_v9  ;;  %v2166_v32 = vsel %vm2138_vm3, %v16980_v21, %v16992_v53  ;;  %v16997_v38 = vrot.slane %v10547_v28, %v7686_v31  ;;  %v10893_v9 = vrot.slane %v2248_v43, %v7686_v31 }
 0x31a   : > { %16990 = vst [vmem:[#allocation179_spill] sm:$0xff] %v10871_v11  ;;  %16991 = vst [vmem:[#allocation167_spill] sm:$0xff] %v10874_v6  ;;  %v16999_v21 = vrot.slane %v10567_v0, %v7686_v31  ;;  %v17000_v41 = vrot.slane %v10588_v50, %v7686_v31  ;;  %v2330_v45 = vmul.f32 %v10625_v36, %v16996_v40  ;;  %4766 = vrot.lane.b32.xlu1 %v16857_v4, %s7369_s23  ;;  %v10913_v0 = vpop.permute.xlu0 %4238 }
 0x31b   : > { %16994 = vst [vmem:[#allocation180_spill] sm:$0xff] %v10883_v22  ;;  %16995 = vst [vmem:[#allocation181_spill] sm:$0xff] %v10886_v35  ;;  %v2327_v62 = vmul.f32 %v16997_v38, %v16996_v40  ;;  %v2331_v28 = vmul.f32 %v10671_v48, %v16996_v40  ;;  %v2332_v43 = vmul.f32 %v10684_v39, %v16996_v40  ;;  %v17002_v48 = vld [vmem:[#allocation71_spill] sm:$0xff]  ;;  %4905 = vrot.lane.b32.xlu0 %v10436_v8, %s7369_s23  ;;  %v17007_v8 = vld [vmem:[#allocation202_spill] sm:$0xff] }
 0x31c   : > { %16998 = vst [vmem:[#allocation169_spill] sm:$0xff] %v10893_v9  ;;  %v2328_v49 = vmul.f32 %v16999_v21, %v16996_v40  ;;  %v2329_v53 = vmul.f32 %v17000_v41, %v16996_v40  ;;  %v2333_v38 = vmul.f32 %v10687_v57, %v16996_v40  ;;  %17001 = vst [vmem:[#allocation183_spill] sm:$0xff] %v10913_v0  ;;  %v7375_v57 = vmov 48  }
 0x31d   : > { %v2334_v50 = vmul.f32 %v10786_v55, %v16996_v40  ;;  %v2335_v21 = vmul.f32 %v10883_v22, %v16996_v40  ;;  %v2336_v41 = vmul.f32 %v10893_v9, %v16996_v40  ;;  %v10923_v39 = vrot.slane %v17002_v48, %v7686_v31  ;;  %v10938_v9 = vpop.permute.xlu1 %4036  ;;  %7125 = vset.pattern.permute.xlu1 %v7375_v57  ;;  %v17008_v48 = vld [vmem:[#allocation186_spill] sm:$0xff] }
 0x31e   : > { %v10928_v4 = vrot.slane %v2166_v32, %v7686_v31  ;;  %v10931_v0 = vrot.slane %v2278_v7, %v7686_v31  ;;  %v2337_v55 = vmul.f32 %v10886_v35, %v16996_v40  ;;  %v10936_v22 = vadd.f32 %v2327_v62, %v10542_v14  ;;  %17006 = vst [vmem:[#allocation173_spill] sm:$0xff] %v10938_v9 }
 0x31f   : > { %17003 = vst [vmem:[#allocation184_spill] sm:$0xff] %v10923_v39  ;;  %v10941_v39 = vadd.f32 %v2328_v49, %v10550_v19  ;;  %v10944_v32 = vadd.f32 %v2329_v53, %v10553_v2  ;;  %v2250_v7 = vsel %vm2138_vm3, %v16962_v51, %v17007_v8  ;;  %v2251_v14 = vsel %vm2138_vm3, %v17007_v8, %v17008_v48  ;;  %v10966_v51 = vpop.permute.xlu0 %4242 }
 0x320   : > { %17004 = vst [vmem:[#allocation185_spill] sm:$0xff] %v10928_v4  ;;  %17005 = vst [vmem:[#allocation171_spill] sm:$0xff] %v10931_v0  ;;  %v10953_v40 = vadd.f32 %v2330_v45, %v10556_v23  ;;  %v10956_v62 = vadd.f32 %v2331_v28, %v10570_v56  ;;  %v10959_v57 = vadd.f32 %v2332_v43, %v10594_v52  ;;  %4770 = vrot.lane.b32.xlu1 %v16909_v58, %s7369_s23  ;;  %v10980_v56 = vld [vmem:[%s9023_s11 + $0x84] ss:$4 sm:$0xff] }
 0x321   : > { %v10962_v19 = vadd.f32 %v2333_v38, %v10597_v34  ;;  %17009 = vst [vmem:[#allocation188_spill] sm:$0xff] %v10966_v51  ;;  %v10969_v2 = vadd.f32 %v2334_v50, %v10602_v61  ;;  %v10972_v8 = vadd.f32 %v2335_v21, %v10605_v63  ;;  %v10975_v23 = vadd.f32 %v2336_v41, %v10608_v13  ;;  %v17014_v13 = vld [vmem:[#allocation211_spill] sm:$0xff]  ;;  %v10998_v53 = vpop.permute.xlu1 %4087  ;;  %v17027_v51 = vld [vmem:[#allocation209_spill] sm:$0xff] }
 0x322   : > { %4909 = vrot.lane.b32.xlu0 %v10496_v44, %s7369_s23  ;;  %17010 = vst [vmem:[#allocation176_spill] sm:$0xff] %v10980_v56  ;;  %v10984_v52 = vrot.slane %v10980_v56, %v16905_v30  ;;  %v10987_v34 = vadd.f32 %v2337_v55, %v10612_v12  ;;  %v10990_v61 = vrot.slane %v2250_v7, %v7686_v31  ;;  %17015 = vst [vmem:[#allocation196_spill] sm:$0xff] %v10998_v53  ;;  %v17016_v45 = vld [vmem:[#allocation203_spill] sm:$0xff]  ;;  %v17028_v53 = vld [vmem:[#allocation197_spill] sm:$0xff] }
 0x323   : > { %v10993_v63 = vrot.slane %v2251_v14, %v7686_v31  ;;  %v2256_v49 = vsel %vm2138_vm3, %v16993_v60, %v17014_v13  ;;  %v17017_v28 = vrot.slane %v10794_v25, %v7686_v31  ;;  %v17018_v55 = vrot.slane %v10805_v42, %v7686_v31  ;;  %v17020_v60 = vld [vmem:[#allocation205_spill] sm:$0xff]  ;;  %v17021_v42 = vld [vmem:[#allocation207_spill] sm:$0xff]  ;;  %v17022_v14 = vld [vmem:[#allocation192_spill] sm:$0xff] }
 0x324   : > { %17011 = vst [vmem:[#allocation189_spill] sm:$0xff] %v10984_v52  ;;  %17012 = vst [vmem:[#allocation191_spill] sm:$0xff] %v10990_v61  ;;  %v17019_v38 = vrot.slane %v10810_v29, %v7686_v31  ;;  %v2252_v21 = vsel %vm2138_vm3, %v17008_v48, %v17020_v60  ;;  %v11023_v25 = vmul.f32 %v10851_v59, %v17016_v45  ;;  %v11037_v48 = vpop.permute.xlu0 %4246  ;;  %v17029_v58 = vld [vmem:[#allocation213_spill] sm:$0xff] }
 0x325   : > { %17013 = vst [vmem:[#allocation178_spill] sm:$0xff] %v10993_v63  ;;  %v11004_v43 = vmul.f32 %v17017_v28, %v17016_v45  ;;  %v11010_v12 = vmul.f32 %v17018_v55, %v17016_v45  ;;  %v11027_v41 = vmul.f32 %v10871_v11, %v17016_v45  ;;  %v2253_v7 = vsel %vm2138_vm3, %v16978_v18, %v17021_v42  ;;  %v17023_v28 = vld [vmem:[#allocation229_spill] sm:$0xff] }
 0x326   : > { %v11016_v50 = vmul.f32 %v17019_v38, %v17016_v45  ;;  %v2254_v29 = vsel %vm2138_vm3, %v17021_v42, %v17022_v14  ;;  %4774 = vrot.lane.b32.xlu1 %v17023_v28, %s7369_s23  ;;  %17024 = vst [vmem:[#allocation182_spill] sm:$0xff] %v11037_v48  ;;  %v11041_v55 = vmul.f32 %v10874_v6, %v17016_v45 }
 0x327   : > { %v11045_v38 = vmul.f32 %v10928_v4, %v17016_v45  ;;  %v11049_v18 = vmul.f32 %v10931_v0, %v17016_v45  ;;  %v11052_v44 = vrot.slane %v2256_v49, %v7686_v31  ;;  %4913 = vrot.lane.b32.xlu0 %v10984_v52, %s7369_s23  ;;  %v11057_v42 = vrot.slane %v2252_v21, %v7686_v31  ;;  %v11068_v49 = vpop.permute.xlu1 %4091  ;;  %v17033_v4 = vld [vmem:[#allocation37_spill] sm:$0xff] }
 0x328   : > { %v2255_v48 = vsel %vm2138_vm3, %v17022_v14, %v17027_v51  ;;  %v2257_v9 = vsel %vm2138_vm3, %v17014_v13, %v17028_v53  ;;  %v2258_v35 = vsel %vm2138_vm3, %v17028_v53, %v17029_v58  ;;  %17030 = vst [vmem:[#allocation200_spill] sm:$0xff] %v11068_v49  ;;  %v11071_v0 = vrot.slane %v2253_v7, %v7686_v31  ;;  %v17035_v14 = vld [vmem:[#allocation89_spill] sm:$0xff]  ;;  %v17037_v13 = vld [vmem:[#allocation215_spill] sm:$0xff] }
 0x329   : > { %17025 = vst [vmem:[#allocation193_spill] sm:$0xff] %v11052_v44  ;;  %17026 = vst [vmem:[#allocation194_spill] sm:$0xff] %v11057_v42  ;;  %v11074_v21 = vrot.slane %v2254_v29, %v7686_v31  ;;  %v11078_v6 = vrot.slane %v17033_v4, %v7686_v31  ;;  %v11082_v11 = vrot.slane %v17035_v14, %v7686_v31  ;;  %v11100_v14 = vpop.permute.xlu0 %4250 }
 0x32a   : > { %17031 = vst [vmem:[#allocation202_spill] sm:$0xff] %v11071_v0  ;;  %v17038_v53 = vrot.slane %v10647_v47, %v7686_v31  ;;  %v17039_v7 = vrot.slane %v10659_v5, %v7686_v31  ;;  %v17040_v29 = vrot.slane %v10664_v10, %v7686_v31  ;;  %4778 = vrot.lane.b32.xlu1 %v16927_v17, %s7369_s23  ;;  %17041 = vst [vmem:[#allocation205_spill] sm:$0xff] %v11100_v14 }
 0x32b   : > { %17032 = vst [vmem:[#allocation186_spill] sm:$0xff] %v11074_v21  ;;  %17034 = vst [vmem:[#allocation211_spill] sm:$0xff] %v11078_v6  ;;  %v2400_v6 = vmul.f32 %v10711_v15, %v17037_v13  ;;  %v11103_v47 = vrot.slane %v2255_v48, %v7686_v31  ;;  %v11110_v5 = vmul.f32 %v11052_v44, %v17016_v45  ;;  %5042 = vperm.xlu0 %7126, %v10561_v20   ;;  %v11124_v14 = vpop.permute.xlu1 %4095 }
 0x32c   : > { %17036 = vst [vmem:[#allocation203_spill] sm:$0xff] %v11082_v11  ;;  %v2397_v59 = vmul.f32 %v17038_v53, %v17037_v13  ;;  %v2398_v49 = vmul.f32 %v17039_v7, %v17037_v13  ;;  %v2399_v36 = vmul.f32 %v17040_v29, %v17037_v13  ;;  %v11106_v53 = vrot.slane %v2257_v9, %v7686_v31 }
 0x32d   : > { %17042 = vst [vmem:[#allocation207_spill] sm:$0xff] %v11103_v47  ;;  %v11113_v10 = vrot.slane %v2258_v35, %v7686_v31  ;;  %v2401_v7 = vmul.f32 %v10714_v1, %v17037_v13  ;;  %v2402_v29 = vmul.f32 %v10728_v3, %v17037_v13  ;;  %v2403_v48 = vmul.f32 %v10761_v54, %v17037_v13 }
 0x32e   : > { %17043 = vst [vmem:[#allocation192_spill] sm:$0xff] %v11106_v53  ;;  %v2404_v9 = vmul.f32 %v10820_v16, %v17037_v13  ;;  %17045 = vst [vmem:[#allocation213_spill] sm:$0xff] %v11124_v14  ;;  %v2405_v35 = vmul.f32 %v10990_v61, %v17037_v13  ;;  %v2406_v17 = vmul.f32 %v10993_v63, %v17037_v13  ;;  %4782 = vrot.lane.b32.xlu1 %v16932_v46, %s7369_s23  ;;  %v11138_v14 = vpop.permute.xlu0 %4254  ;;  %v17047_v61 = vld [vmem:[#allocation217_spill] sm:$0xff] }
 0x32f   : > { %17044 = vst [vmem:[#allocation197_spill] sm:$0xff] %v11113_v10  ;;  %v2407_v44 = vmul.f32 %v11057_v42, %v17037_v13  ;;  %v2408_v11 = vadd.f32 %v2397_v59, %v10936_v22  ;;  %v2409_v51 = vadd.f32 %v2398_v49, %v10941_v39  ;;  %v2410_v56 = vadd.f32 %v2399_v36, %v10944_v32  ;;  %v17055_v13 = vld [vmem:[#allocation154_spill] sm:$0xff] }
 0x330   : > { %v2411_v4 = vadd.f32 %v2400_v6, %v10953_v40  ;;  %17046 = vst [vmem:[#allocation215_spill] sm:$0xff] %v11138_v14  ;;  %v17048_v63 = vrot.slane %v10722_v26, %v7686_v31  ;;  %v17049_v59 = vrot.slane %v10733_v37, %v7686_v31  ;;  %v17050_v36 = vrot.slane %v10738_v24, %v7686_v31  ;;  %v17051_v6 = vld [vmem:[#allocation16_spill] sm:$0xff]  ;;  %v17053_v40 = vld [vmem:[#allocation163_spill] sm:$0xff]  ;;  %v17054_v37 = vld [vmem:[#allocation166_spill] sm:$0xff]  ;;  %v11165_v24 = vpop.permute.xlu1 %4099 }
 0x331   : > { %5267 = vrot.lane.b32.xlu0 %v10392_v33, %s7354_s24  ;;  %v11156_v32 = vrot.slane %v10388_v27, %v17051_v6  ;;  %v2412_v26 = vadd.f32 %v2401_v7, %v10956_v62  ;;  %v2471_v49 = vmul.f32 %v17054_v37, %v17047_v61  ;;  %17056 = vst [vmem:[#allocation293_spill] sm:$0xff] %v11165_v24  ;;  %v17057_v62 = vld [vmem:[#allocation170_spill] sm:$0xff]  ;;  %v17058_v37 = vld [vmem:[#allocation165_spill] sm:$0xff] }
 0x332   : > { %v2467_v16 = vmul.f32 %v17048_v63, %v17047_v61  ;;  %v2468_v22 = vmul.f32 %v17049_v59, %v17047_v61  ;;  %v2469_v39 = vmul.f32 %v17050_v36, %v17047_v61  ;;  %v2470_v63 = vmul.f32 %v17053_v40, %v17047_v61 }
 0x333   : > { %17052 = vst [vmem:[#allocation217_spill] sm:$0xff] %v11156_v32  ;;  %v2472_v59 = vmul.f32 %v17055_v13, %v17047_v61  ;;  %v7376_v36 = vmov 52   ;;  %v2413_v14 = vadd.f32 %v2402_v29, %v10959_v57  ;;  %v2414_v42 = vadd.f32 %v2403_v48, %v10962_v19  ;;  %v17059_v57 = vld [vmem:[#allocation228_spill] sm:$0xff]  ;;  %v11181_v19 = vpop.permute.xlu0 %4258 }
 0x334   : > { %7129 = vset.pattern.permute.xlu0 %v7376_v36  ;;  %v2415_v54 = vadd.f32 %v2404_v9, %v10969_v2  ;;  %v2473_v7 = vmul.f32 %v17057_v62, %v17047_v61  ;;  %v2416_v40 = vadd.f32 %v2405_v35, %v10972_v8  ;;  %v2474_v3 = vmul.f32 %v17058_v37, %v17047_v61 }
 0x335   : > { %v2475_v13 = vmul.f32 %v11071_v0, %v17047_v61  ;;  %v2476_v36 = vmul.f32 %v11074_v21, %v17047_v61  ;;  %4786 = vrot.lane.b32.xlu1 %v17059_v57, %s7369_s23  ;;  %17060 = vst [vmem:[#allocation294_spill] sm:$0xff] %v11181_v19  ;;  %v2477_v2 = vmul.f32 %v11103_v47, %v17047_v61  ;;  %v11188_v21 = vpop.permute.xlu1 %4103  ;;  %v17122_v57 = vld [vmem:[#allocation36_spill] sm:$0xff] }
 0x336   : > { %v2478_v29 = vadd.f32 %v2467_v16, %v2408_v11  ;;  %v2479_v48 = vadd.f32 %v2468_v22, %v2409_v51  ;;  %v2480_v8 = vadd.f32 %v2469_v39, %v2410_v56  ;;  %5271 = vrot.lane.b32.xlu0 %v11156_v32, %s7354_s24  ;;  %v2417_v9 = vadd.f32 %v2406_v17, %v10975_v23  ;;  %v17062_v16 = vld [vmem:[#allocation61_spill] sm:$0xff]  ;;  %v17064_v23 = vld [vmem:[#allocation247_spill] sm:$0xff] }
 0x337   : > { %v2481_v35 = vadd.f32 %v2470_v63, %v2411_v4  ;;  %v2482_v24 = vadd.f32 %v2471_v49, %v2412_v26  ;;  %v2483_v0 = vadd.f32 %v2472_v59, %v2413_v14  ;;  %17061 = vst [vmem:[#allocation295_spill] sm:$0xff] %v11188_v21  ;;  %v2546_v37 = vmul.f32 %v11106_v53, %v17016_v45  ;;  %v11201_v61 = vpop.permute.xlu0 %4262  ;;  %v17071_v63 = vld [vmem:[#allocation225_spill] sm:$0xff] }
 0x338   : > { %v2418_v19 = vadd.f32 %v2407_v44, %v10987_v34  ;;  %v2484_v62 = vadd.f32 %v2473_v7, %v2414_v42  ;;  %v11195_v11 = vrot.slane %v17062_v16, %v7686_v31  ;;  %v2547_v51 = vmul.f32 %v11113_v10, %v17016_v45  ;;  %17065 = vst [vmem:[#allocation297_spill] sm:$0xff] %v11201_v61  ;;  %v17066_v45 = vld [vmem:[#allocation134_spill] sm:$0xff] }
 0x339   : > { %v2485_v56 = vadd.f32 %v2474_v3, %v2415_v54  ;;  %v2486_v17 = vadd.f32 %v2475_v13, %v2416_v40  ;;  %v2487_v4 = vadd.f32 %v2476_v36, %v2417_v9  ;;  %4790 = vrot.lane.b32.xlu1 %v17064_v23, %s7369_s23  ;;  %v11204_v22 = vadd.f32 %v11004_v43, %v2478_v29  ;;  %v17067_v3 = vld [vmem:[#allocation223_spill] sm:$0xff]  ;;  %v17068_v54 = vld [vmem:[#allocation220_spill] sm:$0xff]  ;;  %v11228_v26 = vpop.permute.xlu1 %4107  ;;  %v17074_v36 = vld [vmem:[#allocation250_spill] sm:$0xff] }
 0x33a   : > { %17063 = vst [vmem:[#allocation296_spill] sm:$0xff] %v11195_v11  ;;  %v2488_v14 = vadd.f32 %v2477_v2, %v2418_v19  ;;  %v11207_v44 = vadd.f32 %v11010_v12, %v2479_v48  ;;  %v11210_v34 = vadd.f32 %v11016_v50, %v2480_v8  ;;  %5275 = vrot.lane.b32.xlu0 %v17066_v45, %s7354_s24  ;;  %17069 = vst [vmem:[#allocation223_spill] sm:$0xff] %v11228_v26  ;;  %v17070_v50 = vld [vmem:[#allocation206_spill] sm:$0xff]  ;;  %v17076_v2 = vld [vmem:[#allocation212_spill] sm:$0xff] }
 0x33b   : > { %v11217_v42 = vsel %vm2615_vm4, %v17068_v54, %v17067_v3  ;;  %v11220_v39 = vadd.f32 %v11023_v25, %v2481_v35  ;;  %v11223_v43 = vadd.f32 %v11027_v41, %v2482_v24  ;;  %v11226_v12 = vadd.f32 %v11041_v55, %v2483_v0  ;;  %v17072_v25 = vld [vmem:[#allocation208_spill] sm:$0xff]  ;;  %v17073_v55 = vld [vmem:[#allocation230_spill] sm:$0xff]  ;;  %v17077_v29 = vld [vmem:[#allocation233_spill] sm:$0xff] }
 0x33c   : > { %v11233_v40 = vsel %vm2615_vm4, %v17067_v3, %v17070_v50  ;;  %v11238_v49 = vsel %vm2615_vm4, %v17070_v50, %v17071_v63  ;;  %v11243_v41 = vsel %vm2615_vm4, %v17071_v63, %v17072_v25  ;;  %v11246_v0 = vadd.f32 %v11045_v38, %v2484_v62  ;;  %v17075_v62 = vld [vmem:[#allocation210_spill] sm:$0xff]  ;;  %v17080_v48 = vld [vmem:[#allocation148_spill] sm:$0xff]  ;;  %v17083_v54 = vld [vmem:[#allocation235_spill] sm:$0xff] }
 0x33d   : > { %v11251_v13 = vsel %vm2615_vm4, %v17072_v25, %v17073_v55  ;;  %v11254_v59 = vadd.f32 %v11049_v18, %v2485_v56  ;;  %v11257_v24 = vadd.f32 %v11110_v5, %v2486_v17  ;;  %v11259_v7 = vadd.f32 %v2546_v37, %v2487_v4  ;;  %4794 = vrot.lane.b32.xlu1 %v17074_v36, %s7369_s23  ;;  %v17078_v5 = vld [vmem:[#allocation15_spill] sm:$0xff]  ;;  %v11277_v37 = vpop.permute.xlu0 %4307  ;;  %v11291_v4 = vpop.permute.xlu1 %4111  ;;  %v17084_v63 = vld [vmem:[#allocation214_spill] sm:$0xff]  ;;  %v17088_v56 = vld [vmem:[#allocation216_spill] sm:$0xff] }
 0x33e   : > { %v11268_v19 = vsel %vm2615_vm4, %v17073_v55, %v17075_v62  ;;  %v11273_v18 = vsel %vm2615_vm4, %v17077_v29, %v17076_v2  ;;  %5279 = vrot.lane.b32.xlu0 %v17078_v5, %s7354_s24  ;;  %17079 = vst [vmem:[#allocation220_spill] sm:$0xff] %v11277_v37  ;;  %v11281_v8 = vrot.slane %v17080_v48, %v17051_v6  ;;  %17082 = vst [vmem:[#allocation225_spill] sm:$0xff] %v11291_v4  ;;  %v17085_v55 = vld [vmem:[#allocation26_spill] sm:$0xff]  ;;  %v17089_v35 = vld [vmem:[#allocation276_spill] sm:$0xff] }
 0x33f   : > { %v11289_v17 = vadd.f32 %v2547_v51, %v2488_v14  ;;  %v11298_v50 = vsel %vm2615_vm4, %v17076_v2, %v17083_v54  ;;  %v11303_v25 = vsel %vm2615_vm4, %v17083_v54, %v17084_v63  ;;  %v11307_v29 = vrot.slane %v17085_v55, %v7686_v31  ;;  %v17087_v3 = vld [vmem:[#allocation238_spill] sm:$0xff]  ;;  %v17090_v9 = vld [vmem:[#allocation240_spill] sm:$0xff]  ;;  %v17091_v38 = vld [vmem:[#allocation241_spill] sm:$0xff] }
 0x340   : > { %17081 = vst [vmem:[#allocation206_spill] sm:$0xff] %v11281_v8  ;;  %v11316_v2 = vsel %vm2615_vm4, %v17084_v63, %v17087_v3  ;;  %v11321_v54 = vsel %vm2615_vm4, %v17087_v3, %v17088_v56  ;;  %v11328_v51 = vsel %vm2615_vm4, %v17075_v62, %v17090_v9  ;;  %v11333_v14 = vsel %vm2615_vm4, %v17088_v56, %v17091_v38  ;;  %v17092_v63 = vld [vmem:[#allocation243_spill] sm:$0xff]  ;;  %v17093_v61 = vld [vmem:[#allocation218_spill] sm:$0xff]  ;;  %v17094_v3 = vld [vmem:[#allocation280_spill] sm:$0xff] }
 0x341   : > { %17086 = vst [vmem:[#allocation208_spill] sm:$0xff] %v11307_v29  ;;  %4798 = vrot.lane.b32.xlu1 %v17089_v35, %s7369_s23  ;;  %v11338_v5 = vsel %vm2615_vm4, %v17093_v61, %v17092_v63  ;;  %v11342_v4 = vrot.slane %v17094_v3, %v7686_v31  ;;  %v11346_v37 = vpop.permute.xlu0 %4517  ;;  %v17097_v45 = vld [vmem:[#allocation221_spill] sm:$0xff]  ;;  %v17098_v26 = vld [vmem:[#allocation110_spill] sm:$0xff]  ;;  %v17102_v29 = vld [vmem:[#allocation224_spill] sm:$0xff]  ;;  %v11436_v53 = vrot.slane %v10392_v33, %v7686_v31 }
 0x342   : > { %5283 = vrot.lane.b32.xlu0 %v11281_v8, %s7354_s24  ;;  %17096 = vst [vmem:[#allocation210_spill] sm:$0xff] %v11346_v37  ;;  %v11355_v61 = vsel %vm2615_vm4, %v17092_v63, %v17097_v45  ;;  %v11359_v21 = vrot.slane %v17098_v26, %v7686_v31  ;;  %v17101_v8 = vld [vmem:[#allocation246_spill] sm:$0xff]  ;;  %v17104_v62 = vld [vmem:[#allocation251_spill] sm:$0xff]  ;;  %v17111_v35 = vld [vmem:[#allocation116_spill] sm:$0xff] }
 0x343   : > { %17095 = vst [vmem:[#allocation230_spill] sm:$0xff] %v11342_v4  ;;  %v11361_v4 = vpop.permute.xlu1 %4115  ;;  %v11370_v56 = vsel %vm2615_vm4, %v17097_v45, %v17101_v8  ;;  %v11375_v63 = vsel %vm2615_vm4, %v17101_v8, %v17102_v29  ;;  %v11386_v26 = vsel %vm2615_vm4, %v17102_v29, %v17104_v62  ;;  %v17106_v45 = vld [vmem:[#allocation35_spill] sm:$0xff]  ;;  %v11404_v29 = vrot.slane %v17111_v35, %v7686_v31  ;;  %v17117_v35 = vld [vmem:[#allocation234_spill] sm:$0xff]  ;;  %v17123_v6 = vld [vmem:[#allocation245_spill] sm:$0xff] }
 0x344   : > { %17099 = vst [vmem:[#allocation212_spill] sm:$0xff] %v11359_v21  ;;  %17100 = vst [vmem:[#allocation233_spill] sm:$0xff] %v11361_v4  ;;  %v2795_v21 = vrot.slane %v11328_v51, %v7686_v31  ;;  %v17107_v3 = vld [vmem:[#allocation227_spill] sm:$0xff]  ;;  %v17118_v55 = vld [vmem:[#allocation46_spill] sm:$0xff] }
 0x345   : > { %17103 = vst [vmem:[#allocation235_spill] sm:$0xff] %v11375_v63  ;;  %17105 = vst [vmem:[#allocation214_spill] sm:$0xff] %v11386_v26  ;;  %4802 = vrot.lane.b32.xlu1 %v17106_v45, %s7369_s23  ;;  %v11395_v51 = vsel %vm2615_vm4, %v17104_v62, %v17107_v3  ;;  %v17109_v4 = vld [vmem:[#allocation231_spill] sm:$0xff]  ;;  %v17113_v62 = vld [vmem:[#allocation270_spill] sm:$0xff]  ;;  %v2727_v1 = vsel %vm2615_vm4, %v17118_v55, %v17123_v6 }
 0x346   : > { %17108 = vst [vmem:[#allocation238_spill] sm:$0xff] %v11395_v51  ;;  %v17110_v11 = vld [vmem:[#allocation263_spill] sm:$0xff]  ;;  %17112 = vst [vmem:[#allocation216_spill] sm:$0xff] %v11404_v29  ;;  %5287 = vrot.lane.b32.xlu0 %v10984_v52, %s7354_s24  ;;  %v11415_v10 = vsel %vm2615_vm4, %v17107_v3, %v17113_v62  ;;  %v17119_v16 = vld [vmem:[#allocation242_spill] sm:$0xff]  ;;  %v2811_v48 = vrot.slane %v2727_v1, %v7686_v31 }
 0x347   : > { %v11400_v37 = vsel %vm2615_vm4, %v17110_v11, %v17109_v4  ;;  %17114 = vst [vmem:[#allocation240_spill] sm:$0xff] %v11415_v10  ;;  %v17115_v11 = vld [vmem:[#allocation275_spill] sm:$0xff]  ;;  %v11422_v29 = vpop.permute.xlu1 %4119  ;;  %v2726_v3 = vsel %vm2615_vm4, %v17119_v16, %v17118_v55  ;;  %17120 = vst [vmem:[#allocation243_spill] sm:$0xff] %v11436_v53  ;;  %v17124_v33 = vld [vmem:[#allocation45_spill] sm:$0xff] }
 0x348   : > { %v11420_v47 = vsel %vm2615_vm4, %v17109_v4, %v17115_v11  ;;  %17116 = vst [vmem:[#allocation241_spill] sm:$0xff] %v11422_v29  ;;  %v11429_v8 = vsel %vm2615_vm4, %v17115_v11, %v17117_v35  ;;  %v11438_v4 = vpop.permute.xlu0 %4691  ;;  %v11447_v11 = vsel %vm2615_vm4, %v17117_v35, %v17122_v57  ;;  %v17126_v55 = vld [vmem:[#allocation237_spill] sm:$0xff]  ;;  %v2807_v15 = vrot.slane %v2726_v3, %v7686_v31  ;;  %v17132_v3 = vld [vmem:[#allocation40_spill] sm:$0xff] }
 0x349   : > { %17121 = vst [vmem:[#allocation218_spill] sm:$0xff] %v11438_v4  ;;  %4859 = vrot.lane.b32.xlu1 %v17124_v33, %s7369_s23  ;;  %v2985_v29 = vrot.slane %v11420_v47, %v7686_v31  ;;  %v17125_v4 = vld [vmem:[#allocation47_spill] sm:$0xff]  ;;  %v2989_v6 = vrot.slane %v11429_v8, %v7686_v31  ;;  %v2638_v53 = vsel %vm2615_vm4, %v17122_v57, %v17126_v55  ;;  %v17128_v10 = vld [vmem:[#allocation53_spill] sm:$0xff] }
 0x34a   : > { %v2724_v52 = vsel %vm2615_vm4, %v17090_v9, %v17125_v4  ;;  %v2725_v35 = vsel %vm2615_vm4, %v17125_v4, %v17119_v16  ;;  %5316 = vperm.xlu0 %7129, %v10561_v20   ;;  %v2993_v9 = vrot.slane %v11447_v11, %v7686_v31  ;;  %v17129_v16 = vrot.slane %v11217_v42, %v7686_v31  ;;  %v17134_v26 = vld [vmem:[#allocation49_spill] sm:$0xff] }
 0x34b   : > { %v11471_v47 = vpop.permute.xlu1 %4123  ;;  %v17130_v8 = vrot.slane %v11233_v40, %v7686_v31  ;;  %v2799_v11 = vrot.slane %v2724_v52, %v7686_v31  ;;  %v2803_v1 = vrot.slane %v2725_v35, %v7686_v31  ;;  %v17133_v42 = vrot.slane %v11238_v49, %v7686_v31 }
 0x34c   : > { %17127 = vst [vmem:[#allocation221_spill] sm:$0xff] %v11471_v47  ;;  %v2812_v4 = vmul.f32 %v17129_v16, %v17128_v10  ;;  %v11484_v57 = vpop.permute.xlu0 %4768  ;;  %v2639_v47 = vsel %vm2615_vm4, %v17126_v55, %v17132_v3  ;;  %v2997_v40 = vrot.slane %v2638_v53, %v7686_v31  ;;  %v17136_v52 = vrot.slane %v11251_v13, %v7686_v31 }
 0x34d   : > { %v2813_v51 = vmul.f32 %v17130_v8, %v17128_v10  ;;  %17131 = vst [vmem:[#allocation246_spill] sm:$0xff] %v11484_v57  ;;  %v2814_v16 = vmul.f32 %v17133_v42, %v17128_v10  ;;  %4863 = vrot.lane.b32.xlu1 %v17134_v26, %s7369_s23  ;;  %v17135_v8 = vrot.slane %v11243_v41, %v7686_v31  ;;  %v7377_v42 = vmov 55  }
 0x34e   : > { %v2816_v35 = vmul.f32 %v17136_v52, %v17128_v10  ;;  %v17137_v49 = vrot.slane %v11268_v19, %v7686_v31  ;;  %7132 = vset.pattern.permute.xlu0 %v7377_v42  ;;  %v2818_v26 = vmul.f32 %v2795_v21, %v17128_v10  ;;  %v2819_v53 = vmul.f32 %v2799_v11, %v17128_v10  ;;  %v17150_v42 = vld [vmem:[#allocation72_spill] sm:$0xff] }
 0x34f   : > { %v2815_v57 = vmul.f32 %v17135_v8, %v17128_v10  ;;  %v2820_v63 = vmul.f32 %v2803_v1, %v17128_v10  ;;  %v2821_v41 = vmul.f32 %v2807_v15, %v17128_v10  ;;  %5430 = vperm.xlu0 %7132, %v10561_v20   ;;  %v11515_v8 = vpop.permute.xlu1 %4127  ;;  %v3001_v13 = vrot.slane %v2639_v47, %v7686_v31  ;;  %v17140_v15 = vld [vmem:[#allocation248_spill] sm:$0xff]  ;;  %v17141_v1 = vld [vmem:[#allocation57_spill] sm:$0xff]  ;;  %v17142_v47 = vld [vmem:[#allocation51_spill] sm:$0xff] }
 0x350   : > { %v2817_v55 = vmul.f32 %v17137_v49, %v17128_v10  ;;  %17138 = vst [vmem:[#allocation224_spill] sm:$0xff] %v11515_v8  ;;  %v2822_v52 = vmul.f32 %v2811_v48, %v17128_v10  ;;  %v11520_v19 = vadd.f32 %v2812_v4, %v11204_v22  ;;  %v11523_v49 = vadd.f32 %v2813_v51, %v11207_v44  ;;  %v11525_v21 = vpop.permute.xlu0 %4772 }
 0x351   : > { %17139 = vst [vmem:[#allocation251_spill] sm:$0xff] %v11525_v21  ;;  %v11528_v11 = vadd.f32 %v2814_v16, %v11210_v34  ;;  %v11533_v20 = vsel %vm2615_vm4, %v17141_v1, %v17140_v15  ;;  %4867 = vrot.lane.b32.xlu1 %v17142_v47, %s7369_s23  ;;  %v11539_v10 = vrot.slane %v10388_v27, %v16905_v30 }
 0x352   : > { %v11542_v22 = vadd.f32 %v2815_v57, %v11220_v39  ;;  %v11545_v44 = vadd.f32 %v2816_v35, %v11223_v43  ;;  %v11548_v34 = vadd.f32 %v2817_v55, %v11226_v12  ;;  %v11553_v48 = vsel %vm2615_vm4, %v17091_v38, %v17141_v1  ;;  %v17148_v57 = vld [vmem:[#allocation63_spill] sm:$0xff] }
 0x353   : > { %17143 = vst [vmem:[#allocation227_spill] sm:$0xff] %v11539_v10  ;;  %v11556_v51 = vadd.f32 %v2818_v26, %v11246_v0  ;;  %v11559_v27 = vadd.f32 %v2819_v53, %v11254_v59  ;;  %v11562_v39 = vadd.f32 %v2820_v63, %v11257_v24  ;;  %v11565_v43 = vadd.f32 %v2821_v41, %v11259_v7  ;;  %v11567_v4 = vpop.permute.xlu1 %4131  ;;  %v17145_v0 = vld [vmem:[#allocation62_spill] sm:$0xff]  ;;  %v17146_v24 = vld [vmem:[#allocation257_spill] sm:$0xff]  ;;  %v17159_v1 = vld [vmem:[#allocation267_spill] sm:$0xff] }
 0x354   : > { %17144 = vst [vmem:[#allocation231_spill] sm:$0xff] %v11567_v4  ;;  %5471 = vrot.lane.b32.xlu0 %v17023_v28, %s7378_s28  ;;  %v11572_v12 = vadd.f32 %v2822_v52, %v11289_v17  ;;  %v11579_v59 = vsel %vm2615_vm4, %v17140_v15, %v17145_v0  ;;  %v11584_v7 = vsel %vm2615_vm4, %v17145_v0, %v17146_v24  ;;  %v11586_v38 = vpop.permute.xlu0 %4776  ;;  %v7379_v63 = vmov 56   ;;  %v17151_v0 = vld [vmem:[#allocation264_spill] sm:$0xff]  ;;  %v17161_v15 = vld [vmem:[#allocation78_spill] sm:$0xff] }
 0x355   : > { %17147 = vst [vmem:[#allocation263_spill] sm:$0xff] %v11586_v38  ;;  %7133 = vset.pattern.permute.xlu0 %v7379_v63  ;;  %v17149_v16 = vrot.slane %v11400_v37, %v7686_v31  ;;  %v11597_v55 = vmul.f32 %v2985_v29, %v17148_v57  ;;  %v11602_v53 = vsel %vm2615_vm4, %v17146_v24, %v17150_v42  ;;  %v17152_v24 = vld [vmem:[#allocation69_spill] sm:$0xff]  ;;  %v17163_v17 = vld [vmem:[#allocation268_spill] sm:$0xff]  ;;  %v17169_v4 = vld [vmem:[#allocation86_spill] sm:$0xff] }
 0x356   : > { %4871 = vrot.lane.b32.xlu1 %v11539_v10, %s7369_s23  ;;  %v11607_v41 = vmul.f32 %v2989_v6, %v17148_v57  ;;  %v11610_v52 = vmul.f32 %v2993_v9, %v17148_v57  ;;  %v11613_v37 = vmul.f32 %v2997_v40, %v17148_v57  ;;  %v11616_v29 = vmul.f32 %v3001_v13, %v17148_v57  ;;  %v17154_v6 = vld [vmem:[#allocation265_spill] sm:$0xff]  ;;  %v17157_v13 = vld [vmem:[#allocation266_spill] sm:$0xff] }
 0x357   : > { %v11594_v35 = vmul.f32 %v17149_v16, %v17148_v57  ;;  %v11624_v63 = vmul.f32 %v17152_v24, %v17151_v0  ;;  %v11628_v9 = vmul.f32 %v17152_v24, %v17154_v6  ;;  %v11630_v16 = vpop.permute.xlu1 %4135  ;;  %v11638_v42 = vmul.f32 %v17152_v24, %v17157_v13  ;;  %v17165_v40 = vld [vmem:[#allocation269_spill] sm:$0xff]  ;;  %v17167_v13 = vld [vmem:[#allocation286_spill] sm:$0xff] }
 0x358   : > { %17156 = vst [vmem:[#allocation234_spill] sm:$0xff] %v11630_v16  ;;  %5475 = vrot.lane.b32.xlu0 %v16932_v46, %s7378_s28  ;;  %v11642_v0 = vmul.f32 %v17152_v24, %v17159_v1  ;;  %v11647_v6 = vsel %vm2615_vm4, %v17113_v62, %v17161_v15  ;;  %v11649_v26 = vpop.permute.xlu0 %4780  ;;  %v11653_v21 = vmul.f32 %v17152_v24, %v17163_v17  ;;  %v17170_v62 = vld [vmem:[#allocation59_spill] sm:$0xff]  ;;  %v17173_v17 = vld [vmem:[#allocation289_spill] sm:$0xff] }
 0x359   : > { %17153 = vst [vmem:[#allocation270_spill] sm:$0xff] %v11624_v63  ;;  %17155 = vst [vmem:[#allocation275_spill] sm:$0xff] %v11628_v9  ;;  %v11657_v38 = vmul.f32 %v17152_v24, %v17165_v40  ;;  %v11661_v16 = vmul.f32 %v17152_v24, %v17167_v13  ;;  %v2763_v8 = vsel %vm2615_vm4, %v17132_v3, %v17169_v4  ;;  %v17175_v40 = vld [vmem:[#allocation285_spill] sm:$0xff]  ;;  %v17197_v63 = vld [vmem:[#allocation100_spill] sm:$0xff] }
 0x35a   : > { %17158 = vst [vmem:[#allocation46_spill] sm:$0xff] %v11638_v42  ;;  %17160 = vst [vmem:[#allocation242_spill] sm:$0xff] %v11642_v0  ;;  %4875 = vrot.lane.b32.xlu1 %v17170_v62, %s7369_s23  ;;  %v11674_v1 = vmul.f32 %v17173_v17, %v17152_v24  ;;  %v11679_v13 = vsel %vm2615_vm4, %v17161_v15, %v17175_v40  ;;  %v3005_v17 = vrot.slane %v2763_v8, %v7686_v31  ;;  %v17191_v8 = vld [vmem:[#allocation144_spill] sm:$0xff] }
 0x35b   : > { %17162 = vst [vmem:[#allocation36_spill] sm:$0xff] %v11649_v26  ;;  %17164 = vst [vmem:[#allocation245_spill] sm:$0xff] %v11653_v21  ;;  %v17171_v26 = vld [vmem:[#allocation287_spill] sm:$0xff]  ;;  %v11699_v0 = vpop.permute.xlu1 %4139 }
 0x35c   : > { %17166 = vst [vmem:[#allocation47_spill] sm:$0xff] %v11657_v38  ;;  %17168 = vst [vmem:[#allocation237_spill] sm:$0xff] %v11661_v16  ;;  %v11670_v46 = vmul.f32 %v17152_v24, %v17171_v26  ;;  %v17176_v16 = vld [vmem:[#allocation42_spill] sm:$0xff]  ;;  %5479 = vrot.lane.b32.xlu0 %v17064_v23, %s7378_s28 }
 0x35d   : > { %17174 = vst [vmem:[#allocation40_spill] sm:$0xff] %v11674_v1  ;;  %v2736_v3 = vsel %vm2615_vm4, %v17169_v4, %v17176_v16  ;;  %v17177_v38 = vld [vmem:[#allocation70_spill] sm:$0xff]  ;;  %v17181_v1 = vld [vmem:[#allocation12_spill] sm:$0xff]  ;;  %17182 = vst [vmem:[#allocation62_spill] sm:$0xff] %v11699_v0  ;;  %v11717_v0 = vpop.permute.xlu0 %4784 }
 0x35e   : > { %17172 = vst [vmem:[#allocation53_spill] sm:$0xff] %v11670_v46  ;;  %v11686_v21 = vmul.f32 %v17177_v38, %v17152_v24  ;;  %v17179_v26 = vld [vmem:[#allocation22_spill] sm:$0xff]  ;;  %v11697_v15 = vsel %vm2615_vm4, %v17175_v40, %v17181_v1  ;;  %17187 = vst [vmem:[#allocation63_spill] sm:$0xff] %v11717_v0  ;;  %v3009_v23 = vrot.slane %v2736_v3, %v7686_v31 }
 0x35f   : > { %v11690_v46 = vmul.f32 %v17179_v26, %v17152_v24  ;;  %v17183_v4 = vld [vmem:[#allocation38_spill] sm:$0xff]  ;;  %v17184_v24 = vld [vmem:[#allocation84_spill] sm:$0xff]  ;;  %v11735_v0 = vrot.slane %v17023_v28, %v7686_v31  ;;  %v11739_v3 = vrot.slane %v17124_v33, %v7686_v31  ;;  %v11752_v28 = vrot.slane %v17197_v63, %v7686_v31 }
 0x360   : > { %17178 = vst [vmem:[#allocation248_spill] sm:$0xff] %v11686_v21  ;;  %v11706_v21 = vsel %vm2615_vm4, %v17181_v1, %v17183_v4  ;;  %v17186_v26 = vld [vmem:[#allocation88_spill] sm:$0xff]  ;;  %5483 = vrot.lane.b32.xlu0 %v17074_v36, %s7378_s28 }
 0x361   : > { %17180 = vst [vmem:[#allocation57_spill] sm:$0xff] %v11690_v46  ;;  %v11711_v46 = vsel %vm2138_vm3, %v17020_v60, %v17184_v24  ;;  %v2737_v40 = vsel %vm2615_vm4, %v17176_v16, %v17186_v26  ;;  %v17188_v1 = vld [vmem:[#allocation44_spill] sm:$0xff]  ;;  %v17190_v24 = vld [vmem:[#allocation14_spill] sm:$0xff]  ;;  %17193 = vst [vmem:[#allocation264_spill] sm:$0xff] %v11735_v0  ;;  %v2951_v9 = vrot.slane %v11706_v21, %v7686_v31  ;;  %v11754_v0 = vpop.permute.xlu1 %4228  ;;  %v11770_v63 = vpop.permute.xlu0 %4788 }
 0x362   : > { %17185 = vst [vmem:[#allocation257_spill] sm:$0xff] %v11711_v46  ;;  %v2738_v4 = vsel %vm2615_vm4, %v17186_v26, %v17188_v1  ;;  %v17189_v60 = vld [vmem:[#allocation68_spill] sm:$0xff]  ;;  %v11729_v42 = vrot.slane %v17191_v8, %v17190_v24  ;;  %17194 = vst [vmem:[#allocation69_spill] sm:$0xff] %v11739_v3  ;;  %v17195_v26 = vld [vmem:[#allocation91_spill] sm:$0xff]  ;;  %v3013_v16 = vrot.slane %v2737_v40, %v7686_v31 }
 0x363   : > { %4879 = vrot.lane.b32.xlu1 %v17189_v60, %s7369_s23  ;;  %v11743_v38 = vrot.slane %v17195_v26, %v7686_v31  ;;  %17198 = vst [vmem:[#allocation266_spill] sm:$0xff] %v11752_v28  ;;  %17199 = vst [vmem:[#allocation78_spill] sm:$0xff] %v11754_v0  ;;  %v11759_v3 = vmul.f32 %v3005_v17, %v17148_v57  ;;  %v3017_v26 = vrot.slane %v2738_v4, %v7686_v31  ;;  %v17201_v40 = vld [vmem:[#allocation74_spill] sm:$0xff] }
 0x364   : > { %17192 = vst [vmem:[#allocation72_spill] sm:$0xff] %v11729_v42  ;;  %v11764_v21 = vrot.slane %v17074_v36, %v7686_v31  ;;  %v11768_v8 = vrot.slane %v17201_v40, %v7686_v31  ;;  %17203 = vst [vmem:[#allocation42_spill] sm:$0xff] %v11770_v63  ;;  %v11773_v0 = vmul.f32 %v3009_v23, %v17148_v57  ;;  %v17204_v28 = vld [vmem:[#allocation90_spill] sm:$0xff]  ;;  %v17205_v36 = vld [vmem:[#allocation95_spill] sm:$0xff]  ;;  %5487 = vrot.lane.b32.xlu0 %v17106_v45, %s7378_s28 }
 0x365   : > { %17196 = vst [vmem:[#allocation265_spill] sm:$0xff] %v11743_v38  ;;  %v11778_v17 = vsel %vm2615_vm4, %v17188_v1, %v17204_v28  ;;  %v17208_v23 = vrot.slane %v11273_v18, %v7686_v31  ;;  %v17209_v28 = vrot.slane %v11298_v50, %v7686_v31  ;;  %v17210_v4 = vrot.slane %v11303_v25, %v7686_v31  ;;  %v17214_v25 = vld [vmem:[#allocation48_spill] sm:$0xff]  ;;  %v11819_v46 = vpop.permute.xlu1 %4232 }
 0x366   : > { %17200 = vst [vmem:[#allocation86_spill] sm:$0xff] %v11764_v21  ;;  %17202 = vst [vmem:[#allocation285_spill] sm:$0xff] %v11768_v8  ;;  %v11784_v21 = vrot.slane %v17205_v36, %v7686_v31  ;;  %v17207_v8 = vld [vmem:[#allocation92_spill] sm:$0xff]  ;;  %v11805_v38 = vmul.f32 %v3013_v16, %v17148_v57  ;;  %v17212_v18 = vrot.slane %v11321_v54, %v7686_v31 }
 0x367   : > { %4883 = vrot.lane.b32.xlu1 %v11729_v42, %s7369_s23  ;;  %v2882_v63 = vmul.f32 %v17208_v23, %v17207_v8  ;;  %v2883_v1 = vmul.f32 %v17209_v28, %v17207_v8  ;;  %v2884_v32 = vmul.f32 %v17210_v4, %v17207_v8  ;;  %v17213_v50 = vrot.slane %v11333_v14, %v7686_v31  ;;  %v17217_v16 = vld [vmem:[#allocation292_spill] sm:$0xff] }
 0x368   : > { %17206 = vst [vmem:[#allocation12_spill] sm:$0xff] %v11784_v21  ;;  %v17211_v21 = vrot.slane %v11316_v2, %v7686_v31  ;;  %v2886_v23 = vmul.f32 %v17212_v18, %v17207_v8  ;;  %v11817_v4 = vrot.slane %v17214_v25, %v7686_v31  ;;  %17216 = vst [vmem:[#allocation88_spill] sm:$0xff] %v11819_v46  ;;  %5532 = vrot.lane.b32.xlu0 %v17124_v33, %s7378_s28 }
 0x369   : > { %v2887_v28 = vmul.f32 %v17213_v50, %v17207_v8  ;;  %v11824_v2 = vmul.f32 %v3017_v26, %v17148_v57  ;;  %v3021_v54 = vrot.slane %v11778_v17, %v7686_v31  ;;  %v11831_v14 = vsel %vm2138_vm3, %v17029_v58, %v17217_v16  ;;  %v11837_v50 = vpop.permute.xlu0 %4792 }
 0x36a   : > { %v2885_v36 = vmul.f32 %v17211_v21, %v17207_v8  ;;  %17215 = vst [vmem:[#allocation38_spill] sm:$0xff] %v11817_v4  ;;  %17218 = vst [vmem:[#allocation44_spill] sm:$0xff] %v11831_v14  ;;  %v17219_v21 = vrot.slane %v11553_v48, %v7686_v31  ;;  %v17221_v26 = vrot.slane %v11533_v20, %v7686_v31 }
 0x36b   : > { %17220 = vst [vmem:[#allocation14_spill] sm:$0xff] %v11837_v50  ;;  %v17222_v17 = vrot.slane %v11579_v59, %v7686_v31  ;;  %v17223_v58 = vrot.slane %v11584_v7, %v7686_v31  ;;  %v17224_v48 = vrot.slane %v11602_v53, %v7686_v31  ;;  %4887 = vrot.lane.b32.xlu1 %v17201_v40, %s7369_s23 }
 0x36c   : > { %v2888_v18 = vmul.f32 %v17219_v21, %v17207_v8  ;;  %v2889_v25 = vmul.f32 %v17221_v26, %v17207_v8  ;;  %v2893_v20 = vadd.f32 %v2882_v63, %v11520_v19  ;;  %v2894_v26 = vadd.f32 %v2883_v1, %v11523_v49  ;;  %v11871_v63 = vpop.permute.xlu1 %4236  ;;  %v17230_v49 = vld [vmem:[#allocation235_spill] sm:$0xff] }
 0x36d   : > { %v2890_v46 = vmul.f32 %v17222_v17, %v17207_v8  ;;  %v2891_v45 = vmul.f32 %v17223_v58, %v17207_v8  ;;  %v2892_v21 = vmul.f32 %v17224_v48, %v17207_v8  ;;  %v2895_v59 = vadd.f32 %v2884_v32, %v11528_v11  ;;  %v17225_v58 = vld [vmem:[#allocation55_spill] sm:$0xff]  ;;  %17228 = vst [vmem:[#allocation144_spill] sm:$0xff] %v11871_v63 }
 0x36e   : > { %v2896_v17 = vadd.f32 %v2885_v36, %v11542_v22  ;;  %v2897_v50 = vadd.f32 %v2886_v23, %v11545_v44  ;;  %v2898_v7 = vadd.f32 %v2887_v28, %v11548_v34  ;;  %v17226_v53 = vrot.slane %v11338_v5, %v7686_v31  ;;  %v17232_v22 = vld [vmem:[#allocation214_spill] sm:$0xff]  ;;  %v11891_v28 = vpop.permute.xlu0 %4796 }
 0x36f   : > { %v17227_v48 = vrot.slane %v11355_v61, %v7686_v31  ;;  %v17229_v32 = vrot.slane %v11370_v56, %v7686_v31  ;;  %v17231_v5 = vrot.slane %v17230_v49, %v7686_v31  ;;  %v17233_v61 = vrot.slane %v17232_v22, %v7686_v31  ;;  %v17234_v34 = vld [vmem:[#allocation238_spill] sm:$0xff]  ;;  %17236 = vst [vmem:[#allocation90_spill] sm:$0xff] %v11891_v28  ;;  %v17244_v28 = vld [vmem:[#allocation49_spill] sm:$0xff] }
 0x370   : > { %v2952_v8 = vmul.f32 %v17226_v53, %v17225_v58  ;;  %v17235_v1 = vrot.slane %v17234_v34, %v7686_v31  ;;  %v2899_v56 = vadd.f32 %v2888_v18, %v11556_v51  ;;  %v17237_v53 = vld [vmem:[#allocation240_spill] sm:$0xff]  ;;  %v17239_v49 = vrot.slane %v11647_v6, %v7686_v31  ;;  %v17241_v34 = vld [vmem:[#allocation75_spill] sm:$0xff]  ;;  %v11917_v33 = vpop.permute.xlu1 %4240  ;;  %5536 = vrot.lane.b32.xlu0 %v17244_v28, %s7378_s28 }
 0x371   : > { %v2953_v19 = vmul.f32 %v17227_v48, %v17225_v58  ;;  %v2954_v36 = vmul.f32 %v17229_v32, %v17225_v58  ;;  %v2955_v11 = vmul.f32 %v17231_v5, %v17225_v58  ;;  %v2956_v44 = vmul.f32 %v17233_v61, %v17225_v58  ;;  %4891 = vrot.lane.b32.xlu1 %v17241_v34, %s7369_s23 }
 0x372   : > { %v2957_v23 = vmul.f32 %v17235_v1, %v17225_v58  ;;  %v17238_v48 = vrot.slane %v17237_v53, %v7686_v31  ;;  %v2959_v5 = vmul.f32 %v17239_v49, %v17225_v58  ;;  %v17240_v22 = vrot.slane %v11679_v13, %v7686_v31  ;;  %17243 = vst [vmem:[#allocation92_spill] sm:$0xff] %v11917_v33 }
 0x373   : > { %v2900_v51 = vadd.f32 %v2889_v25, %v11559_v27  ;;  %v2901_v18 = vadd.f32 %v2890_v46, %v11562_v39  ;;  %v2902_v1 = vadd.f32 %v2891_v45, %v11565_v43  ;;  %v17242_v53 = vrot.slane %v11697_v15, %v7686_v31  ;;  %v11921_v43 = vpop.permute.xlu0 %4800 }
 0x374   : > { %v2958_v32 = vmul.f32 %v17238_v48, %v17225_v58  ;;  %v2960_v61 = vmul.f32 %v17240_v22, %v17225_v58  ;;  %v2903_v48 = vadd.f32 %v2892_v21, %v11572_v12  ;;  %v2962_v49 = vmul.f32 %v2951_v9, %v17225_v58  ;;  %17245 = vst [vmem:[#allocation292_spill] sm:$0xff] %v11921_v43  ;;  %v17246_v12 = vld [vmem:[#allocation80_spill] sm:$0xff]  ;;  %v17273_v43 = vld [vmem:[#allocation191_spill] sm:$0xff] }
 0x375   : > { %v2961_v6 = vmul.f32 %v17242_v53, %v17225_v58  ;;  %v2963_v13 = vadd.f32 %v2952_v8, %v2893_v20  ;;  %v2964_v22 = vadd.f32 %v2953_v19, %v2894_v26  ;;  %v2965_v27 = vadd.f32 %v2954_v36, %v2895_v59  ;;  %4895 = vrot.lane.b32.xlu1 %v17246_v12, %s7369_s23  ;;  %v17247_v9 = vld [vmem:[#allocation148_spill] sm:$0xff]  ;;  %v17251_v58 = vld [vmem:[#allocation98_spill] sm:$0xff]  ;;  %v17252_v19 = vld [vmem:[#allocation159_spill] sm:$0xff] }
 0x376   : > { %v2966_v46 = vadd.f32 %v2955_v11, %v2896_v17  ;;  %v2967_v39 = vadd.f32 %v2956_v44, %v2897_v50  ;;  %v2968_v45 = vadd.f32 %v2957_v23, %v2898_v7  ;;  %v2969_v25 = vadd.f32 %v2958_v32, %v2899_v56  ;;  %v17249_v50 = vld [vmem:[#allocation105_spill] sm:$0xff]  ;;  %v17250_v59 = vld [vmem:[#allocation56_spill] sm:$0xff]  ;;  %5540 = vrot.lane.b32.xlu0 %v17142_v47, %s7378_s28 }
 0x377   : > { %v2970_v15 = vadd.f32 %v2959_v5, %v2900_v51  ;;  %v2971_v53 = vadd.f32 %v2960_v61, %v2901_v18  ;;  %v11927_v21 = vrot.slane %v17247_v9, %v16905_v30  ;;  %v3032_v20 = vmul.f32 %v3021_v54, %v17148_v57  ;;  %v11945_v57 = vpop.permute.xlu1 %4244  ;;  %v11953_v32 = vpop.permute.xlu0 %4804  ;;  %v6865_v5 = vld [vmem:[%s9023_s11 + $0x20] ss:$4 sm:$0x7]  ;;  %v17267_v9 = vld [vmem:[#allocation52_spill] sm:$0xff] }
 0x378   : > { %v11934_v17 = vmul.f32 %v17250_v59, %v17249_v50  ;;  %v2972_v7 = vadd.f32 %v2961_v6, %v2902_v1  ;;  %v11938_v8 = vmul.f32 %v17250_v59, %v17251_v58  ;;  %v11942_v36 = vmul.f32 %v17250_v59, %v17252_v19  ;;  %17253 = vst [vmem:[#allocation235_spill] sm:$0xff] %v11945_v57  ;;  %v17269_v58 = vld [vmem:[#allocation161_spill] sm:$0xff] }
 0x379   : > { %17248 = vst [vmem:[#allocation55_spill] sm:$0xff] %v11927_v21  ;;  %v2973_v30 = vadd.f32 %v2962_v49, %v2903_v48  ;;  %v3033_v11 = vadd.f32 %v11594_v35, %v2963_v13  ;;  %v3034_v54 = vadd.f32 %v11597_v55, %v2964_v22  ;;  %v3035_v44 = vadd.f32 %v11607_v41, %v2965_v27  ;;  %v17255_v41 = vld [vmem:[#allocation249_spill] sm:$0xff]  ;;  %v17259_v49 = vld [vmem:[#allocation254_spill] sm:$0xff]  ;;  %v17261_v13 = vld [vmem:[#allocation256_spill] sm:$0xff] }
 0x37a   : > { %v3036_v23 = vadd.f32 %v11610_v52, %v2966_v46  ;;  %v3037_v56 = vadd.f32 %v11613_v37, %v2967_v39  ;;  %17254 = vst [vmem:[#allocation214_spill] sm:$0xff] %v11953_v32  ;;  %v3038_v61 = vadd.f32 %v11616_v29, %v2968_v45  ;;  %v3039_v35 = vadd.f32 %v11759_v3, %v2969_v25  ;;  %v17256_v52 = vld [vmem:[#allocation274_spill] sm:$0xff]  ;;  %v17257_v37 = vld [vmem:[#allocation252_spill] sm:$0xff]  ;;  %v17258_v48 = vld [vmem:[#allocation253_spill] sm:$0xff] }
 0x37b   : > { %v3040_v51 = vadd.f32 %v11773_v0, %v2970_v15  ;;  %v3041_v18 = vadd.f32 %v11805_v38, %v2971_v53  ;;  %4899 = vrot.lane.b32.xlu1 %v11927_v21, %s7369_s23  ;;  %v3042_v55 = vadd.f32 %v11824_v2, %v2972_v7  ;;  %v3072_v1 = vmul.f32 %v17256_v52, %v17255_v41  ;;  %v17260_v0 = vld [vmem:[#allocation255_spill] sm:$0xff]  ;;  %v11975_v27 = vpop.permute.xlu1 %4248  ;;  %v17264_v46 = vld [vmem:[#allocation281_spill] sm:$0xff]  ;;  %v17265_v45 = vld [vmem:[#allocation282_spill] sm:$0xff]  ;;  %v11990_v7 = vpop.permute.xlu0 %4861 }
 0x37c   : > { %v3073_v6 = vmul.f32 %v17256_v52, %v17257_v37  ;;  %v3074_v29 = vmul.f32 %v17256_v52, %v17258_v48  ;;  %v3075_v3 = vmul.f32 %v17256_v52, %v17259_v49  ;;  %v3076_v38 = vmul.f32 %v17256_v52, %v17260_v0  ;;  %17262 = vst [vmem:[#allocation238_spill] sm:$0xff] %v11975_v27  ;;  %v17266_v15 = vld [vmem:[#allocation41_spill] sm:$0xff] }
 0x37d   : > { %v3077_v22 = vmul.f32 %v17256_v52, %v17261_v13  ;;  %5544 = vrot.lane.b32.xlu0 %v11539_v10, %s7378_s28  ;;  %v11980_v2 = vrot.slane %v6865_v5, %v7686_v31  ;;  %v3078_v39 = vmul.f32 %v17256_v52, %v17264_v46  ;;  %v3079_v25 = vmul.f32 %v17256_v52, %v17265_v45  ;;  %v17270_v5 = vld [vmem:[#allocation158_spill] sm:$0xff]  ;;  %v17271_v48 = vld [vmem:[#allocation21_spill] sm:$0xff] }
 0x37e   : > { %v3080_v53 = vmul.f32 %v17266_v15, %v17256_v52  ;;  %v3081_v50 = vmul.f32 %v17267_v9, %v17256_v52  ;;  %17268 = vst [vmem:[#allocation148_spill] sm:$0xff] %v11990_v7  ;;  %v11994_v19 = vmul.f32 %v17250_v59, %v17269_v58  ;;  %v11998_v41 = vmul.f32 %v17250_v59, %v17270_v5  ;;  %v17272_v47 = vld [vmem:[#allocation85_spill] sm:$0xff]  ;;  %v17274_v7 = vld [vmem:[#allocation178_spill] sm:$0xff] }
 0x37f   : > { %17263 = vst [vmem:[#allocation240_spill] sm:$0xff] %v11980_v2  ;;  %v3043_v37 = vadd.f32 %v3032_v20, %v2973_v30  ;;  %v3082_v26 = vmul.f32 %v17271_v48, %v17256_v52  ;;  %4903 = vrot.lane.b32.xlu1 %v17272_v47, %s7369_s23  ;;  %v12006_v32 = vmul.f32 %v17250_v59, %v17273_v43  ;;  %v12012_v30 = vpop.permute.xlu1 %4252  ;;  %v12016_v14 = vpop.permute.xlu0 %4865 }
 0x380   : > { %v12010_v27 = vmul.f32 %v17250_v59, %v17274_v7  ;;  %v3083_v58 = vadd.f32 %v3072_v1, %v3033_v11  ;;  %v3084_v57 = vadd.f32 %v3073_v6, %v3034_v54  ;;  %v3085_v33 = vadd.f32 %v3074_v29, %v3035_v44  ;;  %17275 = vst [vmem:[#allocation105_spill] sm:$0xff] %v12012_v30  ;;  %v17277_v7 = vld [vmem:[#allocation60_spill] sm:$0xff]  ;;  %v17278_v44 = vld [vmem:[#allocation37_spill] sm:$0xff] }
 0x381   : > { %v3086_v5 = vadd.f32 %v3075_v3, %v3036_v23  ;;  %v3087_v63 = vadd.f32 %v3076_v38, %v3037_v56  ;;  %v3088_v20 = vadd.f32 %v3077_v22, %v3038_v61  ;;  %5548 = vrot.lane.b32.xlu0 %v11980_v2, %s7378_s28  ;;  %v3089_v52 = vadd.f32 %v3078_v39, %v3039_v35  ;;  %v17279_v23 = vld [vmem:[#allocation176_spill] sm:$0xff]  ;;  %v17282_v35 = vld [vmem:[#allocation93_spill] sm:$0xff] }
 0x382   : > { %v3090_v28 = vadd.f32 %v3079_v25, %v3040_v51  ;;  %v3091_v4 = vadd.f32 %v3080_v53, %v3041_v18  ;;  %v3092_v43 = vadd.f32 %v3081_v50, %v3042_v55  ;;  %17276 = vst [vmem:[#allocation56_spill] sm:$0xff] %v12016_v14  ;;  %v3093_v47 = vadd.f32 %v3082_v26, %v3043_v37  ;;  %v17281_v61 = vld [vmem:[#allocation20_spill] sm:$0xff]  ;;  %v17283_v18 = vld [vmem:[#allocation258_spill] sm:$0xff]  ;;  %v17284_v55 = vld [vmem:[#allocation259_spill] sm:$0xff] }
 0x383   : > { %v12020_v11 = vmul.f32 %v17277_v7, %v17259_v49  ;;  %v12024_v54 = vmul.f32 %v17277_v7, %v17260_v0  ;;  %4907 = vrot.lane.b32.xlu1 %v17278_v44, %s7369_s23  ;;  %v12030_v56 = vrot.slane %v17279_v23, %v17190_v24  ;;  %v3110_v51 = vmul.f32 %v17282_v35, %v17281_v61  ;;  %v17285_v6 = vld [vmem:[#allocation260_spill] sm:$0xff]  ;;  %v17286_v49 = vld [vmem:[#allocation261_spill] sm:$0xff]  ;;  %v17287_v0 = vld [vmem:[#allocation262_spill] sm:$0xff]  ;;  %v12048_v53 = vpop.permute.xlu1 %4256  ;;  %v12062_v30 = vpop.permute.xlu0 %4869 }
 0x384   : > { %v3111_v26 = vmul.f32 %v17282_v35, %v17283_v18  ;;  %v3112_v1 = vmul.f32 %v17282_v35, %v17284_v55  ;;  %v3113_v29 = vmul.f32 %v17282_v35, %v17285_v6  ;;  %v3114_v3 = vmul.f32 %v17282_v35, %v17286_v49  ;;  %v17288_v24 = vld [vmem:[#allocation283_spill] sm:$0xff]  ;;  %v17289_v39 = vld [vmem:[#allocation284_spill] sm:$0xff]  ;;  %17290 = vst [vmem:[#allocation159_spill] sm:$0xff] %v12048_v53  ;;  %v17291_v37 = vld [vmem:[#allocation290_spill] sm:$0xff] }
 0x385   : > { %17280 = vst [vmem:[#allocation98_spill] sm:$0xff] %v12030_v56  ;;  %v3115_v38 = vmul.f32 %v17282_v35, %v17287_v0  ;;  %v3116_v22 = vmul.f32 %v17282_v35, %v17288_v24  ;;  %v3117_v25 = vmul.f32 %v17282_v35, %v17289_v39  ;;  %5552 = vrot.lane.b32.xlu0 %v17170_v62, %s7378_s28  ;;  %v17292_v61 = vld [vmem:[#allocation54_spill] sm:$0xff]  ;;  %v17293_v55 = vld [vmem:[#allocation96_spill] sm:$0xff]  ;;  %17294 = vst [vmem:[#allocation249_spill] sm:$0xff] %v12062_v30 }
 0x386   : > { %v12054_v50 = vmul.f32 %v17277_v7, %v17261_v13  ;;  %v3118_v23 = vmul.f32 %v17291_v37, %v17282_v35  ;;  %v3119_v18 = vmul.f32 %v17292_v61, %v17282_v35  ;;  %v3120_v14 = vmul.f32 %v17293_v55, %v17282_v35 }
 0x387   : > { %v12066_v53 = vmul.f32 %v17277_v7, %v17264_v46  ;;  %v12070_v2 = vmul.f32 %v17277_v7, %v17265_v45  ;;  %v12074_v13 = vmul.f32 %v17277_v7, %v17266_v15  ;;  %v12078_v62 = vmul.f32 %v17277_v7, %v17267_v9  ;;  %4911 = vrot.lane.b32.xlu1 %v12030_v56, %s7369_s23  ;;  %v12084_v49 = vpop.permute.xlu1 %4260 }
 0x388   : > { %v3121_v35 = vadd.f32 %v3110_v51, %v3083_v58  ;;  %v3122_v30 = vadd.f32 %v3111_v26, %v3084_v57  ;;  %v3123_v37 = vadd.f32 %v3112_v1, %v3085_v33  ;;  %v3124_v46 = vadd.f32 %v3113_v29, %v3086_v5  ;;  %17295 = vst [vmem:[#allocation274_spill] sm:$0xff] %v12084_v49  ;;  %v17298_v58 = vld [vmem:[#allocation277_spill] sm:$0xff]  ;;  %v17311_v26 = vld [vmem:[#allocation270_spill] sm:$0xff]  ;;  %v17312_v29 = vld [vmem:[#allocation275_spill] sm:$0xff] }
 0x389   : > { %v3125_v39 = vadd.f32 %v3114_v3, %v3087_v63  ;;  %v3126_v24 = vadd.f32 %v3115_v38, %v3088_v20  ;;  %v3127_v0 = vadd.f32 %v3116_v22, %v3089_v52  ;;  %v12082_v45 = vadd.f32 %v3117_v25, %v3090_v28  ;;  %5556 = vrot.lane.b32.xlu0 %v17189_v60, %s7378_s28  ;;  %v17299_v57 = vld [vmem:[#allocation65_spill] sm:$0xff]  ;;  %v12098_v63 = vpop.permute.xlu0 %4873  ;;  %v17302_v28 = vld [vmem:[#allocation278_spill] sm:$0xff]  ;;  %v17304_v20 = vld [vmem:[#allocation279_spill] sm:$0xff] }
 0x38a   : > { %v12088_v15 = vadd.f32 %v3118_v23, %v3091_v4  ;;  %v12090_v9 = vadd.f32 %v3119_v18, %v3092_v43  ;;  %v12092_v6 = vadd.f32 %v3120_v14, %v3093_v47  ;;  %v12096_v33 = vmul.f32 %v17299_v57, %v17298_v58  ;;  %17301 = vst [vmem:[#allocation255_spill] sm:$0xff] %v12098_v63  ;;  %v17306_v4 = vld [vmem:[#allocation288_spill] sm:$0xff]  ;;  %v17308_v47 = vld [vmem:[#allocation39_spill] sm:$0xff]  ;;  %v12119_v51 = vld [vmem:[%s15416_s1] sm:$0xff] }
 0x38b   : > { %v12102_v5 = vmul.f32 %v17299_v57, %v17302_v28  ;;  %v12106_v52 = vmul.f32 %v17299_v57, %v17304_v20  ;;  %v12110_v43 = vmul.f32 %v17299_v57, %v17306_v4  ;;  %v12114_v14 = vmul.f32 %v17299_v57, %v17308_v47  ;;  %17310 = vst [vmem:[#allocation161_spill] sm:$0xff] %v12119_v51  ;;  %v17313_v38 = vld [vmem:[#allocation46_spill] sm:$0xff]  ;;  %v17315_v18 = vld [vmem:[#allocation245_spill] sm:$0xff]  ;;  %v17316_v63 = vld [vmem:[#allocation271_spill] sm:$0xff] }
 0x38c   : > { %17296 = vst [vmem:[#allocation252_spill] sm:$0xff] %v12090_v9  ;;  %17297 = vst [vmem:[#allocation253_spill] sm:$0xff] %v12092_v6  ;;  %4972 = vperm.xlu1 %7125, %v12119_v51   ;;  %v3159_v1 = vadd.f32 %v17311_v26, %v3121_v35  ;;  %v3160_v3 = vadd.f32 %v17312_v29, %v3122_v30  ;;  %v3161_v22 = vadd.f32 %v17313_v38, %v3123_v37  ;;  %v17314_v25 = vld [vmem:[#allocation242_spill] sm:$0xff]  ;;  %v17317_v49 = vld [vmem:[#allocation25_spill] sm:$0xff]  ;;  %v12129_v9 = vpop.permute.xlu1 %4264 }
 0x38d   : > { %17300 = vst [vmem:[#allocation254_spill] sm:$0xff] %v12096_v33  ;;  %17303 = vst [vmem:[#allocation256_spill] sm:$0xff] %v12102_v5  ;;  %v3162_v23 = vadd.f32 %v17314_v25, %v3124_v46  ;;  %v3163_v60 = vadd.f32 %v17315_v18, %v3125_v39  ;;  %v3186_v6 = vmul.f32 %v17317_v49, %v17316_v63  ;;  %5560 = vrot.lane.b32.xlu0 %v11729_v42, %s7378_s28  ;;  %v17321_v35 = vld [vmem:[#allocation272_spill] sm:$0xff]  ;;  %v17322_v37 = vld [vmem:[#allocation273_spill] sm:$0xff]  ;;  %v12145_v26 = vpop.permute.xlu0 %4877 }
 0x38e   : > { %17305 = vst [vmem:[#allocation281_spill] sm:$0xff] %v12106_v52  ;;  %17307 = vst [vmem:[#allocation282_spill] sm:$0xff] %v12110_v43  ;;  %v17319_v43 = vld [vmem:[#allocation16_spill] sm:$0xff]  ;;  %v3187_v30 = vmul.f32 %v17317_v49, %v17321_v35  ;;  %v3188_v46 = vmul.f32 %v17317_v49, %v17322_v37  ;;  %v3189_v39 = vmul.f32 %v17317_v49, %v17298_v58  ;;  %v17324_v29 = vld [vmem:[#allocation47_spill] sm:$0xff] }
 0x38f   : > { %17309 = vst [vmem:[#allocation41_spill] sm:$0xff] %v12114_v14  ;;  %17318 = vst [vmem:[#allocation158_spill] sm:$0xff] %v12129_v9  ;;  %v7155_v14 = vld [vmem:[%s9023_s11 + $0x2c] ss:$4 sm:$0xff]  ;;  %v3190_v63 = vmul.f32 %v17317_v49, %v17302_v28  ;;  %v3164_v38 = vadd.f32 %v17324_v29, %v3126_v24  ;;  %v3192_v35 = vmul.f32 %v17317_v49, %v17306_v4  ;;  %v7380_v9 = vmov 50  }
 0x390   : > { %v12135_v52 = vrot.slane %v7155_v14, %v17319_v43  ;;  %17323 = vst [vmem:[#allocation191_spill] sm:$0xff] %v12145_v26  ;;  %v17325_v25 = vld [vmem:[#allocation237_spill] sm:$0xff]  ;;  %v3191_v14 = vmul.f32 %v17317_v49, %v17304_v20  ;;  %7127 = vset.pattern.permute.xlu1 %v7380_v9  ;;  %v17326_v37 = vld [vmem:[#allocation43_spill] sm:$0xff]  ;;  %v17328_v5 = vld [vmem:[#allocation66_spill] sm:$0xff]  ;;  %v12163_v24 = vmul.f32 %v17317_v49, %v17308_v47 }
 0x391   : > { %v3165_v18 = vadd.f32 %v17325_v25, %v3127_v0  ;;  %v12155_v58 = vmul.f32 %v17299_v57, %v17326_v37  ;;  %v12159_v28 = vmul.f32 %v17299_v57, %v17328_v5  ;;  %v12167_v0 = vmul.f32 %v17326_v37, %v17317_v49  ;;  %5112 = vperm.xlu1 %7127, %v12119_v51   ;;  %v17331_v20 = vld [vmem:[#allocation108_spill] sm:$0xff]  ;;  %v12180_v25 = vpop.permute.xlu1 %4377 }
 0x392   : > { %17320 = vst [vmem:[#allocation21_spill] sm:$0xff] %v12135_v52  ;;  %v12172_v9 = vmul.f32 %v17328_v5, %v17317_v49  ;;  %v12176_v4 = vmul.f32 %v17331_v20, %v17317_v49  ;;  %v12178_v29 = vadd.f32 %v3186_v6, %v3159_v1  ;;  %17333 = vst [vmem:[#allocation258_spill] sm:$0xff] %v12180_v25  ;;  %5564 = vrot.lane.b32.xlu0 %v12135_v52, %s7378_s28  ;;  %v12192_v5 = vpop.permute.xlu0 %4881  ;;  %v17335_v6 = vld [vmem:[#allocation31_spill] sm:$0xff]  ;;  %v17336_v1 = vld [vmem:[#allocation24_spill] sm:$0xff] }
 0x393   : > { %17327 = vst [vmem:[#allocation178_spill] sm:$0xff] %v12155_v58  ;;  %17329 = vst [vmem:[#allocation176_spill] sm:$0xff] %v12159_v28  ;;  %v12184_v47 = vadd.f32 %v3187_v30, %v3160_v3  ;;  %v12186_v37 = vadd.f32 %v3188_v46, %v3161_v22  ;;  %v12188_v26 = vadd.f32 %v3189_v39, %v3162_v23  ;;  %v17340_v22 = vld [vmem:[#allocation73_spill] sm:$0xff]  ;;  %v17344_v46 = vld [vmem:[#allocation244_spill] sm:$0xff]  ;;  %v7382_v58 = vmov 53  }
 0x394   : > { %17330 = vst [vmem:[#allocation20_spill] sm:$0xff] %v12172_v9  ;;  %17332 = vst [vmem:[#allocation93_spill] sm:$0xff] %v12176_v4  ;;  %v12190_v28 = vadd.f32 %v3190_v63, %v3163_v60  ;;  %v12194_v9 = vadd.f32 %v3191_v14, %v3164_v38  ;;  %v12196_v49 = vadd.f32 %v3192_v35, %v3165_v18  ;;  %v17338_v4 = vld [vmem:[#allocation32_spill] sm:$0xff]  ;;  %v17342_v60 = vld [vmem:[#allocation135_spill] sm:$0xff]  ;;  %v7381_v14 = vmov 51  }
 0x395   : > { %17334 = vst [vmem:[#allocation259_spill] sm:$0xff] %v12192_v5  ;;  %v12200_v25 = vmul.f32 %v17336_v1, %v17335_v6  ;;  %v12204_v3 = vmul.f32 %v17336_v1, %v17338_v4  ;;  %v12208_v23 = vmul.f32 %v17336_v1, %v17340_v22  ;;  %v12212_v30 = vmul.f32 %v17336_v1, %v17342_v60  ;;  %v17345_v39 = vld [vmem:[#allocation199_spill] sm:$0xff]  ;;  %v17346_v38 = vld [vmem:[#allocation76_spill] sm:$0xff]  ;;  %v17350_v6 = vld [vmem:[#allocation198_spill] sm:$0xff] }
 0x396   : > { %v12217_v63 = vsel %vm2138_vm3, %v17345_v39, %v17344_v46  ;;  %v12222_v18 = vsel %vm2138_vm3, %v17344_v46, %v17346_v38  ;;  %7128 = vset.pattern.permute.xlu1 %v7381_v14  ;;  %v17348_v35 = vld [vmem:[#allocation175_spill] sm:$0xff]  ;;  %v12230_v22 = vmul.f32 %v17336_v1, %v17350_v6  ;;  %v17352_v60 = vld [vmem:[#allocation228_spill] sm:$0xff]  ;;  %5568 = vrot.lane.b32.xlu0 %v17201_v40, %s7378_s28  ;;  %v17354_v46 = vld [vmem:[#allocation17_spill] sm:$0xff] }
 0x397   : > { %17337 = vst [vmem:[#allocation54_spill] sm:$0xff] %v12200_v25  ;;  %17339 = vst [vmem:[#allocation277_spill] sm:$0xff] %v12204_v3  ;;  %v12226_v4 = vmul.f32 %v17336_v1, %v17348_v35  ;;  %v12234_v5 = vmul.f32 %v17336_v1, %v17352_v60  ;;  %5182 = vperm.xlu1 %7128, %v12119_v51   ;;  %v12241_v39 = vmul.f32 %v17354_v46, %v17292_v61  ;;  %v17357_v35 = vld [vmem:[#allocation23_spill] sm:$0xff]  ;;  %v17358_v6 = vld [vmem:[#allocation84_spill] sm:$0xff] }
 0x398   : > { %17341 = vst [vmem:[#allocation278_spill] sm:$0xff] %v12208_v23  ;;  %17343 = vst [vmem:[#allocation279_spill] sm:$0xff] %v12212_v30  ;;  %v12245_v14 = vmul.f32 %v17354_v46, %v17293_v55  ;;  %v17361_v30 = vld [vmem:[#allocation122_spill] sm:$0xff]  ;;  %v17364_v3 = vld [vmem:[#allocation111_spill] sm:$0xff] }
 0x399   : > { %17347 = vst [vmem:[#allocation288_spill] sm:$0xff] %v12222_v18  ;;  %17349 = vst [vmem:[#allocation39_spill] sm:$0xff] %v12226_v4  ;;  %v17359_v4 = vld [vmem:[#allocation82_spill] sm:$0xff]  ;;  %v12261_v23 = vmul.f32 %v17354_v46, %v17361_v30  ;;  %v17366_v25 = vld [vmem:[#allocation79_spill] sm:$0xff] }
 0x39a   : > { %17351 = vst [vmem:[#allocation270_spill] sm:$0xff] %v12230_v22  ;;  %17353 = vst [vmem:[#allocation275_spill] sm:$0xff] %v12234_v5  ;;  %v3268_v22 = vsel %vm2138_vm3, %v17358_v6, %v17357_v35  ;;  %v3269_v60 = vsel %vm2138_vm3, %v17357_v35, %v17359_v4  ;;  %v12253_v5 = vpop.permute.xlu0 %4885  ;;  %v12267_v6 = vmul.f32 %v17354_v46, %v17364_v3  ;;  %v17368_v35 = vld [vmem:[#allocation18_spill] sm:$0xff]  ;;  %v17371_v3 = vld [vmem:[#allocation87_spill] sm:$0xff]  ;;  %5572 = vrot.lane.b32.xlu0 %v17241_v34, %s7378_s28 }
 0x39b   : > { %17355 = vst [vmem:[#allocation46_spill] sm:$0xff] %v12241_v39  ;;  %17356 = vst [vmem:[#allocation242_spill] sm:$0xff] %v12245_v14  ;;  %v12263_v14 = vpop.permute.xlu1 %4447  ;;  %v12271_v4 = vmul.f32 %v17354_v46, %v17366_v25  ;;  %v12276_v40 = vsel %vm2138_vm3, %v17346_v38, %v17368_v35  ;;  %v17369_v39 = vld [vmem:[#allocation107_spill] sm:$0xff]  ;;  %5269 = vrot.lane.b32.xlu1 %v11539_v10, %s7354_s24  ;;  %v17385_v18 = vld [vmem:[#allocation152_spill] sm:$0xff] }
 0x39c   : > { %17360 = vst [vmem:[#allocation245_spill] sm:$0xff] %v12253_v5  ;;  %17362 = vst [vmem:[#allocation271_spill] sm:$0xff] %v12261_v23  ;;  %v17370_v5 = vld [vmem:[#allocation209_spill] sm:$0xff]  ;;  %v3341_v23 = vrot.slane %v3269_v60, %v7686_v31  ;;  %v17373_v38 = vld [vmem:[#allocation203_spill] sm:$0xff]  ;;  %7130 = vset.pattern.permute.xlu1 %v7382_v58 }
 0x39d   : > { %17363 = vst [vmem:[#allocation25_spill] sm:$0xff] %v12263_v14  ;;  %17365 = vst [vmem:[#allocation16_spill] sm:$0xff] %v12267_v6  ;;  %v12281_v30 = vsel %vm2138_vm3, %v17370_v5, %v17369_v39  ;;  %v3337_v14 = vrot.slane %v3268_v22, %v7686_v31  ;;  %v12288_v6 = vsel %vm2138_vm3, %v17369_v39, %v17371_v3  ;;  %v17375_v5 = vld [vmem:[#allocation153_spill] sm:$0xff]  ;;  %v17377_v60 = vld [vmem:[#allocation291_spill] sm:$0xff] }
 0x39e   : > { %17367 = vst [vmem:[#allocation272_spill] sm:$0xff] %v12271_v4  ;;  %17372 = vst [vmem:[#allocation273_spill] sm:$0xff] %v12288_v6  ;;  %v12296_v35 = vmul.f32 %v17373_v38, %v17354_v46  ;;  %v12300_v22 = vmul.f32 %v17375_v5, %v17354_v46  ;;  %v12305_v25 = vsel %vm2138_vm3, %v17371_v3, %v17377_v60  ;;  %v17379_v39 = vld [vmem:[#allocation149_spill] sm:$0xff]  ;;  %v12309_v10 = vpop.permute.xlu0 %4889  ;;  %v17382_v34 = vld [vmem:[#allocation151_spill] sm:$0xff]  ;;  %5576 = vrot.lane.b32.xlu0 %v17246_v12, %s7378_s28 }
 0x39f   : > { %17378 = vst [vmem:[#allocation43_spill] sm:$0xff] %v12305_v25  ;;  %v17380_v4 = vld [vmem:[#allocation121_spill] sm:$0xff]  ;;  %17381 = vst [vmem:[#allocation108_spill] sm:$0xff] %v12309_v10  ;;  %v17384_v5 = vld [vmem:[#allocation99_spill] sm:$0xff]  ;;  %5273 = vrot.lane.b32.xlu1 %v11729_v42, %s7354_s24 }
 0x3a0   : > { %17374 = vst [vmem:[#allocation47_spill] sm:$0xff] %v12296_v35  ;;  %17376 = vst [vmem:[#allocation237_spill] sm:$0xff] %v12300_v22  ;;  %v3304_v55 = vmul.f32 %v17380_v4, %v17379_v39  ;;  %v3305_v38 = vmul.f32 %v17380_v4, %v17382_v34  ;;  %v17383_v35 = vld [vmem:[#allocation155_spill] sm:$0xff]  ;;  %v3307_v22 = vmul.f32 %v17380_v4, %v17384_v5  ;;  %v17386_v34 = vld [vmem:[#allocation180_spill] sm:$0xff] }
 0x3a1   : > { %v3306_v33 = vmul.f32 %v17380_v4, %v17383_v35  ;;  %v3308_v3 = vmul.f32 %v17380_v4, %v17385_v18  ;;  %v3309_v10 = vmul.f32 %v17380_v4, %v17386_v34  ;;  %v12327_v35 = vpop.permute.xlu1 %4615  ;;  %v12330_v5 = vmul.f32 %v3337_v14, %v17250_v59  ;;  %v17390_v46 = vld [vmem:[#allocation169_spill] sm:$0xff]  ;;  %v17391_v58 = vld [vmem:[#allocation119_spill] sm:$0xff] }
 0x3a2   : > { %17387 = vst [vmem:[#allocation31_spill] sm:$0xff] %v12327_v35  ;;  %v12333_v18 = vmul.f32 %v3341_v23, %v17250_v59  ;;  %v3310_v60 = vmul.f32 %v17380_v4, %v17390_v46  ;;  %v12346_v14 = vsel %vm2138_vm3, %v17217_v16, %v17391_v58  ;;  %v3315_v23 = vadd.f32 %v3304_v55, %v12178_v29  ;;  %v17392_v39 = vld [vmem:[#allocation53_spill] sm:$0xff]  ;;  %v12353_v46 = vpop.permute.xlu0 %4893 }
 0x3a3   : > { %17388 = vst [vmem:[#allocation32_spill] sm:$0xff] %v12330_v5  ;;  %v12351_v35 = vadd.f32 %v17392_v39, %v12082_v45  ;;  %17393 = vst [vmem:[#allocation135_spill] sm:$0xff] %v12353_v46  ;;  %v3316_v6 = vadd.f32 %v3305_v38, %v12184_v47  ;;  %v3317_v12 = vadd.f32 %v3306_v33, %v12186_v37  ;;  %v17394_v5 = vld [vmem:[#allocation50_spill] sm:$0xff]  ;;  %v17396_v45 = vld [vmem:[#allocation40_spill] sm:$0xff]  ;;  %5277 = vrot.lane.b32.xlu1 %v12135_v52, %s7354_s24 }
 0x3a4   : > { %17389 = vst [vmem:[#allocation73_spill] sm:$0xff] %v12333_v18  ;;  %v6871_v18 = vld [vmem:[%s9023_s11 + $0x78] ss:$4 sm:$0x7]  ;;  %v3318_v34 = vadd.f32 %v3307_v22, %v12188_v26  ;;  %v3319_v25 = vadd.f32 %v3308_v3, %v12190_v28  ;;  %v12363_v16 = vsel %vm2138_vm3, %v17391_v58, %v17394_v5  ;;  %v3320_v55 = vadd.f32 %v3309_v10, %v12194_v9  ;;  %v17397_v39 = vld [vmem:[#allocation194_spill] sm:$0xff] }
 0x3a5   : > { %17395 = vst [vmem:[#allocation244_spill] sm:$0xff] %v12363_v16  ;;  %v3167_v29 = vadd.f32 %v17396_v45, %v12088_v15  ;;  %v12370_v46 = vmul.f32 %v17250_v59, %v17397_v39  ;;  %v3321_v33 = vadd.f32 %v3310_v60, %v12196_v49  ;;  %v17398_v26 = vld [vmem:[#allocation257_spill] sm:$0xff]  ;;  %v12381_v37 = vpop.permute.xlu1 %4653  ;;  %5580 = vrot.lane.b32.xlu0 %v11927_v21, %s7378_s28  ;;  %v17402_v49 = vld [vmem:[#allocation163_spill] sm:$0xff]  ;;  %v17403_v38 = vld [vmem:[#allocation118_spill] sm:$0xff] }
 0x3a6   : > { %v17399_v28 = vrot.slane %v17398_v26, %v7686_v31  ;;  %17400 = vst [vmem:[#allocation199_spill] sm:$0xff] %v12381_v37  ;;  %v12386_v10 = vrot.slane %v6871_v18, %v7686_v31  ;;  %v3353_v9 = vadd.f32 %v11934_v17, %v3315_v23  ;;  %v12395_v22 = vmul.f32 %v17277_v7, %v17271_v48  ;;  %v12397_v3 = vpop.permute.xlu0 %4897  ;;  %v17405_v17 = vld [vmem:[#allocation166_spill] sm:$0xff]  ;;  %v17418_v37 = vld [vmem:[#allocation171_spill] sm:$0xff] }
 0x3a7   : > { %17404 = vst [vmem:[#allocation175_spill] sm:$0xff] %v12397_v3  ;;  %v3354_v60 = vadd.f32 %v11938_v8, %v3316_v6  ;;  %v3355_v58 = vadd.f32 %v11942_v36, %v3317_v12  ;;  %v3356_v5 = vadd.f32 %v11994_v19, %v3318_v34  ;;  %v3357_v18 = vadd.f32 %v11998_v41, %v3319_v25  ;;  %v17406_v39 = vld [vmem:[#allocation154_spill] sm:$0xff]  ;;  %v17408_v8 = vld [vmem:[#allocation165_spill] sm:$0xff]  ;;  %v17411_v6 = vld [vmem:[#allocation160_spill] sm:$0xff] }
 0x3a8   : > { %v12377_v47 = vmul.f32 %v17399_v28, %v17250_v59  ;;  %17401 = vst [vmem:[#allocation76_spill] sm:$0xff] %v12386_v10  ;;  %v3380_v59 = vmul.f32 %v17403_v38, %v17402_v49  ;;  %v3358_v45 = vadd.f32 %v12006_v32, %v3320_v55  ;;  %v3381_v23 = vmul.f32 %v17403_v38, %v17405_v17  ;;  %v17407_v28 = vld [vmem:[#allocation170_spill] sm:$0xff]  ;;  %v17412_v34 = vld [vmem:[#allocation131_spill] sm:$0xff] }
 0x3a9   : > { %v3382_v26 = vmul.f32 %v17403_v38, %v17406_v39  ;;  %v3383_v49 = vmul.f32 %v17403_v38, %v17407_v28  ;;  %v3359_v15 = vadd.f32 %v12010_v27, %v3321_v33  ;;  %v3384_v12 = vmul.f32 %v17403_v38, %v17408_v8  ;;  %v17409_v36 = vld [vmem:[#allocation202_spill] sm:$0xff]  ;;  %5281 = vrot.lane.b32.xlu1 %v11927_v21, %s7354_s24  ;;  %v17413_v27 = vld [vmem:[#allocation179_spill] sm:$0xff]  ;;  %v12425_v17 = vpop.permute.xlu1 %4729 }
 0x3aa   : > { %v3385_v19 = vmul.f32 %v17403_v38, %v17409_v36  ;;  %5584 = vrot.lane.b32.xlu0 %v12386_v10, %s7378_s28  ;;  %v17410_v32 = vld [vmem:[#allocation186_spill] sm:$0xff]  ;;  %v3391_v25 = vadd.f32 %v3380_v59, %v3353_v9  ;;  %v3418_v55 = vmul.f32 %v17412_v34, %v17411_v6  ;;  %v3419_v33 = vmul.f32 %v17412_v34, %v17413_v27  ;;  %v12427_v39 = vpop.permute.xlu0 %4901  ;;  %v17416_v28 = vld [vmem:[#allocation167_spill] sm:$0xff]  ;;  %v17417_v36 = vld [vmem:[#allocation185_spill] sm:$0xff] }
 0x3ab   : > { %v3386_v41 = vmul.f32 %v17403_v38, %v17410_v32  ;;  %17414 = vst [vmem:[#allocation198_spill] sm:$0xff] %v12425_v17  ;;  %17415 = vst [vmem:[#allocation228_spill] sm:$0xff] %v12427_v39  ;;  %v3420_v8 = vmul.f32 %v17412_v34, %v17416_v28  ;;  %v3421_v3 = vmul.f32 %v17412_v34, %v17417_v36  ;;  %v17419_v59 = vld [vmem:[#allocation193_spill] sm:$0xff]  ;;  %v17420_v27 = vld [vmem:[#allocation192_spill] sm:$0xff] }
 0x3ac   : > { %v3422_v9 = vmul.f32 %v17412_v34, %v17418_v37  ;;  %v3423_v32 = vmul.f32 %v17412_v34, %v17419_v59  ;;  %v3392_v6 = vadd.f32 %v3381_v23, %v3354_v60  ;;  %v3393_v21 = vadd.f32 %v3382_v26, %v3355_v58  ;;  %v17421_v28 = vld [vmem:[#allocation85_spill] sm:$0xff] }
 0x3ad   : > { %v3394_v10 = vadd.f32 %v3383_v49, %v3356_v5  ;;  %v3424_v17 = vmul.f32 %v17412_v34, %v17420_v27  ;;  %v3395_v52 = vadd.f32 %v3384_v12, %v3357_v18  ;;  %v3396_v39 = vadd.f32 %v3385_v19, %v3358_v45  ;;  %5285 = vrot.lane.b32.xlu1 %v12030_v56, %s7354_s24  ;;  %v7156_v36 = vld [vmem:[%s9023_s11 + $0x84] ss:$4 sm:$0xff]  ;;  %v12449_v26 = vpop.permute.xlu1 %4766 }
 0x3ae   : > { %5588 = vrot.lane.b32.xlu0 %v17421_v28, %s7378_s28  ;;  %v12445_v37 = vrot.slane %v7156_v36, %v17319_v43  ;;  %v3397_v58 = vadd.f32 %v3386_v41, %v3359_v15  ;;  %v3429_v5 = vadd.f32 %v3418_v55, %v3391_v25  ;;  %v3430_v23 = vadd.f32 %v3419_v33, %v3392_v6  ;;  %v12451_v18 = vpop.permute.xlu0 %4905  ;;  %v17425_v15 = vld [vmem:[#allocation102_spill] sm:$0xff]  ;;  %v17430_v55 = vld [vmem:[#allocation247_spill] sm:$0xff]  ;;  %v17434_v36 = vld [vmem:[#allocation260_spill] sm:$0xff] }
 0x3af   : > { %17423 = vst [vmem:[#allocation84_spill] sm:$0xff] %v12449_v26  ;;  %17424 = vst [vmem:[#allocation82_spill] sm:$0xff] %v12451_v18  ;;  %v3431_v45 = vadd.f32 %v3420_v8, %v3393_v21  ;;  %v3432_v49 = vadd.f32 %v3421_v3, %v3394_v10  ;;  %v3433_v12 = vadd.f32 %v3422_v9, %v3395_v52  ;;  %v17426_v21 = vld [vmem:[#allocation147_spill] sm:$0xff]  ;;  %v17427_v10 = vld [vmem:[#allocation61_spill] sm:$0xff]  ;;  %v7383_v28 = vmov 54  }
 0x3b0   : > { %17422 = vst [vmem:[#allocation23_spill] sm:$0xff] %v12445_v37  ;;  %v3434_v19 = vadd.f32 %v3423_v32, %v3396_v39  ;;  %v3435_v59 = vadd.f32 %v3424_v17, %v3397_v58  ;;  %v12455_v27 = vadd.f32 %v12163_v24, %v12351_v35  ;;  %v12458_v43 = vadd.f32 %v12167_v0, %v3167_v29  ;;  %v17429_v24 = vld [vmem:[#allocation181_spill] sm:$0xff] }
 0x3b1   : > { %v12462_v41 = vmul.f32 %v17425_v15, %v17277_v7  ;;  %v12466_v25 = vmul.f32 %v17299_v57, %v17331_v20  ;;  %v12470_v52 = vmul.f32 %v17426_v21, %v17299_v57  ;;  %v12474_v3 = vmul.f32 %v17336_v1, %v17427_v10  ;;  %5289 = vrot.lane.b32.xlu1 %v12445_v37, %s7354_s24  ;;  %v12488_v17 = vpop.permute.xlu1 %4770  ;;  %v17437_v10 = vld [vmem:[#allocation262_spill] sm:$0xff]  ;;  %s7195_s24 = sshll.u32 %s7395_s26, 4  ;;  %s7196_s24 = int_to_ptr.vmem [resolvable:$false] %s7195_s24 }
 0x3b2   : > { %5592 = vrot.lane.b32.xlu0 %v17278_v44, %s7378_s28  ;;  %v3311_v0 = vmul.f32 %v17380_v4, %v17429_v24  ;;  %v3495_v35 = vadd.f32 %v12020_v11, %v3429_v5  ;;  %v3496_v29 = vadd.f32 %v12024_v54, %v3430_v23  ;;  %v12486_v33 = vmul.f32 %v17430_v55, %v17336_v1  ;;  %v12490_v39 = vpop.permute.xlu0 %4909  ;;  %v17435_v54 = vld [vmem:[#allocation136_spill] sm:$0xff]  ;;  %v17436_v5 = vld [vmem:[#allocation261_spill] sm:$0xff]  ;;  %v17438_v55 = vld [vmem:[#allocation283_spill] sm:$0xff]  ;;  %s7197_s5 = scalar_lea.vmem %s7196_s24, 2816 }
 0x3b3   : > { %17428 = vst [vmem:[#allocation18_spill] sm:$0xff] %v12474_v3  ;;  %17432 = vst [vmem:[#allocation209_spill] sm:$0xff] %v12488_v17  ;;  %v3497_v8 = vadd.f32 %v12054_v50, %v3431_v45  ;;  %v3498_v9 = vadd.f32 %v12066_v53, %v3432_v49  ;;  %v3499_v32 = vadd.f32 %v12070_v2, %v3433_v12  ;;  %v17439_v45 = vld [vmem:[#allocation284_spill] sm:$0xff]  ;;  %v17440_v2 = vld [vmem:[#allocation290_spill] sm:$0xff] }
 0x3b4   : > { %17431 = vst [vmem:[#allocation107_spill] sm:$0xff] %v12486_v33  ;;  %17433 = vst [vmem:[#allocation87_spill] sm:$0xff] %v12490_v39  ;;  %v3500_v6 = vadd.f32 %v12074_v13, %v3434_v19  ;;  %v3501_v11 = vadd.f32 %v12078_v62, %v3435_v59  ;;  %v3522_v58 = vmul.f32 %v17435_v54, %v17434_v36  ;;  %v17441_v49 = vld [vmem:[#allocation267_spill] sm:$0xff]  ;;  %v17442_v12 = vld [vmem:[#allocation138_spill] sm:$0xff] }
 0x3b5   : > { %v3523_v23 = vmul.f32 %v17435_v54, %v17436_v5  ;;  %v3524_v24 = vmul.f32 %v17435_v54, %v17437_v10  ;;  %v3525_v50 = vmul.f32 %v17435_v54, %v17438_v55  ;;  %v3526_v53 = vmul.f32 %v17435_v54, %v17439_v45  ;;  %5354 = vperm.xlu1 %7130, %v12119_v51   ;;  %v17443_v59 = vld [vmem:[#allocation268_spill] sm:$0xff]  ;;  %v12518_v5 = vpop.permute.xlu1 %4774  ;;  %v17446_v55 = vld [vmem:[#allocation269_spill] sm:$0xff]  ;;  %v17448_v44 = vld [vmem:[#allocation287_spill] sm:$0xff] }
 0x3b6   : > { %v3527_v13 = vmul.f32 %v17435_v54, %v17440_v2  ;;  %5596 = vrot.lane.b32.xlu0 %v12030_v56, %s7378_s28  ;;  %v3528_v62 = vmul.f32 %v17435_v54, %v17292_v61  ;;  %v3560_v19 = vmul.f32 %v17442_v12, %v17441_v49  ;;  %v3561_v36 = vmul.f32 %v17442_v12, %v17443_v59  ;;  %v12520_v10 = vpop.permute.xlu0 %4913  ;;  %v17447_v2 = vld [vmem:[#allocation286_spill] sm:$0xff]  ;;  %v17449_v61 = vld [vmem:[#allocation289_spill] sm:$0xff] }
 0x3b7   : > { %17444 = vst [vmem:[#allocation291_spill] sm:$0xff] %v12518_v5  ;;  %17445 = vst [vmem:[#allocation149_spill] sm:$0xff] %v12520_v10  ;;  %v3562_v45 = vmul.f32 %v17442_v12, %v17446_v55  ;;  %v3563_v60 = vmul.f32 %v17442_v12, %v17447_v2  ;;  %v3564_v39 = vmul.f32 %v17442_v12, %v17448_v44  ;;  %v17450_v59 = vld [vmem:[#allocation70_spill] sm:$0xff] }
 0x3b8   : > { %v3565_v18 = vmul.f32 %v17442_v12, %v17449_v61  ;;  %v3533_v49 = vadd.f32 %v3522_v58, %v3495_v35  ;;  %v3534_v17 = vadd.f32 %v3523_v23, %v3496_v29  ;;  %v3535_v26 = vadd.f32 %v3524_v24, %v3497_v8  ;;  %v17454_v24 = vld [vmem:[#allocation17_spill] sm:$0xff] }
 0x3b9   : > { %v3566_v5 = vmul.f32 %v17442_v12, %v17450_v59  ;;  %v3536_v56 = vadd.f32 %v3525_v50, %v3498_v9  ;;  %v3537_v10 = vadd.f32 %v3526_v53, %v3499_v32  ;;  %v3538_v1 = vadd.f32 %v3527_v13, %v3500_v6  ;;  %7131 = vset.pattern.permute.xlu1 %v7383_v28  ;;  %v12539_v8 = vpop.permute.xlu1 %4778  ;;  %v17455_v50 = vld [vmem:[#allocation265_spill] sm:$0xff] }
 0x3ba   : > { %5600 = vrot.lane.b32.xlu0 %v12445_v37, %s7378_s28  ;;  %v17451_v44 = vrot.slane %v12217_v63, %v7686_v31  ;;  %v3539_v2 = vadd.f32 %v3528_v62, %v3501_v11  ;;  %v3571_v35 = vadd.f32 %v3560_v19, %v3533_v49  ;;  %v3572_v29 = vadd.f32 %v3561_v36, %v3534_v17  ;;  %v12541_v28 = vpop.permute.xlu0 %5042  ;;  %v17457_v63 = vld [vmem:[#allocation266_spill] sm:$0xff]  ;;  %v17459_v17 = vld [vmem:[#allocation288_spill] sm:$0xff] }
 0x3bb   : > { %5392 = vperm.xlu1 %7131, %v12119_v51   ;;  %17452 = vst [vmem:[#allocation121_spill] sm:$0xff] %v12539_v8  ;;  %v3573_v9 = vadd.f32 %v3562_v45, %v3535_v26  ;;  %v3574_v32 = vadd.f32 %v3563_v60, %v3536_v56  ;;  %v3575_v6 = vadd.f32 %v3564_v39, %v3537_v10  ;;  %17453 = vst [vmem:[#allocation151_spill] sm:$0xff] %v12541_v28  ;;  %v17463_v39 = vld [vmem:[#allocation254_spill] sm:$0xff]  ;;  %v17464_v36 = vld [vmem:[#allocation256_spill] sm:$0xff] }
 0x3bc   : > { %v3312_v55 = vmul.f32 %v17451_v44, %v17380_v4  ;;  %v3576_v58 = vadd.f32 %v3565_v18, %v3538_v1  ;;  %v3577_v23 = vadd.f32 %v3566_v5, %v3539_v2  ;;  %v12545_v53 = vmul.f32 %v17455_v50, %v17454_v24  ;;  %v17467_v45 = vld [vmem:[#allocation281_spill] sm:$0xff]  ;;  %v17483_v37 = vld [vmem:[#allocation30_spill] sm:$0xff]  ;;  %v17491_v50 = vld [vmem:[#allocation195_spill] sm:$0xff] }
 0x3bd   : > { %v12549_v11 = vmul.f32 %v17457_v63, %v17454_v24  ;;  %v17460_v13 = vrot.slane %v17459_v17, %v7686_v31  ;;  %v17461_v56 = vrot.slane %v12276_v40, %v7686_v31  ;;  %v17462_v60 = vrot.slane %v12281_v30, %v7686_v31  ;;  %v17465_v40 = vld [vmem:[#allocation226_spill] sm:$0xff]  ;;  %v17469_v44 = vld [vmem:[#allocation41_spill] sm:$0xff] }
 0x3be   : > { %17456 = vst [vmem:[#allocation155_spill] sm:$0xff] %v12545_v53  ;;  %v3322_v18 = vadd.f32 %v3311_v0, %v12455_v27  ;;  %5677 = vperm.xlu0 %7133, %v12119_v51   ;;  %v3609_v19 = vadd.f32 %v17463_v39, %v3571_v35  ;;  %v3610_v5 = vadd.f32 %v17464_v36, %v3572_v29  ;;  %v17468_v30 = vld [vmem:[#allocation282_spill] sm:$0xff]  ;;  %v12582_v17 = vpop.permute.xlu0 %5267  ;;  %v7384_v35 = vmov 57   ;;  %v17472_v29 = vld [vmem:[#allocation176_spill] sm:$0xff]  ;;  %v17476_v36 = vld [vmem:[#allocation67_spill] sm:$0xff] }
 0x3bf   : > { %17458 = vst [vmem:[#allocation99_spill] sm:$0xff] %v12549_v11  ;;  %v12555_v62 = vmul.f32 %v17460_v13, %v17380_v4  ;;  %v12561_v1 = vmul.f32 %v17461_v56, %v17380_v4  ;;  %v12567_v26 = vmul.f32 %v17462_v60, %v17403_v38  ;;  %v3323_v10 = vadd.f32 %v3312_v55, %v12458_v43  ;;  %v12576_v4 = vpop.permute.xlu1 %4782  ;;  %v17470_v27 = vld [vmem:[#allocation178_spill] sm:$0xff]  ;;  %v17473_v43 = vld [vmem:[#allocation27_spill] sm:$0xff]  ;;  %v17475_v60 = vld [vmem:[#allocation28_spill] sm:$0xff] }
 0x3c0   : > { %5467 = vrot.lane.b32.xlu1 %v17465_v40, %s7378_s28  ;;  %17466 = vst [vmem:[#allocation152_spill] sm:$0xff] %v12576_v4  ;;  %v3611_v61 = vadd.f32 %v17467_v45, %v3573_v9  ;;  %v3612_v49 = vadd.f32 %v17468_v30, %v3574_v32  ;;  %v3613_v2 = vadd.f32 %v17469_v44, %v3575_v6  ;;  %17471 = vst [vmem:[#allocation180_spill] sm:$0xff] %v12582_v17  ;;  %v17474_v55 = vld [vmem:[#allocation143_spill] sm:$0xff]  ;;  %v17477_v32 = vld [vmem:[#allocation125_spill] sm:$0xff] }
 0x3c1   : > { %v3614_v0 = vadd.f32 %v17470_v27, %v3576_v58  ;;  %7134 = vset.pattern.permute.xlu1 %v7384_v35  ;;  %v3615_v13 = vadd.f32 %v17472_v29, %v3577_v23  ;;  %v3640_v56 = vmul.f32 %v17474_v55, %v17473_v43  ;;  %v3641_v39 = vmul.f32 %v17474_v55, %v17475_v60  ;;  %v17478_v45 = vld [vmem:[#allocation164_spill] sm:$0xff]  ;;  %v17479_v30 = vld [vmem:[#allocation190_spill] sm:$0xff]  ;;  %v17480_v27 = vld [vmem:[#allocation219_spill] sm:$0xff] }
 0x3c2   : > { %v3642_v9 = vmul.f32 %v17474_v55, %v17476_v36  ;;  %v3643_v6 = vmul.f32 %v17474_v55, %v17477_v32  ;;  %v3644_v58 = vmul.f32 %v17474_v55, %v17478_v45  ;;  %v3645_v44 = vmul.f32 %v17474_v55, %v17479_v30  ;;  %v17481_v29 = vld [vmem:[#allocation29_spill] sm:$0xff]  ;;  %v17482_v43 = vld [vmem:[#allocation139_spill] sm:$0xff]  ;;  %v17487_v30 = vld [vmem:[#allocation130_spill] sm:$0xff] }
 0x3c3   : > { %v3646_v23 = vmul.f32 %v17474_v55, %v17480_v27  ;;  %v7385_v35 = vmov 59   ;;  %v3682_v60 = vmul.f32 %v17482_v43, %v17481_v29  ;;  %v3683_v36 = vmul.f32 %v17482_v43, %v17483_v37  ;;  %v17484_v28 = vld [vmem:[#allocation77_spill] sm:$0xff]  ;;  %v12607_v45 = vpop.permute.xlu1 %4786  ;;  %v17489_v29 = vld [vmem:[#allocation222_spill] sm:$0xff]  ;;  %v12616_v37 = vpop.permute.xlu0 %5271 }
 0x3c4   : > { %7136 = vset.pattern.permute.xlu0 %v7385_v35  ;;  %v3684_v32 = vmul.f32 %v17482_v43, %v17484_v28  ;;  %v17485_v17 = vld [vmem:[#allocation81_spill] sm:$0xff]  ;;  %17486 = vst [vmem:[#allocation169_spill] sm:$0xff] %v12607_v45  ;;  %v3685_v27 = vmul.f32 %v17482_v43, %v17487_v30  ;;  %v17488_v35 = vld [vmem:[#allocation187_spill] sm:$0xff]  ;;  %v3687_v8 = vmul.f32 %v17482_v43, %v17489_v29  ;;  %17490 = vst [vmem:[#allocation119_spill] sm:$0xff] %v12616_v37 }
 0x3c5   : > { %5469 = vrot.lane.b32.xlu1 %v17485_v17, %s7378_s28  ;;  %5887 = vperm.xlu0 %7136, %v12119_v51   ;;  %v3686_v4 = vmul.f32 %v17482_v43, %v17488_v35  ;;  %v3651_v63 = vadd.f32 %v3640_v56, %v3609_v19  ;;  %v3652_v28 = vadd.f32 %v3641_v39, %v3610_v5  ;;  %v17492_v17 = vld [vmem:[#allocation89_spill] sm:$0xff]  ;;  %v7386_v19 = vmov 62  }
 0x3c6   : > { %v3688_v24 = vmul.f32 %v17482_v43, %v17491_v50  ;;  %v12621_v45 = vadd.f32 %v12370_v46, %v3322_v18  ;;  %v3653_v53 = vadd.f32 %v3642_v9, %v3611_v61  ;;  %v3654_v11 = vadd.f32 %v3643_v6, %v3612_v49  ;;  %v17495_v61 = vld [vmem:[#allocation96_spill] sm:$0xff]  ;;  %v17496_v49 = vld [vmem:[#allocation122_spill] sm:$0xff]  ;;  %v17502_v9 = vld [vmem:[#allocation277_spill] sm:$0xff] }
 0x3c7   : > { %v3655_v57 = vadd.f32 %v3644_v58, %v3613_v2  ;;  %v3656_v30 = vadd.f32 %v3645_v44, %v3614_v0  ;;  %v3657_v3 = vadd.f32 %v3646_v23, %v3615_v13  ;;  %v3693_v33 = vadd.f32 %v3682_v60, %v3651_v63  ;;  %v12625_v29 = vpop.permute.xlu1 %4790  ;;  %v12627_v46 = vpop.permute.xlu0 %5275  ;;  %v17497_v0 = vld [vmem:[#allocation22_spill] sm:$0xff]  ;;  %v17503_v58 = vld [vmem:[#allocation236_spill] sm:$0xff]  ;;  %v17505_v60 = vld [vmem:[#allocation91_spill] sm:$0xff] }
 0x3c8   : > { %v3694_v35 = vadd.f32 %v3683_v36, %v3652_v28  ;;  %17493 = vst [vmem:[#allocation53_spill] sm:$0xff] %v12625_v29  ;;  %v3695_v5 = vadd.f32 %v3684_v32, %v3653_v53  ;;  %v3696_v56 = vadd.f32 %v3685_v27, %v3654_v11  ;;  %17494 = vst [vmem:[#allocation50_spill] sm:$0xff] %v12627_v46  ;;  %v17499_v11 = vld [vmem:[#allocation71_spill] sm:$0xff]  ;;  %v17507_v32 = vld [vmem:[#allocation278_spill] sm:$0xff] }
 0x3c9   : > { %5473 = vrot.lane.b32.xlu1 %v17492_v17, %s7378_s28  ;;  %7139 = vset.pattern.permute.xlu0 %v7386_v19  ;;  %v3697_v50 = vadd.f32 %v3686_v4, %v3655_v57  ;;  %v3698_v39 = vadd.f32 %v3687_v8, %v3656_v30  ;;  %v3699_v18 = vadd.f32 %v3688_v24, %v3657_v3  ;;  %v17498_v57 = vld [vmem:[#allocation104_spill] sm:$0xff]  ;;  %v17501_v24 = vld [vmem:[#allocation54_spill] sm:$0xff]  ;;  %v17508_v28 = vld [vmem:[#allocation279_spill] sm:$0xff] }
 0x3ca   : > { %6045 = vperm.xlu0 %7139, %v12119_v51   ;;  %v12632_v63 = vmul.f32 %v17435_v54, %v17495_v61  ;;  %v12636_v2 = vmul.f32 %v17496_v49, %v17435_v54  ;;  %v12640_v53 = vmul.f32 %v17442_v12, %v17497_v0  ;;  %v12644_v8 = vmul.f32 %v17498_v57, %v17442_v12  ;;  %v17509_v30 = vld [vmem:[#allocation39_spill] sm:$0xff]  ;;  %v17512_v49 = vld [vmem:[#allocation229_spill] sm:$0xff]  ;;  %v17526_v29 = vld [vmem:[#allocation58_spill] sm:$0xff] }
 0x3cb   : > { %v12648_v4 = vmul.f32 %v17474_v55, %v17499_v11  ;;  %v12652_v3 = vmul.f32 %v17465_v40, %v17474_v55  ;;  %v3735_v13 = vadd.f32 %v17501_v24, %v3693_v33  ;;  %v3736_v6 = vadd.f32 %v17502_v9, %v3694_v35  ;;  %v12663_v36 = vpop.permute.xlu1 %4794  ;;  %v17510_v33 = vld [vmem:[#allocation270_spill] sm:$0xff]  ;;  %v12669_v35 = vpop.permute.xlu0 %5279  ;;  %v17513_v11 = vld [vmem:[#allocation275_spill] sm:$0xff]  ;;  %v17528_v51 = vld [vmem:[#allocation129_spill] sm:$0xff] }
 0x3cc   : > { %v12658_v44 = vmul.f32 %v17482_v43, %v17503_v58  ;;  %v3361_v23 = vadd.f32 %v12377_v47, %v3323_v10  ;;  %17506 = vst [vmem:[#allocation257_spill] sm:$0xff] %v12663_v36  ;;  %v3737_v27 = vadd.f32 %v17507_v32, %v3695_v5  ;;  %v3738_v40 = vadd.f32 %v17508_v28, %v3696_v56  ;;  %v17514_v10 = vld [vmem:[#allocation33_spill] sm:$0xff]  ;;  %v17515_v24 = vld [vmem:[#allocation115_spill] sm:$0xff]  ;;  %v17516_v58 = vld [vmem:[#allocation34_spill] sm:$0xff] }
 0x3cd   : > { %17500 = vst [vmem:[#allocation40_spill] sm:$0xff] %v12648_v4  ;;  %5477 = vrot.lane.b32.xlu1 %v17505_v60, %s7378_s28  ;;  %v3739_v19 = vadd.f32 %v17509_v30, %v3697_v50  ;;  %v3740_v61 = vadd.f32 %v17510_v33, %v3698_v39  ;;  %17511 = vst [vmem:[#allocation163_spill] sm:$0xff] %v12669_v35  ;;  %v3741_v47 = vadd.f32 %v17513_v11, %v3699_v18  ;;  %v17517_v5 = vld [vmem:[#allocation83_spill] sm:$0xff]  ;;  %v7387_v32 = vmov 64   ;;  %v17518_v50 = vld [vmem:[#allocation140_spill] sm:$0xff] }
 0x3ce   : > { %17504 = vst [vmem:[#allocation194_spill] sm:$0xff] %v12658_v44  ;;  %6122 = vrot.lane.b32.xlu0 %v17512_v49, %s7322_s15  ;;  %v3766_v9 = vmul.f32 %v17515_v24, %v17514_v10  ;;  %v3767_v46 = vmul.f32 %v17515_v24, %v17516_v58  ;;  %v3768_v56 = vmul.f32 %v17515_v24, %v17517_v5  ;;  %v17519_v28 = vld [vmem:[#allocation201_spill] sm:$0xff]  ;;  %v17520_v33 = vld [vmem:[#allocation232_spill] sm:$0xff]  ;;  %v17530_v44 = vld [vmem:[#allocation207_spill] sm:$0xff] }
 0x3cf   : > { %7141 = vset.pattern.permute.xlu0 %v7387_v32  ;;  %v3769_v39 = vmul.f32 %v17515_v24, %v17518_v50  ;;  %v3770_v30 = vmul.f32 %v17515_v24, %v17519_v28  ;;  %v3771_v18 = vmul.f32 %v17515_v24, %v17520_v33  ;;  %v17521_v11 = vld [vmem:[#allocation44_spill] sm:$0xff]  ;;  %v12700_v33 = vpop.permute.xlu1 %4798  ;;  %v3399_v49 = vadd.f32 %v12567_v26, %v3361_v23  ;;  %v17533_v55 = vld [vmem:[#allocation106_spill] sm:$0xff] }
 0x3d0   : > { %v17522_v10 = vrot.slane %v17521_v11, %v7686_v31  ;;  %v17523_v58 = vld [vmem:[#allocation204_spill] sm:$0xff]  ;;  %17527 = vst [vmem:[#allocation118_spill] sm:$0xff] %v12700_v33  ;;  %v3779_v4 = vadd.f32 %v3768_v56, %v3737_v27  ;;  %v17532_v33 = vld [vmem:[#allocation157_spill] sm:$0xff] }
 0x3d1   : > { %v3772_v35 = vmul.f32 %v17515_v24, %v17523_v58  ;;  %v17524_v5 = vld [vmem:[#allocation52_spill] sm:$0xff]  ;;  %5481 = vrot.lane.b32.xlu1 %v17526_v29, %s7378_s28  ;;  %v3778_v29 = vadd.f32 %v3767_v46, %v3736_v6  ;;  %v4302_v12 = vsel %vm4141_vm5, %v17533_v55, %v17532_v33  ;;  %v3781_v7 = vadd.f32 %v3770_v30, %v3739_v19  ;;  %v17536_v46 = vld [vmem:[#allocation26_spill] sm:$0xff] }
 0x3d2   : > { %v3426_v37 = vmul.f32 %v17522_v10, %v17412_v34  ;;  %v17525_v36 = vld [vmem:[#allocation168_spill] sm:$0xff]  ;;  %6126 = vrot.lane.b32.xlu0 %v17505_v60, %s7322_s15 }
 0x3d3   : > { %v3913_v32 = vmul.f32 %v17525_v36, %v17524_v5  ;;  %v3914_v50 = vmul.f32 %v17525_v36, %v17271_v48  ;;  %v3915_v28 = vmul.f32 %v17525_v36, %v17425_v15  ;;  %v3916_v11 = vmul.f32 %v17525_v36, %v17528_v51  ;;  %v17529_v10 = vld [vmem:[#allocation184_spill] sm:$0xff]  ;;  %v12709_v48 = vpop.permute.xlu0 %5283  ;;  %v12726_v6 = vpop.permute.xlu1 %4802 }
 0x3d4   : > { %v3917_v58 = vmul.f32 %v17525_v36, %v17529_v10  ;;  %v3387_v5 = vmul.f32 %v17403_v38, %v17530_v44  ;;  %17531 = vst [vmem:[#allocation166_spill] sm:$0xff] %v12709_v48  ;;  %v3777_v15 = vadd.f32 %v3766_v9, %v3735_v13  ;;  %v3780_v51 = vadd.f32 %v3769_v39, %v3738_v40  ;;  %v17534_v10 = vld [vmem:[#allocation197_spill] sm:$0xff]  ;;  %v17535_v26 = vld [vmem:[#allocation64_spill] sm:$0xff] }
 0x3d5   : > { %v3425_v54 = vmul.f32 %v17412_v34, %v17534_v10  ;;  %v3437_v44 = vadd.f32 %v3426_v37, %v3399_v49  ;;  %v3918_v23 = vmul.f32 %v17535_v26, %v17525_v36  ;;  %v3925_v16 = vadd.f32 %v3914_v50, %v3778_v29  ;;  %5485 = vrot.lane.b32.xlu1 %v17536_v46, %s7378_s28  ;;  %v17539_v49 = vld [vmem:[#allocation250_spill] sm:$0xff]  ;;  %v17541_v39 = vld [vmem:[#allocation276_spill] sm:$0xff] }
 0x3d6   : > { %v3924_v48 = vadd.f32 %v3913_v32, %v3777_v15  ;;  %v12722_v13 = vmul.f32 %v17492_v17, %v17482_v43  ;;  %17537 = vst [vmem:[#allocation154_spill] sm:$0xff] %v12726_v6  ;;  %v3926_v27 = vadd.f32 %v3915_v28, %v3779_v4  ;;  %v3927_v40 = vadd.f32 %v3916_v11, %v3780_v51  ;;  %v17542_v4 = vld [vmem:[#allocation145_spill] sm:$0xff]  ;;  %v17543_v32 = vld [vmem:[#allocation252_spill] sm:$0xff]  ;;  %v17545_v10 = vld [vmem:[#allocation46_spill] sm:$0xff] }
 0x3d7   : > { %v3928_v19 = vadd.f32 %v3917_v58, %v3781_v7  ;;  %v3398_v9 = vadd.f32 %v3387_v5, %v12621_v45  ;;  %v12729_v37 = vpop.permute.xlu0 %5287  ;;  %6130 = vrot.lane.b32.xlu0 %v17539_v49, %s7322_s15  ;;  %v3782_v29 = vadd.f32 %v3771_v18, %v3740_v61  ;;  %v3783_v56 = vadd.f32 %v3772_v35, %v3741_v47  ;;  %v17544_v50 = vld [vmem:[#allocation248_spill] sm:$0xff]  ;;  %v17546_v35 = vld [vmem:[#allocation242_spill] sm:$0xff]  ;;  %v17547_v18 = vld [vmem:[#allocation95_spill] sm:$0xff]  ;;  %v12753_v58 = vpop.permute.xlu1 %4859 }
 0x3d8   : > { %17538 = vst [vmem:[#allocation170_spill] sm:$0xff] %v12729_v37  ;;  %v12734_v17 = vrot.slane %v4302_v12, %v7686_v31  ;;  %v12738_v30 = vmul.f32 %v17515_v24, %v17541_v39  ;;  %v3919_v51 = vmul.f32 %v17542_v4, %v17525_v36  ;;  %v3503_v45 = vadd.f32 %v12462_v41, %v3437_v44  ;;  %v17550_v41 = vld [vmem:[#allocation16_spill] sm:$0xff] }
 0x3d9   : > { %v3436_v7 = vadd.f32 %v3425_v54, %v3398_v9  ;;  %v3168_v28 = vadd.f32 %v17544_v50, %v17543_v32  ;;  %v3929_v11 = vadd.f32 %v3918_v23, %v3782_v29  ;;  %v3974_v61 = vadd.f32 %v17545_v10, %v3924_v48  ;;  %5489 = vrot.lane.b32.xlu1 %v17547_v18, %s7378_s28  ;;  %v17549_v54 = vld [vmem:[#allocation271_spill] sm:$0xff]  ;;  %v17551_v44 = vld [vmem:[#allocation272_spill] sm:$0xff]  ;;  %v17552_v23 = vld [vmem:[#allocation253_spill] sm:$0xff] }
 0x3da   : > { %17540 = vst [vmem:[#allocation165_spill] sm:$0xff] %v12734_v17  ;;  %v3975_v47 = vadd.f32 %v17546_v35, %v3925_v16  ;;  %v12749_v12 = vmul.f32 %v17536_v46, %v17515_v24  ;;  %17548 = vst [vmem:[#allocation202_spill] sm:$0xff] %v12753_v58  ;;  %v3976_v5 = vadd.f32 %v17549_v54, %v3926_v27  ;;  %v17553_v29 = vld [vmem:[#allocation57_spill] sm:$0xff]  ;;  %v17555_v16 = vld [vmem:[#allocation162_spill] sm:$0xff] }
 0x3db   : > { %v3977_v15 = vadd.f32 %v17550_v41, %v3927_v40  ;;  %v3978_v9 = vadd.f32 %v17551_v44, %v3928_v19  ;;  %v3169_v48 = vadd.f32 %v17553_v29, %v17552_v23  ;;  %v12760_v39 = vpop.permute.xlu0 %5316  ;;  %6134 = vrot.lane.b32.xlu0 %v17547_v18, %s7322_s15  ;;  %v4013_v46 = vmul.f32 %v17555_v16, %v17450_v59  ;;  %v17556_v40 = vld [vmem:[#allocation142_spill] sm:$0xff]  ;;  %v17557_v50 = vld [vmem:[#allocation296_spill] sm:$0xff]  ;;  %v17559_v59 = vld [vmem:[#allocation47_spill] sm:$0xff]  ;;  %v12788_v6 = vpop.permute.xlu1 %4863 }
 0x3dc   : > { %17554 = vst [vmem:[#allocation186_spill] sm:$0xff] %v12760_v39  ;;  %v4014_v32 = vmul.f32 %v17555_v16, %v17497_v0  ;;  %v4015_v27 = vmul.f32 %v17555_v16, %v17498_v57  ;;  %v4016_v19 = vmul.f32 %v17555_v16, %v17556_v40  ;;  %v4017_v10 = vmul.f32 %v17555_v16, %v17557_v50  ;;  %v17558_v41 = vld [vmem:[#allocation20_spill] sm:$0xff]  ;;  %v17560_v0 = vld [vmem:[#allocation94_spill] sm:$0xff]  ;;  %v17562_v58 = vld [vmem:[#allocation19_spill] sm:$0xff] }
 0x3dd   : > { %v3502_v35 = vadd.f32 %v12395_v22, %v3436_v7  ;;  %v3541_v54 = vadd.f32 %v12636_v2, %v3503_v45  ;;  %v3206_v44 = vadd.f32 %v17558_v41, %v3168_v28  ;;  %v12777_v23 = vadd.f32 %v3919_v51, %v3783_v56  ;;  %v17561_v57 = vld [vmem:[#allocation264_spill] sm:$0xff]  ;;  %5534 = vrot.lane.b32.xlu1 %v17562_v58, %s7378_s28  ;;  %v17564_v22 = vld [vmem:[#allocation103_spill] sm:$0xff]  ;;  %v17566_v51 = vld [vmem:[#allocation93_spill] sm:$0xff] }
 0x3de   : > { %v3979_v29 = vadd.f32 %v17559_v59, %v3929_v11  ;;  %v4018_v37 = vmul.f32 %v17560_v0, %v17555_v16  ;;  %v12784_v39 = vmul.f32 %v17561_v57, %v17525_v36  ;;  %17563 = vst [vmem:[#allocation160_spill] sm:$0xff] %v12788_v6  ;;  %v12792_v2 = vmul.f32 %v17564_v22, %v17555_v16  ;;  %v17567_v59 = vld [vmem:[#allocation69_spill] sm:$0xff] }
 0x3df   : > { %v3579_v56 = vadd.f32 %v12644_v8, %v3541_v54  ;;  %v3207_v7 = vadd.f32 %v17566_v51, %v3169_v48  ;;  %v3324_v45 = vadd.f32 %v12555_v62, %v3206_v44  ;;  %6166 = vrot.lane.b32.xlu0 %v17562_v58, %s7322_s15  ;;  %v12799_v28 = vadd.f32 %v4013_v46, %v3974_v61  ;;  %v12807_v57 = vpop.permute.xlu0 %5430  ;;  %v17571_v61 = vld [vmem:[#allocation86_spill] sm:$0xff] }
 0x3e0   : > { %17565 = vst [vmem:[#allocation131_spill] sm:$0xff] %v12792_v2  ;;  %v12801_v11 = vadd.f32 %v4014_v32, %v3975_v47  ;;  %v4026_v41 = vadd.f32 %v4015_v27, %v3976_v5  ;;  %v12805_v6 = vmul.f32 %v17567_v59, %v17525_v36  ;;  %17568 = vst [vmem:[#allocation179_spill] sm:$0xff] %v12807_v57  ;;  %v17572_v5 = vld [vmem:[#allocation285_spill] sm:$0xff]  ;;  %v17576_v32 = vld [vmem:[#allocation32_spill] sm:$0xff] }
 0x3e1   : > { %v12809_v4 = vadd.f32 %v4016_v19, %v3977_v15  ;;  %v12811_v8 = vadd.f32 %v4017_v10, %v3978_v9  ;;  %v3540_v62 = vadd.f32 %v12632_v63, %v3502_v35  ;;  %v3325_v48 = vadd.f32 %v12561_v1, %v3207_v7  ;;  %v17574_v9 = vld [vmem:[#allocation280_spill] sm:$0xff]  ;;  %v12831_v63 = vpop.permute.xlu1 %4867  ;;  %v17577_v19 = vld [vmem:[#allocation273_spill] sm:$0xff]  ;;  %v17579_v44 = vld [vmem:[#allocation66_spill] sm:$0xff] }
 0x3e2   : > { %v12815_v54 = vadd.f32 %v4018_v37, %v3979_v29  ;;  %v12819_v47 = vmul.f32 %v17571_v61, %v17555_v16  ;;  %v12823_v46 = vmul.f32 %v17572_v5, %v17555_v16  ;;  %v12827_v15 = vrot.slane %v11729_v42, %v7686_v31  ;;  %5538 = vrot.lane.b32.xlu1 %v17574_v9, %s7378_s28  ;;  %v17580_v29 = vld [vmem:[#allocation173_spill] sm:$0xff] }
 0x3e3   : > { %17569 = vst [vmem:[#allocation167_spill] sm:$0xff] %v12811_v8  ;;  %17575 = vst [vmem:[#allocation193_spill] sm:$0xff] %v12831_v63  ;;  %v3578_v1 = vadd.f32 %v12640_v53, %v3540_v62  ;;  %v3617_v37 = vadd.f32 %v12470_v52, %v3579_v56  ;;  %v3362_v27 = vadd.f32 %v17576_v32, %v3324_v45  ;;  %6170 = vrot.lane.b32.xlu0 %v17574_v9, %s7322_s15  ;;  %v17581_v53 = vld [vmem:[#allocation117_spill] sm:$0xff]  ;;  %v12856_v45 = vpop.permute.xlu0 %5471  ;;  %v17584_v62 = vld [vmem:[#allocation150_spill] sm:$0xff] }
 0x3e4   : > { %17570 = vst [vmem:[#allocation185_spill] sm:$0xff] %v12815_v54  ;;  %17573 = vst [vmem:[#allocation171_spill] sm:$0xff] %v12827_v15  ;;  %v17578_v10 = vrot.slane %v17577_v19, %v7686_v31  ;;  %v12844_v51 = vmul.f32 %v17580_v29, %v17579_v44  ;;  %v12848_v7 = vmul.f32 %v17580_v29, %v17331_v20  ;;  %v17586_v32 = vld [vmem:[#allocation73_spill] sm:$0xff]  ;;  %v17590_v63 = vld [vmem:[#allocation208_spill] sm:$0xff] }
 0x3e5   : > { %v4065_v52 = vmul.f32 %v17580_v29, %v17426_v21  ;;  %v12854_v56 = vmul.f32 %v17580_v29, %v17581_v53  ;;  %17583 = vst [vmem:[#allocation102_spill] sm:$0xff] %v12856_v45  ;;  %v12860_v9 = vmul.f32 %v17580_v29, %v17584_v62  ;;  %v3363_v19 = vadd.f32 %v17586_v32, %v3325_v48  ;;  %v17592_v45 = vld [vmem:[#allocation196_spill] sm:$0xff]  ;;  %v17593_v59 = vld [vmem:[#allocation97_spill] sm:$0xff] }
 0x3e6   : > { %v3389_v35 = vmul.f32 %v17578_v10, %v17403_v38  ;;  %v17587_v10 = vld [vmem:[#allocation43_spill] sm:$0xff]  ;;  %v17589_v21 = vrot.slane %v12346_v14, %v7686_v31  ;;  %v12873_v57 = vmul.f32 %v17590_v63, %v17580_v29  ;;  %v12878_v15 = vsel %vm4141_vm5, %v17593_v59, %v17592_v45  ;;  %v17594_v48 = vld [vmem:[#allocation12_spill] sm:$0xff]  ;;  %v17600_v2 = vld [vmem:[#allocation101_spill] sm:$0xff] }
 0x3e7   : > { %17582 = vst [vmem:[#allocation192_spill] sm:$0xff] %v12854_v56  ;;  %17585 = vst [vmem:[#allocation147_spill] sm:$0xff] %v12860_v9  ;;  %v17588_v20 = vrot.slane %v17587_v10, %v7686_v31  ;;  %v12882_v32 = vmul.f32 %v17594_v48, %v17580_v29  ;;  %v17596_v14 = vld [vmem:[#allocation128_spill] sm:$0xff]  ;;  %v3659_v63 = vadd.f32 %v12652_v3, %v3617_v37  ;;  %v17603_v3 = vld [vmem:[#allocation79_spill] sm:$0xff] }
 0x3e8   : > { %v3427_v42 = vmul.f32 %v17589_v21, %v17412_v34  ;;  %17591 = vst [vmem:[#allocation61_spill] sm:$0xff] %v12873_v57  ;;  %5542 = vrot.lane.b32.xlu1 %v17596_v14, %s7378_s28  ;;  %v3616_v21 = vadd.f32 %v12466_v25, %v3578_v1  ;;  %v3400_v26 = vadd.f32 %v3389_v35, %v3362_v27  ;;  %v17598_v59 = vld [vmem:[#allocation244_spill] sm:$0xff]  ;;  %v17602_v25 = vld [vmem:[#allocation111_spill] sm:$0xff]  ;;  %v12911_v27 = vpop.permute.xlu0 %5475 }
 0x3e9   : > { %v3390_v44 = vmul.f32 %v17588_v20, %v17403_v38  ;;  %v17595_v38 = vld [vmem:[#allocation38_spill] sm:$0xff]  ;;  %v12890_v20 = vpop.permute.xlu1 %4871  ;;  %v17599_v22 = vrot.slane %v17598_v59, %v7686_v31  ;;  %6174 = vrot.lane.b32.xlu0 %v17596_v14, %s7322_s15  ;;  %v12905_v57 = vsel %vm4141_vm5, %v17592_v45, %v17600_v2  ;;  %17604 = vst [vmem:[#allocation247_spill] sm:$0xff] %v12911_v27  ;;  %v17605_v14 = vld [vmem:[#allocation60_spill] sm:$0xff]  ;;  %v17608_v9 = vld [vmem:[#allocation143_spill] sm:$0xff] }
 0x3ea   : > { %v12886_v10 = vmul.f32 %v17595_v38, %v17580_v29  ;;  %17597 = vst [vmem:[#allocation181_spill] sm:$0xff] %v12890_v20  ;;  %v12900_v38 = vadd.f32 %v4065_v52, %v4026_v41  ;;  %v17601_v20 = vld [vmem:[#allocation136_spill] sm:$0xff]  ;;  %v3438_v35 = vadd.f32 %v3427_v42, %v3400_v26  ;;  %v17606_v41 = vld [vmem:[#allocation129_spill] sm:$0xff]  ;;  %v17607_v45 = vld [vmem:[#allocation138_spill] sm:$0xff] }
 0x3eb   : > { %v3428_v48 = vmul.f32 %v17599_v22, %v17412_v34  ;;  %v3531_v1 = vmul.f32 %v17602_v25, %v17601_v20  ;;  %v3532_v37 = vmul.f32 %v17603_v3, %v17601_v20  ;;  %v3701_v34 = vadd.f32 %v12722_v13, %v3659_v63  ;;  %v17609_v20 = vld [vmem:[#allocation81_spill] sm:$0xff]  ;;  %v17612_v26 = vld [vmem:[#allocation182_spill] sm:$0xff] }
 0x3ec   : > { %v3401_v22 = vadd.f32 %v3390_v44, %v3363_v19  ;;  %v3493_v52 = vmul.f32 %v17606_v41, %v17605_v14  ;;  %v3569_v54 = vmul.f32 %v17556_v40, %v17607_v45  ;;  %v3570_v25 = vmul.f32 %v17557_v50, %v17607_v45  ;;  %v17610_v13 = vld [vmem:[#allocation217_spill] sm:$0xff]  ;;  %v17614_v44 = vld [vmem:[#allocation40_spill] sm:$0xff] }
 0x3ed   : > { %v12924_v3 = vmul.f32 %v17609_v20, %v17608_v9  ;;  %5546 = vrot.lane.b32.xlu1 %v17610_v13, %s7378_s28  ;;  %v12928_v42 = vpop.permute.xlu1 %4875  ;;  %v17613_v63 = vld [vmem:[#allocation141_spill] sm:$0xff]  ;;  %v3658_v59 = vadd.f32 %v17614_v44, %v3616_v21  ;;  %v17615_v41 = vld [vmem:[#allocation184_spill] sm:$0xff]  ;;  %6178 = vrot.lane.b32.xlu0 %v17610_v13, %s7322_s15  ;;  %v12953_v21 = vpop.permute.xlu0 %5479  ;;  %v17621_v44 = vld [vmem:[#allocation194_spill] sm:$0xff] }
 0x3ee   : > { %17611 = vst [vmem:[#allocation260_spill] sm:$0xff] %v12928_v42  ;;  %v4304_v19 = vsel %vm4141_vm5, %v17613_v63, %v17612_v26  ;;  %v3439_v27 = vadd.f32 %v3428_v48, %v3401_v22  ;;  %v3494_v40 = vmul.f32 %v17615_v41, %v17605_v14  ;;  %v17616_v20 = vld [vmem:[#allocation200_spill] sm:$0xff]  ;;  %v17617_v50 = vld [vmem:[#allocation229_spill] sm:$0xff]  ;;  %v12951_v48 = vrot.slane %v17562_v58, %v7686_v31  ;;  %v17622_v13 = vld [vmem:[#allocation107_spill] sm:$0xff] }
 0x3ef   : > { %v12943_v42 = vsel %vm4141_vm5, %v17600_v2, %v17616_v20  ;;  %v12947_v26 = vmul.f32 %v17617_v50, %v17608_v9  ;;  %17619 = vst [vmem:[#allocation262_spill] sm:$0xff] %v12953_v21  ;;  %v17620_v22 = vld [vmem:[#allocation109_spill] sm:$0xff]  ;;  %v3700_v45 = vadd.f32 %v17621_v44, %v3658_v59  ;;  %v3743_v41 = vadd.f32 %v17622_v13, %v3701_v34  ;;  %v17624_v50 = vld [vmem:[#allocation239_spill] sm:$0xff]  ;;  %v17627_v59 = vld [vmem:[#allocation100_spill] sm:$0xff] }
 0x3f0   : > { %17618 = vst [vmem:[#allocation261_spill] sm:$0xff] %v12951_v48  ;;  %v4145_v14 = vsel %vm4141_vm5, %v17616_v20, %v17620_v22  ;;  %v3504_v2 = vadd.f32 %v3493_v52, %v3438_v35  ;;  %v12961_v8 = vrot.slane %v4304_v19, %v7686_v31  ;;  %v12965_v9 = vmul.f32 %v17624_v50, %v17482_v43  ;;  %v17625_v21 = vld [vmem:[#allocation49_spill] sm:$0xff]  ;;  %v17629_v52 = vld [vmem:[#allocation35_spill] sm:$0xff] }
 0x3f1   : > { %v12969_v58 = vmul.f32 %v17505_v60, %v17482_v43  ;;  %v12973_v33 = vrot.slane %v17625_v21, %v7686_v31  ;;  %5550 = vrot.lane.b32.xlu1 %v17627_v59, %s7378_s28  ;;  %v12977_v34 = vpop.permute.xlu1 %4879  ;;  %v12983_v20 = vmul.f32 %v17629_v52, %v17515_v24  ;;  %v12987_v43 = vmul.f32 %v17547_v18, %v17515_v24  ;;  %v17630_v13 = vld [vmem:[#allocation161_spill] sm:$0xff]  ;;  %v17632_v35 = vld [vmem:[#allocation59_spill] sm:$0xff]  ;;  %v17636_v18 = vld [vmem:[#allocation18_spill] sm:$0xff] }
 0x3f2   : > { %17623 = vst [vmem:[#allocation283_spill] sm:$0xff] %v12961_v8  ;;  %17628 = vst [vmem:[#allocation290_spill] sm:$0xff] %v12977_v34  ;;  %v3505_v60 = vadd.f32 %v3494_v40, %v3439_v27  ;;  %6325 = vperm.xlu0 %7141, %v17630_v13   ;;  %v12991_v19 = vrot.slane %v4145_v14, %v7686_v31  ;;  %v12995_v44 = vmul.f32 %v12951_v48, %v17525_v36  ;;  %v13001_v34 = vpop.permute.xlu0 %5483  ;;  %v17635_v21 = vld [vmem:[#allocation213_spill] sm:$0xff]  ;;  %v17640_v8 = vld [vmem:[#allocation114_spill] sm:$0xff] }
 0x3f3   : > { %17626 = vst [vmem:[#allocation284_spill] sm:$0xff] %v12973_v33  ;;  %v12999_v59 = vrot.slane %v17632_v35, %v7686_v31  ;;  %17634 = vst [vmem:[#allocation269_spill] sm:$0xff] %v13001_v34  ;;  %v4146_v24 = vsel %vm4141_vm5, %v17620_v22, %v17635_v21  ;;  %v3742_v40 = vadd.f32 %v17636_v18, %v3700_v45  ;;  %v17638_v35 = vld [vmem:[#allocation113_spill] sm:$0xff]  ;;  %v17645_v18 = vld [vmem:[#allocation75_spill] sm:$0xff] }
 0x3f4   : > { %17631 = vst [vmem:[#allocation267_spill] sm:$0xff] %v12991_v19  ;;  %v3785_v27 = vadd.f32 %v12749_v12, %v3743_v41  ;;  %v3542_v14 = vadd.f32 %v3531_v1, %v3504_v2  ;;  %v4147_v50 = vsel %vm4141_vm5, %v17635_v21, %v17533_v55  ;;  %v13013_v48 = vmul.f32 %v12973_v33, %v17525_v36  ;;  %v17643_v45 = vld [vmem:[#allocation65_spill] sm:$0xff] }
 0x3f5   : > { %17633 = vst [vmem:[#allocation268_spill] sm:$0xff] %v12999_v59  ;;  %v13017_v34 = vrot.slane %v17638_v35, %v7686_v31  ;;  %v13021_v22 = vrot.slane %v17640_v8, %v7686_v31  ;;  %5554 = vrot.lane.b32.xlu1 %v17638_v35, %s7378_s28  ;;  %v13025_v12 = vpop.permute.xlu1 %4883  ;;  %v3543_v55 = vadd.f32 %v3532_v37, %v3505_v60  ;;  %v7388_v21 = vmov 66   ;;  %v17652_v60 = vld [vmem:[#allocation293_spill] sm:$0xff] }
 0x3f6   : > { %17637 = vst [vmem:[#allocation286_spill] sm:$0xff] %v13013_v48  ;;  %17642 = vst [vmem:[#allocation70_spill] sm:$0xff] %v13025_v12  ;;  %v3932_v1 = vadd.f32 %v12805_v6, %v3785_v27  ;;  %v3580_v41 = vadd.f32 %v3569_v54, %v3542_v14  ;;  %v3607_v36 = vmul.f32 %v17581_v53, %v17643_v45  ;;  %7143 = vset.pattern.permute.xlu0 %v7388_v21  ;;  %v17647_v48 = vld [vmem:[#allocation85_spill] sm:$0xff]  ;;  %v17651_v54 = vld [vmem:[#allocation112_spill] sm:$0xff] }
 0x3f7   : > { %17639 = vst [vmem:[#allocation287_spill] sm:$0xff] %v13017_v34  ;;  %17641 = vst [vmem:[#allocation289_spill] sm:$0xff] %v13021_v22  ;;  %v13031_v2 = vrot.slane %v4146_v24, %v7686_v31  ;;  %v13035_v33 = vrot.slane %v17645_v18, %v7686_v31  ;;  %v13039_v56 = vrot.slane %v17647_v48, %v7686_v31  ;;  %v17649_v6 = vld [vmem:[#allocation133_spill] sm:$0xff]  ;;  %6465 = vperm.xlu0 %7143, %v17630_v13   ;;  %v17655_v12 = vld [vmem:[#allocation295_spill] sm:$0xff] }
 0x3f8   : > { %v13043_v37 = vrot.slane %v17649_v6, %v7686_v31  ;;  %v13049_v24 = vsel %vm4141_vm5, %v17652_v60, %v17651_v54  ;;  %v3784_v27 = vadd.f32 %v12738_v30, %v3742_v40  ;;  %v3581_v14 = vadd.f32 %v3570_v25, %v3543_v55  ;;  %v13066_v60 = vpop.permute.xlu0 %5487  ;;  %v17659_v30 = vld [vmem:[#allocation110_spill] sm:$0xff]  ;;  %v17661_v40 = vld [vmem:[#allocation123_spill] sm:$0xff] }
 0x3f9   : > { %17644 = vst [vmem:[#allocation288_spill] sm:$0xff] %v13031_v2  ;;  %17646 = vst [vmem:[#allocation254_spill] sm:$0xff] %v13035_v33  ;;  %v3608_v21 = vmul.f32 %v17584_v62, %v17643_v45  ;;  %v13055_v48 = vrot.slane %v4147_v50, %v7686_v31  ;;  %v13060_v53 = vsel %vm4141_vm5, %v17651_v54, %v17655_v12  ;;  %5558 = vrot.lane.b32.xlu1 %v17659_v30, %s7378_s28  ;;  %v13070_v25 = vpop.permute.xlu1 %4887  ;;  %v17663_v45 = vld [vmem:[#allocation99_spill] sm:$0xff] }
 0x3fa   : > { %17648 = vst [vmem:[#allocation256_spill] sm:$0xff] %v13039_v56  ;;  %17650 = vst [vmem:[#allocation226_spill] sm:$0xff] %v13043_v37  ;;  %v13064_v13 = vmul.f32 %v13021_v22, %v17555_v16  ;;  %v13075_v50 = vsel %vm4141_vm5, %v17655_v12, %v17661_v40  ;;  %v3931_v55 = vadd.f32 %v12784_v39, %v3784_v27  ;;  %v6868_v6 = vld [vmem:[%s9023_s11 + $0x4c] ss:$4 sm:$0x7] }
 0x3fb   : > { %17653 = vst [vmem:[#allocation281_spill] sm:$0xff] %v13049_v24  ;;  %17654 = vst [vmem:[#allocation282_spill] sm:$0xff] %v13055_v48  ;;  %v3982_v54 = vadd.f32 %v17663_v45, %v3932_v1  ;;  %v3618_v62 = vadd.f32 %v3607_v36, %v3580_v41  ;;  %v13092_v12 = vmul.f32 %v13043_v37, %v17580_v29  ;;  %6188 = vrot.lane.b32.xlu0 %v17638_v35, %s7322_s15  ;;  %v17664_v1 = vld [vmem:[#allocation223_spill] sm:$0xff]  ;;  %v7389_v45 = vmov 67   ;;  %v17666_v37 = vld [vmem:[#allocation24_spill] sm:$0xff] }
 0x3fc   : > { %17656 = vst [vmem:[#allocation41_spill] sm:$0xff] %v13060_v53  ;;  %17657 = vst [vmem:[#allocation178_spill] sm:$0xff] %v13064_v13  ;;  %v4151_v41 = vsel %vm4141_vm5, %v17661_v40, %v17664_v1  ;;  %v3619_v27 = vadd.f32 %v3608_v21, %v3581_v14  ;;  %7144 = vset.pattern.permute.xlu0 %v7389_v45  ;;  %v3734_v39 = vmul.f32 %v17539_v49, %v17666_v37  ;;  %v17668_v53 = vld [vmem:[#allocation134_spill] sm:$0xff]  ;;  %v17671_v14 = vld [vmem:[#allocation155_spill] sm:$0xff] }
 0x3fd   : > { %17658 = vst [vmem:[#allocation176_spill] sm:$0xff] %v13066_v60  ;;  %17660 = vst [vmem:[#allocation27_spill] sm:$0xff] %v13070_v25  ;;  %v13084_v60 = vmul.f32 %v13035_v33, %v17555_v16  ;;  %v13088_v25 = vmul.f32 %v13039_v56, %v17580_v29  ;;  %v17665_v16 = vld [vmem:[#allocation126_spill] sm:$0xff]  ;;  %5562 = vrot.lane.b32.xlu1 %v17668_v53, %s7378_s28  ;;  %v13112_v40 = vpop.permute.xlu1 %4891  ;;  %v13115_v24 = vrot.slane %v6868_v6, %v7686_v31  ;;  %v17672_v13 = vld [vmem:[#allocation17_spill] sm:$0xff] }
 0x3fe   : > { %17662 = vst [vmem:[#allocation28_spill] sm:$0xff] %v13075_v50  ;;  %v4152_v36 = vsel %vm4141_vm5, %v17664_v1, %v17665_v16  ;;  %v17667_v56 = vld [vmem:[#allocation58_spill] sm:$0xff]  ;;  %17669 = vst [vmem:[#allocation67_spill] sm:$0xff] %v13112_v40  ;;  %v3981_v21 = vadd.f32 %v17671_v14, %v3931_v55  ;;  %v4032_v1 = vadd.f32 %v12823_v46, %v3982_v54  ;;  %v17675_v40 = vld [vmem:[#allocation220_spill] sm:$0xff] }
 0x3ff   : > { %v3733_v35 = vmul.f32 %v17667_v56, %v17666_v37  ;;  %17670 = vst [vmem:[#allocation125_spill] sm:$0xff] %v13115_v24  ;;  %v3660_v45 = vadd.f32 %v12924_v3, %v3618_v62  ;;  %v13122_v56 = vmul.f32 %v12999_v59, %v17672_v13  ;;  %v13125_v49 = vrot.slane %v4151_v41, %v7686_v31  ;;  %v13138_v3 = vpop.permute.xlu0 %5532  ;;  %v17680_v41 = vld [vmem:[#allocation225_spill] sm:$0xff] }
 0x400   : > { %v13128_v37 = vrot.slane %v4152_v36, %v7686_v31  ;;  %v17676_v6 = vrot.slane %v12878_v15, %v7686_v31  ;;  %v17677_v46 = vrot.slane %v12943_v42, %v7686_v31  ;;  %17678 = vst [vmem:[#allocation219_spill] sm:$0xff] %v13138_v3  ;;  %6192 = vrot.lane.b32.xlu0 %v17659_v30, %s7322_s15 }
 0x401   : > { %17673 = vst [vmem:[#allocation164_spill] sm:$0xff] %v13125_v49  ;;  %v17679_v55 = vrot.slane %v12905_v57, %v7686_v31  ;;  %v4153_v15 = vsel %vm4141_vm5, %v17665_v16, %v17680_v41  ;;  %v3661_v36 = vadd.f32 %v12947_v26, %v3619_v27  ;;  %v3702_v14 = vadd.f32 %v12965_v9, %v3660_v45  ;;  %v13169_v26 = vpop.permute.xlu1 %4895  ;;  %v17682_v9 = vld [vmem:[#allocation233_spill] sm:$0xff]  ;;  %v17683_v16 = vld [vmem:[#allocation120_spill] sm:$0xff] }
 0x402   : > { %17674 = vst [vmem:[#allocation190_spill] sm:$0xff] %v13128_v37  ;;  %v4354_v50 = vmul.f32 %v17676_v6, %v17675_v40  ;;  %v4356_v62 = vmul.f32 %v17677_v46, %v17675_v40  ;;  %v13153_v42 = vmul.f32 %v12991_v19, %v17675_v40  ;;  %v13157_v30 = vmul.f32 %v13031_v2, %v17675_v40  ;;  %v17684_v45 = vld [vmem:[#allocation124_spill] sm:$0xff] }
 0x403   : > { %v4355_v54 = vmul.f32 %v17679_v55, %v17675_v40  ;;  %v13161_v57 = vmul.f32 %v13055_v48, %v17675_v40  ;;  %v13165_v6 = vmul.f32 %v12734_v17, %v17675_v40  ;;  %5566 = vrot.lane.b32.xlu1 %v13115_v24, %s7378_s28  ;;  %17681 = vst [vmem:[#allocation29_spill] sm:$0xff] %v13169_v26  ;;  %v17686_v26 = vld [vmem:[#allocation241_spill] sm:$0xff] }
 0x404   : > { %v13174_v27 = vsel %vm4141_vm5, %v17683_v16, %v17682_v9  ;;  %v13179_v46 = vsel %vm4141_vm5, %v17682_v9, %v17684_v45  ;;  %v4031_v55 = vadd.f32 %v12819_v47, %v3981_v21  ;;  %v3703_v3 = vadd.f32 %v12969_v58, %v3661_v36  ;;  %6196 = vrot.lane.b32.xlu0 %v17668_v53, %s7322_s15  ;;  %v17687_v47 = vld [vmem:[#allocation137_spill] sm:$0xff]  ;;  %v17693_v36 = vld [vmem:[#allocation76_spill] sm:$0xff]  ;;  %v17714_v9 = vld [vmem:[#allocation167_spill] sm:$0xff] }
 0x405   : > { %v13184_v48 = vadd.f32 %v4356_v62, %v12900_v38  ;;  %v13187_v17 = vrot.slane %v4153_v15, %v7686_v31  ;;  %v13192_v16 = vsel %vm4141_vm5, %v17684_v45, %v17686_v26  ;;  %v13195_v2 = vadd.f32 %v12886_v10, %v4032_v1  ;;  %v17695_v15 = vld [vmem:[#allocation218_spill] sm:$0xff]  ;;  %v17702_v10 = vld [vmem:[#allocation116_spill] sm:$0xff]  ;;  %v17717_v1 = vld [vmem:[#allocation61_spill] sm:$0xff] }
 0x406   : > { %v4157_v58 = vsel %vm4141_vm5, %v17686_v26, %v17687_v47  ;;  %v13203_v38 = vadd.f32 %v12882_v32, %v4031_v55  ;;  %v3744_v21 = vadd.f32 %v3733_v35, %v3702_v14  ;;  %v3973_v62 = vmul.f32 %v13017_v34, %v17672_v13  ;;  %v13215_v26 = vpop.permute.xlu0 %5536  ;;  %v13219_v32 = vpop.permute.xlu1 %4899  ;;  %v17692_v35 = vld [vmem:[#allocation221_spill] sm:$0xff]  ;;  %v17788_v34 = vld [vmem:[#allocation63_spill] sm:$0xff] }
 0x407   : > { %17685 = vst [vmem:[#allocation139_spill] sm:$0xff] %v13187_v17  ;;  %17690 = vst [vmem:[#allocation30_spill] sm:$0xff] %v13215_v26  ;;  %5570 = vrot.lane.b32.xlu1 %v17640_v8, %s7378_s28  ;;  %v4158_v14 = vsel %vm4141_vm5, %v17687_v47, %v17692_v35  ;;  %v3745_v55 = vadd.f32 %v3734_v39, %v3703_v3  ;;  %v13229_v45 = vrot.slane %v4157_v58, %v7686_v31 }
 0x408   : > { %17691 = vst [vmem:[#allocation77_spill] sm:$0xff] %v13219_v32  ;;  %v13233_v53 = vmul.f32 %v17695_v15, %v17560_v0  ;;  %v13237_v26 = vmul.f32 %v17695_v15, %v17571_v61  ;;  %v13241_v13 = vmul.f32 %v17695_v15, %v17572_v5  ;;  %6200 = vrot.lane.b32.xlu0 %v13115_v24, %s7322_s15  ;;  %v17716_v32 = vld [vmem:[#allocation185_spill] sm:$0xff] }
 0x409   : > { %17694 = vst [vmem:[#allocation130_spill] sm:$0xff] %v13229_v45  ;;  %v4159_v39 = vsel %vm4141_vm5, %v17692_v35, %v17613_v63  ;;  %v3786_v3 = vadd.f32 %v12983_v20, %v3744_v21  ;;  %v13251_v0 = vmul.f32 %v17695_v15, %v13021_v22  ;;  %v13255_v47 = vmul.f32 %v17695_v15, %v13035_v33  ;;  %v17705_v35 = vld [vmem:[#allocation132_spill] sm:$0xff] }
 0x40a   : > { %17696 = vst [vmem:[#allocation187_spill] sm:$0xff] %v13233_v53  ;;  %17697 = vst [vmem:[#allocation222_spill] sm:$0xff] %v13237_v26  ;;  %v13258_v58 = vrot.slane %v4158_v14, %v7686_v31  ;;  %v13262_v5 = vpop.permute.xlu1 %4903  ;;  %v4074_v63 = vadd.f32 %v12844_v51, %v12799_v28  ;;  %v4075_v20 = vadd.f32 %v12848_v7, %v12801_v11  ;;  %v17706_v33 = vld [vmem:[#allocation224_spill] sm:$0xff]  ;;  %v13282_v51 = vpop.permute.xlu0 %5540  ;;  %v13287_v11 = vld [vmem:[%s15416_s1] sm:$0xff] }
 0x40b   : > { %17698 = vst [vmem:[#allocation195_spill] sm:$0xff] %v13241_v13  ;;  %17699 = vst [vmem:[#allocation89_spill] sm:$0xff] %v13251_v0  ;;  %5574 = vrot.lane.b32.xlu1 %v17702_v10, %s7378_s28  ;;  %v13270_v21 = vrot.slane %v17629_v52, %v7686_v31  ;;  %v4160_v14 = vsel %vm4141_vm5, %v17706_v33, %v17705_v35  ;;  %v3787_v22 = vadd.f32 %v12987_v43, %v3745_v55  ;;  %v17707_v10 = vld [vmem:[#allocation237_spill] sm:$0xff]  ;;  %v17710_v43 = vld [vmem:[#allocation192_spill] sm:$0xff] }
 0x40c   : > { %17700 = vst [vmem:[#allocation96_spill] sm:$0xff] %v13255_v47  ;;  %17701 = vst [vmem:[#allocation122_spill] sm:$0xff] %v13258_v58  ;;  %v3933_v61 = vadd.f32 %v12995_v44, %v3786_v3  ;;  %v3980_v8 = vadd.f32 %v17707_v10, %v12777_v23  ;;  %v13280_v28 = vrot.slane %v4159_v39, %v7686_v31  ;;  %6535 = vperm.xlu0 %7144, %v13287_v11   ;;  %v17711_v23 = vld [vmem:[#allocation78_spill] sm:$0xff]  ;;  %v17712_v10 = vld [vmem:[#allocation157_spill] sm:$0xff] }
 0x40d   : > { %17703 = vst [vmem:[#allocation22_spill] sm:$0xff] %v13262_v5  ;;  %17704 = vst [vmem:[#allocation104_spill] sm:$0xff] %v13270_v21  ;;  %v13290_v33 = vadd.f32 %v4354_v50, %v4074_v63  ;;  %v13292_v7 = vadd.f32 %v4355_v54, %v4075_v20  ;;  %v4077_v44 = vadd.f32 %v17710_v43, %v12809_v4  ;;  %v17713_v39 = vld [vmem:[#allocation286_spill] sm:$0xff]  ;;  %v17718_v63 = vld [vmem:[#allocation156_spill] sm:$0xff] }
 0x40e   : > { %17708 = vst [vmem:[#allocation71_spill] sm:$0xff] %v13280_v28  ;;  %17709 = vst [vmem:[#allocation54_spill] sm:$0xff] %v13282_v51  ;;  %v4266_v55 = vsel %vm4141_vm5, %v17712_v10, %v17711_v23  ;;  %v3934_v3 = vadd.f32 %v17713_v39, %v3787_v22  ;;  %v17715_v51 = vld [vmem:[#allocation147_spill] sm:$0xff]  ;;  %v4079_v19 = vadd.f32 %v17717_v1, %v17716_v32  ;;  %v17719_v20 = vld [vmem:[#allocation88_spill] sm:$0xff]  ;;  %v13313_v22 = vpop.permute.xlu1 %4907 }
 0x40f   : > { %v4078_v5 = vadd.f32 %v17715_v51, %v17714_v9  ;;  %v4523_v50 = vrot.slane %v4160_v14, %v7686_v31  ;;  %v4267_v54 = vsel %vm4141_vm5, %v17711_v23, %v17718_v63  ;;  %v4268_v4 = vsel %vm4141_vm5, %v17718_v63, %v17719_v20  ;;  %v17720_v43 = vld [vmem:[#allocation15_spill] sm:$0xff]  ;;  %17721 = vst [vmem:[#allocation277_spill] sm:$0xff] %v13313_v22  ;;  %v17723_v32 = vld [vmem:[#allocation146_spill] sm:$0xff]  ;;  %v17726_v22 = vld [vmem:[#allocation13_spill] sm:$0xff] }
 0x410   : > { %5578 = vrot.lane.b32.xlu1 %v17720_v43, %s7378_s28  ;;  %v4069_v9 = vmul.f32 %v13270_v21, %v17580_v29  ;;  %v17722_v51 = vld [vmem:[#allocation231_spill] sm:$0xff]  ;;  %v3983_v23 = vadd.f32 %v13122_v56, %v3933_v61  ;;  %v17725_v63 = vld [vmem:[#allocation234_spill] sm:$0xff]  ;;  %v13332_v47 = vrot.slane %v4266_v55, %v7686_v31  ;;  %6208 = vrot.lane.b32.xlu0 %v17645_v18, %s7322_s15 }
 0x411   : > { %v4161_v1 = vsel %vm4141_vm5, %v17705_v35, %v17722_v51  ;;  %v4162_v14 = vsel %vm4141_vm5, %v17722_v51, %v17723_v32  ;;  %v17724_v10 = vld [vmem:[#allocation131_spill] sm:$0xff]  ;;  %v4163_v52 = vsel %vm4141_vm5, %v17723_v32, %v17725_v63  ;;  %v4164_v29 = vsel %vm4141_vm5, %v17725_v63, %v17726_v22  ;;  %v17728_v35 = vld [vmem:[#allocation177_spill] sm:$0xff]  ;;  %v17729_v61 = vld [vmem:[#allocation62_spill] sm:$0xff]  ;;  %v13350_v63 = vpop.permute.xlu0 %5544 }
 0x412   : > { %v4030_v39 = vadd.f32 %v17724_v10, %v3980_v8  ;;  %17727 = vst [vmem:[#allocation236_spill] sm:$0xff] %v13332_v47  ;;  %v4269_v0 = vsel %vm4141_vm5, %v17719_v20, %v17728_v35  ;;  %v4165_v8 = vsel %vm4141_vm5, %v17726_v22, %v17729_v61  ;;  %v13343_v56 = vrot.slane %v4267_v54, %v7686_v31  ;;  %v17733_v20 = vld [vmem:[#allocation206_spill] sm:$0xff]  ;;  %v13354_v18 = vpop.permute.xlu1 %4911  ;;  %v17787_v13 = vld [vmem:[#allocation255_spill] sm:$0xff] }
 0x413   : > { %v3984_v51 = vadd.f32 %v3973_v62, %v3934_v3  ;;  %v13346_v32 = vrot.slane %v4268_v4, %v7686_v31  ;;  %v4527_v55 = vrot.slane %v4161_v1, %v7686_v31  ;;  %v4531_v10 = vrot.slane %v4162_v14, %v7686_v31  ;;  %17732 = vst [vmem:[#allocation279_spill] sm:$0xff] %v13350_v63  ;;  %v17783_v53 = vld [vmem:[#allocation98_spill] sm:$0xff] }
 0x414   : > { %17730 = vst [vmem:[#allocation91_spill] sm:$0xff] %v13343_v56  ;;  %5582 = vrot.lane.b32.xlu1 %v17733_v20, %s7378_s28  ;;  %17734 = vst [vmem:[#allocation39_spill] sm:$0xff] %v13354_v18  ;;  %v13357_v22 = vadd.f32 %v13153_v42, %v4077_v44  ;;  %v13360_v54 = vadd.f32 %v13157_v30, %v4078_v5  ;;  %v13363_v62 = vrot.slane %v4163_v52, %v7686_v31  ;;  %v17739_v5 = vld [vmem:[#allocation178_spill] sm:$0xff]  ;;  %v17740_v52 = vld [vmem:[#allocation80_spill] sm:$0xff] }
 0x415   : > { %17731 = vst [vmem:[#allocation278_spill] sm:$0xff] %v13346_v32  ;;  %v13366_v3 = vrot.slane %v4164_v29, %v7686_v31  ;;  %v13369_v4 = vrot.slane %v4269_v0, %v7686_v31  ;;  %v13372_v1 = vadd.f32 %v13161_v57, %v4079_v19  ;;  %v13375_v14 = vrot.slane %v4165_v8, %v7686_v31  ;;  %v17741_v29 = vld [vmem:[#allocation210_spill] sm:$0xff] }
 0x416   : > { %17735 = vst [vmem:[#allocation270_spill] sm:$0xff] %v13363_v62  ;;  %v4361_v42 = vmul.f32 %v13332_v47, %v17675_v40  ;;  %v4033_v30 = vadd.f32 %v17739_v5, %v3983_v23  ;;  %6212 = vrot.lane.b32.xlu0 %v17740_v52, %s7322_s15  ;;  %v4080_v44 = vadd.f32 %v4069_v9, %v4030_v39  ;;  %v17742_v9 = vld [vmem:[#allocation48_spill] sm:$0xff]  ;;  %v17781_v47 = vld [vmem:[#allocation274_spill] sm:$0xff] }
 0x417   : > { %17736 = vst [vmem:[#allocation275_spill] sm:$0xff] %v13366_v3  ;;  %17737 = vst [vmem:[#allocation33_spill] sm:$0xff] %v13369_v4  ;;  %v13383_v20 = vmul.f32 %v4523_v50, %v17741_v29  ;;  %v4362_v0 = vmul.f32 %v13343_v56, %v17675_v40  ;;  %v4034_v19 = vadd.f32 %v13084_v60, %v3984_v51  ;;  %v13399_v50 = vpop.permute.xlu1 %4972  ;;  %v17778_v56 = vld [vmem:[#allocation296_spill] sm:$0xff]  ;;  %v17792_v26 = vld [vmem:[#allocation258_spill] sm:$0xff] }
 0x418   : > { %17738 = vst [vmem:[#allocation115_spill] sm:$0xff] %v13375_v14  ;;  %v4363_v57 = vmul.f32 %v13346_v32, %v17675_v40  ;;  %v13391_v8 = vmul.f32 %v4527_v55, %v17741_v29  ;;  %v13394_v23 = vmul.f32 %v4531_v10, %v17741_v29  ;;  %v4083_v5 = vadd.f32 %v13088_v25, %v4033_v30  ;;  %v17746_v30 = vld [vmem:[#allocation183_spill] sm:$0xff] }
 0x419   : > { %5586 = vrot.lane.b32.xlu1 %v17742_v9, %s7378_s28  ;;  %17743 = vst [vmem:[#allocation34_spill] sm:$0xff] %v13399_v50  ;;  %v13402_v39 = vadd.f32 %v13165_v6, %v4080_v44  ;;  %v13406_v60 = vmul.f32 %v13363_v62, %v17741_v29  ;;  %v13410_v51 = vmul.f32 %v13366_v3, %v17741_v29  ;;  %v17747_v44 = vld [vmem:[#allocation144_spill] sm:$0xff]  ;;  %v17755_v62 = vld [vmem:[#allocation182_spill] sm:$0xff] }
 0x41a   : > { %v4084_v55 = vadd.f32 %v13092_v12, %v4034_v19  ;;  %v4364_v25 = vmul.f32 %v13369_v4, %v17675_v40  ;;  %v13417_v10 = vmul.f32 %v13375_v14, %v17741_v29  ;;  %v13420_v6 = vadd.f32 %v4361_v42, %v13203_v38  ;;  %v13428_v12 = vpop.permute.xlu0 %5548  ;;  %v17749_v40 = vld [vmem:[#allocation55_spill] sm:$0xff]  ;;  %v17751_v38 = vld [vmem:[#allocation92_spill] sm:$0xff] }
 0x41b   : > { %v4270_v63 = vsel %vm4141_vm5, %v17747_v44, %v17746_v30  ;;  %v4303_v18 = vsel %vm4141_vm5, %v17680_v41, %v17747_v44  ;;  %17748 = vst [vmem:[#allocation201_spill] sm:$0xff] %v13428_v12  ;;  %6216 = vrot.lane.b32.xlu0 %v17749_v40, %s7322_s15  ;;  %v13433_v19 = vadd.f32 %v4362_v0, %v13195_v2  ;;  %v17752_v14 = vld [vmem:[#allocation188_spill] sm:$0xff]  ;;  %v17753_v41 = vld [vmem:[#allocation235_spill] sm:$0xff]  ;;  %v17754_v12 = vld [vmem:[#allocation238_spill] sm:$0xff] }
 0x41c   : > { %17744 = vst [vmem:[#allocation83_spill] sm:$0xff] %v13417_v10  ;;  %17745 = vst [vmem:[#allocation140_spill] sm:$0xff] %v13420_v6  ;;  %v13435_v50 = vadd.f32 %v4363_v57, %v4083_v5  ;;  %v4271_v42 = vsel %vm4141_vm5, %v17746_v30, %v17751_v38  ;;  %v4272_v3 = vsel %vm4141_vm5, %v17751_v38, %v17752_v14  ;;  %v17756_v2 = vld [vmem:[#allocation133_spill] sm:$0xff] }
 0x41d   : > { %17750 = vst [vmem:[#allocation232_spill] sm:$0xff] %v13433_v19  ;;  %v4273_v44 = vsel %vm4141_vm5, %v17752_v14, %v17753_v41  ;;  %v4274_v40 = vsel %vm4141_vm5, %v17755_v62, %v17754_v12  ;;  %5590 = vrot.lane.b32.xlu1 %v17756_v2, %s7378_s28  ;;  %v13453_v0 = vrot.slane %v17740_v52, %v7686_v31  ;;  %v17761_v38 = vld [vmem:[#allocation205_spill] sm:$0xff]  ;;  %v13468_v41 = vpop.permute.xlu1 %5112 }
 0x41e   : > { %v13457_v57 = vrot.slane %v17720_v43, %v7686_v31  ;;  %v4375_v5 = vadd.f32 %v4364_v25, %v4084_v55  ;;  %v13460_v30 = vrot.slane %v4303_v18, %v7686_v31  ;;  %v13463_v14 = vrot.slane %v4270_v63, %v7686_v31  ;;  %17762 = vst [vmem:[#allocation207_spill] sm:$0xff] %v13468_v41  ;;  %v17765_v43 = vld [vmem:[#allocation159_spill] sm:$0xff] }
 0x41f   : > { %17757 = vst [vmem:[#allocation44_spill] sm:$0xff] %v13453_v0  ;;  %v4275_v62 = vsel %vm4141_vm5, %v17754_v12, %v17761_v38  ;;  %v13471_v52 = vrot.slane %v4271_v42, %v7686_v31  ;;  %v13474_v4 = vrot.slane %v4272_v3, %v7686_v31  ;;  %v4305_v18 = vsel %vm4141_vm5, %v17729_v61, %v17765_v43  ;;  %v17768_v12 = vld [vmem:[#allocation105_spill] sm:$0xff]  ;;  %v17769_v42 = vld [vmem:[#allocation294_spill] sm:$0xff]  ;;  %v17771_v63 = vld [vmem:[#allocation215_spill] sm:$0xff] }
 0x420   : > { %17758 = vst [vmem:[#allocation204_spill] sm:$0xff] %v13457_v57  ;;  %17759 = vst [vmem:[#allocation52_spill] sm:$0xff] %v13460_v30  ;;  %6220 = vrot.lane.b32.xlu0 %v17693_v36, %s7322_s15  ;;  %v13484_v55 = vrot.slane %v4273_v44, %v7686_v31  ;;  %v13487_v25 = vrot.slane %v4274_v40, %v7686_v31  ;;  %v4276_v3 = vsel %vm4141_vm5, %v17761_v38, %v17768_v12  ;;  %v13501_v44 = vpop.permute.xlu0 %5552  ;;  %v17773_v40 = vld [vmem:[#allocation127_spill] sm:$0xff] }
 0x421   : > { %17760 = vst [vmem:[#allocation168_spill] sm:$0xff] %v13463_v14  ;;  %17763 = vst [vmem:[#allocation106_spill] sm:$0xff] %v13471_v52  ;;  %v4278_v61 = vsel %vm4141_vm5, %v17765_v43, %v17769_v42  ;;  %v13496_v41 = vrot.slane %v4275_v62, %v7686_v31  ;;  %v4277_v36 = vsel %vm4141_vm5, %v17768_v12, %v17771_v63  ;;  %5594 = vrot.lane.b32.xlu1 %v17773_v40, %s7378_s28  ;;  %v13521_v12 = vld [vmem:[%s9023_s11 + $0xa4] ss:$4 sm:$0x7]  ;;  %v13540_v35 = vpop.permute.xlu1 %5182 }
 0x422   : > { %17764 = vst [vmem:[#allocation197_spill] sm:$0xff] %v13474_v4  ;;  %17766 = vst [vmem:[#allocation26_spill] sm:$0xff] %v13484_v55  ;;  %v13507_v24 = vmul.f32 %v13453_v0, %v17695_v15  ;;  %v13511_v38 = vmul.f32 %v13457_v57, %v17695_v15  ;;  %v13514_v43 = vrot.slane %v4305_v18, %v7686_v31 }
 0x423   : > { %17767 = vst [vmem:[#allocation250_spill] sm:$0xff] %v13487_v25  ;;  %17770 = vst [vmem:[#allocation276_spill] sm:$0xff] %v13496_v41  ;;  %v13518_v62 = vrot.slane %v17773_v40, %v7686_v31  ;;  %v13529_v0 = vmul.f32 %v17695_v15, %v17778_v56  ;;  %v13532_v57 = vrot.slane %v4276_v3, %v7686_v31  ;;  %v17786_v3 = vld [vmem:[#allocation297_spill] sm:$0xff] }
 0x424   : > { %17772 = vst [vmem:[#allocation252_spill] sm:$0xff] %v13501_v44  ;;  %17774 = vst [vmem:[#allocation248_spill] sm:$0xff] %v13514_v43  ;;  %v17777_v44 = vld [vmem:[#allocation142_spill] sm:$0xff]  ;;  %v13535_v18 = vrot.slane %v4278_v61, %v7686_v31  ;;  %v4279_v63 = vsel %vm4141_vm5, %v17769_v42, %v17781_v47  ;;  %6224 = vrot.lane.b32.xlu0 %v17742_v9, %s7322_s15  ;;  %v13549_v56 = vrot.slane %v4277_v36, %v7686_v31  ;;  %v17793_v36 = vld [vmem:[#allocation28_spill] sm:$0xff] }
 0x425   : > { %17775 = vst [vmem:[#allocation46_spill] sm:$0xff] %v13518_v62  ;;  %17776 = vst [vmem:[#allocation242_spill] sm:$0xff] %v13521_v12  ;;  %v13525_v32 = vmul.f32 %v17695_v15, %v17777_v44  ;;  %v13544_v44 = vrot.slane %v17783_v53, %v7686_v31  ;;  %v4280_v61 = vsel %vm4141_vm5, %v17781_v47, %v17786_v3  ;;  %v17791_v53 = vld [vmem:[#allocation158_spill] sm:$0xff]  ;;  %v17795_v47 = vld [vmem:[#allocation189_spill] sm:$0xff]  ;;  %v13604_v6 = vpop.permute.xlu1 %5269 }
 0x426   : > { %17779 = vst [vmem:[#allocation95_spill] sm:$0xff] %v13532_v57  ;;  %17780 = vst [vmem:[#allocation271_spill] sm:$0xff] %v13535_v18  ;;  %v13557_v42 = vsel %vm4806_vm6, %v17788_v34, %v17787_v13  ;;  %v4281_v9 = vsel %vm4141_vm5, %v17786_v3, %v17791_v53  ;;  %v17794_v10 = vrot.slane %v17793_v36, %v7686_v31  ;;  %5598 = vrot.lane.b32.xlu1 %v17795_v47, %s7378_s28  ;;  %v17798_v36 = vld [vmem:[#allocation216_spill] sm:$0xff] }
 0x427   : > { %17782 = vst [vmem:[#allocation16_spill] sm:$0xff] %v13540_v35  ;;  %17784 = vst [vmem:[#allocation272_spill] sm:$0xff] %v13544_v44  ;;  %v17789_v35 = vld [vmem:[#allocation103_spill] sm:$0xff]  ;;  %v4433_v13 = vmul.f32 %v13474_v4, %v17792_v26  ;;  %v13576_v34 = vrot.slane %v13521_v12, %v7686_v31  ;;  %v13583_v3 = vrot.slane %v4279_v63, %v7686_v31 }
 0x428   : > { %17785 = vst [vmem:[#allocation253_spill] sm:$0xff] %v13549_v56  ;;  %v13561_v59 = vmul.f32 %v17695_v15, %v17789_v35  ;;  %v4426_v19 = vmul.f32 %v17794_v10, %v17792_v26  ;;  %v13580_v35 = vmul.f32 %v13514_v43, %v17741_v29  ;;  %v4434_v10 = vmul.f32 %v13484_v55, %v17792_v26 }
 0x429   : > { %17796 = vst [vmem:[#allocation162_spill] sm:$0xff] %v13576_v34  ;;  %v13589_v53 = vmul.f32 %v17798_v36, %v17695_v15  ;;  %v13593_v4 = vmul.f32 %v13535_v18, %v17741_v29  ;;  %v13596_v12 = vrot.slane %v4280_v61, %v7686_v31  ;;  %v17800_v43 = vrot.slane %v13192_v16, %v7686_v31 }
 0x42a   : > { %17790 = vst [vmem:[#allocation57_spill] sm:$0xff] %v13561_v59  ;;  %17797 = vst [vmem:[#allocation20_spill] sm:$0xff] %v13580_v35  ;;  %v17799_v59 = vld [vmem:[#allocation25_spill] sm:$0xff]  ;;  %v13602_v35 = vpop.permute.xlu0 %5556  ;;  %6228 = vrot.lane.b32.xlu0 %v17756_v2, %s7322_s15  ;;  %v13613_v61 = vrot.slane %v4281_v9, %v7686_v31  ;;  %5602 = vrot.lane.b32.xlu1 %v13576_v34, %s7378_s28  ;;  %v13633_v18 = vmul.f32 %v13583_v3, %v17741_v29  ;;  %s6627_s28 = scalar_lea.sflag [#allocation5], %s200_s29 }
 0x42b   : > { %v4496_v63 = vmul.f32 %v17800_v43, %v17799_v59  ;;  %17801 = vst [vmem:[#allocation47_spill] sm:$0xff] %v13602_v35  ;;  %17802 = vst [vmem:[#allocation94_spill] sm:$0xff] %v13604_v6  ;;  %v4503_v15 = vmul.f32 %v13532_v57, %v17799_v59  ;;  %v4504_v16 = vmul.f32 %v13549_v56, %v17799_v59  ;;  %v17803_v43 = vld [vmem:[#allocation281_spill] sm:$0xff] }
 0x42c   : > { %v17804_v35 = vrot.slane %v17803_v43, %v7686_v31  ;;  %v4437_v6 = vadd.f32 %v4426_v19, %v13184_v48  ;;  %v4444_v57 = vadd.f32 %v4433_v13, %v13435_v50  ;;  %v17805_v2 = vld [vmem:[#allocation41_spill] sm:$0xff]  ;;  %v4427_v56 = vmul.f32 %v13125_v49, %v17792_v26 }
 0x42d   : > { %v17806_v9 = vrot.slane %v17805_v2, %v7686_v31  ;;  %v17807_v48 = vrot.slane %v13174_v27, %v7686_v31  ;;  %v4428_v50 = vmul.f32 %v13128_v37, %v17792_v26  ;;  %v13641_v2 = vpop.permute.xlu1 %5273  ;;  %v4573_v27 = vmul.f32 %v13596_v12, %v17741_v29 }
 0x42e   : > { %v4424_v55 = vmul.f32 %v17804_v35, %v17792_v26  ;;  %v4445_v35 = vadd.f32 %v4434_v10, %v4375_v5  ;;  %v4507_v19 = vadd.f32 %v4496_v63, %v4437_v6  ;;  %v4514_v43 = vadd.f32 %v4503_v15, %v4444_v57  ;;  %17808 = vst [vmem:[#allocation19_spill] sm:$0xff] %v13641_v2  ;;  %v13656_v63 = vpop.permute.xlu0 %5560  ;;  %v17942_v2 = vld [vmem:[#allocation275_spill] sm:$0xff] }
 0x42f   : > { %v4425_v36 = vmul.f32 %v17806_v9, %v17792_v26  ;;  %v4494_v13 = vmul.f32 %v17807_v48, %v17799_v59  ;;  %v17809_v9 = vrot.slane %v13179_v46, %v7686_v31  ;;  %v4430_v5 = vmul.f32 %v13460_v30, %v17792_v26  ;;  %6232 = vrot.lane.b32.xlu0 %v17773_v40, %s7322_s15 }
 0x430   : > { %v4574_v6 = vmul.f32 %v13613_v61, %v17741_v29  ;;  %v4515_v57 = vadd.f32 %v4504_v16, %v4445_v35  ;;  %v4435_v10 = vadd.f32 %v4424_v55, %v13290_v33  ;;  %17810 = vst [vmem:[#allocation93_spill] sm:$0xff] %v13656_v63  ;;  %5747 = vperm.xlu1 %7134, %v13287_v11  }
 0x431   : > { %v4495_v49 = vmul.f32 %v17809_v9, %v17799_v59  ;;  %v4436_v46 = vadd.f32 %v4425_v36, %v13292_v7  ;;  %v4438_v15 = vadd.f32 %v4427_v56, %v13357_v22  ;;  %v4497_v40 = vmul.f32 %v13229_v45, %v17799_v59  ;;  %v13669_v35 = vpop.permute.xlu1 %5277  ;;  %v17812_v56 = vld [vmem:[#allocation64_spill] sm:$0xff]  ;;  %v17813_v36 = vld [vmem:[#allocation31_spill] sm:$0xff] }
 0x432   : > { %v4498_v48 = vmul.f32 %v13258_v58, %v17799_v59  ;;  %v4505_v9 = vadd.f32 %v4494_v13, %v4435_v10  ;;  %v4439_v29 = vadd.f32 %v4428_v50, %v13360_v54  ;;  %v4429_v33 = vmul.f32 %v13187_v17, %v17792_v26  ;;  %17811 = vst [vmem:[#allocation280_spill] sm:$0xff] %v13669_v35  ;;  %v17814_v54 = vld [vmem:[#allocation172_spill] sm:$0xff]  ;;  %v17815_v10 = vld [vmem:[#allocation243_spill] sm:$0xff] }
 0x433   : > { %v4577_v55 = vadd.f32 %v13394_v23, %v4507_v19  ;;  %v4584_v16 = vadd.f32 %v4573_v27, %v4514_v43  ;;  %v4506_v7 = vadd.f32 %v4495_v49, %v4436_v46  ;;  %v13672_v22 = vadd.f32 %v4430_v5, %v13402_v39  ;;  %6236 = vrot.lane.b32.xlu0 %v17795_v47, %s7322_s15  ;;  %v17816_v27 = vld [vmem:[#allocation199_spill] sm:$0xff]  ;;  %v17817_v46 = vld [vmem:[#allocation212_spill] sm:$0xff] }
 0x434   : > { %v4632_v13 = vmul.f32 %v17813_v36, %v17812_v56  ;;  %v4639_v50 = vmul.f32 %v17814_v54, %v17813_v36  ;;  %v4640_v63 = vmul.f32 %v17815_v10, %v17813_v36  ;;  %v4585_v23 = vadd.f32 %v4574_v6, %v4515_v57  ;;  %v17818_v54 = vld [vmem:[#allocation171_spill] sm:$0xff]  ;;  %v17819_v6 = vld [vmem:[#allocation129_spill] sm:$0xff] }
 0x435   : > { %v7390_v19 = vmov 58   ;;  %v4508_v43 = vadd.f32 %v4497_v40, %v4438_v15  ;;  %v4509_v49 = vadd.f32 %v4498_v48, %v4439_v29  ;;  %v13684_v39 = vmul.f32 %v13463_v14, %v17792_v26  ;;  %v13698_v40 = vpop.permute.xlu0 %5564  ;;  %v13700_v48 = vpop.permute.xlu1 %5281  ;;  %v17822_v29 = vld [vmem:[#allocation184_spill] sm:$0xff]  ;;  %v17825_v58 = vld [vmem:[#allocation79_spill] sm:$0xff] }
 0x436   : > { %7135 = vset.pattern.permute.xlu1 %v7390_v19  ;;  %v13688_v5 = vmul.f32 %v13471_v52, %v17792_v26  ;;  %v4677_v56 = vmul.f32 %v17817_v46, %v17816_v27  ;;  %v4678_v47 = vmul.f32 %v17818_v54, %v17816_v27  ;;  %v4630_v57 = vmul.f32 %v17813_v36, %v17819_v6  ;;  %v17823_v46 = vld [vmem:[#allocation203_spill] sm:$0xff]  ;;  %v17918_v14 = vld [vmem:[#allocation236_spill] sm:$0xff] }
 0x437   : > { %5817 = vperm.xlu1 %7135, %v13287_v11   ;;  %v4575_v15 = vadd.f32 %v13383_v20, %v4505_v9  ;;  %17820 = vst [vmem:[#allocation32_spill] sm:$0xff] %v13698_v40  ;;  %17821 = vst [vmem:[#allocation273_spill] sm:$0xff] %v13700_v48  ;;  %v4631_v26 = vmul.f32 %v17813_v36, %v17822_v29  ;;  %v4576_v19 = vadd.f32 %v13391_v8, %v4506_v7  ;;  %v17824_v9 = vld [vmem:[#allocation111_spill] sm:$0xff]  ;;  %v17826_v29 = vld [vmem:[#allocation145_spill] sm:$0xff]  ;;  %v7391_v52 = vmov 60  }
 0x438   : > { %v4440_v10 = vadd.f32 %v4429_v33, %v13372_v1  ;;  %6240 = vrot.lane.b32.xlu0 %v13576_v34, %s7322_s15  ;;  %v4643_v54 = vadd.f32 %v4632_v13, %v4577_v55  ;;  %v4670_v6 = vmul.f32 %v17816_v27, %v17823_v46  ;;  %v4650_v17 = vadd.f32 %v4639_v50, %v4584_v16  ;;  %v17827_v13 = vld [vmem:[#allocation264_spill] sm:$0xff]  ;;  %v17932_v35 = vld [vmem:[#allocation191_spill] sm:$0xff] }
 0x439   : > { %v4651_v20 = vadd.f32 %v4640_v63, %v4585_v23  ;;  %v4668_v40 = vmul.f32 %v17816_v27, %v17824_v9  ;;  %v4669_v45 = vmul.f32 %v17816_v27, %v17825_v58  ;;  %v4633_v8 = vmul.f32 %v17813_v36, %v17826_v29  ;;  %v13722_v50 = vpop.permute.xlu1 %5285  ;;  %v17829_v23 = vld [vmem:[#allocation153_spill] sm:$0xff]  ;;  %v17833_v63 = vld [vmem:[#allocation198_spill] sm:$0xff]  ;;  %v17930_v48 = vld [vmem:[#allocation260_spill] sm:$0xff] }
 0x43a   : > { %v4578_v1 = vadd.f32 %v13406_v60, %v4508_v43  ;;  %v4688_v33 = vadd.f32 %v4677_v56, %v4650_v17  ;;  %v4641_v55 = vadd.f32 %v4630_v57, %v4575_v15  ;;  %v4634_v16 = vmul.f32 %v17813_v36, %v17827_v13  ;;  %17828 = vst [vmem:[#allocation66_spill] sm:$0xff] %v13722_v50  ;;  %v13736_v57 = vpop.permute.xlu0 %5568  ;;  %v17938_v50 = vld [vmem:[#allocation179_spill] sm:$0xff] }
 0x43b   : > { %v4689_v7 = vadd.f32 %v4678_v47, %v4651_v20  ;;  %7137 = vset.pattern.permute.xlu1 %v7391_v52  ;;  %v4642_v58 = vadd.f32 %v4631_v26, %v4576_v19  ;;  %v4671_v46 = vmul.f32 %v17816_v27, %v17829_v23  ;;  %v4579_v17 = vadd.f32 %v13410_v51, %v4509_v49  ;;  %v17830_v52 = vld [vmem:[#allocation228_spill] sm:$0xff]  ;;  %v17831_v47 = vld [vmem:[#allocation214_spill] sm:$0xff]  ;;  %v17832_v19 = vld [vmem:[#allocation283_spill] sm:$0xff] }
 0x43c   : > { %5969 = vperm.xlu1 %7137, %v13287_v11   ;;  %v13727_v60 = vadd.f32 %v4670_v6, %v4643_v54  ;;  %v13732_v43 = vsel %vm4806_vm6, %v17831_v47, %v17830_v52  ;;  %v4499_v56 = vmul.f32 %v13280_v28, %v17799_v59  ;;  %v4679_v15 = vadd.f32 %v4668_v40, %v4641_v55  ;;  %v17834_v23 = vld [vmem:[#allocation208_spill] sm:$0xff] }
 0x43d   : > { %v4680_v20 = vadd.f32 %v4669_v45, %v4642_v58  ;;  %v4644_v26 = vadd.f32 %v4633_v8, %v4578_v1  ;;  %v4500_v9 = vmul.f32 %v17832_v19, %v17799_v59  ;;  %v4753_v51 = vmul.f32 %v13518_v62, %v17833_v63  ;;  %v13752_v8 = vpop.permute.xlu1 %5289  ;;  %v17836_v1 = vld [vmem:[#allocation265_spill] sm:$0xff] }
 0x43e   : > { %v4754_v54 = vmul.f32 %v13544_v44, %v17833_v63  ;;  %v4726_v49 = vadd.f32 %v13507_v24, %v4688_v33  ;;  %v4727_v6 = vadd.f32 %v13511_v38, %v4689_v7  ;;  %v13748_v29 = vmul.f32 %v17833_v63, %v17834_v23  ;;  %17835 = vst [vmem:[#allocation173_spill] sm:$0xff] %v13752_v8  ;;  %v17837_v24 = vld [vmem:[#allocation117_spill] sm:$0xff]  ;;  %v17838_v33 = vld [vmem:[#allocation150_spill] sm:$0xff] }
 0x43f   : > { %v7392_v40 = vmov 61   ;;  %v4672_v55 = vmul.f32 %v17816_v27, %v17836_v1  ;;  %v4645_v58 = vadd.f32 %v4634_v16, %v4579_v17  ;;  %v4744_v38 = vmul.f32 %v17833_v63, %v17837_v24  ;;  %v13772_v1 = vpop.permute.xlu0 %5572 }
 0x440   : > { %7138 = vset.pattern.permute.xlu1 %v7392_v40  ;;  %v4745_v7 = vmul.f32 %v17833_v63, %v17838_v33  ;;  %v4682_v23 = vadd.f32 %v4671_v46, %v4644_v26  ;;  %v4510_v34 = vadd.f32 %v4499_v56, %v4440_v10  ;;  %v4511_v45 = vadd.f32 %v4500_v9, %v13672_v22  ;;  %v17841_v56 = vld [vmem:[#allocation140_spill] sm:$0xff]  ;;  %v17847_v33 = vld [vmem:[#allocation83_spill] sm:$0xff] }
 0x441   : > { %6007 = vperm.xlu1 %7138, %v13287_v11   ;;  %v4501_v40 = vmul.f32 %v13487_v25, %v17799_v59  ;;  %v4502_v44 = vmul.f32 %v13496_v41, %v17799_v59  ;;  %v13766_v62 = vadd.f32 %v4753_v51, %v4726_v49  ;;  %v13768_v16 = vadd.f32 %v4754_v54, %v4727_v6  ;;  %v13774_v46 = vpop.permute.xlu1 %5354  ;;  %v17842_v59 = vld [vmem:[#allocation232_spill] sm:$0xff]  ;;  %v17843_v51 = vld [vmem:[#allocation246_spill] sm:$0xff]  ;;  %v17846_v49 = vld [vmem:[#allocation69_spill] sm:$0xff] }
 0x442   : > { %v4717_v17 = vadd.f32 %v13525_v32, %v4679_v15  ;;  %v4718_v24 = vadd.f32 %v13529_v0, %v4680_v20  ;;  %17839 = vst [vmem:[#allocation73_spill] sm:$0xff] %v13772_v1  ;;  %17840 = vst [vmem:[#allocation43_spill] sm:$0xff] %v13774_v46  ;;  %v4747_v22 = vmul.f32 %v17833_v63, %v13270_v21  ;;  %v17844_v54 = vld [vmem:[#allocation84_spill] sm:$0xff]  ;;  %v7393_v0 = vmov 63   ;;  %v17845_v15 = vld [vmem:[#allocation57_spill] sm:$0xff] }
 0x443   : > { %v4683_v10 = vadd.f32 %v4672_v55, %v4645_v58  ;;  %v4442_v26 = vadd.f32 %v13684_v39, %v17841_v56  ;;  %v4443_v9 = vadd.f32 %v13688_v5, %v17842_v59  ;;  %v13785_v32 = vsel %vm4806_vm6, %v17844_v54, %v17843_v51  ;;  %v17848_v39 = vld [vmem:[#allocation261_spill] sm:$0xff]  ;;  %v17849_v5 = vld [vmem:[#allocation20_spill] sm:$0xff]  ;;  %v17923_v46 = vld [vmem:[#allocation278_spill] sm:$0xff] }
 0x444   : > { %v4720_v20 = vadd.f32 %v17845_v15, %v4682_v23  ;;  %v4635_v6 = vmul.f32 %v17813_v36, %v17846_v49  ;;  %v4580_v55 = vadd.f32 %v17847_v33, %v4510_v34  ;;  %v4636_v58 = vmul.f32 %v17813_v36, %v17848_v39  ;;  %v17851_v15 = vld [vmem:[#allocation266_spill] sm:$0xff]  ;;  %v17853_v39 = vld [vmem:[#allocation268_spill] sm:$0xff] }
 0x445   : > { %7140 = vset.pattern.permute.xlu1 %v7393_v0  ;;  %v4581_v56 = vadd.f32 %v17849_v5, %v4511_v45  ;;  %v4512_v59 = vadd.f32 %v4501_v40, %v4442_v26  ;;  %v4513_v21 = vadd.f32 %v4502_v44, %v4443_v9  ;;  %v13795_v54 = vadd.f32 %v4744_v38, %v4717_v17  ;;  %v17850_v0 = vld [vmem:[#allocation12_spill] sm:$0xff]  ;;  %v17852_v33 = vld [vmem:[#allocation222_spill] sm:$0xff]  ;;  %v17854_v40 = vld [vmem:[#allocation209_spill] sm:$0xff]  ;;  %v13813_v38 = vpop.permute.xlu1 %5392  ;;  %v13819_v9 = vpop.permute.xlu0 %5576 }
 0x446   : > { %6083 = vperm.xlu1 %7140, %v13287_v11   ;;  %v13797_v13 = vadd.f32 %v4745_v7, %v4718_v24  ;;  %v4748_v23 = vmul.f32 %v17833_v63, %v17850_v0  ;;  %v4673_v49 = vmul.f32 %v17816_v27, %v17851_v15  ;;  %v4721_v1 = vadd.f32 %v17852_v33, %v4683_v10  ;;  %v17856_v24 = vld [vmem:[#allocation284_spill] sm:$0xff]  ;;  %v17858_v10 = vld [vmem:[#allocation81_spill] sm:$0xff]  ;;  %v17859_v33 = vld [vmem:[#allocation230_spill] sm:$0xff] }
 0x447   : > { %v4674_v45 = vmul.f32 %v17816_v27, %v17853_v39  ;;  %v13811_v44 = vsel %vm4806_vm6, %v17843_v51, %v17854_v40  ;;  %17855 = vst [vmem:[#allocation196_spill] sm:$0xff] %v13813_v38  ;;  %v13815_v7 = vadd.f32 %v4747_v22, %v4720_v20  ;;  %v4646_v17 = vadd.f32 %v4635_v6, %v4580_v55  ;;  %v17860_v22 = vld [vmem:[#allocation38_spill] sm:$0xff]  ;;  %v17861_v6 = vld [vmem:[#allocation256_spill] sm:$0xff] }
 0x448   : > { %v4637_v26 = vmul.f32 %v17813_v36, %v17856_v24  ;;  %17857 = vst [vmem:[#allocation97_spill] sm:$0xff] %v13819_v9  ;;  %v4647_v5 = vadd.f32 %v4636_v58, %v4581_v56  ;;  %v4638_v34 = vmul.f32 %v17859_v33, %v17813_v36  ;;  %v4582_v51 = vadd.f32 %v13593_v4, %v4512_v59  ;;  %v17862_v24 = vld [vmem:[#allocation287_spill] sm:$0xff]  ;;  %v17863_v58 = vld [vmem:[#allocation121_spill] sm:$0xff]  ;;  %v17865_v33 = vld [vmem:[#allocation36_spill] sm:$0xff] }
 0x449   : > { %v4583_v0 = vadd.f32 %v13633_v18, %v4513_v21  ;;  %v7394_v39 = vmov 65   ;;  %v4749_v20 = vmul.f32 %v17833_v63, %v17860_v22  ;;  %v4750_v55 = vmul.f32 %v17833_v63, %v17861_v6  ;;  %v17864_v56 = vld [vmem:[#allocation263_spill] sm:$0xff]  ;;  %v17866_v18 = vld [vmem:[#allocation174_spill] sm:$0xff]  ;;  %v13853_v22 = vpop.permute.xlu1 %5467  ;;  %v13872_v41 = vpop.permute.xlu0 %5580 }
 0x44a   : > { %6120 = vrot.lane.b32.xlu1 %v17858_v10, %s7322_s15  ;;  %v4684_v15 = vadd.f32 %v4673_v49, %v4646_v17  ;;  %v4675_v10 = vmul.f32 %v17816_v27, %v17862_v24  ;;  %v4811_v36 = vsel %vm4806_vm6, %v17864_v56, %v17863_v58  ;;  %v4812_v21 = vsel %vm4806_vm6, %v17863_v58, %v17865_v33  ;;  %v17867_v59 = vld [vmem:[#allocation251_spill] sm:$0xff] }
 0x44b   : > { %7142 = vset.pattern.permute.xlu1 %v7394_v39  ;;  %v4685_v4 = vadd.f32 %v4674_v45, %v4647_v5  ;;  %v4676_v39 = vmul.f32 %v17866_v18, %v17816_v27  ;;  %v13844_v6 = vsel %vm4806_vm6, %v17854_v40, %v17867_v59  ;;  %v17868_v17 = vld [vmem:[#allocation291_spill] sm:$0xff]  ;;  %17869 = vst [vmem:[#allocation128_spill] sm:$0xff] %v13853_v22  ;;  %v17870_v45 = vld [vmem:[#allocation152_spill] sm:$0xff]  ;;  %17875 = vst [vmem:[#allocation244_spill] sm:$0xff] %v13872_v41 }
 0x44c   : > { %v13851_v56 = vsel %vm4806_vm6, %v17867_v59, %v17868_v17  ;;  %v13855_v58 = vadd.f32 %v4748_v23, %v4721_v1  ;;  %v4813_v27 = vsel %vm4806_vm6, %v17865_v33, %v17870_v45  ;;  %v17871_v5 = vld [vmem:[#allocation63_spill] sm:$0xff]  ;;  %v4648_v49 = vadd.f32 %v4637_v26, %v4582_v51  ;;  %v17877_v26 = vld [vmem:[#allocation180_spill] sm:$0xff]  ;;  %v17878_v51 = vld [vmem:[#allocation177_spill] sm:$0xff] }
 0x44d   : > { %v4814_v40 = vsel %vm4806_vm6, %v17870_v45, %v17871_v5  ;;  %v17872_v18 = vld [vmem:[#allocation239_spill] sm:$0xff]  ;;  %v4649_v24 = vadd.f32 %v4638_v34, %v4583_v0  ;;  %v5048_v59 = vrot.slane %v4811_v36, %v7686_v31  ;;  %v5052_v9 = vrot.slane %v4812_v21, %v7686_v31  ;;  %v17876_v45 = vld [vmem:[#allocation89_spill] sm:$0xff] }
 0x44e   : > { %6124 = vrot.lane.b32.xlu1 %v17872_v18, %s7322_s15  ;;  %v17873_v22 = vld [vmem:[#allocation195_spill] sm:$0xff]  ;;  %v4723_v5 = vadd.f32 %v17876_v45, %v4685_v4  ;;  %v4686_v25 = vadd.f32 %v4675_v10, %v4648_v49  ;;  %v5056_v0 = vrot.slane %v4813_v27, %v7686_v31  ;;  %v5060_v34 = vrot.slane %v4814_v40, %v7686_v31  ;;  %v17882_v4 = vld [vmem:[#allocation169_spill] sm:$0xff]  ;;  %v17883_v10 = vld [vmem:[#allocation58_spill] sm:$0xff] }
 0x44f   : > { %v4722_v1 = vadd.f32 %v17873_v22, %v4684_v15  ;;  %v17874_v23 = vld [vmem:[#allocation187_spill] sm:$0xff]  ;;  %v4687_v18 = vadd.f32 %v4676_v39, %v4649_v24  ;;  %v5291_v15 = vsel %vm4141_vm5, %v17878_v51, %v17877_v26  ;;  %v13880_v22 = vpop.permute.xlu1 %5469  ;;  %v17885_v49 = vrot.slane %v13557_v42, %v7686_v31  ;;  %v17887_v42 = vld [vmem:[#allocation96_spill] sm:$0xff] }
 0x450   : > { %v4719_v28 = vadd.f32 %v17874_v23, %v13727_v60  ;;  %17879 = vst [vmem:[#allocation101_spill] sm:$0xff] %v13880_v22  ;;  %v17880_v60 = vld [vmem:[#allocation226_spill] sm:$0xff]  ;;  %v17884_v39 = vld [vmem:[#allocation151_spill] sm:$0xff] }
 0x451   : > { %v4751_v36 = vmul.f32 %v17833_v63, %v17880_v60  ;;  %v17881_v23 = vld [vmem:[#allocation42_spill] sm:$0xff]  ;;  %v13897_v27 = vmul.f32 %v17885_v49, %v17884_v39  ;;  %v17886_v40 = vld [vmem:[#allocation211_spill] sm:$0xff]  ;;  %v13902_v51 = vmul.f32 %v5048_v59, %v17884_v39  ;;  %v13905_v33 = vmul.f32 %v5052_v9, %v17884_v39  ;;  %v17901_v9 = vld [vmem:[#allocation292_spill] sm:$0xff] }
 0x452   : > { %v13889_v24 = vsel %vm4806_vm6, %v17882_v4, %v17881_v23  ;;  %6128 = vrot.lane.b32.xlu1 %v17883_v10, %s7322_s15  ;;  %v4752_v45 = vmul.f32 %v17886_v40, %v17833_v63  ;;  %v13907_v4 = vadd.f32 %v4749_v20, %v4722_v1  ;;  %v13910_v21 = vadd.f32 %v13748_v29, %v4719_v28  ;;  %v17889_v20 = vld [vmem:[#allocation53_spill] sm:$0xff]  ;;  %v17902_v40 = vld [vmem:[#allocation154_spill] sm:$0xff] }
 0x453   : > { %v5322_v10 = vrot.slane %v5291_v15, %v7686_v31  ;;  %v13913_v60 = vadd.f32 %v4750_v55, %v4723_v5  ;;  %v4724_v49 = vadd.f32 %v17887_v42, %v4686_v25  ;;  %v4725_v41 = vadd.f32 %v13589_v53, %v4687_v18  ;;  %v13930_v29 = vpop.permute.xlu1 %5473  ;;  %v17891_v55 = vld [vmem:[#allocation14_spill] sm:$0xff]  ;;  %v17893_v25 = vld [vmem:[#allocation257_spill] sm:$0xff]  ;;  %v17894_v5 = vld [vmem:[#allocation163_spill] sm:$0xff]  ;;  %v13952_v42 = vpop.permute.xlu0 %5584 }
 0x454   : > { %v13918_v63 = vmul.f32 %v5056_v0, %v17884_v39  ;;  %v13921_v59 = vmul.f32 %v5060_v34, %v17884_v39  ;;  %v13928_v28 = vsel %vm4806_vm6, %v17881_v23, %v17889_v20  ;;  %17890 = vst [vmem:[#allocation60_spill] sm:$0xff] %v13930_v29  ;;  %v13935_v53 = vsel %vm4806_vm6, %v17889_v20, %v17891_v55  ;;  %v17895_v18 = vld [vmem:[#allocation215_spill] sm:$0xff]  ;;  %v17897_v34 = vld [vmem:[#allocation118_spill] sm:$0xff] }
 0x455   : > { %17892 = vst [vmem:[#allocation138_spill] sm:$0xff] %v13935_v53  ;;  %v13940_v1 = vsel %vm4806_vm6, %v17891_v55, %v17893_v25  ;;  %v13945_v0 = vsel %vm4141_vm5, %v17895_v18, %v17894_v5  ;;  %v17898_v15 = vld [vmem:[#allocation90_spill] sm:$0xff]  ;;  %17899 = vst [vmem:[#allocation141_spill] sm:$0xff] %v13952_v42  ;;  %v17900_v20 = vld [vmem:[#allocation35_spill] sm:$0xff]  ;;  %v13959_v55 = vsel %vm4806_vm6, %v17897_v34, %v17901_v9 }
 0x456   : > { %17888 = vst [vmem:[#allocation136_spill] sm:$0xff] %v13918_v63  ;;  %17896 = vst [vmem:[#allocation143_spill] sm:$0xff] %v13945_v0  ;;  %v13950_v23 = vsel %vm4806_vm6, %v17898_v15, %v17897_v34  ;;  %6132 = vrot.lane.b32.xlu1 %v17900_v20, %s7322_s15  ;;  %v13964_v18 = vsel %vm4806_vm6, %v17901_v9, %v17902_v40  ;;  %v13969_v15 = vsel %vm4806_vm6, %v17902_v40, %v17831_v47  ;;  %v17904_v29 = vld [vmem:[#allocation202_spill] sm:$0xff]  ;;  %v17905_v34 = vld [vmem:[#allocation148_spill] sm:$0xff] }
 0x457   : > { %17903 = vst [vmem:[#allocation40_spill] sm:$0xff] %v13964_v18  ;;  %v13974_v42 = vsel %vm4806_vm6, %v17868_v17, %v17904_v29  ;;  %v13981_v22 = vsel %vm4806_vm6, %v17904_v29, %v17905_v34  ;;  %v13983_v9 = vadd.f32 %v4751_v36, %v4724_v49  ;;  %v13985_v19 = vadd.f32 %v4752_v45, %v4725_v41  ;;  %v13995_v38 = vpop.permute.xlu1 %5477  ;;  %v17907_v29 = vld [vmem:[#allocation45_spill] sm:$0xff]  ;;  %v17908_v47 = vld [vmem:[#allocation160_spill] sm:$0xff]  ;;  %v17910_v45 = vld [vmem:[#allocation267_spill] sm:$0xff]  ;;  %v14023_v49 = vpop.permute.xlu0 %5588 }
 0x458   : > { %17906 = vst [vmem:[#allocation200_spill] sm:$0xff] %v13995_v38  ;;  %v14012_v20 = vsel %vm4806_vm6, %v17905_v34, %v17908_v47  ;;  %v17909_v36 = vld [vmem:[#allocation56_spill] sm:$0xff]  ;;  %v17911_v40 = vld [vmem:[#allocation186_spill] sm:$0xff]  ;;  %17913 = vst [vmem:[#allocation109_spill] sm:$0xff] %v14023_v49 }
 0x459   : > { %v14017_v41 = vsel %vm4806_vm6, %v17908_v47, %v17909_v36  ;;  %v14021_v38 = vmul.f32 %v17911_v40, %v17910_v45  ;;  %v17916_v0 = vld [vmem:[#allocation165_spill] sm:$0xff]  ;;  %v14035_v30 = vmul.f32 %v17911_v40, %v17918_v14  ;;  %v17920_v47 = vld [vmem:[#allocation91_spill] sm:$0xff]  ;;  %v14045_v49 = vmul.f32 %v17911_v40, %v17923_v46  ;;  %v17928_v5 = vld [vmem:[#allocation282_spill] sm:$0xff] }
 0x45a   : > { %6164 = vrot.lane.b32.xlu1 %v17907_v29, %s7322_s15  ;;  %v17914_v29 = vld [vmem:[#allocation288_spill] sm:$0xff]  ;;  %v14031_v34 = vmul.f32 %v17911_v40, %v17916_v0  ;;  %v14039_v37 = vmul.f32 %v17911_v40, %v17920_v47  ;;  %v14052_v0 = vmul.f32 %v5322_v10, %v17911_v40  ;;  %v14056_v14 = vmul.f32 %v17911_v40, %v17928_v5  ;;  %v17931_v46 = vld [vmem:[#allocation255_spill] sm:$0xff]  ;;  %v17933_v10 = vld [vmem:[#allocation49_spill] sm:$0xff] }
 0x45b   : > { %17912 = vst [vmem:[#allocation229_spill] sm:$0xff] %v14021_v38  ;;  %v14027_v17 = vmul.f32 %v17911_v40, %v17914_v29  ;;  %17919 = vst [vmem:[#allocation161_spill] sm:$0xff] %v14035_v30  ;;  %v14041_v45 = vpop.permute.xlu1 %5481  ;;  %v17925_v29 = vld [vmem:[#allocation33_spill] sm:$0xff]  ;;  %v17944_v53 = vld [vmem:[#allocation248_spill] sm:$0xff] }
 0x45c   : > { %17917 = vst [vmem:[#allocation107_spill] sm:$0xff] %v14031_v34  ;;  %17921 = vst [vmem:[#allocation213_spill] sm:$0xff] %v14039_v37  ;;  %v14049_v8 = vmul.f32 %v17911_v40, %v17925_v29  ;;  %v4922_v29 = vsel %vm4806_vm6, %v17930_v48, %v17932_v35  ;;  %v17941_v37 = vld [vmem:[#allocation249_spill] sm:$0xff] }
 0x45d   : > { %17915 = vst [vmem:[#allocation194_spill] sm:$0xff] %v14027_v17  ;;  %17922 = vst [vmem:[#allocation18_spill] sm:$0xff] %v14041_v45  ;;  %v17936_v45 = vld [vmem:[#allocation70_spill] sm:$0xff]  ;;  %v17946_v63 = vld [vmem:[#allocation181_spill] sm:$0xff] }
 0x45e   : > { %17924 = vst [vmem:[#allocation113_spill] sm:$0xff] %v14045_v49  ;;  %17926 = vst [vmem:[#allocation65_spill] sm:$0xff] %v14049_v8  ;;  %v4921_v49 = vsel %vm4806_vm6, %v17931_v46, %v17930_v48  ;;  %6168 = vrot.lane.b32.xlu1 %v17933_v10, %s7322_s15  ;;  %v17937_v46 = vld [vmem:[#allocation270_spill] sm:$0xff]  ;;  %v17940_v48 = vld [vmem:[#allocation193_spill] sm:$0xff] }
 0x45f   : > { %17927 = vst [vmem:[#allocation75_spill] sm:$0xff] %v14052_v0  ;;  %17929 = vst [vmem:[#allocation112_spill] sm:$0xff] %v14056_v14  ;;  %v17934_v0 = vld [vmem:[#allocation290_spill] sm:$0xff]  ;;  %v17935_v14 = vld [vmem:[#allocation259_spill] sm:$0xff]  ;;  %v14081_v18 = vmul.f32 %v17938_v50, %v17937_v46  ;;  %v14086_v10 = vsel %vm4806_vm6, %v17909_v36, %v17940_v48  ;;  %v4920_v46 = vsel %vm4806_vm6, %v17941_v37, %v17946_v63  ;;  %v14107_v34 = vpop.permute.xlu1 %5485 }
 0x460   : > { %v4923_v5 = vsel %vm4806_vm6, %v17932_v35, %v17934_v0  ;;  %v4924_v47 = vsel %vm4806_vm6, %v17934_v0, %v17935_v14  ;;  %v4925_v8 = vsel %vm4806_vm6, %v17935_v14, %v17936_v45  ;;  %v4919_v35 = vsel %vm4806_vm6, %v17940_v48, %v17941_v37  ;;  %v17947_v30 = vld [vmem:[#allocation245_spill] sm:$0xff]  ;;  %17948 = vst [vmem:[#allocation123_spill] sm:$0xff] %v14107_v34  ;;  %v17950_v37 = vld [vmem:[#allocation51_spill] sm:$0xff] }
 0x461   : > { %17939 = vst [vmem:[#allocation293_spill] sm:$0xff] %v14081_v18  ;;  %v14093_v0 = vmul.f32 %v17938_v50, %v17942_v2  ;;  %v14097_v14 = vmul.f32 %v17938_v50, %v17944_v53  ;;  %v5068_v18 = vrot.slane %v4921_v49, %v7686_v31  ;;  %v5072_v36 = vrot.slane %v4922_v29, %v7686_v31  ;;  %v17951_v63 = vld [vmem:[#allocation271_spill] sm:$0xff] }
 0x462   : > { %v4926_v48 = vsel %vm4806_vm6, %v17936_v45, %v17947_v30  ;;  %v5076_v2 = vrot.slane %v4923_v5, %v7686_v31  ;;  %v5084_v53 = vrot.slane %v4925_v8, %v7686_v31  ;;  %6172 = vrot.lane.b32.xlu1 %v17950_v37, %s7322_s15  ;;  %v14118_v49 = vmul.f32 %v17938_v50, %v17951_v63 }
 0x463   : > { %17943 = vst [vmem:[#allocation295_spill] sm:$0xff] %v14093_v0  ;;  %17945 = vst [vmem:[#allocation110_spill] sm:$0xff] %v14097_v14  ;;  %v5080_v0 = vrot.slane %v4924_v47, %v7686_v31  ;;  %v14112_v14 = vpop.permute.xlu0 %5592  ;;  %v14122_v30 = vmul.f32 %v17938_v50, %v13583_v3  ;;  %v14126_v45 = vmul.f32 %v17938_v50, %v13596_v12  ;;  %v17956_v47 = vld [vmem:[#allocation115_spill] sm:$0xff] }
 0x464   : > { %17949 = vst [vmem:[#allocation99_spill] sm:$0xff] %v14112_v14  ;;  %17952 = vst [vmem:[#allocation223_spill] sm:$0xff] %v14118_v49  ;;  %v14130_v8 = vmul.f32 %v17938_v50, %v13613_v61  ;;  %v14134_v29 = vmul.f32 %v17938_v50, %v17956_v47  ;;  %v5014_v37 = vrot.slane %v4919_v35, %v7686_v31  ;;  %v17958_v61 = vld [vmem:[#allocation108_spill] sm:$0xff]  ;;  %v17959_v14 = vld [vmem:[#allocation27_spill] sm:$0xff]  ;;  %v14157_v35 = vpop.permute.xlu1 %5489 }
 0x465   : > { %17953 = vst [vmem:[#allocation126_spill] sm:$0xff] %v14122_v30  ;;  %17954 = vst [vmem:[#allocation24_spill] sm:$0xff] %v14126_v45  ;;  %v5018_v3 = vrot.slane %v4920_v46, %v7686_v31  ;;  %v5088_v63 = vrot.slane %v4926_v48, %v7686_v31  ;;  %v14142_v12 = vmul.f32 %v5068_v18, %v17884_v39  ;;  %v17963_v48 = vld [vmem:[#allocation227_spill] sm:$0xff]  ;;  %v17966_v49 = vld [vmem:[#allocation102_spill] sm:$0xff] }
 0x466   : > { %17955 = vst [vmem:[#allocation155_spill] sm:$0xff] %v14130_v8  ;;  %17957 = vst [vmem:[#allocation17_spill] sm:$0xff] %v14134_v29  ;;  %v14145_v34 = vmul.f32 %v5072_v36, %v17884_v39  ;;  %v14150_v47 = vsel %vm4806_vm6, %v17959_v14, %v17958_v61  ;;  %v14155_v5 = vsel %vm4806_vm6, %v17893_v25, %v17959_v14  ;;  %6176 = vrot.lane.b32.xlu1 %v17963_v48, %s7322_s15  ;;  %v7158_v29 = vld [vmem:[%s9023_s11 + $0x20] ss:$4 sm:$0x7]  ;;  %v17964_v8 = vld [vmem:[#allocation11_spill] sm:$0xff] }
 0x467   : > { %17960 = vst [vmem:[#allocation220_spill] sm:$0xff] %v14157_v35  ;;  %v14160_v46 = vmul.f32 %v5076_v2, %v17884_v39  ;;  %v14163_v18 = vmul.f32 %v5080_v0, %v17884_v39  ;;  %v5098_v36 = vmul.f32 %v5084_v53, %v17884_v39  ;;  %v6151_v45 = vrot.slane %v7158_v29, %v17964_v8  ;;  %v17965_v30 = vld [vmem:[#allocation219_spill] sm:$0xff]  ;;  %v17971_v35 = vld [vmem:[#allocation29_spill] sm:$0xff] }
 0x468   : > { %v14173_v25 = vsel %vm5491_vm7, %v17966_v49, %v17965_v30  ;;  %v17968_v14 = vld [vmem:[#allocation67_spill] sm:$0xff]  ;;  %v5099_v29 = vmul.f32 %v5088_v63, %v17884_v39  ;;  %v5134_v30 = vrot.slane %v14155_v5, %v7686_v31  ;;  %v17976_v39 = vrot.slane %v13785_v32, %v7686_v31  ;;  %v14210_v49 = vpop.permute.xlu1 %5534  ;;  %v17983_v32 = vld [vmem:[#allocation277_spill] sm:$0xff] }
 0x469   : > { %17961 = vst [vmem:[#allocation225_spill] sm:$0xff] %v14160_v46  ;;  %17962 = vst [vmem:[#allocation233_spill] sm:$0xff] %v14163_v18  ;;  %v14178_v2 = vsel %vm4806_vm6, %v17958_v61, %v17968_v14  ;;  %v17969_v0 = vld [vmem:[#allocation135_spill] sm:$0xff]  ;;  %v14198_v18 = vpop.permute.xlu0 %5596  ;;  %v17977_v5 = vrot.slane %v13811_v44, %v7686_v31 }
 0x46a   : > { %17967 = vst [vmem:[#allocation120_spill] sm:$0xff] %v14173_v25  ;;  %v14183_v53 = vsel %vm4806_vm6, %v17968_v14, %v17969_v0  ;;  %v14188_v48 = vsel %vm4806_vm6, %v17969_v0, %v17971_v35  ;;  %v17973_v61 = vld [vmem:[#allocation175_spill] sm:$0xff]  ;;  %17974 = vst [vmem:[#allocation137_spill] sm:$0xff] %v14198_v18  ;;  %v17975_v14 = vld [vmem:[#allocation34_spill] sm:$0xff] }
 0x46b   : > { %17970 = vst [vmem:[#allocation124_spill] sm:$0xff] %v14183_v53  ;;  %17972 = vst [vmem:[#allocation241_spill] sm:$0xff] %v14188_v48  ;;  %v4931_v50 = vsel %vm4806_vm6, %v17971_v35, %v17973_v61  ;;  %v5028_v17 = vmul.f32 %v5014_v37, %v17975_v14  ;;  %v5029_v38 = vmul.f32 %v5018_v3, %v17975_v14  ;;  %v17982_v37 = vld [vmem:[#allocation82_spill] sm:$0xff] }
 0x46c   : > { %v5019_v63 = vmul.f32 %v17976_v39, %v17975_v14  ;;  %v5020_v0 = vmul.f32 %v17977_v5, %v17975_v14  ;;  %17978 = vst [vmem:[#allocation221_spill] sm:$0xff] %v14210_v49  ;;  %v17979_v39 = vld [vmem:[#allocation240_spill] sm:$0xff]  ;;  %v5154_v44 = vrot.slane %v4931_v50, %v7686_v31  ;;  %v17980_v5 = vld [vmem:[#allocation77_spill] sm:$0xff]  ;;  %v17981_v49 = vld [vmem:[#allocation22_spill] sm:$0xff] }
 0x46d   : > { %6180 = vrot.lane.b32.xlu1 %v17979_v39, %s7322_s15  ;;  %v4932_v18 = vsel %vm4806_vm6, %v17973_v61, %v17980_v5  ;;  %v14229_v35 = vsel %vm4806_vm6, %v17830_v52, %v17981_v49  ;;  %v14234_v3 = vsel %vm4806_vm6, %v17981_v49, %v17982_v37  ;;  %v14239_v39 = vsel %vm4806_vm6, %v17982_v37, %v17983_v32  ;;  %v17984_v50 = vld [vmem:[#allocation87_spill] sm:$0xff] }
 0x46e   : > { %v14244_v61 = vsel %vm4806_vm6, %v17983_v32, %v17984_v50  ;;  %v17985_v52 = vrot.slane %v13974_v42, %v7686_v31  ;;  %v17986_v49 = vrot.slane %v13851_v56, %v7686_v31  ;;  %v5039_v48 = vadd.f32 %v5028_v17, %v13766_v62  ;;  %v14258_v32 = vpop.permute.xlu1 %5538  ;;  %v14265_v56 = vpop.permute.xlu0 %5600  ;;  %v14269_v62 = vld [vmem:[%s9023_s11 + $0x4c] ss:$4 sm:$0x7] }
 0x46f   : > { %v5040_v37 = vadd.f32 %v5029_v38, %v13768_v16  ;;  %v5030_v40 = vadd.f32 %v5019_v63, %v13795_v54  ;;  %v5031_v53 = vadd.f32 %v5020_v0, %v13797_v13  ;;  %v5158_v46 = vrot.slane %v4932_v18, %v7686_v31  ;;  %17987 = vst [vmem:[#allocation218_spill] sm:$0xff] %v14265_v56  ;;  %v17988_v38 = vld [vmem:[#allocation39_spill] sm:$0xff]  ;;  %v17989_v18 = vld [vmem:[#allocation149_spill] sm:$0xff] }
 0x470   : > { %v5023_v5 = vmul.f32 %v17985_v52, %v17975_v14  ;;  %v5022_v25 = vmul.f32 %v17986_v49, %v17975_v14  ;;  %v4937_v17 = vsel %vm4806_vm6, %v17984_v50, %v17988_v38  ;;  %v4938_v63 = vsel %vm4806_vm6, %v17988_v38, %v17989_v18 }
 0x471   : > { %6395 = vperm.xlu1 %7142, %v13287_v11   ;;  %v17990_v49 = vrot.slane %v13981_v22, %v7686_v31  ;;  %v17991_v54 = vrot.slane %v14012_v20, %v7686_v31  ;;  %v5109_v52 = vadd.f32 %v5098_v36, %v5039_v48  ;;  %v5110_v50 = vadd.f32 %v5099_v29, %v5040_v37 }
 0x472   : > { %v5033_v11 = vadd.f32 %v5022_v25, %v13815_v7  ;;  %v5034_v0 = vadd.f32 %v5023_v5, %v13855_v58  ;;  %v5100_v42 = vadd.f32 %v13902_v51, %v5030_v40  ;;  %v5101_v38 = vadd.f32 %v13905_v33, %v5031_v53  ;;  %v5543_v18 = vpop.permute.xlu1 %5542  ;;  %v17992_v7 = vld [vmem:[#allocation207_spill] sm:$0xff]  ;;  %v17993_v5 = vld [vmem:[#allocation54_spill] sm:$0xff]  ;;  %v14312_v48 = vpop.permute.xlu0 %5677 }
 0x473   : > { %v5024_v16 = vmul.f32 %v17990_v49, %v17975_v14  ;;  %v5025_v13 = vmul.f32 %v17991_v54, %v17975_v14  ;;  %v5168_v25 = vmul.f32 %v5154_v44, %v17992_v7  ;;  %v5169_v58 = vmul.f32 %v5158_v46, %v17992_v7  ;;  %v17994_v49 = vld [vmem:[#allocation279_spill] sm:$0xff] }
 0x474   : > { %v5608_v22 = vsel %vm5491_vm7, %v17993_v5, %v5543_v18  ;;  %v5609_v56 = vsel %vm5491_vm7, %v5543_v18, %v17994_v49  ;;  %v17995_v20 = vrot.slane %v13889_v24, %v7686_v31  ;;  %v17996_v33 = vrot.slane %v13928_v28, %v7686_v31 }
 0x475   : > { %6182 = vrot.lane.b32.xlu1 %v6151_v45, %s7322_s15  ;;  %v5711_v46 = vrot.slane %v5608_v22, %v7686_v31  ;;  %v5715_v36 = vrot.slane %v5609_v56, %v7686_v31  ;;  %v5163_v53 = vmul.f32 %v5134_v30, %v17992_v7  ;;  %v5103_v45 = vadd.f32 %v13921_v59, %v5033_v11 }
 0x476   : > { %v5159_v51 = vmul.f32 %v17995_v20, %v17992_v7  ;;  %v5160_v40 = vmul.f32 %v17996_v33, %v17992_v7  ;;  %v5104_v29 = vadd.f32 %v13897_v27, %v5034_v0  ;;  %v17997_v24 = vrot.slane %v13940_v1, %v7686_v31  ;;  %v5547_v30 = vpop.permute.xlu1 %5546  ;;  %v17998_v1 = vld [vmem:[#allocation201_spill] sm:$0xff] }
 0x477   : > { %v5224_v28 = vrot.slane %v4937_v17, %v7686_v31  ;;  %v5035_v37 = vadd.f32 %v5024_v16, %v13907_v4  ;;  %v14324_v54 = vmul.f32 %v5711_v46, %v14312_v48  ;;  %v14327_v56 = vmul.f32 %v5715_v36, %v14312_v48  ;;  %v17999_v17 = vld [vmem:[#allocation100_spill] sm:$0xff] }
 0x478   : > { %v5162_v44 = vmul.f32 %v17997_v24, %v17992_v7  ;;  %v5228_v59 = vrot.slane %v4938_v63, %v7686_v31  ;;  %v5036_v27 = vadd.f32 %v5025_v13, %v13913_v60  ;;  %v5610_v11 = vsel %vm5491_vm7, %v17994_v49, %v5547_v30 }
 0x479   : > { %v5611_v0 = vsel %vm5491_vm7, %v5547_v30, %v17998_v1  ;;  %6184 = vrot.lane.b32.xlu1 %v17999_v17, %s7322_s15  ;;  %v5179_v4 = vadd.f32 %v5168_v25, %v5109_v52  ;;  %v5180_v16 = vadd.f32 %v5169_v58, %v5110_v50  ;;  %v5719_v18 = vrot.slane %v5610_v11, %v7686_v31  ;;  %v18005_v25 = vld [vmem:[#allocation16_spill] sm:$0xff]  ;;  %v18012_v30 = vld [vmem:[#allocation119_spill] sm:$0xff] }
 0x47a   : > { %v5723_v22 = vrot.slane %v5611_v0, %v7686_v31  ;;  %v5170_v20 = vadd.f32 %v5159_v51, %v5100_v42  ;;  %v5171_v33 = vadd.f32 %v5160_v40, %v5101_v38  ;;  %v5173_v63 = vadd.f32 %v5162_v44, %v5103_v45  ;;  %v14350_v50 = vpop.permute.xlu1 %5550  ;;  %v18003_v42 = vld [vmem:[#allocation269_spill] sm:$0xff]  ;;  %v18009_v45 = vld [vmem:[#allocation59_spill] sm:$0xff]  ;;  %v18010_v44 = vld [vmem:[#allocation94_spill] sm:$0xff] }
 0x47b   : > { %v5174_v46 = vadd.f32 %v5163_v53, %v5104_v29  ;;  %v5105_v60 = vadd.f32 %v14142_v12, %v5035_v37  ;;  %v18000_v13 = vrot.slane %v14017_v41, %v7686_v31  ;;  %v14345_v36 = vmul.f32 %v5719_v18, %v14312_v48  ;;  %v18071_v0 = vld [vmem:[#allocation283_spill] sm:$0xff] }
 0x47c   : > { %v14348_v52 = vmul.f32 %v5723_v22, %v14312_v48  ;;  %v14355_v38 = vsel %vm5491_vm7, %v18003_v42, %v13736_v57  ;;  %v18006_v12 = vrot.slane %v13950_v23, %v7686_v31  ;;  %v18007_v41 = vrot.slane %v13959_v55, %v7686_v31 }
 0x47d   : > { %v5026_v49 = vmul.f32 %v18000_v13, %v17975_v14  ;;  %18001 = vst [vmem:[#allocation132_spill] sm:$0xff] %v14345_v36  ;;  %18004 = vst [vmem:[#allocation237_spill] sm:$0xff] %v14355_v38  ;;  %v18008_v40 = vrot.slane %v14150_v47, %v7686_v31  ;;  %6186 = vrot.lane.b32.xlu1 %v18009_v45, %s7322_s15  ;;  %v5238_v29 = vmul.f32 %v5224_v28, %v18005_v25 }
 0x47e   : > { %18002 = vst [vmem:[#allocation224_spill] sm:$0xff] %v14348_v52  ;;  %v5229_v58 = vmul.f32 %v18006_v12, %v18005_v25  ;;  %v5230_v51 = vmul.f32 %v18007_v41, %v18005_v25  ;;  %v5239_v24 = vmul.f32 %v5228_v59, %v18005_v25  ;;  %v5292_v23 = vsel %vm4141_vm5, %v17877_v26, %v18010_v44  ;;  %v14403_v13 = vpop.permute.xlu1 %5554  ;;  %v18080_v52 = vld [vmem:[#allocation101_spill] sm:$0xff] }
 0x47f   : > { %v5164_v53 = vmul.f32 %v18008_v40, %v17992_v7  ;;  %v18011_v55 = vrot.slane %v14086_v10, %v7686_v31  ;;  %v5293_v47 = vsel %vm4141_vm5, %v18010_v44, %v18012_v30  ;;  %v18013_v11 = vrot.slane %v13969_v15, %v7686_v31  ;;  %v18027_v30 = vld [vmem:[#allocation233_spill] sm:$0xff] }
 0x480   : > { %v18014_v59 = vrot.slane %v13732_v43, %v7686_v31  ;;  %v18015_v26 = vrot.slane %v13844_v6, %v7686_v31  ;;  %v5106_v17 = vadd.f32 %v14145_v34, %v5036_v27  ;;  %v18016_v15 = vrot.slane %v14178_v2, %v7686_v31  ;;  %v18018_v34 = vld [vmem:[#allocation68_spill] sm:$0xff] }
 0x481   : > { %v5027_v37 = vmul.f32 %v18011_v55, %v17975_v14  ;;  %v5232_v28 = vmul.f32 %v18013_v11, %v18005_v25  ;;  %v5037_v22 = vadd.f32 %v5026_v49, %v13983_v9  ;;  %v5326_v43 = vrot.slane %v5292_v23, %v7686_v31  ;;  %6190 = vrot.lane.b32.xlu1 %v18018_v34, %s7322_s15  ;;  %v18028_v11 = vld [vmem:[#allocation241_spill] sm:$0xff]  ;;  %v18037_v34 = vld [vmem:[#allocation235_spill] sm:$0xff] }
 0x482   : > { %v5233_v1 = vmul.f32 %v18014_v59, %v18005_v25  ;;  %v5021_v10 = vmul.f32 %v18015_v26, %v17975_v14  ;;  %v5165_v18 = vmul.f32 %v18016_v15, %v17992_v7  ;;  %v5240_v12 = vadd.f32 %v5229_v58, %v5170_v20  ;;  %v18032_v15 = vld [vmem:[#allocation161_spill] sm:$0xff] }
 0x483   : > { %v5241_v41 = vadd.f32 %v5230_v51, %v5171_v33  ;;  %v18017_v6 = vrot.slane %v14229_v35, %v7686_v31  ;;  %v5249_v27 = vadd.f32 %v5238_v29, %v5179_v4  ;;  %v5250_v40 = vadd.f32 %v5239_v24, %v5180_v16  ;;  %v18020_v51 = vld [vmem:[#allocation225_spill] sm:$0xff]  ;;  %v18021_v4 = vld [vmem:[#allocation124_spill] sm:$0xff]  ;;  %v14424_v24 = vpop.permute.xlu1 %5558 }
 0x484   : > { %v5330_v2 = vrot.slane %v5293_v47, %v7686_v31  ;;  %v5038_v9 = vadd.f32 %v5027_v37, %v13985_v19  ;;  %v5243_v49 = vadd.f32 %v5232_v28, %v5173_v63  ;;  %v5244_v45 = vadd.f32 %v5233_v1, %v5174_v46  ;;  %v18023_v19 = vld [vmem:[#allocation186_spill] sm:$0xff]  ;;  %v18024_v46 = vld [vmem:[#allocation229_spill] sm:$0xff] }
 0x485   : > { %v5234_v14 = vmul.f32 %v18017_v6, %v18005_v25  ;;  %v5175_v44 = vadd.f32 %v5164_v53, %v5105_v60  ;;  %v5032_v20 = vadd.f32 %v5021_v10, %v13910_v21  ;;  %v5176_v33 = vadd.f32 %v5165_v18, %v5106_v17  ;;  %v18025_v21 = vld [vmem:[#allocation194_spill] sm:$0xff]  ;;  %v18031_v10 = vld [vmem:[#allocation107_spill] sm:$0xff] }
 0x486   : > { %v18019_v35 = vrot.slane %v14234_v3, %v7686_v31  ;;  %v5107_v23 = vadd.f32 %v18020_v51, %v5037_v22  ;;  %v18022_v16 = vrot.slane %v18021_v4, %v7686_v31  ;;  %v5340_v63 = vmul.f32 %v5326_v43, %v18023_v19  ;;  %v18026_v3 = vld [vmem:[#allocation72_spill] sm:$0xff] }
 0x487   : > { %v14428_v60 = vadd.f32 %v18024_v46, %v5240_v12  ;;  %v14431_v53 = vadd.f32 %v18025_v21, %v5241_v41  ;;  %v5245_v55 = vadd.f32 %v5234_v14, %v5175_v44  ;;  %6194 = vrot.lane.b32.xlu1 %v18026_v3, %s7322_s15  ;;  %v5341_v37 = vmul.f32 %v5330_v2, %v18023_v19  ;;  %v18033_v22 = vld [vmem:[#allocation136_spill] sm:$0xff]  ;;  %v18034_v12 = vld [vmem:[#allocation138_spill] sm:$0xff]  ;;  %v18036_v14 = vld [vmem:[#allocation19_spill] sm:$0xff] }
 0x488   : > { %v5235_v58 = vmul.f32 %v18019_v35, %v18005_v25  ;;  %v5166_v29 = vmul.f32 %v18022_v16, %v17992_v7  ;;  %v5108_v47 = vadd.f32 %v18027_v30, %v5038_v9  ;;  %v18029_v28 = vrot.slane %v18028_v11, %v7686_v31  ;;  %v14459_v35 = vpop.permute.xlu1 %5562  ;;  %v18046_v3 = vld [vmem:[#allocation280_spill] sm:$0xff]  ;;  %v18047_v30 = vld [vmem:[#allocation170_spill] sm:$0xff] }
 0x489   : > { %v18030_v1 = vrot.slane %v14239_v39, %v7686_v31  ;;  %v5345_v17 = vadd.f32 %v18031_v10, %v5243_v49  ;;  %v5346_v18 = vadd.f32 %v18032_v15, %v5244_v45  ;;  %v5102_v43 = vadd.f32 %v18033_v22, %v5032_v20  ;;  %v18039_v20 = vld [vmem:[#allocation50_spill] sm:$0xff]  ;;  %v18050_v15 = vld [vmem:[#allocation163_spill] sm:$0xff] }
 0x48a   : > { %v5167_v59 = vmul.f32 %v18029_v28, %v17992_v7  ;;  %v18035_v41 = vrot.slane %v18034_v12, %v7686_v31  ;;  %v5294_v2 = vsel %vm4141_vm5, %v18037_v34, %v18036_v14  ;;  %v5246_v9 = vadd.f32 %v5235_v58, %v5176_v33  ;;  %v18041_v33 = vld [vmem:[#allocation21_spill] sm:$0xff]  ;;  %v18042_v58 = vld [vmem:[#allocation40_spill] sm:$0xff]  ;;  %v18051_v12 = vld [vmem:[#allocation166_spill] sm:$0xff] }
 0x48b   : > { %v5236_v26 = vmul.f32 %v18030_v1, %v18005_v25  ;;  %v5177_v44 = vadd.f32 %v5166_v29, %v5107_v23  ;;  %v18038_v39 = vrot.slane %v14244_v61, %v7686_v31  ;;  %v14461_v45 = vadd.f32 %v5340_v63, %v5249_v27  ;;  %6198 = vrot.lane.b32.xlu1 %v18041_v33, %s7322_s15  ;;  %v18044_v27 = vld [vmem:[#allocation66_spill] sm:$0xff] }
 0x48c   : > { %v5161_v6 = vmul.f32 %v18035_v41, %v17992_v7  ;;  %v14466_v51 = vsel %vm4141_vm5, %v18036_v14, %v18039_v20  ;;  %v18040_v7 = vld [vmem:[#allocation213_spill] sm:$0xff]  ;;  %v18043_v61 = vrot.slane %v18042_v58, %v7686_v31  ;;  %v14475_v16 = vadd.f32 %v5341_v37, %v5250_v40  ;;  %v18045_v29 = vld [vmem:[#allocation158_spill] sm:$0xff]  ;;  %v14490_v10 = vpop.permute.xlu1 %5566 }
 0x48d   : > { %v5237_v49 = vmul.f32 %v18038_v39, %v18005_v25  ;;  %v5347_v4 = vadd.f32 %v18040_v7, %v5245_v55  ;;  %v5300_v19 = vsel %vm4141_vm5, %v18045_v29, %v18044_v27  ;;  %v5178_v63 = vadd.f32 %v5167_v59, %v5108_v47  ;;  %v18048_v40 = vld [vmem:[#allocation113_spill] sm:$0xff]  ;;  %v18057_v58 = vld [vmem:[#allocation190_spill] sm:$0xff] }
 0x48e   : > { %v5231_v23 = vmul.f32 %v18043_v61, %v18005_v25  ;;  %v5247_v46 = vadd.f32 %v5236_v26, %v5177_v44  ;;  %v5360_v21 = vrot.slane %v5294_v2, %v7686_v31  ;;  %v5296_v55 = vsel %vm4141_vm5, %v18039_v20, %v18046_v3  ;;  %v14493_v47 = vld [vmem:[%s9023_s11 + $0x78] ss:$4 sm:$0x7]  ;;  %v14526_v3 = vpop.permute.xlu0 %5887  ;;  %s6643_s11 = sshll.u32 %s7572_s6, 4  ;;  %s15352_s11 = int_to_ptr.vmem [resolvable:$true] %s6643_s11 }
 0x48f   : > { %v5301_v11 = vsel %vm4141_vm5, %v18044_v27, %v18047_v30  ;;  %v5172_v28 = vadd.f32 %v5161_v6, %v5102_v43  ;;  %v5364_v25 = vrot.slane %v14466_v51, %v7686_v31  ;;  %v5348_v37 = vadd.f32 %v18048_v40, %v5246_v9  ;;  %v18049_v26 = vld [vmem:[#allocation273_spill] sm:$0xff]  ;;  %v18055_v20 = vld [vmem:[#allocation164_spill] sm:$0xff]  ;;  %v18056_v51 = vld [vmem:[#allocation43_spill] sm:$0xff]  ;;  %s7191_s25 = scalar_lea.vmem %s15352_s11, 1408  ;;  %p7198_p1 = scmp.lt.s32.totalorder %s15352_s11, %s7196_s24 }
 0x490   : > { %v5248_v1 = vadd.f32 %v5237_v49, %v5178_v63  ;;  %v5298_v22 = vsel %vm4141_vm5, %v18050_v15, %v18049_v26  ;;  %v5299_v43 = vsel %vm4141_vm5, %v18049_v26, %v18051_v12  ;;  %v5436_v41 = vrot.slane %v5300_v19, %v7686_v31  ;;  %v18053_v9 = vld [vmem:[#allocation173_spill] sm:$0xff]  ;;  %v18059_v27 = vld [vmem:[#allocation168_spill] sm:$0xff]  ;;  %v18062_v40 = vld [vmem:[#allocation179_spill] sm:$0xff]  ;;  %p7192_p7 = scmp.ne.s32.totalorder %s15352_s11, %s7191_s25  ;;  %p7199_p3 = scmp.lt.s32.totalorder %s7197_s5, %s7191_s25 }
 0x491   : > { %v18052_v6 = vrot.slane %v14269_v62, %v17964_v8  ;;  %v5242_v14 = vadd.f32 %v5231_v23, %v5172_v28  ;;  %v5368_v34 = vrot.slane %v5296_v55, %v7686_v31  ;;  %v5440_v2 = vrot.slane %v5301_v11, %v7686_v31  ;;  %v18054_v39 = vld [vmem:[#allocation65_spill] sm:$0xff]  ;;  %v18058_v62 = vld [vmem:[#allocation52_spill] sm:$0xff]  ;;  %v18060_v55 = vld [vmem:[#allocation106_spill] sm:$0xff]  ;;  %v14531_v28 = vpop.permute.xlu1 %5570 }
 0x492   : > { %v14513_v44 = vsel %vm4141_vm5, %v18047_v30, %v18053_v9  ;;  %v5349_v49 = vadd.f32 %v18054_v39, %v5247_v46  ;;  %v5369_v7 = vmul.f32 %v18056_v51, %v18055_v20  ;;  %v5370_v61 = vmul.f32 %v18056_v51, %v18057_v58  ;;  %v18061_v30 = vld [vmem:[#allocation75_spill] sm:$0xff]  ;;  %v18063_v15 = vld [vmem:[#allocation197_spill] sm:$0xff]  ;;  %v18066_v9 = vld [vmem:[#allocation112_spill] sm:$0xff]  ;;  %p7193_p4 = pnand %p7192_p7, %p18214_p2  ;;  %p7200_p8 = por %p7199_p3, %p7198_p1 }
 0x493   : > { %6202 = vrot.lane.b32.xlu1 %v18052_v6, %s7322_s15  ;;  %v5372_v23 = vmul.f32 %v18056_v51, %v18058_v62  ;;  %v5373_v29 = vmul.f32 %v18056_v51, %v18059_v27  ;;  %v5402_v19 = vrot.slane %v5298_v22, %v7686_v31  ;;  %v5406_v63 = vrot.slane %v5299_v43, %v7686_v31  ;;  %v18064_v6 = vld [vmem:[#allocation26_spill] sm:$0xff] }
 0x494   : > { %v5374_v46 = vmul.f32 %v18056_v51, %v18060_v55  ;;  %v5350_v11 = vadd.f32 %v18061_v30, %v5248_v1  ;;  %v14534_v26 = vmul.f32 %v5436_v41, %v18062_v40  ;;  %v5375_v12 = vmul.f32 %v18056_v51, %v18063_v15  ;;  %v18065_v43 = vld [vmem:[#allocation74_spill] sm:$0xff]  ;;  %p7194_p0 = pneg %p7193_p4 }
 0x495   : > { %v5376_v22 = vmul.f32 %v18056_v51, %v18064_v6  ;;  %v5344_v39 = vadd.f32 %v18066_v9, %v5242_v14  ;;  %v14544_v20 = vmul.f32 %v5440_v2, %v18062_v40  ;;  %v5444_v1 = vrot.slane %v14513_v44, %v7686_v31  ;;  %v18068_v6 = vld [vmem:[#allocation130_spill] sm:$0xff]  ;;  %v14561_v33 = vpop.permute.xlu1 %5574 }
 0x496   : > { %v5377_v41 = vmul.f32 %v5360_v21, %v18056_v51  ;;  %v5380_v27 = vadd.f32 %v5369_v7, %v14428_v60  ;;  %v5381_v55 = vadd.f32 %v5370_v61, %v14431_v53  ;;  %v5383_v30 = vadd.f32 %v5372_v23, %v5345_v17  ;;  %v18070_v9 = vld [vmem:[#allocation122_spill] sm:$0xff]  ;;  %v14559_v21 = vpop.permute.xlu0 %6045  ;;  %18073 = vst [vmem:[#allocation78_spill] sm:$0xff] %v14561_v33  ;;  %v18075_v17 = vld [vmem:[#allocation276_spill] sm:$0xff]  ;;  %v18077_v23 = vld [vmem:[#allocation95_spill] sm:$0xff]  ;;  %p7201_p10 = pnand %p7200_p8, %p7194_p0 }
 0x497   : > { %6204 = vrot.lane.b32.xlu1 %v18065_v43, %s7322_s15  ;;  %v5384_v15 = vadd.f32 %v5373_v29, %v5346_v18  ;;  %v18069_v43 = vld [vmem:[#allocation196_spill] sm:$0xff]  ;;  %v5385_v59 = vadd.f32 %v5374_v46, %v5347_v4  ;;  %18072 = vst [vmem:[#allocation192_spill] sm:$0xff] %v14559_v21  ;;  %v18074_v62 = vld [vmem:[#allocation250_spill] sm:$0xff]  ;;  %v5386_v53 = vadd.f32 %v5375_v12, %v5348_v37  ;;  %v18078_v46 = vld [vmem:[#allocation139_spill] sm:$0xff] }
 0x498   : > { %v5407_v14 = vmul.f32 %v18069_v43, %v18068_v6  ;;  %v5408_v2 = vmul.f32 %v18069_v43, %v18070_v9  ;;  %v5410_v44 = vmul.f32 %v18069_v43, %v18071_v0  ;;  %v5411_v60 = vmul.f32 %v18069_v43, %v18074_v62  ;;  %v18076_v61 = vld [vmem:[#allocation114_spill] sm:$0xff]  ;;  %v18081_v12 = vld [vmem:[#allocation253_spill] sm:$0xff]  ;;  %v18085_v33 = vld [vmem:[#allocation116_spill] sm:$0xff] }
 0x499   : > { %v5412_v18 = vmul.f32 %v18069_v43, %v18075_v17  ;;  %v5387_v7 = vadd.f32 %v5376_v22, %v5349_v49  ;;  %v5413_v29 = vmul.f32 %v18069_v43, %v18077_v23  ;;  %v5388_v0 = vadd.f32 %v5377_v41, %v5350_v11  ;;  %v18079_v9 = vld [vmem:[#allocation102_spill] sm:$0xff]  ;;  %v18082_v49 = vld [vmem:[#allocation143_spill] sm:$0xff]  ;;  %v14584_v23 = vpop.permute.xlu1 %5578 }
 0x49a   : > { %v5378_v4 = vmul.f32 %v5364_v25, %v18056_v51  ;;  %v5371_v6 = vmul.f32 %v18056_v51, %v18078_v46  ;;  %v5493_v37 = vsel %vm5491_vm7, %v18080_v52, %v18079_v9  ;;  %v5414_v62 = vmul.f32 %v18069_v43, %v18081_v12  ;;  %v18084_v46 = vld [vmem:[#allocation71_spill] sm:$0xff] }
 0x49b   : > { %6206 = vrot.lane.b32.xlu1 %v18076_v61, %s7322_s15  ;;  %v18083_v22 = vrot.slane %v18082_v49, %v7686_v31  ;;  %v5379_v61 = vmul.f32 %v5368_v34, %v18056_v51  ;;  %v5418_v11 = vadd.f32 %v5407_v14, %v5380_v27  ;;  %v5419_v41 = vadd.f32 %v5408_v2, %v5381_v55  ;;  %v18086_v49 = vld [vmem:[#allocation128_spill] sm:$0xff]  ;;  %v14596_v55 = vpop.permute.xlu0 %6122  ;;  %v18090_v2 = vld [vmem:[#allocation295_spill] sm:$0xff] }
 0x49c   : > { %v5421_v25 = vadd.f32 %v5410_v44, %v5383_v30  ;;  %v5409_v36 = vmul.f32 %v18069_v43, %v18084_v46  ;;  %v5422_v38 = vadd.f32 %v5411_v60, %v5384_v15  ;;  %v5423_v9 = vadd.f32 %v5412_v18, %v5385_v59  ;;  %18087 = vst [vmem:[#allocation157_spill] sm:$0xff] %v14596_v55  ;;  %v18091_v18 = vld [vmem:[#allocation110_spill] sm:$0xff] }
 0x49d   : > { %v5415_v17 = vmul.f32 %v18083_v22, %v18069_v43  ;;  %v5416_v58 = vmul.f32 %v5402_v19, %v18069_v43  ;;  %v5417_v12 = vmul.f32 %v5406_v63, %v18069_v43  ;;  %v5492_v34 = vsel %vm5491_vm7, %v18086_v49, %v18080_v52  ;;  %v18088_v43 = vld [vmem:[#allocation293_spill] sm:$0xff]  ;;  %v14605_v52 = vpop.permute.xlu1 %5582  ;;  %v18097_v22 = vld [vmem:[#allocation219_spill] sm:$0xff]  ;;  %v18101_v46 = vld [vmem:[#allocation30_spill] sm:$0xff] }
 0x49e   : > { %v5687_v51 = vrot.slane %v5493_v37, %v7686_v31  ;;  %v5424_v27 = vadd.f32 %v5413_v29, %v5386_v53  ;;  %v5382_v30 = vadd.f32 %v5371_v6, %v5344_v39  ;;  %v5425_v14 = vadd.f32 %v5414_v62, %v5387_v7  ;;  %v18095_v6 = vld [vmem:[#allocation24_spill] sm:$0xff]  ;;  %v18096_v62 = vld [vmem:[#allocation221_spill] sm:$0xff] }
 0x49f   : > { %6210 = vrot.lane.b32.xlu1 %v18085_v33, %s7322_s15  ;;  %v5426_v15 = vadd.f32 %v5415_v17, %v5388_v0  ;;  %v5389_v59 = vadd.f32 %v5378_v4, %v14461_v45  ;;  %v5390_v19 = vadd.f32 %v5379_v61, %v14475_v16  ;;  %v5455_v63 = vmul.f32 %v5444_v1, %v18062_v40  ;;  %v18092_v45 = vld [vmem:[#allocation15_spill] sm:$0xff]  ;;  %v18094_v0 = vld [vmem:[#allocation126_spill] sm:$0xff]  ;;  %v14633_v49 = vpop.permute.xlu0 %6126 }
 0x4a0   : > { %v14602_v33 = vadd.f32 %v18088_v43, %v5418_v11  ;;  %v5457_v44 = vadd.f32 %v18090_v2, %v5419_v41  ;;  %v5420_v60 = vadd.f32 %v5409_v36, %v5382_v30  ;;  %v5683_v53 = vrot.slane %v5492_v34, %v7686_v31  ;;  %v18093_v40 = vld [vmem:[#allocation223_spill] sm:$0xff]  ;;  %v18099_v11 = vld [vmem:[#allocation120_spill] sm:$0xff]  ;;  %18102 = vst [vmem:[#allocation167_spill] sm:$0xff] %v14633_v49  ;;  %v18103_v34 = vld [vmem:[#allocation17_spill] sm:$0xff] }
 0x4a1   : > { %v5459_v39 = vadd.f32 %v18091_v18, %v5421_v25  ;;  %v5427_v7 = vadd.f32 %v5416_v58, %v5389_v59  ;;  %v5428_v29 = vadd.f32 %v5417_v12, %v5390_v19  ;;  %v5725_v16 = vmul.f32 %v5687_v51, %v14312_v48  ;;  %v18098_v17 = vld [vmem:[#allocation155_spill] sm:$0xff]  ;;  %v18109_v43 = vld [vmem:[#allocation200_spill] sm:$0xff] }
 0x4a2   : > { %18089 = vst [vmem:[#allocation286_spill] sm:$0xff] %v14602_v33  ;;  %v5460_v1 = vadd.f32 %v18093_v40, %v5422_v38  ;;  %v5461_v4 = vadd.f32 %v18094_v0, %v5423_v9  ;;  %v5462_v37 = vadd.f32 %v18095_v6, %v5424_v27  ;;  %v5604_v36 = vsel %vm5491_vm7, %v18097_v22, %v18096_v62  ;;  %v18105_v30 = vld [vmem:[#allocation247_spill] sm:$0xff]  ;;  %v18111_v18 = vld [vmem:[#allocation220_spill] sm:$0xff] }
 0x4a3   : > { %6214 = vrot.lane.b32.xlu1 %v18092_v45, %s7322_s15  ;;  %v5463_v61 = vadd.f32 %v18098_v17, %v5425_v14  ;;  %v5464_v58 = vadd.f32 %v14534_v26, %v5426_v15  ;;  %v18100_v41 = vrot.slane %v18099_v11, %v7686_v31  ;;  %v5605_v38 = vsel %vm5491_vm7, %v18096_v62, %v18101_v46  ;;  %v5587_v26 = vpop.permute.xlu1 %5586  ;;  %v18106_v14 = vld [vmem:[#allocation60_spill] sm:$0xff]  ;;  %v18114_v62 = vld [vmem:[#allocation285_spill] sm:$0xff]  ;;  %v18115_v17 = vld [vmem:[#allocation262_spill] sm:$0xff] }
 0x4a4   : > { %v5606_v9 = vsel %vm5491_vm7, %v18101_v46, %v14258_v32  ;;  %v5607_v12 = vsel %vm5491_vm7, %v14258_v32, %v17993_v5  ;;  %v5458_v51 = vadd.f32 %v18103_v34, %v5420_v60  ;;  %v14637_v27 = vmul.f32 %v5683_v53, %v14312_v48  ;;  %v18108_v32 = vld [vmem:[#allocation206_spill] sm:$0xff]  ;;  %v18118_v46 = vld [vmem:[#allocation289_spill] sm:$0xff]  ;;  %v14703_v34 = vpop.permute.xlu0 %6130  ;;  %v18131_v49 = vld [vmem:[#allocation47_spill] sm:$0xff] }
 0x4a5   : > { %v5726_v25 = vmul.f32 %v18100_v41, %v14312_v48  ;;  %v14642_v15 = vsel %vm5491_vm7, %v18106_v14, %v18105_v30  ;;  %v14645_v59 = vadd.f32 %v14544_v20, %v5427_v7  ;;  %v14647_v19 = vadd.f32 %v5455_v63, %v5428_v29  ;;  %v18110_v60 = vld [vmem:[#allocation18_spill] sm:$0xff]  ;;  %v18112_v63 = vld [vmem:[#allocation176_spill] sm:$0xff]  ;;  %18119 = vst [vmem:[#allocation156_spill] sm:$0xff] %v14703_v34  ;;  %v18121_v14 = vld [vmem:[#allocation55_spill] sm:$0xff] }
 0x4a6   : > { %18104 = vst [vmem:[#allocation147_spill] sm:$0xff] %v14637_v27  ;;  %18107 = vst [vmem:[#allocation185_spill] sm:$0xff] %v14642_v15  ;;  %v14651_v5 = vadd.f32 %v5725_v16, %v5457_v44  ;;  %v14656_v2 = vsel %vm5491_vm7, %v18105_v30, %v18109_v43  ;;  %v14661_v53 = vsel %vm5491_vm7, %v18110_v60, %v18003_v42  ;;  %v18113_v42 = vld [vmem:[#allocation86_spill] sm:$0xff]  ;;  %v18128_v16 = vld [vmem:[#allocation85_spill] sm:$0xff] }
 0x4a7   : > { %6218 = vrot.lane.b32.xlu1 %v18108_v32, %s7322_s15  ;;  %v5695_v20 = vrot.slane %v5604_v36, %v7686_v31  ;;  %v5499_v7 = vsel %vm5491_vm7, %v18112_v63, %v18111_v18  ;;  %v5699_v29 = vrot.slane %v5605_v38, %v7686_v31  ;;  %v5703_v44 = vrot.slane %v5606_v9, %v7686_v31  ;;  %v14672_v40 = vpop.permute.xlu1 %5590  ;;  %v18129_v36 = vld [vmem:[#allocation204_spill] sm:$0xff] }
 0x4a8   : > { %v5707_v45 = vrot.slane %v5607_v12, %v7686_v31  ;;  %v14674_v0 = vadd.f32 %v5726_v25, %v5458_v51  ;;  %v14678_v6 = vmul.f32 %v14559_v21, %v18113_v42  ;;  %v14682_v22 = vmul.f32 %v14559_v21, %v18114_v62  ;;  %v18120_v51 = vld [vmem:[#allocation254_spill] sm:$0xff]  ;;  %v14763_v33 = vpop.permute.xlu0 %6134 }
 0x4a9   : > { %v14689_v11 = vsel %vm5491_vm7, %v18115_v17, %v18110_v60  ;;  %v18117_v25 = vrot.slane %v14493_v47, %v17964_v8  ;;  %v14699_v38 = vmul.f32 %v14559_v21, %v18118_v46  ;;  %v5897_v9 = vrot.slane %v5499_v7, %v7686_v31  ;;  %v18122_v17 = vld [vmem:[#allocation216_spill] sm:$0xff]  ;;  %18133 = vst [vmem:[#allocation146_spill] sm:$0xff] %v14763_v33  ;;  %v18142_v33 = vld [vmem:[#allocation98_spill] sm:$0xff] }
 0x4aa   : > { %18116 = vst [vmem:[#allocation61_spill] sm:$0xff] %v14689_v11  ;;  %v5727_v12 = vmul.f32 %v5695_v20, %v14312_v48  ;;  %v14707_v30 = vmul.f32 %v14559_v21, %v18120_v51  ;;  %v6051_v60 = vrot.slane %v18121_v14, %v7686_v31  ;;  %v5728_v47 = vmul.f32 %v5699_v29, %v14312_v48  ;;  %v18124_v51 = vld [vmem:[#allocation227_spill] sm:$0xff]  ;;  %v18125_v14 = vld [vmem:[#allocation134_spill] sm:$0xff] }
 0x4ab   : > { %6222 = vrot.lane.b32.xlu1 %v18117_v25, %s7322_s15  ;;  %v5729_v42 = vmul.f32 %v5703_v44, %v14312_v48  ;;  %v5730_v62 = vmul.f32 %v5707_v45, %v14312_v48  ;;  %v14716_v7 = vmul.f32 %v14559_v21, %v18122_v17  ;;  %v14718_v20 = vpop.permute.xlu1 %5594  ;;  %v18123_v25 = vld [vmem:[#allocation44_spill] sm:$0xff]  ;;  %v18126_v44 = vld [vmem:[#allocation189_spill] sm:$0xff]  ;;  %v5673_v17 = vsel %vm5491_vm7, %v18109_v43, %v14350_v50 }
 0x4ac   : > { %v14722_v46 = vmul.f32 %v14559_v21, %v18123_v25  ;;  %v18127_v48 = vld [vmem:[#allocation252_spill] sm:$0xff]  ;;  %v14743_v29 = vmul.f32 %v14559_v21, %v18129_v36  ;;  %v14746_v41 = vmul.f32 %v5897_v9, %v14526_v3  ;;  %v5738_v34 = vadd.f32 %v5727_v12, %v5459_v39 }
 0x4ad   : > { %v5612_v45 = vsel %vm5491_vm7, %v14350_v50, %v18127_v48  ;;  %v5613_v25 = vsel %vm5491_vm7, %v18127_v48, %v14403_v13  ;;  %v5614_v55 = vsel %vm5491_vm7, %v14403_v13, %v18131_v49  ;;  %v14752_v50 = vmul.f32 %v6051_v60, %v14559_v21 }
 0x4ae   : > { %18130 = vst [vmem:[#allocation88_spill] sm:$0xff] %v14743_v29  ;;  %v5739_v43 = vadd.f32 %v5728_v47, %v5460_v1  ;;  %v5740_v48 = vadd.f32 %v5729_v42, %v5461_v4  ;;  %v5741_v27 = vadd.f32 %v5730_v62, %v5462_v37  ;;  %v14758_v36 = vadd.f32 %v14327_v56, %v5464_v58  ;;  %v18134_v4 = vld [vmem:[#allocation109_spill] sm:$0xff]  ;;  %v18137_v47 = vld [vmem:[#allocation32_spill] sm:$0xff]  ;;  %v18139_v62 = vld [vmem:[#allocation78_spill] sm:$0xff] }
 0x4af   : > { %6226 = vrot.lane.b32.xlu1 %v18128_v16, %s7322_s15  ;;  %18132 = vst [vmem:[#allocation231_spill] sm:$0xff] %v14752_v50  ;;  %v14755_v16 = vadd.f32 %v14324_v54, %v5463_v61  ;;  %v5761_v9 = vrot.slane %v5673_v17, %v7686_v31  ;;  %v5765_v39 = vrot.slane %v5612_v45, %v7686_v31  ;;  %v14765_v13 = vpop.permute.xlu1 %5598  ;;  %v18135_v61 = vld [vmem:[#allocation37_spill] sm:$0xff] }
 0x4b0   : > { %v5769_v12 = vrot.slane %v5613_v25, %v7686_v31  ;;  %v5773_v1 = vrot.slane %v5614_v55, %v7686_v31  ;;  %v5615_v54 = vsel %vm5491_vm7, %v18131_v49, %v14424_v24  ;;  %v5628_v56 = vsel %vm5491_vm7, %v5587_v26, %v18134_v4  ;;  %v18136_v58 = vld [vmem:[#allocation93_spill] sm:$0xff]  ;;  %v18141_v25 = vld [vmem:[#allocation244_spill] sm:$0xff] }
 0x4b1   : > { %v5675_v37 = vsel %vm5491_vm7, %v18111_v18, %v5587_v26  ;;  %v5616_v60 = vsel %vm5491_vm7, %v14424_v24, %v18136_v58  ;;  %v5617_v55 = vsel %vm5491_vm7, %v18136_v58, %v14459_v35  ;;  %v5618_v49 = vsel %vm5491_vm7, %v14459_v35, %v18137_v47  ;;  %v18138_v18 = vld [vmem:[#allocation73_spill] sm:$0xff] }
 0x4b2   : > { %v5619_v42 = vsel %vm5491_vm7, %v18137_v47, %v14490_v10  ;;  %v5620_v26 = vsel %vm5491_vm7, %v13736_v57, %v14531_v28  ;;  %v5621_v24 = vsel %vm5491_vm7, %v14531_v28, %v18138_v18  ;;  %v5622_v45 = vsel %vm5491_vm7, %v18138_v18, %v18139_v62  ;;  %v18140_v17 = vld [vmem:[#allocation97_spill] sm:$0xff] }
 0x4b3   : > { %6230 = vrot.lane.b32.xlu1 %v18135_v61, %s7322_s15  ;;  %v5623_v35 = vsel %vm5491_vm7, %v18139_v62, %v18140_v17  ;;  %v14804_v10 = vsel %vm5491_vm7, %v18140_v17, %v14584_v23  ;;  %v14809_v57 = vsel %vm5491_vm7, %v14584_v23, %v18141_v25  ;;  %v5901_v28 = vrot.slane %v5675_v37, %v7686_v31  ;;  %v14813_v58 = vpop.permute.xlu1 %5602 }
 0x4b4   : > { %v5905_v61 = vrot.slane %v5628_v56, %v7686_v31  ;;  %v5777_v47 = vrot.slane %v5615_v54, %v7686_v31  ;;  %v5781_v18 = vrot.slane %v5616_v60, %v7686_v31  ;;  %v5785_v62 = vrot.slane %v5617_v55, %v7686_v31  ;;  %v14824_v56 = vpop.permute.xlu0 %6166 }
 0x4b5   : > { %v5789_v17 = vrot.slane %v5618_v49, %v7686_v31  ;;  %v5793_v23 = vrot.slane %v5619_v42, %v7686_v31  ;;  %v5835_v63 = vrot.slane %v5620_v26, %v7686_v31  ;;  %v5839_v37 = vrot.slane %v5621_v24, %v7686_v31  ;;  %18143 = vst [vmem:[#allocation131_spill] sm:$0xff] %v14824_v56  ;;  %v18145_v56 = vld [vmem:[#allocation23_spill] sm:$0xff] }
 0x4b6   : > { %v5629_v54 = vsel %vm5491_vm7, %v18134_v4, %v14672_v40  ;;  %v5843_v60 = vrot.slane %v5622_v45, %v7686_v31  ;;  %v5847_v55 = vrot.slane %v5623_v35, %v7686_v31  ;;  %v5851_v49 = vrot.slane %v14804_v10, %v7686_v31  ;;  %v18144_v4 = vld [vmem:[#allocation99_spill] sm:$0xff] }
 0x4b7   : > { %6234 = vrot.lane.b32.xlu1 %v18142_v33, %s7322_s15  ;;  %v14838_v42 = vsel %vm5491_vm7, %v18141_v25, %v14605_v52  ;;  %v5936_v26 = vmul.f32 %v5901_v28, %v14526_v3  ;;  %v5937_v24 = vmul.f32 %v5905_v61, %v14526_v3  ;;  %v5630_v45 = vsel %vm5491_vm7, %v14672_v40, %v18144_v4  ;;  %v14845_v35 = vpop.permute.xlu1 %5747 }
 0x4b8   : > { %v5909_v10 = vrot.slane %v5629_v54, %v7686_v31  ;;  %v5796_v33 = vmul.f32 %v5761_v9, %v14845_v35  ;;  %v18146_v25 = vrot.slane %v14656_v2, %v7686_v31  ;;  %v5797_v61 = vmul.f32 %v5765_v39, %v14845_v35  ;;  %v14863_v29 = vpop.permute.xlu0 %6170 }
 0x4b9   : > { %v5798_v15 = vmul.f32 %v5769_v12, %v14845_v35  ;;  %v5799_v40 = vmul.f32 %v5773_v1, %v14845_v35  ;;  %v5800_v21 = vmul.f32 %v5777_v47, %v14845_v35  ;;  %v5801_v54 = vmul.f32 %v5781_v18, %v14845_v35  ;;  %v18147_v18 = vld [vmem:[#allocation242_spill] sm:$0xff] }
 0x4ba   : > { %v5795_v28 = vmul.f32 %v18146_v25, %v14845_v35  ;;  %v5913_v11 = vrot.slane %v5630_v45, %v7686_v31  ;;  %v5807_v9 = vadd.f32 %v5796_v33, %v14674_v0  ;;  %v5802_v12 = vmul.f32 %v5785_v62, %v14845_v35 }
 0x4bb   : > { %6238 = vrot.lane.b32.xlu1 %v18145_v56, %s7322_s15  ;;  %v5808_v56 = vadd.f32 %v5797_v61, %v5738_v34  ;;  %v5809_v2 = vadd.f32 %v5798_v15, %v5739_v43  ;;  %v5810_v25 = vadd.f32 %v5799_v40, %v5740_v48  ;;  %v5811_v39 = vadd.f32 %v5800_v21, %v5741_v27  ;;  %v14869_v47 = vpop.permute.xlu1 %5817  ;;  %v18149_v27 = vld [vmem:[#allocation137_spill] sm:$0xff] }
 0x4bc   : > { %v5806_v50 = vadd.f32 %v5795_v28, %v14651_v5  ;;  %v5631_v1 = vsel %vm5491_vm7, %v18144_v4, %v14718_v20  ;;  %v18148_v5 = vrot.slane %v18147_v18, %v17964_v8  ;;  %v5812_v0 = vadd.f32 %v5801_v54, %v14755_v16  ;;  %v18151_v8 = vld [vmem:[#allocation237_spill] sm:$0xff] }
 0x4bd   : > { %v14877_v34 = vmul.f32 %v5789_v17, %v14845_v35  ;;  %v14880_v21 = vmul.f32 %v5793_v23, %v14845_v35  ;;  %v5632_v15 = vsel %vm5491_vm7, %v14718_v20, %v18149_v27  ;;  %v18150_v43 = vrot.slane %v14661_v53, %v7686_v31 }
 0x4be   : > { %v18152_v62 = vrot.slane %v18151_v8, %v7686_v31  ;;  %v5867_v17 = vmul.f32 %v5835_v63, %v14869_v47  ;;  %v5868_v33 = vmul.f32 %v5839_v37, %v14869_v47  ;;  %v5869_v23 = vmul.f32 %v5843_v60, %v14869_v47  ;;  %v14903_v37 = vpop.permute.xlu0 %6174  ;;  %v18157_v8 = vld [vmem:[#allocation230_spill] sm:$0xff] }
 0x4bf   : > { %6242 = vrot.lane.b32.xlu1 %v18148_v5, %s7322_s15  ;;  %v5865_v48 = vmul.f32 %v18150_v43, %v14869_v47  ;;  %v5870_v4 = vmul.f32 %v5847_v55, %v14869_v47  ;;  %v14898_v20 = vadd.f32 %v5802_v12, %v14758_v36  ;;  %v5917_v45 = vrot.slane %v5631_v1, %v7686_v31  ;;  %v14905_v60 = vpop.permute.xlu1 %5969  ;;  %v18156_v43 = vld [vmem:[#allocation284_spill] sm:$0xff]  ;;  %s6634_s15 = smul.u32 11, %s7297_s18 }
 0x4c0   : > { %v5866_v16 = vmul.f32 %v18152_v62, %v14869_v47  ;;  %v5878_v61 = vadd.f32 %v5867_v17, %v5808_v56  ;;  %v5879_v40 = vadd.f32 %v5868_v33, %v5809_v2  ;;  %v5880_v54 = vadd.f32 %v5869_v23, %v5810_v25  ;;  %v18155_v25 = vld [vmem:[#allocation261_spill] sm:$0xff] }
 0x4c1   : > { %v5876_v53 = vadd.f32 %v5865_v48, %v5806_v50  ;;  %v5881_v18 = vadd.f32 %v5870_v4, %v5811_v39  ;;  %v5871_v5 = vmul.f32 %v5851_v49, %v14869_v47  ;;  %v5938_v63 = vmul.f32 %v5909_v10, %v14526_v3  ;;  %v18153_v50 = vld [vmem:[#allocation264_spill] sm:$0xff]  ;;  %s6639_s18 = sadd.s32 %s6882_s27, %s6634_s15 }
 0x4c2   : > { %v5877_v28 = vadd.f32 %v5866_v16, %v5807_v9  ;;  %v5948_v12 = vadd.f32 %v5937_v24, %v5878_v61  ;;  %v5939_v1 = vmul.f32 %v5913_v11, %v14526_v3  ;;  %v5985_v56 = vmul.f32 %v14905_v60, %v18153_v50  ;;  %v18154_v9 = vld [vmem:[#allocation69_spill] sm:$0xff]  ;;  %v18158_v16 = vld [vmem:[#allocation132_spill] sm:$0xff]  ;;  %s6875_s19 = sshll.u32 %s6639_s18, 7 }
 0x4c3   : > { %v5946_v55 = vadd.f32 %v14746_v41, %v5876_v53  ;;  %v5986_v2 = vmul.f32 %v14905_v60, %v18154_v9  ;;  %v5987_v49 = vmul.f32 %v14905_v60, %v18155_v25  ;;  %v5921_v10 = vrot.slane %v5632_v15, %v7686_v31  ;;  %v18159_v53 = vld [vmem:[#allocation141_spill] sm:$0xff]  ;;  %v18165_v9 = vld [vmem:[#allocation287_spill] sm:$0xff]  ;;  %s15350_s4 = scalar_lea.hbm %s15418_s3, %s6875_s19 }
 0x4c4   : > { %v5947_v36 = vadd.f32 %v5936_v26, %v5877_v28  ;;  %v5940_v39 = vmul.f32 %v5917_v45, %v14526_v3  ;;  %v5988_v41 = vmul.f32 %v14905_v60, %v18156_v43  ;;  %v5949_v26 = vadd.f32 %v5938_v63, %v5879_v40  ;;  %v14928_v45 = vpop.permute.xlu1 %6007  ;;  %v18160_v28 = vld [vmem:[#allocation172_spill] sm:$0xff]  ;;  %v18167_v43 = vld [vmem:[#allocation218_spill] sm:$0xff] }
 0x4c5   : > { %v5996_v24 = vadd.f32 %v5985_v56, %v5946_v55  ;;  %v5998_v11 = vadd.f32 %v5987_v49, %v5948_v12  ;;  %v5989_v62 = vmul.f32 %v14905_v60, %v18157_v8  ;;  %v5744_v17 = vadd.f32 %v18158_v16, %v14645_v59 }
 0x4c6   : > { %v5997_v48 = vadd.f32 %v5986_v2, %v5947_v36  ;;  %v5999_v33 = vadd.f32 %v5988_v41, %v5949_v26  ;;  %v5950_v23 = vadd.f32 %v5939_v1, %v5880_v54  ;;  %v5951_v4 = vadd.f32 %v5940_v39, %v5881_v18  ;;  %v14938_v54 = vpop.permute.xlu0 %6178  ;;  %v18162_v18 = vld [vmem:[#allocation265_spill] sm:$0xff]  ;;  %v18163_v36 = vld [vmem:[#allocation266_spill] sm:$0xff]  ;;  %v18164_v1 = vld [vmem:[#allocation268_spill] sm:$0xff] }
 0x4c7   : > { %v14926_v15 = vsel %vm5491_vm7, %v14605_v52, %v18159_v53  ;;  %v5990_v61 = vmul.f32 %v14905_v60, %v18160_v28  ;;  %v18161_v40 = vrot.slane %v14809_v57, %v7686_v31  ;;  %v5882_v55 = vadd.f32 %v5871_v5, %v5812_v0  ;;  %v18166_v0 = vld [vmem:[#allocation174_spill] sm:$0xff]  ;;  %v18168_v28 = vld [vmem:[#allocation212_spill] sm:$0xff] }
 0x4c8   : > { %v5859_v59 = vrot.slane %v14838_v42, %v7686_v31  ;;  %v6023_v52 = vmul.f32 %v14928_v45, %v18162_v18  ;;  %v6024_v12 = vmul.f32 %v14928_v45, %v18163_v36  ;;  %v6025_v50 = vmul.f32 %v14928_v45, %v18164_v1  ;;  %v14957_v16 = vpop.permute.xlu1 %6083 }
 0x4c9   : > { %v5872_v63 = vmul.f32 %v18161_v40, %v14869_v47  ;;  %v5941_v56 = vmul.f32 %v5921_v10, %v14526_v3  ;;  %v6026_v57 = vmul.f32 %v14928_v45, %v18165_v9  ;;  %v6027_v5 = vmul.f32 %v14928_v45, %v18166_v0  ;;  %v18174_v9 = vld [vmem:[#allocation243_spill] sm:$0xff] }
 0x4ca   : > { %v6000_v42 = vadd.f32 %v5989_v62, %v5950_v23  ;;  %v5633_v2 = vsel %vm5491_vm7, %v18149_v27, %v14765_v13  ;;  %v6034_v25 = vadd.f32 %v6023_v52, %v5996_v24  ;;  %v6035_v49 = vadd.f32 %v6024_v12, %v5997_v48  ;;  %v18169_v48 = vld [vmem:[#allocation12_spill] sm:$0xff]  ;;  %v14972_v40 = vpop.permute.xlu0 %6325  ;;  %v18173_v52 = vld [vmem:[#allocation211_spill] sm:$0xff] }
 0x4cb   : > { %v6036_v39 = vadd.f32 %v6025_v50, %v5998_v11  ;;  %v5634_v41 = vsel %vm5491_vm7, %v14765_v13, %v18167_v43  ;;  %v6037_v26 = vadd.f32 %v6026_v57, %v5999_v33  ;;  %v6001_v10 = vadd.f32 %v5990_v61, %v5951_v4  ;;  %v18170_v13 = vld [vmem:[#allocation38_spill] sm:$0xff]  ;;  %v18171_v4 = vld [vmem:[#allocation256_spill] sm:$0xff] }
 0x4cc   : > { %v6038_v8 = vadd.f32 %v6027_v5, %v6000_v42  ;;  %v6072_v53 = vadd.f32 %v14678_v6, %v6034_v25  ;;  %v6073_v62 = vadd.f32 %v14682_v22, %v6035_v49  ;;  %v6028_v27 = vmul.f32 %v14928_v45, %v18168_v28  ;;  %v18172_v22 = vld [vmem:[#allocation226_spill] sm:$0xff]  ;;  %v14987_v0 = vpop.permute.xlu1 %6120 }
 0x4cd   : > { %v6074_v23 = vadd.f32 %v14699_v38, %v6036_v39  ;;  %v5925_v24 = vrot.slane %v5633_v2, %v7686_v31  ;;  %v6099_v11 = vmul.f32 %v14957_v16, %v18169_v48  ;;  %v6100_v33 = vmul.f32 %v14957_v16, %v18170_v13  ;;  %v18175_v42 = vld [vmem:[#allocation46_spill] sm:$0xff] }
 0x4ce   : > { %v6101_v61 = vmul.f32 %v14957_v16, %v18171_v4  ;;  %v5929_v6 = vrot.slane %v5634_v41, %v7686_v31  ;;  %v6102_v38 = vmul.f32 %v14957_v16, %v18172_v22  ;;  %v6075_v18 = vadd.f32 %v14707_v30, %v6037_v26 }
 0x4cf   : > { %v6103_v36 = vmul.f32 %v14957_v16, %v18173_v52  ;;  %v14979_v12 = vadd.f32 %v6099_v11, %v6072_v53  ;;  %v14981_v1 = vadd.f32 %v6100_v33, %v6073_v62  ;;  %v5991_v57 = vmul.f32 %v14905_v60, %v18174_v9  ;;  %v18181_v33 = vld [vmem:[#allocation217_spill] sm:$0xff] }
 0x4d0   : > { %v14983_v50 = vadd.f32 %v6101_v61, %v6074_v23  ;;  %v14989_v5 = vadd.f32 %v6102_v38, %v6075_v18  ;;  %v6104_v2 = vmul.f32 %v14957_v16, %v18175_v42  ;;  %v6039_v30 = vadd.f32 %v6028_v27, %v6001_v10  ;;  %v18177_v10 = vld [vmem:[#allocation171_spill] sm:$0xff] }
 0x4d1   : > { %v6076_v25 = vadd.f32 %v14716_v7, %v6038_v8  ;;  %v5942_v49 = vmul.f32 %v5925_v24, %v14526_v3  ;;  %v5635_v39 = vsel %vm5491_vm7, %v18167_v43, %v14813_v58  ;;  %v18176_v41 = vrot.slane %v18124_v51, %v7686_v31  ;;  %v15019_v24 = vpop.permute.xlu1 %6124 }
 0x4d2   : > { %v5883_v53 = vadd.f32 %v5872_v63, %v14898_v20  ;;  %v6077_v62 = vadd.f32 %v14722_v46, %v6039_v30  ;;  %v6029_v7 = vmul.f32 %v14928_v45, %v18177_v10  ;;  %v5952_v8 = vadd.f32 %v5941_v56, %v5882_v55  ;;  %v18179_v20 = vld [vmem:[#allocation224_spill] sm:$0xff]  ;;  %v15017_v63 = vpop.permute.xlu0 %6465  ;;  %v18187_v30 = vld [vmem:[#allocation23_spill] sm:$0xff]  ;;  %v18191_v10 = vld [vmem:[#allocation61_spill] sm:$0xff] }
 0x4d3   : > { %v5992_v26 = vmul.f32 %v18176_v41, %v14905_v60  ;;  %v15004_v23 = vadd.f32 %v6103_v36, %v6076_v25  ;;  %v18178_v28 = vrot.slane %v18125_v14, %v7686_v31  ;;  %v6055_v51 = vrot.slane %v18108_v32, %v7686_v31  ;;  %v18184_v36 = vld [vmem:[#allocation88_spill] sm:$0xff] }
 0x4d4   : > { %v5953_v43 = vadd.f32 %v5942_v49, %v5883_v53  ;;  %v5814_v27 = vadd.f32 %v14877_v34, %v5744_v17  ;;  %v5745_v46 = vadd.f32 %v18179_v20, %v14647_v19  ;;  %v15021_v48 = vadd.f32 %v6104_v2, %v6077_v62  ;;  %v18180_v17 = vld [vmem:[#allocation272_spill] sm:$0xff]  ;;  %v18193_v20 = vld [vmem:[#allocation185_spill] sm:$0xff] }
 0x4d5   : > { %v6030_v58 = vmul.f32 %v18178_v28, %v14928_v45  ;;  %v6002_v55 = vadd.f32 %v5991_v57, %v5952_v8  ;;  %v5873_v56 = vmul.f32 %v5859_v59, %v14869_v47  ;;  %v5863_v14 = vrot.slane %v14926_v15, %v7686_v31  ;;  %v15040_v52 = vpop.permute.xlu1 %6128  ;;  %v18185_v57 = vld [vmem:[#allocation21_spill] sm:$0xff] }
 0x4d6   : > { %v5943_v11 = vmul.f32 %v5929_v6, %v14526_v3  ;;  %v5933_v32 = vrot.slane %v5635_v39, %v7686_v31  ;;  %v6003_v34 = vadd.f32 %v5992_v26, %v5953_v43  ;;  %v6105_v19 = vmul.f32 %v14957_v16, %v18180_v17  ;;  %v18188_v39 = vld [vmem:[#allocation231_spill] sm:$0xff]  ;;  %v15057_v8 = vpop.permute.xlu0 %6188  ;;  %v18192_v43 = vld [vmem:[#allocation192_spill] sm:$0xff] }
 0x4d7   : > { %v6040_v13 = vadd.f32 %v6029_v7, %v6002_v55  ;;  %v18182_v4 = vrot.slane %v18181_v33, %v7686_v31  ;;  %v5884_v22 = vadd.f32 %v5873_v56, %v5814_v27  ;;  %v18183_v59 = vrot.slane %v18126_v44, %v7686_v31  ;;  %v18197_v17 = vld [vmem:[#allocation176_spill] sm:$0xff] }
 0x4d8   : > { %v6041_v38 = vadd.f32 %v6030_v58, %v6003_v34  ;;  %v5815_v6 = vadd.f32 %v14880_v21, %v5745_v46  ;;  %v5874_v18 = vmul.f32 %v5863_v14, %v14869_v47  ;;  %v18186_v42 = vrot.slane %v18185_v57, %v7686_v31  ;;  %v18189_v21 = vld [vmem:[#allocation240_spill] sm:$0xff]  ;;  %v18195_v14 = vld [vmem:[#allocation125_spill] sm:$0xff] }
 0x4d9   : > { %v5993_v61 = vmul.f32 %v18182_v4, %v14905_v60  ;;  %v6106_v15 = vmul.f32 %v18183_v59, %v14957_v16  ;;  %v6078_v9 = vadd.f32 %v18184_v36, %v6040_v13  ;;  %v6093_v25 = vrot.slane %v18187_v30, %v7686_v31  ;;  %v18198_v13 = vld [vmem:[#allocation123_spill] sm:$0xff]  ;;  %v15075_v33 = vpop.permute.xlu1 %6132 }
 0x4da   : > { %v6031_v2 = vmul.f32 %v18186_v42, %v14928_v45  ;;  %v5954_v49 = vadd.f32 %v5943_v11, %v5884_v22  ;;  %v5944_v44 = vmul.f32 %v5933_v32, %v14526_v3  ;;  %v6079_v41 = vadd.f32 %v18188_v39, %v6041_v38  ;;  %v18200_v22 = vld [vmem:[#allocation147_spill] sm:$0xff]  ;;  %v18201_v38 = vld [vmem:[#allocation76_spill] sm:$0xff]  ;;  %v18203_v42 = vld [vmem:[#allocation162_spill] sm:$0xff] }
 0x4db   : > { %v18190_v26 = vrot.slane %v18189_v21, %v7686_v31  ;;  %v5885_v62 = vadd.f32 %v5874_v18, %v5815_v6  ;;  %v5823_v7 = vrot.slane %v18191_v10, %v7686_v31  ;;  %v15059_v28 = vadd.f32 %v6105_v19, %v6078_v9 }
 0x4dc   : > { %v6004_v58 = vadd.f32 %v5993_v61, %v5954_v49  ;;  %v6069_v27 = vmul.f32 %v6055_v51, %v18192_v43  ;;  %v18194_v46 = vrot.slane %v18193_v20, %v7686_v31  ;;  %v15066_v56 = vadd.f32 %v6106_v15, %v6079_v41  ;;  %v18199_v61 = vld [vmem:[#allocation286_spill] sm:$0xff]  ;;  %v15090_v49 = vpop.permute.xlu0 %6192  ;;  %v18205_v41 = vld [vmem:[#allocation131_spill] sm:$0xff] }
 0x4dd   : > { %v5994_v53 = vmul.f32 %v18190_v26, %v14905_v60  ;;  %v18196_v11 = vrot.slane %v18195_v14, %v7686_v31  ;;  %v5955_v34 = vadd.f32 %v5944_v44, %v5885_v62  ;;  %v5498_v19 = vsel %vm5491_vm7, %v18198_v13, %v18197_v17  ;;  %v15092_v44 = vpop.permute.xlu1 %6164  ;;  %v18207_v17 = vld [vmem:[#allocation153_spill] sm:$0xff] }
 0x4de   : > { %v5794_v55 = vmul.f32 %v18194_v46, %v14845_v35  ;;  %v6107_v51 = vmul.f32 %v6093_v25, %v14957_v16  ;;  %v6042_v4 = vadd.f32 %v6031_v2, %v6004_v58  ;;  %v5735_v35 = vadd.f32 %v18200_v22, %v18199_v61  ;;  %v18208_v61 = vld [vmem:[#allocation157_spill] sm:$0xff] }
 0x4df   : > { %v6032_v32 = vmul.f32 %v18196_v11, %v14928_v45  ;;  %v5864_v59 = vmul.f32 %v5823_v7, %v14869_v47  ;;  %v6005_v15 = vadd.f32 %v5994_v53, %v5955_v34  ;;  %v18202_v6 = vrot.slane %v18201_v38, %v7686_v31 }
 0x4e0   : > { %v6080_v36 = vadd.f32 %v6069_v27, %v6042_v4  ;;  %v5893_v9 = vrot.slane %v5498_v19, %v7686_v31  ;;  %v5805_v57 = vadd.f32 %v5794_v55, %v5735_v35  ;;  %v18204_v30 = vrot.slane %v18203_v42, %v7686_v31  ;;  %v18206_v27 = vld [vmem:[#allocation145_spill] sm:$0xff]  ;;  %v15110_v11 = vpop.permute.xlu0 %6196 }
 0x4e1   : > { %v6070_v18 = vmul.f32 %v18202_v6, %v18192_v43  ;;  %v6043_v25 = vadd.f32 %v6032_v32, %v6005_v15  ;;  %v6244_v21 = vsel %vm838_vm1, %v15092_v44, %v18205_v41  ;;  %v6169_v58 = vpop.permute.xlu1 %6168  ;;  %v5984_v20 = vmul.f32 %v14905_v60, %v18206_v27 }
 0x4e2   : > { %v6108_v2 = vmul.f32 %v18204_v30, %v14957_v16  ;;  %v15094_v47 = vadd.f32 %v6107_v51, %v6080_v36  ;;  %v5875_v39 = vadd.f32 %v5864_v59, %v5805_v57  ;;  %v6339_v53 = vrot.slane %v6244_v21, %v7686_v31 }
 0x4e3   : > { %v6081_v26 = vadd.f32 %v6070_v18, %v6043_v25  ;;  %v5934_v62 = vmul.f32 %v5893_v9, %v14526_v3  ;;  %v6245_v55 = vsel %vm838_vm1, %v18205_v41, %v6169_v58  ;;  %v6246_v14 = vsel %vm838_vm1, %v6169_v58, %v14863_v29  ;;  %v18209_v18 = vld [vmem:[#allocation103_spill] sm:$0xff] }
 0x4e4   : > { %v6374_v7 = vmul.f32 %v6339_v53, %v14972_v40  ;;  %v6343_v3 = vrot.slane %v6245_v55, %v7686_v31  ;;  %v6347_v34 = vrot.slane %v6246_v14, %v7686_v31  ;;  %v6022_v13 = vmul.f32 %v14928_v45, %v18207_v17  ;;  %v15138_v36 = vpop.permute.xlu0 %6200  ;;  %v18212_v53 = vld [vmem:[#allocation156_spill] sm:$0xff] }
 0x4e5   : > { %v15101_v10 = vadd.f32 %v6108_v2, %v6081_v26  ;;  %v5945_v46 = vadd.f32 %v5934_v62, %v5875_v39  ;;  %v6173_v51 = vpop.permute.xlu1 %6172  ;;  %v6136_v22 = vsel %vm838_vm1, %v14987_v0, %v18208_v61  ;;  %v6060_v0 = vmul.f32 %v18192_v43, %v18209_v18  ;;  %v18210_v39 = vld [vmem:[#allocation104_spill] sm:$0xff]  ;;  %v18211_v26 = vld [vmem:[#allocation167_spill] sm:$0xff] }
 0x4e6   : > { %v15113_v32 = vadd.f32 %v6374_v7, %v14981_v1  ;;  %v6375_v60 = vmul.f32 %v6343_v3, %v14972_v40  ;;  %v6376_v19 = vmul.f32 %v6347_v34, %v14972_v40  ;;  %v6247_v1 = vsel %vm838_vm1, %v14863_v29, %v6173_v51 }
 0x4e7   : > { %v5995_v4 = vadd.f32 %v5984_v20, %v5945_v46  ;;  %v6248_v35 = vsel %vm838_vm1, %v6173_v51, %v14903_v37  ;;  %v6351_v15 = vrot.slane %v6247_v1, %v7686_v31  ;;  %v6098_v41 = vmul.f32 %v14957_v16, %v18210_v39  ;;  %v18213_v20 = vld [vmem:[#allocation146_spill] sm:$0xff] }
 0x4e8   : > { %v15129_v59 = vadd.f32 %v6375_v60, %v14983_v50  ;;  %v15132_v45 = vadd.f32 %v6376_v19, %v14989_v5  ;;  %v6355_v38 = vrot.slane %v6248_v35, %v7686_v31  ;;  %v6331_v50 = vrot.slane %v6136_v22, %v7686_v31  ;;  %v15168_v16 = vpop.permute.xlu0 %6535 }
 0x4e9   : > { %v6033_v6 = vadd.f32 %v6022_v13, %v5995_v4  ;;  %v6377_v29 = vmul.f32 %v6351_v15, %v14972_v40  ;;  %v6177_v57 = vpop.permute.xlu1 %6176 }
 0x4ea   : > { %v6378_v9 = vmul.f32 %v6355_v38, %v14972_v40  ;;  %v6249_v5 = vsel %vm838_vm1, %v14903_v37, %v6177_v57  ;;  %v6250_v42 = vsel %vm838_vm1, %v6177_v57, %v14938_v54  ;;  %v6137_v37 = vsel %vm838_vm1, %v15019_v24, %v18211_v26 }
 0x4eb   : > { %v15148_v30 = vadd.f32 %v6377_v29, %v15004_v23  ;;  %v6359_v2 = vrot.slane %v6249_v5, %v7686_v31  ;;  %v6363_v25 = vrot.slane %v6250_v42, %v7686_v31  ;;  %v6071_v21 = vadd.f32 %v6060_v0, %v6033_v6 }
 0x4ec   : > { %v15151_v43 = vadd.f32 %v6378_v9, %v15021_v48  ;;  %v6138_v23 = vsel %vm838_vm1, %v15040_v52, %v18212_v53  ;;  %v6372_v58 = vmul.f32 %v6331_v50, %v14972_v40  ;;  %v6139_v24 = vsel %vm838_vm1, %v15075_v33, %v18213_v20  ;;  %v15187_v51 = vpop.permute.xlu0 %6208 }
 0x4ed   : > { %v6379_v62 = vmul.f32 %v6359_v2, %v14972_v40  ;;  %v6380_v48 = vmul.f32 %v6363_v25, %v14972_v40  ;;  %v6181_v7 = vpop.permute.xlu1 %6180  ;;  %v6109_v14 = vadd.f32 %v6098_v41, %v6071_v21  ;;  %v6401_v3 = vrot.slane %v6137_v37, %v7686_v31 }
 0x4ee   : > { %v6251_v27 = vsel %vm838_vm1, %v14938_v54, %v6181_v7  ;;  %v6471_v34 = vrot.slane %v6138_v23, %v7686_v31  ;;  %v6541_v60 = vrot.slane %v6139_v24, %v7686_v31  ;;  %v6320_v2 = vsel %vm838_vm1, %v18208_v61, %v15092_v44 }
 0x4ef   : > { %v15174_v46 = vadd.f32 %v6379_v62, %v15059_v28  ;;  %v6391_v52 = vadd.f32 %v6380_v48, %v15066_v56  ;;  %v6367_v55 = vrot.slane %v6251_v27, %v7686_v31  ;;  %v6383_v13 = vadd.f32 %v6372_v58, %v6109_v14 }
 0x4f0   : > { %v6512_v56 = vmul.f32 %v6471_v34, %v15017_v63  ;;  %v6582_v22 = vmul.f32 %v6541_v60, %v15168_v16  ;;  %v15193_v29 = vpop.permute.xlu0 %6212  ;;  %v6335_v21 = vrot.slane %v6320_v2, %v7686_v31 }
 0x4f1   : > { %v6381_v54 = vmul.f32 %v6367_v55, %v14972_v40  ;;  %v15181_v17 = vpop.permute.xlu1 %6395 }
 0x4f2   : > { %v6442_v33 = vmul.f32 %v6401_v3, %v15181_v17  ;;  %v6373_v58 = vmul.f32 %v6335_v21, %v14972_v40 }
 0x4f3   : > { %v6392_v28 = vadd.f32 %v6381_v54, %v15094_v47 }
 0x4f4   : > { %v6453_v19 = vadd.f32 %v6442_v33, %v6383_v13  ;;  %v15197_v57 = vpop.permute.xlu0 %6216 }
 0x4f5   : > { %v6183_v4 = vpop.permute.xlu1 %6182 }
 0x4f6   : > { %v6523_v1 = vadd.f32 %v6512_v56, %v6453_v19  ;;  %v6252_v35 = vsel %vm838_vm1, %v6181_v7, %v6183_v4 }
 0x4f7   : > { %v6371_v15 = vrot.slane %v6252_v35, %v7686_v31 }
 0x4f8   : > { %v6593_v38 = vadd.f32 %v6582_v22, %v6523_v1  ;;  %v15199_v42 = vpop.permute.xlu0 %6220 }
 0x4f9   : > { %v6382_v6 = vmul.f32 %v6371_v15, %v14972_v40  ;;  %v6185_v18 = vpop.permute.xlu1 %6184 }
 0x4fa   : > { %v6604_v0 = vmax.f32 %v6593_v38, 0.0  ;;  %v6321_v39 = vsel %vm838_vm1, %v18211_v26, %v6185_v18 }
 0x4fb   : > { %v6393_v47 = vadd.f32 %v6382_v6, %v15101_v10  ;;  %v6405_v44 = vrot.slane %v6321_v39, %v7686_v31 }
 0x4fc   : > { %6615 = vst [vmem:[%s7572_s6] sm:$0xff] %v6604_v0  ;;  %v15213_v62 = vpop.permute.xlu0 %6224 }
 0x4fd   : > { %v6187_v9 = vpop.permute.xlu1 %6186  ;;  %v6323_v14 = vsel %vm838_vm1, %v18213_v20, %v15213_v62  ;;  %v6443_v3 = vmul.f32 %v6405_v44, %v15181_v17 }
 0x4fe   : > { %v6545_v40 = vrot.slane %v6323_v14, %v7686_v31  ;;  %v6254_v35 = vsel %vm838_vm1, %v6187_v9, %v15057_v8 }
 0x4ff   : > { %v6413_v0 = vrot.slane %v6254_v35, %v7686_v31 }
 0x500   : > { %v6583_v56 = vmul.f32 %v6545_v40, %v15168_v16  ;;  %v6229_v39 = vpop.permute.xlu0 %6228 }
 0x501   : > { %v6191_v50 = vpop.permute.xlu1 %6190 }
 0x502   : > { %v6256_v38 = vsel %vm838_vm1, %v6191_v50, %v15090_v49 }
 0x503   : > { %v6421_v2 = vrot.slane %v6256_v38, %v7686_v31 }
 0x505   : > { %v6195_v5 = vpop.permute.xlu1 %6194 }
 0x509   : > { %v6199_v25 = vpop.permute.xlu1 %6198 }
 0x50a   : > { %v6259_v41 = vsel %vm838_vm1, %v15110_v11, %v6199_v25  ;;  %v6260_v10 = vsel %vm838_vm1, %v6199_v25, %v15138_v36 }
 0x50b   : > { %v6433_v37 = vrot.slane %v6259_v41, %v7686_v31  ;;  %v6437_v23 = vrot.slane %v6260_v10, %v7686_v31 }
 0x50d   : > { %v6450_v61 = vmul.f32 %v6433_v37, %v15181_v17  ;;  %v6451_v26 = vmul.f32 %v6437_v23, %v15181_v17  ;;  %v6203_v48 = vpop.permute.xlu1 %6202 }
 0x50e   : > { %v6261_v7 = vsel %vm838_vm1, %v15138_v36, %v6203_v48 }
 0x50f   : > { %v15221_v27 = vadd.f32 %v6450_v61, %v6391_v52  ;;  %v15223_v24 = vadd.f32 %v6451_v26, %v6392_v28  ;;  %v6441_v55 = vrot.slane %v6261_v7, %v7686_v31  ;;  %v6384_v52 = vadd.f32 %v6373_v58, %v14979_v12 }
 0x510   : > { %v6255_v12 = vsel %vm838_vm1, %v15057_v8, %v6191_v50  ;;  %v6447_v26 = vmul.f32 %v6421_v2, %v15181_v17 }
 0x511   : > { %v6452_v34 = vmul.f32 %v6441_v55, %v15181_v17  ;;  %v6205_v54 = vpop.permute.xlu1 %6204  ;;  %v6454_v33 = vadd.f32 %v6443_v3, %v6384_v52 }
 0x512   : > { %v6322_v36 = vsel %vm838_vm1, %v18212_v53, %v6205_v54  ;;  %v6253_v53 = vsel %vm838_vm1, %v6185_v18, %v6187_v9  ;;  %v6257_v18 = vsel %vm838_vm1, %v15090_v49, %v6195_v5  ;;  %v6258_v49 = vsel %vm838_vm1, %v6195_v5, %v15110_v11  ;;  %v6233_v5 = vpop.permute.xlu0 %6232 }
 0x513   : > { %v15235_v13 = vadd.f32 %v6452_v34, %v6393_v47  ;;  %v6475_v60 = vrot.slane %v6322_v36, %v7686_v31  ;;  %v6409_v6 = vrot.slane %v6253_v53, %v7686_v31  ;;  %v6417_v47 = vrot.slane %v6255_v12, %v7686_v31 }
 0x514   : > { %v6425_v10 = vrot.slane %v6257_v18, %v7686_v31  ;;  %v6429_v58 = vrot.slane %v6258_v49, %v7686_v31  ;;  %v6458_v52 = vadd.f32 %v6447_v26, %v15148_v30 }
 0x515   : > { %v6513_v20 = vmul.f32 %v6475_v60, %v15017_v63  ;;  %v6207_v28 = vpop.permute.xlu1 %6206  ;;  %v6444_v41 = vmul.f32 %v6409_v6, %v15181_v17  ;;  %v6446_v61 = vmul.f32 %v6417_v47, %v15181_v17 }
 0x516   : > { %v6262_v9 = vsel %vm838_vm1, %v6205_v54, %v6207_v28  ;;  %v6263_v8 = vsel %vm838_vm1, %v6207_v28, %v15187_v51  ;;  %v6448_v55 = vmul.f32 %v6425_v10, %v15181_v17  ;;  %v6237_v12 = vpop.permute.xlu0 %6236 }
 0x517   : > { %v6524_v19 = vadd.f32 %v6513_v20, %v6454_v33  ;;  %v6479_v37 = vrot.slane %v6262_v9, %v7686_v31  ;;  %v6483_v23 = vrot.slane %v6263_v8, %v7686_v31  ;;  %v6455_v14 = vadd.f32 %v6444_v41, %v15113_v32 }
 0x518   : > { %v6457_v40 = vadd.f32 %v6446_v61, %v15132_v45 }
 0x519   : > { %v6594_v4 = vadd.f32 %v6583_v56, %v6524_v19  ;;  %v6211_v22 = vpop.permute.xlu1 %6210  ;;  %v6514_v3 = vmul.f32 %v6479_v37, %v15017_v63  ;;  %v6515_v34 = vmul.f32 %v6483_v23, %v15017_v63  ;;  %v6449_v56 = vmul.f32 %v6429_v58, %v15181_v17 }
 0x51a   : > { %v6264_v25 = vsel %vm838_vm1, %v15187_v51, %v6211_v22  ;;  %v6265_v21 = vsel %vm838_vm1, %v6211_v22, %v15193_v29  ;;  %v6445_v51 = vmul.f32 %v6413_v0, %v15181_v17 }
 0x51b   : > { %v6605_v1 = vmax.f32 %v6594_v4, 0.0  ;;  %v6487_v44 = vrot.slane %v6264_v25, %v7686_v31  ;;  %v6491_v7 = vrot.slane %v6265_v21, %v7686_v31  ;;  %v6525_v19 = vadd.f32 %v6514_v3, %v6455_v14 }
 0x51c   : > { %v6456_v36 = vadd.f32 %v6445_v51, %v15129_v59  ;;  %v6459_v59 = vadd.f32 %v6448_v55, %v15151_v43  ;;  %v6460_v37 = vadd.f32 %v6449_v56, %v15174_v46 }
 0x51d   : > { %6616 = vst [vmem:[%s7572_s6 + $0x8] sm:$0xff] %v6605_v1  ;;  %v6215_v15 = vpop.permute.xlu1 %6214  ;;  %v6516_v54 = vmul.f32 %v6487_v44, %v15017_v63 }
 0x51e   : > { %v6266_v11 = vsel %vm838_vm1, %v15193_v29, %v6215_v15  ;;  %v6267_v60 = vsel %vm838_vm1, %v6215_v15, %v15197_v57  ;;  %v6517_v29 = vmul.f32 %v6491_v7, %v15017_v63  ;;  %v6526_v4 = vadd.f32 %v6515_v34, %v6456_v36  ;;  %v6241_v7 = vpop.permute.xlu0 %6240 }
 0x51f   : > { %v6495_v32 = vrot.slane %v6266_v11, %v7686_v31  ;;  %v6527_v22 = vadd.f32 %v6516_v54, %v6457_v40  ;;  %v6499_v1 = vrot.slane %v6267_v60, %v7686_v31 }
 0x520   : > { %v6528_v15 = vadd.f32 %v6517_v29, %v6458_v52 }
 0x521   : > { %v6219_v50 = vpop.permute.xlu1 %6218  ;;  %v6518_v38 = vmul.f32 %v6495_v32, %v15017_v63  ;;  %v6519_v9 = vmul.f32 %v6499_v1, %v15017_v63 }
 0x522   : > { %v6268_v53 = vsel %vm838_vm1, %v15197_v57, %v6219_v50 }
 0x523   : > { %v6503_v8 = vrot.slane %v6268_v53, %v7686_v31  ;;  %v6529_v23 = vadd.f32 %v6518_v38, %v6459_v59  ;;  %v6530_v58 = vadd.f32 %v6519_v9, %v6460_v37 }
 0x525   : > { %v6223_v48 = vpop.permute.xlu1 %6222  ;;  %v6520_v46 = vmul.f32 %v6503_v8, %v15017_v63 }
 0x527   : > { %v6531_v32 = vadd.f32 %v6520_v46, %v15221_v27 }
 0x529   : > { %v6227_v33 = vpop.permute.xlu1 %6226 }
 0x52a   : > { %v6271_v20 = vsel %vm838_vm1, %v15213_v62, %v6227_v33  ;;  %v6272_v28 = vsel %vm838_vm1, %v6227_v33, %v6229_v39  ;;  %v6269_v62 = vsel %vm838_vm1, %v6219_v50, %v15199_v42  ;;  %v6270_v50 = vsel %vm838_vm1, %v15199_v42, %v6223_v48 }
 0x52b   : > { %v6549_v45 = vrot.slane %v6271_v20, %v7686_v31  ;;  %v6553_v30 = vrot.slane %v6272_v28, %v7686_v31  ;;  %v6507_v25 = vrot.slane %v6269_v62, %v7686_v31  ;;  %v6511_v11 = vrot.slane %v6270_v50, %v7686_v31 }
 0x52d   : > { %v6584_v35 = vmul.f32 %v6549_v45, %v15168_v16  ;;  %v6585_v17 = vmul.f32 %v6553_v30, %v15168_v16  ;;  %v6231_v43 = vpop.permute.xlu1 %6230  ;;  %v6521_v55 = vmul.f32 %v6507_v25, %v15017_v63  ;;  %v6522_v28 = vmul.f32 %v6511_v11, %v15017_v63 }
 0x52e   : > { %v6273_v6 = vsel %vm838_vm1, %v6229_v39, %v6231_v43  ;;  %v6274_v0 = vsel %vm838_vm1, %v6231_v43, %v6233_v5 }
 0x52f   : > { %v6595_v47 = vadd.f32 %v6584_v35, %v6525_v19  ;;  %v6596_v18 = vadd.f32 %v6585_v17, %v6526_v4  ;;  %v6557_v57 = vrot.slane %v6273_v6, %v7686_v31  ;;  %v6561_v2 = vrot.slane %v6274_v0, %v7686_v31 }
 0x530   : > { %v6532_v20 = vadd.f32 %v6521_v55, %v15223_v24  ;;  %v6533_v24 = vadd.f32 %v6522_v28, %v15235_v13 }
 0x531   : > { %v6606_v39 = vmax.f32 %v6595_v47, 0.0  ;;  %v6607_v41 = vmax.f32 %v6596_v18, 0.0  ;;  %v6586_v10 = vmul.f32 %v6557_v57, %v15168_v16  ;;  %v6587_v21 = vmul.f32 %v6561_v2, %v15168_v16  ;;  %v6235_v49 = vpop.permute.xlu1 %6234 }
 0x532   : > { %v6275_v44 = vsel %vm838_vm1, %v6233_v5, %v6235_v49  ;;  %v6276_v51 = vsel %vm838_vm1, %v6235_v49, %v6237_v12 }
 0x533   : > { %6617 = vst [vmem:[%s7572_s6 + $0x10] sm:$0xff] %v6606_v39  ;;  %6618 = vst [vmem:[%s7572_s6 + $0x18] sm:$0xff] %v6607_v41  ;;  %v6597_v61 = vadd.f32 %v6586_v10, %v6527_v22  ;;  %v6598_v26 = vadd.f32 %v6587_v21, %v6528_v15  ;;  %v6565_v42 = vrot.slane %v6275_v44, %v7686_v31 }
 0x534   : > { %v6569_v48 = vrot.slane %v6276_v51, %v7686_v31 }
 0x535   : > { %v6608_v5 = vmax.f32 %v6597_v61, 0.0  ;;  %v6609_v14 = vmax.f32 %v6598_v26, 0.0  ;;  %v6588_v3 = vmul.f32 %v6565_v42, %v15168_v16  ;;  %v6239_v54 = vpop.permute.xlu1 %6238 }
 0x536   : > { %v6589_v34 = vmul.f32 %v6569_v48, %v15168_v16  ;;  %v6277_v36 = vsel %vm838_vm1, %v6237_v12, %v6239_v54  ;;  %v6278_v40 = vsel %vm838_vm1, %v6239_v54, %v6241_v7 }
 0x537   : > { %6619 = vst [vmem:[%s7572_s6 + $0x20] sm:$0xff] %v6608_v5  ;;  %6620 = vst [vmem:[%s7572_s6 + $0x28] sm:$0xff] %v6609_v14  ;;  %v6599_v52 = vadd.f32 %v6588_v3, %v6529_v23  ;;  %v6573_v33 = vrot.slane %v6277_v36, %v7686_v31  ;;  %v6577_v29 = vrot.slane %v6278_v40, %v7686_v31 }
 0x538   : > { %v6600_v60 = vadd.f32 %v6589_v34, %v6530_v58 }
 0x539   : > { %v6610_v56 = vmax.f32 %v6599_v52, 0.0  ;;  %v6590_v45 = vmul.f32 %v6573_v33, %v15168_v16  ;;  %v6591_v30 = vmul.f32 %v6577_v29, %v15168_v16  ;;  %v6243_v19 = vpop.permute.xlu1 %6242 }
 0x53a   : > { %v6611_v59 = vmax.f32 %v6600_v60, 0.0  ;;  %v6279_v4 = vsel %vm838_vm1, %v6241_v7, %v6243_v19 }
 0x53b   : > { %6621 = vst [vmem:[%s7572_s6 + $0x30] sm:$0xff] %v6610_v56  ;;  %v6601_v22 = vadd.f32 %v6590_v45, %v6531_v32  ;;  %v6602_v27 = vadd.f32 %v6591_v30, %v6532_v20  ;;  %v6581_v63 = vrot.slane %v6279_v4, %v7686_v31 }
 0x53c   : > { %6622 = vst [vmem:[%s7572_s6 + $0x38] sm:$0xff] %v6611_v59 }
 0x53d   : > { %v6612_v1 = vmax.f32 %v6601_v22, 0.0  ;;  %v6613_v53 = vmax.f32 %v6602_v27, 0.0  ;;  %v6592_v62 = vmul.f32 %v6581_v63, %v15168_v16 }
 0x53f   : > { %6623 = vst [vmem:[%s7572_s6 + $0x40] sm:$0xff] %v6612_v1  ;;  %6624 = vst [vmem:[%s7572_s6 + $0x48] sm:$0xff] %v6613_v53  ;;  %v6603_v35 = vadd.f32 %v6592_v62, %v6533_v24 }
 0x541   : > { %v6614_v17 = vmax.f32 %v6603_v35, 0.0 }
 0x543   : > { %6625 = vst [vmem:[%s7572_s6 + $0x50] sm:$0xff] %v6614_v17 }
 0x544   : > { %7204 = shalt.err (!%p7201_p10)
}
 0x545   : > { %s7205_s29 = scalar_lea.hbm %s15350_s4, 1408  ;;  %s7209_s27 = scalar_lea.hbm %s15418_s3, 5632 }
 0x546   : > { %p7206_p11 = scmp.ne.s32.totalorder %s15350_s4, %s7205_s29  ;;  %p7210_p6 = scmp.lt.u32.totalorder %s15350_s4, %s15418_s3 }
 0x547   : > { %p7211_p9 = scmp.lt.u32.totalorder %s7209_s27, %s7205_s29  ;;  %p7213_p7 = scmp.lt.u32.totalorder %s7205_s29, %s15350_s4 }
 0x548   : > { %p7207_p13 = pnand %p7206_p11, %p18214_p2 }
 0x549   : > { %p7212_p12 = por %p7211_p9, %p7210_p6 }
 0x54a   : > { %p7208_p5 = pneg %p7207_p13 }
 0x54b   : > { %p7214_p4 = por %p7213_p7, %p7212_p12 }
 0x54d   : > { %p7215_p0 = pnand %p7214_p4, %p7208_p5 }
 0x54f   : > { %7218 = shalt.err (!%p7215_p0)
}
 0x550   : > { %6885 = dma.vmem_to_hbm [thread:$0]  (%p18214_p2), %s15352_s11, 1408, %s15350_s4, %s6627_s28  }
 0x551 PF: > { %p6896_p1 = scmp.ge.s32.totalorder %s7313_s22, 2  ;;  %s6655_s23 = sand.u32 1, %s7273_s12  }
 0x552   : > { %p18215_p3 = scmp.ne.s32.totalorder %s16215_s10, 0  ;;  %s6656_s30 = scalar_lea.sflag [#allocation5], %s6655_s23 }
 0x554   : > { %p6892_p8 = pnand %p6896_p1, %p18215_p3 }
 0x556   : > { %7268 = dma.done.wait (!%p6892_p8), %s6656_s30, 1408  }
 0x557   : > { %7270 = vsyncadd (!%p6892_p8), %s6656_s30, 4294965888  ;;  %s19_s22 = sadd.s32 1, %s7313_s22   ;;  %s18216_s7 = sld [smem:[#allocation9_spill]] }
 0x558   : > { %p16_p10 = scmp.ge.s32.totalorder %s19_s22, 6   ;;  %s18217_s11 = sld [smem:[#allocation10_spill]] }
 0x559   : > { %s18218_s12 = smov %s7277_s13  ;;  %s18219_s13 = smov %s7281_s14 }
 0x55a   : > { %s18220_s14 = smov %s7506_s9  ;;  %s18221_s15 = smov %s7289_s16 }
 0x55b   : > { %s18222_s16 = smov %s7293_s17  ;;  %s18223_s17 = smov %s7503_s8 }
 0x55c   : > { %s18224_s18 = smov %s7305_s20  ;;  %s18225_s19 = smov %s7309_s21 }
 0x55d   : > { %s18226_s20 = smov %s18216_s7  ;;  %18 = sbr.rel (!%p16_p10) target bundleno = 9 (0x9), region = 120 }
 0x55e   : > { %s18227_s21 = smov %s18217_s11 }
 0x564   :  { %6661 = vsyncpa [#allocation4], 1 }
 0x565   :  { %6663 = vsyncpa [#allocation4 + $0x1], 1 }
 0x566   :  { %6664 = vsyncpa [#allocation5], 1 }
 0x567   :  { %6666 = vsyncpa [#allocation5 + $0x1], 1 }

</bundles_post_ra>
